<compile_context>
chip_gen: v7x
topology: tpu7x:2x2x1
jax: 0.10.0
libtpu: 0.0.40
codegen_flags: <defaults>
</compile_context>

<pallas_src>
import jax
import jax.numpy as jnp
from jax.experimental import pallas as pl
from jax.experimental.pallas import tpu as pltpu

ISIZE = 16
HSIZE = 32
S_SIZE = 8
R_SIZE = 8
T_SIZE = 8          # read chain feeds q (size T) back as an S-sized query
B = 2
SEQ = 8
WRITE_SIZE = S_SIZE + R_SIZE + T_SIZE + 1
READ_SIZE = S_SIZE + 3 * R_SIZE
SR = S_SIZE * R_SIZE        # 64
LN_EPS = 1e-5

assert T_SIZE == S_SIZE, "FWM read chain requires T_SIZE == S_SIZE"

# Packed projection lane layout (pv = h @ W_proj + b_proj, width PROJ):
OFF_SEXP = 0                    # s, expanded over r                [  0: 64)
OFF_RTIL = OFF_SEXP + SR        # write r, tiled over s             [ 64:128)
OFF_R1 = OFF_RTIL + SR          # read r1, tiled over s             [128:192)
OFF_R2 = OFF_R1 + SR            # read r2, tiled over s             [192:256)
OFF_R3 = OFF_R2 + SR            # read r3, tiled over s             [256:320)
OFF_T = OFF_R3 + SR             # write t                           [320:328)
OFF_Q = OFF_T + T_SIZE          # read q0                           [328:336)
OFF_BETA = OFF_Q + S_SIZE       # write beta (pre-sigmoid, +1 in bias) [336:337)
PROJ_USED = OFF_BETA + 1        # 337
PROJ = 384                      # padded to a multiple of 128 lanes


def fwmrnn_kernel(gx_ref, h0_ref, c0_ref, f0_ref,
                  whh_ref, wp_ref, bp_ref, es_ref, wblk_ref, bout_ref,
                  out_ref, hT_ref, cT_ref, fT_ref):
    H = HSIZE
    T = gx_ref.shape[0]

    # Loop-invariant weights needed inside the recurrence.
    whh = whh_ref[...]
    wp = wp_ref[...]
    bp = bp_ref[...]
    es = es_ref[...]

    h = h0_ref[...]                 # (B, H)
    c = c0_ref[...]                 # (B, H)
    F = f0_ref[...]                 # (B, T_SIZE, SR)

    hs = []
    qs = []

    # Fully-unrolled time recurrence (T is small and static).
    for t in range(T):
        # ---- LSTM cell: input projection precomputed outside the kernel ----
        gates = gx_ref[t] + jnp.dot(h, whh, preferred_element_type=jnp.float32)
        sg = jax.nn.sigmoid(gates)                                  # full-tile
        tg = jnp.tanh(gates)                                        # full-tile
        c = sg[:, H:2 * H] * c + sg[:, 0:H] * tg[:, 2 * H:3 * H]
        h = sg[:, 3 * H:4 * H] * jnp.tanh(c)

        # ---- fused FWM write + read projection (one MXU push) ----
        pv = jnp.dot(h, wp, preferred_element_type=jnp.float32) + bp   # (B, PROJ)
        tp = jnp.tanh(pv)
        sr = tp[:, OFF_SEXP:OFF_SEXP + SR] * tp[:, OFF_RTIL:OFF_RTIL + SR]  # (B,SR)
        tt = tp[:, OFF_T:OFF_T + T_SIZE]                            # (B, T_SIZE)
        q = tp[:, OFF_Q:OFF_Q + S_SIZE]                             # (B, S_SIZE)
        beta = jax.nn.sigmoid(pv[:, OFF_BETA:OFF_BETA + 1])         # (+1 in bias)

        # ---- FWM write: contraction over the 64-lane axis, keepdims so the
        # (B, T, 1) results stay in sublane layout for the broadcast back ----
        srk = sr[:, None, :]                                        # (B, 1, SR)
        v = jnp.sum(srk * F, axis=-1, keepdims=True)                # (B, T, 1)
        new_v = beta[:, :, None] * (tt[:, :, None] - v)             # (B, T, 1)
        F = F + srk * new_v
        fsq = jnp.sum(F * F, axis=-1, keepdims=True)                # (B, T, 1)
        fn = jnp.sqrt(jnp.sum(fsq, axis=1, keepdims=True))          # (B, 1, 1)
        fn = jnp.maximum(fn - 1.0, 0.0) + 1.0
        F = F * pl.reciprocal(fn, approx=True)

        # ---- FWM read: 3 hops + LayerNorm (no affine), parallel-form stats ----
        for k in range(3):
            rk = tp[:, OFF_R1 + k * SR:OFF_R1 + (k + 1) * SR]       # (B, SR)
            q_exp = jnp.dot(q, es, preferred_element_type=jnp.float32)  # (B, SR)
            qk = jnp.sum((q_exp * rk)[:, None, :] * F, axis=-1)     # (B, T_SIZE)
            mu = jnp.mean(qk, axis=-1, keepdims=True)
            msq = jnp.mean(qk * qk, axis=-1, keepdims=True)
            var = msq - mu * mu
            q = (qk - mu) * jax.lax.rsqrt(var + LN_EPS)

        hs.append(h)
        qs.append(q)

    hT_ref[...] = h
    cT_ref[...] = c
    fT_ref[...] = F

    # ---- hoisted output head: one lane concat, one block-diagonal matmul,
    # one lane-dense (B, T*H) store ----
    q_cat = jnp.concatenate(qs, axis=1)                             # (B, T*T_SIZE)
    h_cat = jnp.concatenate(hs, axis=1)                             # (B, T*H)
    out_ref[...] = (h_cat
                    + jnp.dot(q_cat, wblk_ref[...],
                              preferred_element_type=jnp.float32)
                    + bout_ref[...])


def _pack_proj(params):
    """Fold beta's +1 into the bias and pre-expand the FWM projection columns."""
    (wih, whh, bih, bhh, wwr, bwr, wrd, brd, wlin, blin) = params
    S, R, TT = S_SIZE, R_SIZE, T_SIZE

    div = jnp.arange(SR) // R                       # lane -> s index
    mod = jnp.arange(SR) % R                        # lane -> r index

    wp = jnp.concatenate([
        wwr[:, div],                                # s, expanded over r
        wwr[:, S + mod],                            # write r, tiled over s
        wrd[:, S + mod],                            # read r1, tiled
        wrd[:, S + R + mod],                        # read r2, tiled
        wrd[:, S + 2 * R + mod],                    # read r3, tiled
        wwr[:, S + R:S + R + TT],                   # write t
        wrd[:, 0:S],                                # read q0
        wwr[:, S + R + TT:WRITE_SIZE],              # write beta
        jnp.zeros((HSIZE, PROJ - PROJ_USED), jnp.float32),
    ], axis=1)                                      # (HSIZE, PROJ)

    bp = jnp.concatenate([
        bwr[:, div],
        bwr[:, S + mod],
        brd[:, S + mod],
        brd[:, S + R + mod],
        brd[:, S + 2 * R + mod],
        bwr[:, S + R:S + R + TT],
        brd[:, 0:S],
        bwr[:, S + R + TT:WRITE_SIZE] + 1.0,        # fold sigmoid(b + 1) offset
        jnp.zeros((1, PROJ - PROJ_USED), jnp.float32),
    ], axis=1)                                      # (1, PROJ)

    # q -> q expanded over r: q_exp[b, c] = q[b, c // R]
    es = jnp.repeat(jnp.eye(S, dtype=jnp.float32), R, axis=1)   # (S, SR)
    return wp, bp, es


@jax.jit
def fwmrnn_forward(inputs, h0, c0, F0, params):
    """inputs: (T, B, ISIZE); F0: (B, S_SIZE*R_SIZE, T_SIZE) (PyTorch layout)."""
    T, Bc, _ = inputs.shape
    (wih, whh, bih, bhh, wwr, bwr, wrd, brd, wlin, blin) = params
    wp, bp, es = _pack_proj(params)

    # Hoisted input projection (+ folded gate biases): one (T*B, ISIZE) matmul.
    gx = (jnp.dot(inputs.reshape(T * Bc, ISIZE), wih) + bih + bhh)
    gx = gx.reshape(T, Bc, 4 * HSIZE)

    # Hoisted output head: block-diagonal kron(eye(T), W_lin) and tiled bias.
    wblk = jnp.kron(jnp.eye(T, dtype=jnp.float32), wlin)        # (T*T_SIZE, T*H)
    bout = jnp.tile(blin, (1, T))                                # (1, T*H)

    Fk0 = jnp.transpose(F0, (0, 2, 1))              # (B, T_SIZE, SR): lanes = S*R
    vmem = pl.BlockSpec(memory_space=pltpu.MemorySpace.VMEM)
    out_cat, hT, cT, FkT = pl.pallas_call(
        fwmrnn_kernel,
        out_shape=(
            jax.ShapeDtypeStruct((Bc, T * HSIZE), jnp.float32),
            jax.ShapeDtypeStruct((Bc, HSIZE), jnp.float32),
            jax.ShapeDtypeStruct((Bc, HSIZE), jnp.float32),
            jax.ShapeDtypeStruct((Bc, T_SIZE, SR), jnp.float32),
        ),
        in_specs=[vmem] * 10,
        out_specs=(vmem, vmem, vmem, vmem),
    )(gx, h0, c0, Fk0, whh, wp, bp, es, wblk, bout)
    out = jnp.transpose(out_cat.reshape(Bc, T, HSIZE), (1, 0, 2))
    return out, hT, cT, jnp.transpose(FkT, (0, 2, 1))


def init_params(key):
    ks = jax.random.split(key, 10)
    a_lstm = 1.0 / float(jnp.sqrt(HSIZE))
    a_fwm = float(jnp.sqrt(6.0 / (HSIZE + S_SIZE)))
    u = lambda k, shape, a: jax.random.uniform(k, shape, jnp.float32, -a, a)
    wih = u(ks[0], (ISIZE, 4 * HSIZE), a_lstm)    # transposed W_ih
    whh = u(ks[1], (HSIZE, 4 * HSIZE), a_lstm)    # transposed W_hh
    bih = u(ks[2], (1, 4 * HSIZE), a_lstm)
    bhh = u(ks[3], (1, 4 * HSIZE), a_lstm)
    wwr = u(ks[4], (HSIZE, WRITE_SIZE), a_fwm)    # transposed W_write
    bwr = u(ks[5], (1, WRITE_SIZE), a_lstm)
    wrd = u(ks[6], (HSIZE, READ_SIZE), a_fwm)     # transposed W_read
    brd = u(ks[7], (1, READ_SIZE), a_lstm)
    wlin = u(ks[8], (T_SIZE, HSIZE), 1.0 / float(jnp.sqrt(T_SIZE)))
    blin = u(ks[9], (1, HSIZE), 1.0 / float(jnp.sqrt(T_SIZE)))
    return (wih, whh, bih, bhh, wwr, bwr, wrd, brd, wlin, blin)


def reference_forward(inputs, h0, c0, F0, params):
    """Pure-JAX mirror of the PyTorch forward (F in (B, S*R, T) layout)."""
    (wih, whh, bih, bhh, wwr, bwr, wrd, brd, wlin, blin) = params
    H, S, R, TT = HSIZE, S_SIZE, R_SIZE, T_SIZE
    h, c, F = h0, c0, F0
    outs = []
    for t in range(inputs.shape[0]):
        x_t = inputs[t]
        gates = x_t @ wih + h @ whh + bih + bhh
        i_g = jax.nn.sigmoid(gates[:, 0:H])
        f_g = jax.nn.sigmoid(gates[:, H:2 * H])
        g_g = jnp.tanh(gates[:, 2 * H:3 * H])
        o_g = jax.nn.sigmoid(gates[:, 3 * H:4 * H])
        c = f_g * c + i_g * g_g
        h = o_g * jnp.tanh(c)
        # FWM write
        wv = h @ wwr + bwr
        s = jnp.tanh(wv[:, 0:S])
        r = jnp.tanh(wv[:, S:S + R])
        tt = jnp.tanh(wv[:, S + R:S + R + TT])
        b = jax.nn.sigmoid(wv[:, S + R + TT:S + R + TT + 1] + 1.0)
        sr = (s[:, :, None] * r[:, None, :]).reshape(-1, S * R)
        v = jnp.einsum('bk,bkt->bt', sr, F)
        new_v = b * (tt - v)
        F = F + sr[:, :, None] * new_v[:, None, :]
        fn = jnp.sqrt(jnp.sum(F * F, axis=(1, 2), keepdims=True))
        fn = jnp.maximum(fn - 1.0, 0.0) + 1.0
        F = F / fn
        # FWM read
        rv = jnp.tanh(h @ wrd + brd)
        q = rv[:, 0:S]
        for k in range(3):
            r_k = rv[:, S + k * R:S + (k + 1) * R]
            nr = (q[:, :, None] * r_k[:, None, :]).reshape(-1, S * R)
            q = jnp.einsum('bk,bkt->bt', nr, F)
            mu = jnp.mean(q, axis=-1, keepdims=True)
            var = jnp.mean((q - mu) ** 2, axis=-1, keepdims=True)
            q = (q - mu) / jnp.sqrt(var + LN_EPS)
        outs.append(h + q @ wlin + blin)
    return jnp.stack(outs, 0), h, c, F


if __name__ == "__main__":
    key = jax.random.PRNGKey(0)
    k_in, k_par = jax.random.split(key)
    inputs = jax.random.normal(k_in, (SEQ, B, ISIZE), jnp.float32)
    h0 = jnp.zeros((B, HSIZE), jnp.float32)
    c0 = jnp.zeros((B, HSIZE), jnp.float32)
    F0 = jnp.zeros((B, S_SIZE * R_SIZE, T_SIZE), jnp.float32)
    params = init_params(k_par)

    out, hT, cT, FT = fwmrnn_forward(inputs, h0, c0, F0, params)
    jax.block_until_ready((out, hT, cT, FT))

    ref_out, ref_h, ref_c, ref_F = reference_forward(inputs, h0, c0, F0, params)
    assert jnp.allclose(out, ref_out, rtol=2e-3, atol=2e-3), "output mismatch"
    assert jnp.allclose(hT, ref_h, rtol=2e-3, atol=2e-3), "h mismatch"
    assert jnp.allclose(cT, ref_c, rtol=2e-3, atol=2e-3), "c mismatch"
    assert jnp.allclose(FT, ref_F, rtol=2e-3, atol=2e-3), "F mismatch"

    print("KERNEL_OK")
</pallas_src>

<mosaic_0001>
module attributes {stable_mosaic.version = 11 : i64} {
  func.func @fwmrnn_kernel(%arg0: memref<8x2x128xf32, #tpu.memory_space<vmem>>, %arg1: memref<2x32xf32, #tpu.memory_space<vmem>>, %arg2: memref<2x32xf32, #tpu.memory_space<vmem>>, %arg3: memref<2x8x64xf32, #tpu.memory_space<vmem>>, %arg4: memref<32x128xf32, #tpu.memory_space<vmem>>, %arg5: memref<32x384xf32, #tpu.memory_space<vmem>>, %arg6: memref<1x384xf32, #tpu.memory_space<vmem>>, %arg7: memref<8x64xf32, #tpu.memory_space<vmem>>, %arg8: memref<64x256xf32, #tpu.memory_space<vmem>>, %arg9: memref<1x256xf32, #tpu.memory_space<vmem>>, %arg10: memref<2x256xf32, #tpu.memory_space<vmem>>, %arg11: memref<2x32xf32, #tpu.memory_space<vmem>>, %arg12: memref<2x32xf32, #tpu.memory_space<vmem>>, %arg13: memref<2x8x64xf32, #tpu.memory_space<vmem>>) attributes {dimension_semantics = [], scalar_prefetch = 0 : i64, scratch_operands = 0 : i64, tpu.core_type = #tpu.core_type<tc>} {
    %c0 = arith.constant 0 : index
    %c0_0 = arith.constant 0 : index
    %0 = vector.load %arg4[%c0, %c0_0] : memref<32x128xf32, #tpu.memory_space<vmem>>, vector<32x128xf32>
    %c0_1 = arith.constant 0 : index
    %c0_2 = arith.constant 0 : index
    %1 = vector.load %arg5[%c0_1, %c0_2] : memref<32x384xf32, #tpu.memory_space<vmem>>, vector<32x384xf32>
    %c0_3 = arith.constant 0 : index
    %c0_4 = arith.constant 0 : index
    %2 = vector.load %arg6[%c0_3, %c0_4] : memref<1x384xf32, #tpu.memory_space<vmem>>, vector<1x384xf32>
    %c0_5 = arith.constant 0 : index
    %c0_6 = arith.constant 0 : index
    %3 = vector.load %arg7[%c0_5, %c0_6] : memref<8x64xf32, #tpu.memory_space<vmem>>, vector<8x64xf32>
    %c0_7 = arith.constant 0 : index
    %c0_8 = arith.constant 0 : index
    %4 = vector.load %arg1[%c0_7, %c0_8] : memref<2x32xf32, #tpu.memory_space<vmem>>, vector<2x32xf32>
    %c0_9 = arith.constant 0 : index
    %c0_10 = arith.constant 0 : index
    %5 = vector.load %arg2[%c0_9, %c0_10] : memref<2x32xf32, #tpu.memory_space<vmem>>, vector<2x32xf32>
    %c0_11 = arith.constant 0 : index
    %c0_12 = arith.constant 0 : index
    %c0_13 = arith.constant 0 : index
    %6 = vector.load %arg3[%c0_11, %c0_12, %c0_13] : memref<2x8x64xf32, #tpu.memory_space<vmem>>, vector<2x8x64xf32>
    %c0_14 = arith.constant 0 : index
    %c0_15 = arith.constant 0 : index
    %c0_16 = arith.constant 0 : index
    %7 = vector.load %arg0[%c0_14, %c0_15, %c0_16] : memref<8x2x128xf32, #tpu.memory_space<vmem>>, vector<1x2x128xf32>
    %8 = vector.shape_cast %7 : vector<1x2x128xf32> to vector<2x128xf32>
    %cst = arith.constant dense<0.000000e+00> : vector<2x128xf32>
    %9 = tpu.matmul %4, %0, %cst {dimension_numbers = #tpu.dot_dimension_numbers<[1], [0], [0], [1], [0, 0, 1, 1], [], []>} : vector<2x32xf32>, vector<32x128xf32>, vector<2x128xf32> -> vector<2x128xf32>
    %10 = arith.addf %8, %9 : vector<2x128xf32>
    %11 = arith.negf %10 : vector<2x128xf32>
    %12 = math.exp %11 : vector<2x128xf32>
    %cst_17 = arith.constant 1.000000e+00 : f32
    %13 = vector.broadcast %cst_17 : f32 to vector<2x128xf32>
    %14 = arith.addf %13, %12 : vector<2x128xf32>
    %15 = arith.divf %13, %14 : vector<2x128xf32>
    %16 = math.tanh %10 : vector<2x128xf32>
    %17 = vector.extract_strided_slice %15 {offsets = [0, 32], sizes = [2, 32], strides = [1, 1]} : vector<2x128xf32> to vector<2x32xf32>
    %18 = arith.mulf %17, %5 : vector<2x32xf32>
    %19 = vector.extract_strided_slice %15 {offsets = [0, 0], sizes = [2, 32], strides = [1, 1]} : vector<2x128xf32> to vector<2x32xf32>
    %20 = vector.extract_strided_slice %16 {offsets = [0, 64], sizes = [2, 32], strides = [1, 1]} : vector<2x128xf32> to vector<2x32xf32>
    %21 = arith.mulf %19, %20 : vector<2x32xf32>
    %22 = arith.addf %18, %21 : vector<2x32xf32>
    %23 = vector.extract_strided_slice %15 {offsets = [0, 96], sizes = [2, 32], strides = [1, 1]} : vector<2x128xf32> to vector<2x32xf32>
    %24 = math.tanh %22 : vector<2x32xf32>
    %25 = arith.mulf %23, %24 : vector<2x32xf32>
    %cst_18 = arith.constant dense<0.000000e+00> : vector<2x384xf32>
    %26 = tpu.matmul %25, %1, %cst_18 {dimension_numbers = #tpu.dot_dimension_numbers<[1], [0], [0], [1], [0, 0, 1, 1], [], []>} : vector<2x32xf32>, vector<32x384xf32>, vector<2x384xf32> -> vector<2x384xf32>
    %27 = vector.broadcast %2 : vector<1x384xf32> to vector<2x384xf32>
    %28 = arith.addf %26, %27 : vector<2x384xf32>
    %29 = math.tanh %28 : vector<2x384xf32>
    %30 = vector.extract_strided_slice %29 {offsets = [0, 0], sizes = [2, 64], strides = [1, 1]} : vector<2x384xf32> to vector<2x64xf32>
    %31 = vector.extract_strided_slice %29 {offsets = [0, 64], sizes = [2, 64], strides = [1, 1]} : vector<2x384xf32> to vector<2x64xf32>
    %32 = arith.mulf %30, %31 : vector<2x64xf32>
    %33 = vector.extract_strided_slice %29 {offsets = [0, 320], sizes = [2, 8], strides = [1, 1]} : vector<2x384xf32> to vector<2x8xf32>
    %34 = vector.extract_strided_slice %29 {offsets = [0, 328], sizes = [2, 8], strides = [1, 1]} : vector<2x384xf32> to vector<2x8xf32>
    %35 = vector.extract_strided_slice %28 {offsets = [0, 336], sizes = [2, 1], strides = [1, 1]} : vector<2x384xf32> to vector<2x1xf32>
    %36 = arith.negf %35 : vector<2x1xf32>
    %37 = math.exp %36 : vector<2x1xf32>
    %cst_19 = arith.constant 1.000000e+00 : f32
    %38 = vector.broadcast %cst_19 : f32 to vector<2x1xf32>
    %39 = arith.addf %38, %37 : vector<2x1xf32>
    %40 = arith.divf %38, %39 : vector<2x1xf32>
    %41 = vector.shape_cast %32 : vector<2x64xf32> to vector<2x1x64xf32>
    %42 = vector.broadcast %41 : vector<2x1x64xf32> to vector<2x8x64xf32>
    %43 = arith.mulf %42, %6 : vector<2x8x64xf32>
    %cst_20 = arith.constant dense<0.000000e+00> : vector<2x8xf32>
    %44 = vector.multi_reduction <add>, %43, %cst_20 [2] : vector<2x8x64xf32> to vector<2x8xf32>
    %45 = vector.shape_cast %44 : vector<2x8xf32> to vector<2x8x1xf32>
    %46 = vector.shape_cast %40 : vector<2x1xf32> to vector<2x1x1xf32>
    %47 = vector.shape_cast %33 : vector<2x8xf32> to vector<2x8x1xf32>
    %48 = arith.subf %47, %45 : vector<2x8x1xf32>
    %49 = vector.broadcast %46 : vector<2x1x1xf32> to vector<2x8x1xf32>
    %50 = arith.mulf %49, %48 : vector<2x8x1xf32>
    %51 = vector.broadcast %41 : vector<2x1x64xf32> to vector<2x8x64xf32>
    %52 = vector.broadcast %50 : vector<2x8x1xf32> to vector<2x8x64xf32>
    %53 = arith.mulf %51, %52 : vector<2x8x64xf32>
    %54 = arith.addf %6, %53 : vector<2x8x64xf32>
    %55 = arith.mulf %54, %54 : vector<2x8x64xf32>
    %cst_21 = arith.constant dense<0.000000e+00> : vector<2x8xf32>
    %56 = vector.multi_reduction <add>, %55, %cst_21 [2] : vector<2x8x64xf32> to vector<2x8xf32>
    %57 = vector.shape_cast %56 : vector<2x8xf32> to vector<2x8x1xf32>
    %cst_22 = arith.constant dense<0.000000e+00> : vector<2x1xf32>
    %58 = vector.multi_reduction <add>, %57, %cst_22 [1] : vector<2x8x1xf32> to vector<2x1xf32>
    %59 = vector.shape_cast %58 : vector<2x1xf32> to vector<2x1x1xf32>
    %60 = math.sqrt %59 : vector<2x1x1xf32>
    %cst_23 = arith.constant 1.000000e+00 : f32
    %61 = vector.broadcast %cst_23 : f32 to vector<2x1x1xf32>
    %62 = arith.subf %60, %61 : vector<2x1x1xf32>
    %cst_24 = arith.constant 0.000000e+00 : f32
    %63 = vector.broadcast %cst_24 : f32 to vector<2x1x1xf32>
    %64 = arith.maximumf %62, %63 : vector<2x1x1xf32>
    %cst_25 = arith.constant 1.000000e+00 : f32
    %65 = vector.broadcast %cst_25 : f32 to vector<2x1x1xf32>
    %66 = arith.addf %64, %65 : vector<2x1x1xf32>
    %67 = tpu.reciprocal %66 {approx = true} : vector<2x1x1xf32> -> vector<2x1x1xf32>
    %68 = vector.broadcast %67 : vector<2x1x1xf32> to vector<2x8x64xf32>
    %69 = arith.mulf %54, %68 : vector<2x8x64xf32>
    %70 = vector.extract_strided_slice %29 {offsets = [0, 128], sizes = [2, 64], strides = [1, 1]} : vector<2x384xf32> to vector<2x64xf32>
    %cst_26 = arith.constant dense<0.000000e+00> : vector<2x64xf32>
    %71 = tpu.matmul %34, %3, %cst_26 {dimension_numbers = #tpu.dot_dimension_numbers<[1], [0], [0], [1], [0, 0, 1, 1], [], []>} : vector<2x8xf32>, vector<8x64xf32>, vector<2x64xf32> -> vector<2x64xf32>
    %72 = arith.mulf %71, %70 : vector<2x64xf32>
    %73 = vector.shape_cast %72 : vector<2x64xf32> to vector<2x1x64xf32>
    %74 = vector.broadcast %73 : vector<2x1x64xf32> to vector<2x8x64xf32>
    %75 = arith.mulf %74, %69 : vector<2x8x64xf32>
    %cst_27 = arith.constant dense<0.000000e+00> : vector<2x8xf32>
    %76 = vector.multi_reduction <add>, %75, %cst_27 [2] : vector<2x8x64xf32> to vector<2x8xf32>
    %cst_28 = arith.constant dense<0.000000e+00> : vector<2xf32>
    %77 = vector.multi_reduction <add>, %76, %cst_28 [1] : vector<2x8xf32> to vector<2xf32>
    %78 = vector.shape_cast %77 : vector<2xf32> to vector<2x1xf32>
    %cst_29 = arith.constant 8.000000e+00 : f32
    %79 = vector.broadcast %cst_29 : f32 to vector<2x1xf32>
    %80 = arith.divf %78, %79 : vector<2x1xf32>
    %81 = arith.mulf %76, %76 : vector<2x8xf32>
    %cst_30 = arith.constant dense<0.000000e+00> : vector<2xf32>
    %82 = vector.multi_reduction <add>, %81, %cst_30 [1] : vector<2x8xf32> to vector<2xf32>
    %83 = vector.shape_cast %82 : vector<2xf32> to vector<2x1xf32>
    %cst_31 = arith.constant 8.000000e+00 : f32
    %84 = vector.broadcast %cst_31 : f32 to vector<2x1xf32>
    %85 = arith.divf %83, %84 : vector<2x1xf32>
    %86 = arith.mulf %80, %80 : vector<2x1xf32>
    %87 = arith.subf %85, %86 : vector<2x1xf32>
    %88 = vector.broadcast %80 : vector<2x1xf32> to vector<2x8xf32>
    %89 = arith.subf %76, %88 : vector<2x8xf32>
    %cst_32 = arith.constant 9.99999974E-6 : f32
    %90 = vector.broadcast %cst_32 : f32 to vector<2x1xf32>
    %91 = arith.addf %87, %90 : vector<2x1xf32>
    %92 = math.rsqrt %91 : vector<2x1xf32>
    %93 = vector.broadcast %92 : vector<2x1xf32> to vector<2x8xf32>
    %94 = arith.mulf %89, %93 : vector<2x8xf32>
    %95 = vector.extract_strided_slice %29 {offsets = [0, 192], sizes = [2, 64], strides = [1, 1]} : vector<2x384xf32> to vector<2x64xf32>
    %cst_33 = arith.constant dense<0.000000e+00> : vector<2x64xf32>
    %96 = tpu.matmul %94, %3, %cst_33 {dimension_numbers = #tpu.dot_dimension_numbers<[1], [0], [0], [1], [0, 0, 1, 1], [], []>} : vector<2x8xf32>, vector<8x64xf32>, vector<2x64xf32> -> vector<2x64xf32>
    %97 = arith.mulf %96, %95 : vector<2x64xf32>
    %98 = vector.shape_cast %97 : vector<2x64xf32> to vector<2x1x64xf32>
    %99 = vector.broadcast %98 : vector<2x1x64xf32> to vector<2x8x64xf32>
    %100 = arith.mulf %99, %69 : vector<2x8x64xf32>
    %cst_34 = arith.constant dense<0.000000e+00> : vector<2x8xf32>
    %101 = vector.multi_reduction <add>, %100, %cst_34 [2] : vector<2x8x64xf32> to vector<2x8xf32>
    %cst_35 = arith.constant dense<0.000000e+00> : vector<2xf32>
    %102 = vector.multi_reduction <add>, %101, %cst_35 [1] : vector<2x8xf32> to vector<2xf32>
    %103 = vector.shape_cast %102 : vector<2xf32> to vector<2x1xf32>
    %cst_36 = arith.constant 8.000000e+00 : f32
    %104 = vector.broadcast %cst_36 : f32 to vector<2x1xf32>
    %105 = arith.divf %103, %104 : vector<2x1xf32>
    %106 = arith.mulf %101, %101 : vector<2x8xf32>
    %cst_37 = arith.constant dense<0.000000e+00> : vector<2xf32>
    %107 = vector.multi_reduction <add>, %106, %cst_37 [1] : vector<2x8xf32> to vector<2xf32>
    %108 = vector.shape_cast %107 : vector<2xf32> to vector<2x1xf32>
    %cst_38 = arith.constant 8.000000e+00 : f32
    %109 = vector.broadcast %cst_38 : f32 to vector<2x1xf32>
    %110 = arith.divf %108, %109 : vector<2x1xf32>
    %111 = arith.mulf %105, %105 : vector<2x1xf32>
    %112 = arith.subf %110, %111 : vector<2x1xf32>
    %113 = vector.broadcast %105 : vector<2x1xf32> to vector<2x8xf32>
    %114 = arith.subf %101, %113 : vector<2x8xf32>
    %cst_39 = arith.constant 9.99999974E-6 : f32
    %115 = vector.broadcast %cst_39 : f32 to vector<2x1xf32>
    %116 = arith.addf %112, %115 : vector<2x1xf32>
    %117 = math.rsqrt %116 : vector<2x1xf32>
    %118 = vector.broadcast %117 : vector<2x1xf32> to vector<2x8xf32>
    %119 = arith.mulf %114, %118 : vector<2x8xf32>
    %120 = vector.extract_strided_slice %29 {offsets = [0, 256], sizes = [2, 64], strides = [1, 1]} : vector<2x384xf32> to vector<2x64xf32>
    %cst_40 = arith.constant dense<0.000000e+00> : vector<2x64xf32>
    %121 = tpu.matmul %119, %3, %cst_40 {dimension_numbers = #tpu.dot_dimension_numbers<[1], [0], [0], [1], [0, 0, 1, 1], [], []>} : vector<2x8xf32>, vector<8x64xf32>, vector<2x64xf32> -> vector<2x64xf32>
    %122 = arith.mulf %121, %120 : vector<2x64xf32>
    %123 = vector.shape_cast %122 : vector<2x64xf32> to vector<2x1x64xf32>
    %124 = vector.broadcast %123 : vector<2x1x64xf32> to vector<2x8x64xf32>
    %125 = arith.mulf %124, %69 : vector<2x8x64xf32>
    %cst_41 = arith.constant dense<0.000000e+00> : vector<2x8xf32>
    %126 = vector.multi_reduction <add>, %125, %cst_41 [2] : vector<2x8x64xf32> to vector<2x8xf32>
    %cst_42 = arith.constant dense<0.000000e+00> : vector<2xf32>
    %127 = vector.multi_reduction <add>, %126, %cst_42 [1] : vector<2x8xf32> to vector<2xf32>
    %128 = vector.shape_cast %127 : vector<2xf32> to vector<2x1xf32>
    %cst_43 = arith.constant 8.000000e+00 : f32
    %129 = vector.broadcast %cst_43 : f32 to vector<2x1xf32>
    %130 = arith.divf %128, %129 : vector<2x1xf32>
    %131 = arith.mulf %126, %126 : vector<2x8xf32>
    %cst_44 = arith.constant dense<0.000000e+00> : vector<2xf32>
    %132 = vector.multi_reduction <add>, %131, %cst_44 [1] : vector<2x8xf32> to vector<2xf32>
    %133 = vector.shape_cast %132 : vector<2xf32> to vector<2x1xf32>
    %cst_45 = arith.constant 8.000000e+00 : f32
    %134 = vector.broadcast %cst_45 : f32 to vector<2x1xf32>
    %135 = arith.divf %133, %134 : vector<2x1xf32>
    %136 = arith.mulf %130, %130 : vector<2x1xf32>
    %137 = arith.subf %135, %136 : vector<2x1xf32>
    %138 = vector.broadcast %130 : vector<2x1xf32> to vector<2x8xf32>
    %139 = arith.subf %126, %138 : vector<2x8xf32>
    %cst_46 = arith.constant 9.99999974E-6 : f32
    %140 = vector.broadcast %cst_46 : f32 to vector<2x1xf32>
    %141 = arith.addf %137, %140 : vector<2x1xf32>
    %142 = math.rsqrt %141 : vector<2x1xf32>
    %143 = vector.broadcast %142 : vector<2x1xf32> to vector<2x8xf32>
    %144 = arith.mulf %139, %143 : vector<2x8xf32>
    %c1 = arith.constant 1 : index
    %c0_47 = arith.constant 0 : index
    %c0_48 = arith.constant 0 : index
    %145 = vector.load %arg0[%c1, %c0_47, %c0_48] : memref<8x2x128xf32, #tpu.memory_space<vmem>>, vector<1x2x128xf32>
    %146 = vector.shape_cast %145 : vector<1x2x128xf32> to vector<2x128xf32>
    %cst_49 = arith.constant dense<0.000000e+00> : vector<2x128xf32>
    %147 = tpu.matmul %25, %0, %cst_49 {dimension_numbers = #tpu.dot_dimension_numbers<[1], [0], [0], [1], [0, 0, 1, 1], [], []>} : vector<2x32xf32>, vector<32x128xf32>, vector<2x128xf32> -> vector<2x128xf32>
    %148 = arith.addf %146, %147 : vector<2x128xf32>
    %149 = arith.negf %148 : vector<2x128xf32>
    %150 = math.exp %149 : vector<2x128xf32>
    %cst_50 = arith.constant 1.000000e+00 : f32
    %151 = vector.broadcast %cst_50 : f32 to vector<2x128xf32>
    %152 = arith.addf %151, %150 : vector<2x128xf32>
    %153 = arith.divf %151, %152 : vector<2x128xf32>
    %154 = math.tanh %148 : vector<2x128xf32>
    %155 = vector.extract_strided_slice %153 {offsets = [0, 32], sizes = [2, 32], strides = [1, 1]} : vector<2x128xf32> to vector<2x32xf32>
    %156 = arith.mulf %155, %22 : vector<2x32xf32>
    %157 = vector.extract_strided_slice %153 {offsets = [0, 0], sizes = [2, 32], strides = [1, 1]} : vector<2x128xf32> to vector<2x32xf32>
    %158 = vector.extract_strided_slice %154 {offsets = [0, 64], sizes = [2, 32], strides = [1, 1]} : vector<2x128xf32> to vector<2x32xf32>
    %159 = arith.mulf %157, %158 : vector<2x32xf32>
    %160 = arith.addf %156, %159 : vector<2x32xf32>
    %161 = vector.extract_strided_slice %153 {offsets = [0, 96], sizes = [2, 32], strides = [1, 1]} : vector<2x128xf32> to vector<2x32xf32>
    %162 = math.tanh %160 : vector<2x32xf32>
    %163 = arith.mulf %161, %162 : vector<2x32xf32>
    %cst_51 = arith.constant dense<0.000000e+00> : vector<2x384xf32>
    %164 = tpu.matmul %163, %1, %cst_51 {dimension_numbers = #tpu.dot_dimension_numbers<[1], [0], [0], [1], [0, 0, 1, 1], [], []>} : vector<2x32xf32>, vector<32x384xf32>, vector<2x384xf32> -> vector<2x384xf32>
    %165 = vector.broadcast %2 : vector<1x384xf32> to vector<2x384xf32>
    %166 = arith.addf %164, %165 : vector<2x384xf32>
    %167 = math.tanh %166 : vector<2x384xf32>
    %168 = vector.extract_strided_slice %167 {offsets = [0, 0], sizes = [2, 64], strides = [1, 1]} : vector<2x384xf32> to vector<2x64xf32>
    %169 = vector.extract_strided_slice %167 {offsets = [0, 64], sizes = [2, 64], strides = [1, 1]} : vector<2x384xf32> to vector<2x64xf32>
    %170 = arith.mulf %168, %169 : vector<2x64xf32>
    %171 = vector.extract_strided_slice %167 {offsets = [0, 320], sizes = [2, 8], strides = [1, 1]} : vector<2x384xf32> to vector<2x8xf32>
    %172 = vector.extract_strided_slice %167 {offsets = [0, 328], sizes = [2, 8], strides = [1, 1]} : vector<2x384xf32> to vector<2x8xf32>
    %173 = vector.extract_strided_slice %166 {offsets = [0, 336], sizes = [2, 1], strides = [1, 1]} : vector<2x384xf32> to vector<2x1xf32>
    %174 = arith.negf %173 : vector<2x1xf32>
    %175 = math.exp %174 : vector<2x1xf32>
    %cst_52 = arith.constant 1.000000e+00 : f32
    %176 = vector.broadcast %cst_52 : f32 to vector<2x1xf32>
    %177 = arith.addf %176, %175 : vector<2x1xf32>
    %178 = arith.divf %176, %177 : vector<2x1xf32>
    %179 = vector.shape_cast %170 : vector<2x64xf32> to vector<2x1x64xf32>
    %180 = vector.broadcast %179 : vector<2x1x64xf32> to vector<2x8x64xf32>
    %181 = arith.mulf %180, %69 : vector<2x8x64xf32>
    %cst_53 = arith.constant dense<0.000000e+00> : vector<2x8xf32>
    %182 = vector.multi_reduction <add>, %181, %cst_53 [2] : vector<2x8x64xf32> to vector<2x8xf32>
    %183 = vector.shape_cast %182 : vector<2x8xf32> to vector<2x8x1xf32>
    %184 = vector.shape_cast %178 : vector<2x1xf32> to vector<2x1x1xf32>
    %185 = vector.shape_cast %171 : vector<2x8xf32> to vector<2x8x1xf32>
    %186 = arith.subf %185, %183 : vector<2x8x1xf32>
    %187 = vector.broadcast %184 : vector<2x1x1xf32> to vector<2x8x1xf32>
    %188 = arith.mulf %187, %186 : vector<2x8x1xf32>
    %189 = vector.broadcast %179 : vector<2x1x64xf32> to vector<2x8x64xf32>
    %190 = vector.broadcast %188 : vector<2x8x1xf32> to vector<2x8x64xf32>
    %191 = arith.mulf %189, %190 : vector<2x8x64xf32>
    %192 = arith.addf %69, %191 : vector<2x8x64xf32>
    %193 = arith.mulf %192, %192 : vector<2x8x64xf32>
    %cst_54 = arith.constant dense<0.000000e+00> : vector<2x8xf32>
    %194 = vector.multi_reduction <add>, %193, %cst_54 [2] : vector<2x8x64xf32> to vector<2x8xf32>
    %195 = vector.shape_cast %194 : vector<2x8xf32> to vector<2x8x1xf32>
    %cst_55 = arith.constant dense<0.000000e+00> : vector<2x1xf32>
    %196 = vector.multi_reduction <add>, %195, %cst_55 [1] : vector<2x8x1xf32> to vector<2x1xf32>
    %197 = vector.shape_cast %196 : vector<2x1xf32> to vector<2x1x1xf32>
    %198 = math.sqrt %197 : vector<2x1x1xf32>
    %cst_56 = arith.constant 1.000000e+00 : f32
    %199 = vector.broadcast %cst_56 : f32 to vector<2x1x1xf32>
    %200 = arith.subf %198, %199 : vector<2x1x1xf32>
    %cst_57 = arith.constant 0.000000e+00 : f32
    %201 = vector.broadcast %cst_57 : f32 to vector<2x1x1xf32>
    %202 = arith.maximumf %200, %201 : vector<2x1x1xf32>
    %cst_58 = arith.constant 1.000000e+00 : f32
    %203 = vector.broadcast %cst_58 : f32 to vector<2x1x1xf32>
    %204 = arith.addf %202, %203 : vector<2x1x1xf32>
    %205 = tpu.reciprocal %204 {approx = true} : vector<2x1x1xf32> -> vector<2x1x1xf32>
    %206 = vector.broadcast %205 : vector<2x1x1xf32> to vector<2x8x64xf32>
    %207 = arith.mulf %192, %206 : vector<2x8x64xf32>
    %208 = vector.extract_strided_slice %167 {offsets = [0, 128], sizes = [2, 64], strides = [1, 1]} : vector<2x384xf32> to vector<2x64xf32>
    %cst_59 = arith.constant dense<0.000000e+00> : vector<2x64xf32>
    %209 = tpu.matmul %172, %3, %cst_59 {dimension_numbers = #tpu.dot_dimension_numbers<[1], [0], [0], [1], [0, 0, 1, 1], [], []>} : vector<2x8xf32>, vector<8x64xf32>, vector<2x64xf32> -> vector<2x64xf32>
    %210 = arith.mulf %209, %208 : vector<2x64xf32>
    %211 = vector.shape_cast %210 : vector<2x64xf32> to vector<2x1x64xf32>
    %212 = vector.broadcast %211 : vector<2x1x64xf32> to vector<2x8x64xf32>
    %213 = arith.mulf %212, %207 : vector<2x8x64xf32>
    %cst_60 = arith.constant dense<0.000000e+00> : vector<2x8xf32>
    %214 = vector.multi_reduction <add>, %213, %cst_60 [2] : vector<2x8x64xf32> to vector<2x8xf32>
    %cst_61 = arith.constant dense<0.000000e+00> : vector<2xf32>
    %215 = vector.multi_reduction <add>, %214, %cst_61 [1] : vector<2x8xf32> to vector<2xf32>
    %216 = vector.shape_cast %215 : vector<2xf32> to vector<2x1xf32>
    %cst_62 = arith.constant 8.000000e+00 : f32
    %217 = vector.broadcast %cst_62 : f32 to vector<2x1xf32>
    %218 = arith.divf %216, %217 : vector<2x1xf32>
    %219 = arith.mulf %214, %214 : vector<2x8xf32>
    %cst_63 = arith.constant dense<0.000000e+00> : vector<2xf32>
    %220 = vector.multi_reduction <add>, %219, %cst_63 [1] : vector<2x8xf32> to vector<2xf32>
    %221 = vector.shape_cast %220 : vector<2xf32> to vector<2x1xf32>
    %cst_64 = arith.constant 8.000000e+00 : f32
    %222 = vector.broadcast %cst_64 : f32 to vector<2x1xf32>
    %223 = arith.divf %221, %222 : vector<2x1xf32>
    %224 = arith.mulf %218, %218 : vector<2x1xf32>
    %225 = arith.subf %223, %224 : vector<2x1xf32>
    %226 = vector.broadcast %218 : vector<2x1xf32> to vector<2x8xf32>
    %227 = arith.subf %214, %226 : vector<2x8xf32>
    %cst_65 = arith.constant 9.99999974E-6 : f32
    %228 = vector.broadcast %cst_65 : f32 to vector<2x1xf32>
    %229 = arith.addf %225, %228 : vector<2x1xf32>
    %230 = math.rsqrt %229 : vector<2x1xf32>
    %231 = vector.broadcast %230 : vector<2x1xf32> to vector<2x8xf32>
    %232 = arith.mulf %227, %231 : vector<2x8xf32>
    %233 = vector.extract_strided_slice %167 {offsets = [0, 192], sizes = [2, 64], strides = [1, 1]} : vector<2x384xf32> to vector<2x64xf32>
    %cst_66 = arith.constant dense<0.000000e+00> : vector<2x64xf32>
    %234 = tpu.matmul %232, %3, %cst_66 {dimension_numbers = #tpu.dot_dimension_numbers<[1], [0], [0], [1], [0, 0, 1, 1], [], []>} : vector<2x8xf32>, vector<8x64xf32>, vector<2x64xf32> -> vector<2x64xf32>
    %235 = arith.mulf %234, %233 : vector<2x64xf32>
    %236 = vector.shape_cast %235 : vector<2x64xf32> to vector<2x1x64xf32>
    %237 = vector.broadcast %236 : vector<2x1x64xf32> to vector<2x8x64xf32>
    %238 = arith.mulf %237, %207 : vector<2x8x64xf32>
    %cst_67 = arith.constant dense<0.000000e+00> : vector<2x8xf32>
    %239 = vector.multi_reduction <add>, %238, %cst_67 [2] : vector<2x8x64xf32> to vector<2x8xf32>
    %cst_68 = arith.constant dense<0.000000e+00> : vector<2xf32>
    %240 = vector.multi_reduction <add>, %239, %cst_68 [1] : vector<2x8xf32> to vector<2xf32>
    %241 = vector.shape_cast %240 : vector<2xf32> to vector<2x1xf32>
    %cst_69 = arith.constant 8.000000e+00 : f32
    %242 = vector.broadcast %cst_69 : f32 to vector<2x1xf32>
    %243 = arith.divf %241, %242 : vector<2x1xf32>
    %244 = arith.mulf %239, %239 : vector<2x8xf32>
    %cst_70 = arith.constant dense<0.000000e+00> : vector<2xf32>
    %245 = vector.multi_reduction <add>, %244, %cst_70 [1] : vector<2x8xf32> to vector<2xf32>
    %246 = vector.shape_cast %245 : vector<2xf32> to vector<2x1xf32>
    %cst_71 = arith.constant 8.000000e+00 : f32
    %247 = vector.broadcast %cst_71 : f32 to vector<2x1xf32>
    %248 = arith.divf %246, %247 : vector<2x1xf32>
    %249 = arith.mulf %243, %243 : vector<2x1xf32>
    %250 = arith.subf %248, %249 : vector<2x1xf32>
    %251 = vector.broadcast %243 : vector<2x1xf32> to vector<2x8xf32>
    %252 = arith.subf %239, %251 : vector<2x8xf32>
    %cst_72 = arith.constant 9.99999974E-6 : f32
    %253 = vector.broadcast %cst_72 : f32 to vector<2x1xf32>
    %254 = arith.addf %250, %253 : vector<2x1xf32>
    %255 = math.rsqrt %254 : vector<2x1xf32>
    %256 = vector.broadcast %255 : vector<2x1xf32> to vector<2x8xf32>
    %257 = arith.mulf %252, %256 : vector<2x8xf32>
    %258 = vector.extract_strided_slice %167 {offsets = [0, 256], sizes = [2, 64], strides = [1, 1]} : vector<2x384xf32> to vector<2x64xf32>
    %cst_73 = arith.constant dense<0.000000e+00> : vector<2x64xf32>
    %259 = tpu.matmul %257, %3, %cst_73 {dimension_numbers = #tpu.dot_dimension_numbers<[1], [0], [0], [1], [0, 0, 1, 1], [], []>} : vector<2x8xf32>, vector<8x64xf32>, vector<2x64xf32> -> vector<2x64xf32>
    %260 = arith.mulf %259, %258 : vector<2x64xf32>
    %261 = vector.shape_cast %260 : vector<2x64xf32> to vector<2x1x64xf32>
    %262 = vector.broadcast %261 : vector<2x1x64xf32> to vector<2x8x64xf32>
    %263 = arith.mulf %262, %207 : vector<2x8x64xf32>
    %cst_74 = arith.constant dense<0.000000e+00> : vector<2x8xf32>
    %264 = vector.multi_reduction <add>, %263, %cst_74 [2] : vector<2x8x64xf32> to vector<2x8xf32>
    %cst_75 = arith.constant dense<0.000000e+00> : vector<2xf32>
    %265 = vector.multi_reduction <add>, %264, %cst_75 [1] : vector<2x8xf32> to vector<2xf32>
    %266 = vector.shape_cast %265 : vector<2xf32> to vector<2x1xf32>
    %cst_76 = arith.constant 8.000000e+00 : f32
    %267 = vector.broadcast %cst_76 : f32 to vector<2x1xf32>
    %268 = arith.divf %266, %267 : vector<2x1xf32>
    %269 = arith.mulf %264, %264 : vector<2x8xf32>
    %cst_77 = arith.constant dense<0.000000e+00> : vector<2xf32>
    %270 = vector.multi_reduction <add>, %269, %cst_77 [1] : vector<2x8xf32> to vector<2xf32>
    %271 = vector.shape_cast %270 : vector<2xf32> to vector<2x1xf32>
    %cst_78 = arith.constant 8.000000e+00 : f32
    %272 = vector.broadcast %cst_78 : f32 to vector<2x1xf32>
    %273 = arith.divf %271, %272 : vector<2x1xf32>
    %274 = arith.mulf %268, %268 : vector<2x1xf32>
    %275 = arith.subf %273, %274 : vector<2x1xf32>
    %276 = vector.broadcast %268 : vector<2x1xf32> to vector<2x8xf32>
    %277 = arith.subf %264, %276 : vector<2x8xf32>
    %cst_79 = arith.constant 9.99999974E-6 : f32
    %278 = vector.broadcast %cst_79 : f32 to vector<2x1xf32>
    %279 = arith.addf %275, %278 : vector<2x1xf32>
    %280 = math.rsqrt %279 : vector<2x1xf32>
    %281 = vector.broadcast %280 : vector<2x1xf32> to vector<2x8xf32>
    %282 = arith.mulf %277, %281 : vector<2x8xf32>
    %c2 = arith.constant 2 : index
    %c0_80 = arith.constant 0 : index
    %c0_81 = arith.constant 0 : index
    %283 = vector.load %arg0[%c2, %c0_80, %c0_81] : memref<8x2x128xf32, #tpu.memory_space<vmem>>, vector<1x2x128xf32>
    %284 = vector.shape_cast %283 : vector<1x2x128xf32> to vector<2x128xf32>
    %cst_82 = arith.constant dense<0.000000e+00> : vector<2x128xf32>
    %285 = tpu.matmul %163, %0, %cst_82 {dimension_numbers = #tpu.dot_dimension_numbers<[1], [0], [0], [1], [0, 0, 1, 1], [], []>} : vector<2x32xf32>, vector<32x128xf32>, vector<2x128xf32> -> vector<2x128xf32>
    %286 = arith.addf %284, %285 : vector<2x128xf32>
    %287 = arith.negf %286 : vector<2x128xf32>
    %288 = math.exp %287 : vector<2x128xf32>
    %cst_83 = arith.constant 1.000000e+00 : f32
    %289 = vector.broadcast %cst_83 : f32 to vector<2x128xf32>
    %290 = arith.addf %289, %288 : vector<2x128xf32>
    %291 = arith.divf %289, %290 : vector<2x128xf32>
    %292 = math.tanh %286 : vector<2x128xf32>
    %293 = vector.extract_strided_slice %291 {offsets = [0, 32], sizes = [2, 32], strides = [1, 1]} : vector<2x128xf32> to vector<2x32xf32>
    %294 = arith.mulf %293, %160 : vector<2x32xf32>
    %295 = vector.extract_strided_slice %291 {offsets = [0, 0], sizes = [2, 32], strides = [1, 1]} : vector<2x128xf32> to vector<2x32xf32>
    %296 = vector.extract_strided_slice %292 {offsets = [0, 64], sizes = [2, 32], strides = [1, 1]} : vector<2x128xf32> to vector<2x32xf32>
    %297 = arith.mulf %295, %296 : vector<2x32xf32>
    %298 = arith.addf %294, %297 : vector<2x32xf32>
    %299 = vector.extract_strided_slice %291 {offsets = [0, 96], sizes = [2, 32], strides = [1, 1]} : vector<2x128xf32> to vector<2x32xf32>
    %300 = math.tanh %298 : vector<2x32xf32>
    %301 = arith.mulf %299, %300 : vector<2x32xf32>
    %cst_84 = arith.constant dense<0.000000e+00> : vector<2x384xf32>
    %302 = tpu.matmul %301, %1, %cst_84 {dimension_numbers = #tpu.dot_dimension_numbers<[1], [0], [0], [1], [0, 0, 1, 1], [], []>} : vector<2x32xf32>, vector<32x384xf32>, vector<2x384xf32> -> vector<2x384xf32>
    %303 = vector.broadcast %2 : vector<1x384xf32> to vector<2x384xf32>
    %304 = arith.addf %302, %303 : vector<2x384xf32>
    %305 = math.tanh %304 : vector<2x384xf32>
    %306 = vector.extract_strided_slice %305 {offsets = [0, 0], sizes = [2, 64], strides = [1, 1]} : vector<2x384xf32> to vector<2x64xf32>
    %307 = vector.extract_strided_slice %305 {offsets = [0, 64], sizes = [2, 64], strides = [1, 1]} : vector<2x384xf32> to vector<2x64xf32>
    %308 = arith.mulf %306, %307 : vector<2x64xf32>
    %309 = vector.extract_strided_slice %305 {offsets = [0, 320], sizes = [2, 8], strides = [1, 1]} : vector<2x384xf32> to vector<2x8xf32>
    %310 = vector.extract_strided_slice %305 {offsets = [0, 328], sizes = [2, 8], strides = [1, 1]} : vector<2x384xf32> to vector<2x8xf32>
    %311 = vector.extract_strided_slice %304 {offsets = [0, 336], sizes = [2, 1], strides = [1, 1]} : vector<2x384xf32> to vector<2x1xf32>
    %312 = arith.negf %311 : vector<2x1xf32>
    %313 = math.exp %312 : vector<2x1xf32>
    %cst_85 = arith.constant 1.000000e+00 : f32
    %314 = vector.broadcast %cst_85 : f32 to vector<2x1xf32>
    %315 = arith.addf %314, %313 : vector<2x1xf32>
    %316 = arith.divf %314, %315 : vector<2x1xf32>
    %317 = vector.shape_cast %308 : vector<2x64xf32> to vector<2x1x64xf32>
    %318 = vector.broadcast %317 : vector<2x1x64xf32> to vector<2x8x64xf32>
    %319 = arith.mulf %318, %207 : vector<2x8x64xf32>
    %cst_86 = arith.constant dense<0.000000e+00> : vector<2x8xf32>
    %320 = vector.multi_reduction <add>, %319, %cst_86 [2] : vector<2x8x64xf32> to vector<2x8xf32>
    %321 = vector.shape_cast %320 : vector<2x8xf32> to vector<2x8x1xf32>
    %322 = vector.shape_cast %316 : vector<2x1xf32> to vector<2x1x1xf32>
    %323 = vector.shape_cast %309 : vector<2x8xf32> to vector<2x8x1xf32>
    %324 = arith.subf %323, %321 : vector<2x8x1xf32>
    %325 = vector.broadcast %322 : vector<2x1x1xf32> to vector<2x8x1xf32>
    %326 = arith.mulf %325, %324 : vector<2x8x1xf32>
    %327 = vector.broadcast %317 : vector<2x1x64xf32> to vector<2x8x64xf32>
    %328 = vector.broadcast %326 : vector<2x8x1xf32> to vector<2x8x64xf32>
    %329 = arith.mulf %327, %328 : vector<2x8x64xf32>
    %330 = arith.addf %207, %329 : vector<2x8x64xf32>
    %331 = arith.mulf %330, %330 : vector<2x8x64xf32>
    %cst_87 = arith.constant dense<0.000000e+00> : vector<2x8xf32>
    %332 = vector.multi_reduction <add>, %331, %cst_87 [2] : vector<2x8x64xf32> to vector<2x8xf32>
    %333 = vector.shape_cast %332 : vector<2x8xf32> to vector<2x8x1xf32>
    %cst_88 = arith.constant dense<0.000000e+00> : vector<2x1xf32>
    %334 = vector.multi_reduction <add>, %333, %cst_88 [1] : vector<2x8x1xf32> to vector<2x1xf32>
    %335 = vector.shape_cast %334 : vector<2x1xf32> to vector<2x1x1xf32>
    %336 = math.sqrt %335 : vector<2x1x1xf32>
    %cst_89 = arith.constant 1.000000e+00 : f32
    %337 = vector.broadcast %cst_89 : f32 to vector<2x1x1xf32>
    %338 = arith.subf %336, %337 : vector<2x1x1xf32>
    %cst_90 = arith.constant 0.000000e+00 : f32
    %339 = vector.broadcast %cst_90 : f32 to vector<2x1x1xf32>
    %340 = arith.maximumf %338, %339 : vector<2x1x1xf32>
    %cst_91 = arith.constant 1.000000e+00 : f32
    %341 = vector.broadcast %cst_91 : f32 to vector<2x1x1xf32>
    %342 = arith.addf %340, %341 : vector<2x1x1xf32>
    %343 = tpu.reciprocal %342 {approx = true} : vector<2x1x1xf32> -> vector<2x1x1xf32>
    %344 = vector.broadcast %343 : vector<2x1x1xf32> to vector<2x8x64xf32>
    %345 = arith.mulf %330, %344 : vector<2x8x64xf32>
    %346 = vector.extract_strided_slice %305 {offsets = [0, 128], sizes = [2, 64], strides = [1, 1]} : vector<2x384xf32> to vector<2x64xf32>
    %cst_92 = arith.constant dense<0.000000e+00> : vector<2x64xf32>
    %347 = tpu.matmul %310, %3, %cst_92 {dimension_numbers = #tpu.dot_dimension_numbers<[1], [0], [0], [1], [0, 0, 1, 1], [], []>} : vector<2x8xf32>, vector<8x64xf32>, vector<2x64xf32> -> vector<2x64xf32>
    %348 = arith.mulf %347, %346 : vector<2x64xf32>
    %349 = vector.shape_cast %348 : vector<2x64xf32> to vector<2x1x64xf32>
    %350 = vector.broadcast %349 : vector<2x1x64xf32> to vector<2x8x64xf32>
    %351 = arith.mulf %350, %345 : vector<2x8x64xf32>
    %cst_93 = arith.constant dense<0.000000e+00> : vector<2x8xf32>
    %352 = vector.multi_reduction <add>, %351, %cst_93 [2] : vector<2x8x64xf32> to vector<2x8xf32>
    %cst_94 = arith.constant dense<0.000000e+00> : vector<2xf32>
    %353 = vector.multi_reduction <add>, %352, %cst_94 [1] : vector<2x8xf32> to vector<2xf32>
    %354 = vector.shape_cast %353 : vector<2xf32> to vector<2x1xf32>
    %cst_95 = arith.constant 8.000000e+00 : f32
    %355 = vector.broadcast %cst_95 : f32 to vector<2x1xf32>
    %356 = arith.divf %354, %355 : vector<2x1xf32>
    %357 = arith.mulf %352, %352 : vector<2x8xf32>
    %cst_96 = arith.constant dense<0.000000e+00> : vector<2xf32>
    %358 = vector.multi_reduction <add>, %357, %cst_96 [1] : vector<2x8xf32> to vector<2xf32>
    %359 = vector.shape_cast %358 : vector<2xf32> to vector<2x1xf32>
    %cst_97 = arith.constant 8.000000e+00 : f32
    %360 = vector.broadcast %cst_97 : f32 to vector<2x1xf32>
    %361 = arith.divf %359, %360 : vector<2x1xf32>
    %362 = arith.mulf %356, %356 : vector<2x1xf32>
    %363 = arith.subf %361, %362 : vector<2x1xf32>
    %364 = vector.broadcast %356 : vector<2x1xf32> to vector<2x8xf32>
    %365 = arith.subf %352, %364 : vector<2x8xf32>
    %cst_98 = arith.constant 9.99999974E-6 : f32
    %366 = vector.broadcast %cst_98 : f32 to vector<2x1xf32>
    %367 = arith.addf %363, %366 : vector<2x1xf32>
    %368 = math.rsqrt %367 : vector<2x1xf32>
    %369 = vector.broadcast %368 : vector<2x1xf32> to vector<2x8xf32>
    %370 = arith.mulf %365, %369 : vector<2x8xf32>
    %371 = vector.extract_strided_slice %305 {offsets = [0, 192], sizes = [2, 64], strides = [1, 1]} : vector<2x384xf32> to vector<2x64xf32>
    %cst_99 = arith.constant dense<0.000000e+00> : vector<2x64xf32>
    %372 = tpu.matmul %370, %3, %cst_99 {dimension_numbers = #tpu.dot_dimension_numbers<[1], [0], [0], [1], [0, 0, 1, 1], [], []>} : vector<2x8xf32>, vector<8x64xf32>, vector<2x64xf32> -> vector<2x64xf32>
    %373 = arith.mulf %372, %371 : vector<2x64xf32>
    %374 = vector.shape_cast %373 : vector<2x64xf32> to vector<2x1x64xf32>
    %375 = vector.broadcast %374 : vector<2x1x64xf32> to vector<2x8x64xf32>
    %376 = arith.mulf %375, %345 : vector<2x8x64xf32>
    %cst_100 = arith.constant dense<0.000000e+00> : vector<2x8xf32>
    %377 = vector.multi_reduction <add>, %376, %cst_100 [2] : vector<2x8x64xf32> to vector<2x8xf32>
    %cst_101 = arith.constant dense<0.000000e+00> : vector<2xf32>
    %378 = vector.multi_reduction <add>, %377, %cst_101 [1] : vector<2x8xf32> to vector<2xf32>
    %379 = vector.shape_cast %378 : vector<2xf32> to vector<2x1xf32>
    %cst_102 = arith.constant 8.000000e+00 : f32
    %380 = vector.broadcast %cst_102 : f32 to vector<2x1xf32>
    %381 = arith.divf %379, %380 : vector<2x1xf32>
    %382 = arith.mulf %377, %377 : vector<2x8xf32>
    %cst_103 = arith.constant dense<0.000000e+00> : vector<2xf32>
    %383 = vector.multi_reduction <add>, %382, %cst_103 [1] : vector<2x8xf32> to vector<2xf32>
    %384 = vector.shape_cast %383 : vector<2xf32> to vector<2x1xf32>
    %cst_104 = arith.constant 8.000000e+00 : f32
    %385 = vector.broadcast %cst_104 : f32 to vector<2x1xf32>
    %386 = arith.divf %384, %385 : vector<2x1xf32>
    %387 = arith.mulf %381, %381 : vector<2x1xf32>
    %388 = arith.subf %386, %387 : vector<2x1xf32>
    %389 = vector.broadcast %381 : vector<2x1xf32> to vector<2x8xf32>
    %390 = arith.subf %377, %389 : vector<2x8xf32>
    %cst_105 = arith.constant 9.99999974E-6 : f32
    %391 = vector.broadcast %cst_105 : f32 to vector<2x1xf32>
    %392 = arith.addf %388, %391 : vector<2x1xf32>
    %393 = math.rsqrt %392 : vector<2x1xf32>
    %394 = vector.broadcast %393 : vector<2x1xf32> to vector<2x8xf32>
    %395 = arith.mulf %390, %394 : vector<2x8xf32>
    %396 = vector.extract_strided_slice %305 {offsets = [0, 256], sizes = [2, 64], strides = [1, 1]} : vector<2x384xf32> to vector<2x64xf32>
    %cst_106 = arith.constant dense<0.000000e+00> : vector<2x64xf32>
    %397 = tpu.matmul %395, %3, %cst_106 {dimension_numbers = #tpu.dot_dimension_numbers<[1], [0], [0], [1], [0, 0, 1, 1], [], []>} : vector<2x8xf32>, vector<8x64xf32>, vector<2x64xf32> -> vector<2x64xf32>
    %398 = arith.mulf %397, %396 : vector<2x64xf32>
    %399 = vector.shape_cast %398 : vector<2x64xf32> to vector<2x1x64xf32>
    %400 = vector.broadcast %399 : vector<2x1x64xf32> to vector<2x8x64xf32>
    %401 = arith.mulf %400, %345 : vector<2x8x64xf32>
    %cst_107 = arith.constant dense<0.000000e+00> : vector<2x8xf32>
    %402 = vector.multi_reduction <add>, %401, %cst_107 [2] : vector<2x8x64xf32> to vector<2x8xf32>
    %cst_108 = arith.constant dense<0.000000e+00> : vector<2xf32>
    %403 = vector.multi_reduction <add>, %402, %cst_108 [1] : vector<2x8xf32> to vector<2xf32>
    %404 = vector.shape_cast %403 : vector<2xf32> to vector<2x1xf32>
    %cst_109 = arith.constant 8.000000e+00 : f32
    %405 = vector.broadcast %cst_109 : f32 to vector<2x1xf32>
    %406 = arith.divf %404, %405 : vector<2x1xf32>
    %407 = arith.mulf %402, %402 : vector<2x8xf32>
    %cst_110 = arith.constant dense<0.000000e+00> : vector<2xf32>
    %408 = vector.multi_reduction <add>, %407, %cst_110 [1] : vector<2x8xf32> to vector<2xf32>
    %409 = vector.shape_cast %408 : vector<2xf32> to vector<2x1xf32>
    %cst_111 = arith.constant 8.000000e+00 : f32
    %410 = vector.broadcast %cst_111 : f32 to vector<2x1xf32>
    %411 = arith.divf %409, %410 : vector<2x1xf32>
    %412 = arith.mulf %406, %406 : vector<2x1xf32>
    %413 = arith.subf %411, %412 : vector<2x1xf32>
    %414 = vector.broadcast %406 : vector<2x1xf32> to vector<2x8xf32>
    %415 = arith.subf %402, %414 : vector<2x8xf32>
    %cst_112 = arith.constant 9.99999974E-6 : f32
    %416 = vector.broadcast %cst_112 : f32 to vector<2x1xf32>
    %417 = arith.addf %413, %416 : vector<2x1xf32>
    %418 = math.rsqrt %417 : vector<2x1xf32>
    %419 = vector.broadcast %418 : vector<2x1xf32> to vector<2x8xf32>
    %420 = arith.mulf %415, %419 : vector<2x8xf32>
    %c3 = arith.constant 3 : index
    %c0_113 = arith.constant 0 : index
    %c0_114 = arith.constant 0 : index
    %421 = vector.load %arg0[%c3, %c0_113, %c0_114] : memref<8x2x128xf32, #tpu.memory_space<vmem>>, vector<1x2x128xf32>
    %422 = vector.shape_cast %421 : vector<1x2x128xf32> to vector<2x128xf32>
    %cst_115 = arith.constant dense<0.000000e+00> : vector<2x128xf32>
    %423 = tpu.matmul %301, %0, %cst_115 {dimension_numbers = #tpu.dot_dimension_numbers<[1], [0], [0], [1], [0, 0, 1, 1], [], []>} : vector<2x32xf32>, vector<32x128xf32>, vector<2x128xf32> -> vector<2x128xf32>
    %424 = arith.addf %422, %423 : vector<2x128xf32>
    %425 = arith.negf %424 : vector<2x128xf32>
    %426 = math.exp %425 : vector<2x128xf32>
    %cst_116 = arith.constant 1.000000e+00 : f32
    %427 = vector.broadcast %cst_116 : f32 to vector<2x128xf32>
    %428 = arith.addf %427, %426 : vector<2x128xf32>
    %429 = arith.divf %427, %428 : vector<2x128xf32>
    %430 = math.tanh %424 : vector<2x128xf32>
    %431 = vector.extract_strided_slice %429 {offsets = [0, 32], sizes = [2, 32], strides = [1, 1]} : vector<2x128xf32> to vector<2x32xf32>
    %432 = arith.mulf %431, %298 : vector<2x32xf32>
    %433 = vector.extract_strided_slice %429 {offsets = [0, 0], sizes = [2, 32], strides = [1, 1]} : vector<2x128xf32> to vector<2x32xf32>
    %434 = vector.extract_strided_slice %430 {offsets = [0, 64], sizes = [2, 32], strides = [1, 1]} : vector<2x128xf32> to vector<2x32xf32>
    %435 = arith.mulf %433, %434 : vector<2x32xf32>
    %436 = arith.addf %432, %435 : vector<2x32xf32>
    %437 = vector.extract_strided_slice %429 {offsets = [0, 96], sizes = [2, 32], strides = [1, 1]} : vector<2x128xf32> to vector<2x32xf32>
    %438 = math.tanh %436 : vector<2x32xf32>
    %439 = arith.mulf %437, %438 : vector<2x32xf32>
    %cst_117 = arith.constant dense<0.000000e+00> : vector<2x384xf32>
    %440 = tpu.matmul %439, %1, %cst_117 {dimension_numbers = #tpu.dot_dimension_numbers<[1], [0], [0], [1], [0, 0, 1, 1], [], []>} : vector<2x32xf32>, vector<32x384xf32>, vector<2x384xf32> -> vector<2x384xf32>
    %441 = vector.broadcast %2 : vector<1x384xf32> to vector<2x384xf32>
    %442 = arith.addf %440, %441 : vector<2x384xf32>
    %443 = math.tanh %442 : vector<2x384xf32>
    %444 = vector.extract_strided_slice %443 {offsets = [0, 0], sizes = [2, 64], strides = [1, 1]} : vector<2x384xf32> to vector<2x64xf32>
    %445 = vector.extract_strided_slice %443 {offsets = [0, 64], sizes = [2, 64], strides = [1, 1]} : vector<2x384xf32> to vector<2x64xf32>
    %446 = arith.mulf %444, %445 : vector<2x64xf32>
    %447 = vector.extract_strided_slice %443 {offsets = [0, 320], sizes = [2, 8], strides = [1, 1]} : vector<2x384xf32> to vector<2x8xf32>
    %448 = vector.extract_strided_slice %443 {offsets = [0, 328], sizes = [2, 8], strides = [1, 1]} : vector<2x384xf32> to vector<2x8xf32>
    %449 = vector.extract_strided_slice %442 {offsets = [0, 336], sizes = [2, 1], strides = [1, 1]} : vector<2x384xf32> to vector<2x1xf32>
    %450 = arith.negf %449 : vector<2x1xf32>
    %451 = math.exp %450 : vector<2x1xf32>
    %cst_118 = arith.constant 1.000000e+00 : f32
    %452 = vector.broadcast %cst_118 : f32 to vector<2x1xf32>
    %453 = arith.addf %452, %451 : vector<2x1xf32>
    %454 = arith.divf %452, %453 : vector<2x1xf32>
    %455 = vector.shape_cast %446 : vector<2x64xf32> to vector<2x1x64xf32>
    %456 = vector.broadcast %455 : vector<2x1x64xf32> to vector<2x8x64xf32>
    %457 = arith.mulf %456, %345 : vector<2x8x64xf32>
    %cst_119 = arith.constant dense<0.000000e+00> : vector<2x8xf32>
    %458 = vector.multi_reduction <add>, %457, %cst_119 [2] : vector<2x8x64xf32> to vector<2x8xf32>
    %459 = vector.shape_cast %458 : vector<2x8xf32> to vector<2x8x1xf32>
    %460 = vector.shape_cast %454 : vector<2x1xf32> to vector<2x1x1xf32>
    %461 = vector.shape_cast %447 : vector<2x8xf32> to vector<2x8x1xf32>
    %462 = arith.subf %461, %459 : vector<2x8x1xf32>
    %463 = vector.broadcast %460 : vector<2x1x1xf32> to vector<2x8x1xf32>
    %464 = arith.mulf %463, %462 : vector<2x8x1xf32>
    %465 = vector.broadcast %455 : vector<2x1x64xf32> to vector<2x8x64xf32>
    %466 = vector.broadcast %464 : vector<2x8x1xf32> to vector<2x8x64xf32>
    %467 = arith.mulf %465, %466 : vector<2x8x64xf32>
    %468 = arith.addf %345, %467 : vector<2x8x64xf32>
    %469 = arith.mulf %468, %468 : vector<2x8x64xf32>
    %cst_120 = arith.constant dense<0.000000e+00> : vector<2x8xf32>
    %470 = vector.multi_reduction <add>, %469, %cst_120 [2] : vector<2x8x64xf32> to vector<2x8xf32>
    %471 = vector.shape_cast %470 : vector<2x8xf32> to vector<2x8x1xf32>
    %cst_121 = arith.constant dense<0.000000e+00> : vector<2x1xf32>
    %472 = vector.multi_reduction <add>, %471, %cst_121 [1] : vector<2x8x1xf32> to vector<2x1xf32>
    %473 = vector.shape_cast %472 : vector<2x1xf32> to vector<2x1x1xf32>
    %474 = math.sqrt %473 : vector<2x1x1xf32>
    %cst_122 = arith.constant 1.000000e+00 : f32
    %475 = vector.broadcast %cst_122 : f32 to vector<2x1x1xf32>
    %476 = arith.subf %474, %475 : vector<2x1x1xf32>
    %cst_123 = arith.constant 0.000000e+00 : f32
    %477 = vector.broadcast %cst_123 : f32 to vector<2x1x1xf32>
    %478 = arith.maximumf %476, %477 : vector<2x1x1xf32>
    %cst_124 = arith.constant 1.000000e+00 : f32
    %479 = vector.broadcast %cst_124 : f32 to vector<2x1x1xf32>
    %480 = arith.addf %478, %479 : vector<2x1x1xf32>
    %481 = tpu.reciprocal %480 {approx = true} : vector<2x1x1xf32> -> vector<2x1x1xf32>
    %482 = vector.broadcast %481 : vector<2x1x1xf32> to vector<2x8x64xf32>
    %483 = arith.mulf %468, %482 : vector<2x8x64xf32>
    %484 = vector.extract_strided_slice %443 {offsets = [0, 128], sizes = [2, 64], strides = [1, 1]} : vector<2x384xf32> to vector<2x64xf32>
    %cst_125 = arith.constant dense<0.000000e+00> : vector<2x64xf32>
    %485 = tpu.matmul %448, %3, %cst_125 {dimension_numbers = #tpu.dot_dimension_numbers<[1], [0], [0], [1], [0, 0, 1, 1], [], []>} : vector<2x8xf32>, vector<8x64xf32>, vector<2x64xf32> -> vector<2x64xf32>
    %486 = arith.mulf %485, %484 : vector<2x64xf32>
    %487 = vector.shape_cast %486 : vector<2x64xf32> to vector<2x1x64xf32>
    %488 = vector.broadcast %487 : vector<2x1x64xf32> to vector<2x8x64xf32>
    %489 = arith.mulf %488, %483 : vector<2x8x64xf32>
    %cst_126 = arith.constant dense<0.000000e+00> : vector<2x8xf32>
    %490 = vector.multi_reduction <add>, %489, %cst_126 [2] : vector<2x8x64xf32> to vector<2x8xf32>
    %cst_127 = arith.constant dense<0.000000e+00> : vector<2xf32>
    %491 = vector.multi_reduction <add>, %490, %cst_127 [1] : vector<2x8xf32> to vector<2xf32>
    %492 = vector.shape_cast %491 : vector<2xf32> to vector<2x1xf32>
    %cst_128 = arith.constant 8.000000e+00 : f32
    %493 = vector.broadcast %cst_128 : f32 to vector<2x1xf32>
    %494 = arith.divf %492, %493 : vector<2x1xf32>
    %495 = arith.mulf %490, %490 : vector<2x8xf32>
    %cst_129 = arith.constant dense<0.000000e+00> : vector<2xf32>
    %496 = vector.multi_reduction <add>, %495, %cst_129 [1] : vector<2x8xf32> to vector<2xf32>
    %497 = vector.shape_cast %496 : vector<2xf32> to vector<2x1xf32>
    %cst_130 = arith.constant 8.000000e+00 : f32
    %498 = vector.broadcast %cst_130 : f32 to vector<2x1xf32>
    %499 = arith.divf %497, %498 : vector<2x1xf32>
    %500 = arith.mulf %494, %494 : vector<2x1xf32>
    %501 = arith.subf %499, %500 : vector<2x1xf32>
    %502 = vector.broadcast %494 : vector<2x1xf32> to vector<2x8xf32>
    %503 = arith.subf %490, %502 : vector<2x8xf32>
    %cst_131 = arith.constant 9.99999974E-6 : f32
    %504 = vector.broadcast %cst_131 : f32 to vector<2x1xf32>
    %505 = arith.addf %501, %504 : vector<2x1xf32>
    %506 = math.rsqrt %505 : vector<2x1xf32>
    %507 = vector.broadcast %506 : vector<2x1xf32> to vector<2x8xf32>
    %508 = arith.mulf %503, %507 : vector<2x8xf32>
    %509 = vector.extract_strided_slice %443 {offsets = [0, 192], sizes = [2, 64], strides = [1, 1]} : vector<2x384xf32> to vector<2x64xf32>
    %cst_132 = arith.constant dense<0.000000e+00> : vector<2x64xf32>
    %510 = tpu.matmul %508, %3, %cst_132 {dimension_numbers = #tpu.dot_dimension_numbers<[1], [0], [0], [1], [0, 0, 1, 1], [], []>} : vector<2x8xf32>, vector<8x64xf32>, vector<2x64xf32> -> vector<2x64xf32>
    %511 = arith.mulf %510, %509 : vector<2x64xf32>
    %512 = vector.shape_cast %511 : vector<2x64xf32> to vector<2x1x64xf32>
    %513 = vector.broadcast %512 : vector<2x1x64xf32> to vector<2x8x64xf32>
    %514 = arith.mulf %513, %483 : vector<2x8x64xf32>
    %cst_133 = arith.constant dense<0.000000e+00> : vector<2x8xf32>
    %515 = vector.multi_reduction <add>, %514, %cst_133 [2] : vector<2x8x64xf32> to vector<2x8xf32>
    %cst_134 = arith.constant dense<0.000000e+00> : vector<2xf32>
    %516 = vector.multi_reduction <add>, %515, %cst_134 [1] : vector<2x8xf32> to vector<2xf32>
    %517 = vector.shape_cast %516 : vector<2xf32> to vector<2x1xf32>
    %cst_135 = arith.constant 8.000000e+00 : f32
    %518 = vector.broadcast %cst_135 : f32 to vector<2x1xf32>
    %519 = arith.divf %517, %518 : vector<2x1xf32>
    %520 = arith.mulf %515, %515 : vector<2x8xf32>
    %cst_136 = arith.constant dense<0.000000e+00> : vector<2xf32>
    %521 = vector.multi_reduction <add>, %520, %cst_136 [1] : vector<2x8xf32> to vector<2xf32>
    %522 = vector.shape_cast %521 : vector<2xf32> to vector<2x1xf32>
    %cst_137 = arith.constant 8.000000e+00 : f32
    %523 = vector.broadcast %cst_137 : f32 to vector<2x1xf32>
    %524 = arith.divf %522, %523 : vector<2x1xf32>
    %525 = arith.mulf %519, %519 : vector<2x1xf32>
    %526 = arith.subf %524, %525 : vector<2x1xf32>
    %527 = vector.broadcast %519 : vector<2x1xf32> to vector<2x8xf32>
    %528 = arith.subf %515, %527 : vector<2x8xf32>
    %cst_138 = arith.constant 9.99999974E-6 : f32
    %529 = vector.broadcast %cst_138 : f32 to vector<2x1xf32>
    %530 = arith.addf %526, %529 : vector<2x1xf32>
    %531 = math.rsqrt %530 : vector<2x1xf32>
    %532 = vector.broadcast %531 : vector<2x1xf32> to vector<2x8xf32>
    %533 = arith.mulf %528, %532 : vector<2x8xf32>
    %534 = vector.extract_strided_slice %443 {offsets = [0, 256], sizes = [2, 64], strides = [1, 1]} : vector<2x384xf32> to vector<2x64xf32>
    %cst_139 = arith.constant dense<0.000000e+00> : vector<2x64xf32>
    %535 = tpu.matmul %533, %3, %cst_139 {dimension_numbers = #tpu.dot_dimension_numbers<[1], [0], [0], [1], [0, 0, 1, 1], [], []>} : vector<2x8xf32>, vector<8x64xf32>, vector<2x64xf32> -> vector<2x64xf32>
    %536 = arith.mulf %535, %534 : vector<2x64xf32>
    %537 = vector.shape_cast %536 : vector<2x64xf32> to vector<2x1x64xf32>
    %538 = vector.broadcast %537 : vector<2x1x64xf32> to vector<2x8x64xf32>
    %539 = arith.mulf %538, %483 : vector<2x8x64xf32>
    %cst_140 = arith.constant dense<0.000000e+00> : vector<2x8xf32>
    %540 = vector.multi_reduction <add>, %539, %cst_140 [2] : vector<2x8x64xf32> to vector<2x8xf32>
    %cst_141 = arith.constant dense<0.000000e+00> : vector<2xf32>
    %541 = vector.multi_reduction <add>, %540, %cst_141 [1] : vector<2x8xf32> to vector<2xf32>
    %542 = vector.shape_cast %541 : vector<2xf32> to vector<2x1xf32>
    %cst_142 = arith.constant 8.000000e+00 : f32
    %543 = vector.broadcast %cst_142 : f32 to vector<2x1xf32>
    %544 = arith.divf %542, %543 : vector<2x1xf32>
    %545 = arith.mulf %540, %540 : vector<2x8xf32>
    %cst_143 = arith.constant dense<0.000000e+00> : vector<2xf32>
    %546 = vector.multi_reduction <add>, %545, %cst_143 [1] : vector<2x8xf32> to vector<2xf32>
    %547 = vector.shape_cast %546 : vector<2xf32> to vector<2x1xf32>
    %cst_144 = arith.constant 8.000000e+00 : f32
    %548 = vector.broadcast %cst_144 : f32 to vector<2x1xf32>
    %549 = arith.divf %547, %548 : vector<2x1xf32>
    %550 = arith.mulf %544, %544 : vector<2x1xf32>
    %551 = arith.subf %549, %550 : vector<2x1xf32>
    %552 = vector.broadcast %544 : vector<2x1xf32> to vector<2x8xf32>
    %553 = arith.subf %540, %552 : vector<2x8xf32>
    %cst_145 = arith.constant 9.99999974E-6 : f32
    %554 = vector.broadcast %cst_145 : f32 to vector<2x1xf32>
    %555 = arith.addf %551, %554 : vector<2x1xf32>
    %556 = math.rsqrt %555 : vector<2x1xf32>
    %557 = vector.broadcast %556 : vector<2x1xf32> to vector<2x8xf32>
    %558 = arith.mulf %553, %557 : vector<2x8xf32>
    %c4 = arith.constant 4 : index
    %c0_146 = arith.constant 0 : index
    %c0_147 = arith.constant 0 : index
    %559 = vector.load %arg0[%c4, %c0_146, %c0_147] : memref<8x2x128xf32, #tpu.memory_space<vmem>>, vector<1x2x128xf32>
    %560 = vector.shape_cast %559 : vector<1x2x128xf32> to vector<2x128xf32>
    %cst_148 = arith.constant dense<0.000000e+00> : vector<2x128xf32>
    %561 = tpu.matmul %439, %0, %cst_148 {dimension_numbers = #tpu.dot_dimension_numbers<[1], [0], [0], [1], [0, 0, 1, 1], [], []>} : vector<2x32xf32>, vector<32x128xf32>, vector<2x128xf32> -> vector<2x128xf32>
    %562 = arith.addf %560, %561 : vector<2x128xf32>
    %563 = arith.negf %562 : vector<2x128xf32>
    %564 = math.exp %563 : vector<2x128xf32>
    %cst_149 = arith.constant 1.000000e+00 : f32
    %565 = vector.broadcast %cst_149 : f32 to vector<2x128xf32>
    %566 = arith.addf %565, %564 : vector<2x128xf32>
    %567 = arith.divf %565, %566 : vector<2x128xf32>
    %568 = math.tanh %562 : vector<2x128xf32>
    %569 = vector.extract_strided_slice %567 {offsets = [0, 32], sizes = [2, 32], strides = [1, 1]} : vector<2x128xf32> to vector<2x32xf32>
    %570 = arith.mulf %569, %436 : vector<2x32xf32>
    %571 = vector.extract_strided_slice %567 {offsets = [0, 0], sizes = [2, 32], strides = [1, 1]} : vector<2x128xf32> to vector<2x32xf32>
    %572 = vector.extract_strided_slice %568 {offsets = [0, 64], sizes = [2, 32], strides = [1, 1]} : vector<2x128xf32> to vector<2x32xf32>
    %573 = arith.mulf %571, %572 : vector<2x32xf32>
    %574 = arith.addf %570, %573 : vector<2x32xf32>
    %575 = vector.extract_strided_slice %567 {offsets = [0, 96], sizes = [2, 32], strides = [1, 1]} : vector<2x128xf32> to vector<2x32xf32>
    %576 = math.tanh %574 : vector<2x32xf32>
    %577 = arith.mulf %575, %576 : vector<2x32xf32>
    %cst_150 = arith.constant dense<0.000000e+00> : vector<2x384xf32>
    %578 = tpu.matmul %577, %1, %cst_150 {dimension_numbers = #tpu.dot_dimension_numbers<[1], [0], [0], [1], [0, 0, 1, 1], [], []>} : vector<2x32xf32>, vector<32x384xf32>, vector<2x384xf32> -> vector<2x384xf32>
    %579 = vector.broadcast %2 : vector<1x384xf32> to vector<2x384xf32>
    %580 = arith.addf %578, %579 : vector<2x384xf32>
    %581 = math.tanh %580 : vector<2x384xf32>
    %582 = vector.extract_strided_slice %581 {offsets = [0, 0], sizes = [2, 64], strides = [1, 1]} : vector<2x384xf32> to vector<2x64xf32>
    %583 = vector.extract_strided_slice %581 {offsets = [0, 64], sizes = [2, 64], strides = [1, 1]} : vector<2x384xf32> to vector<2x64xf32>
    %584 = arith.mulf %582, %583 : vector<2x64xf32>
    %585 = vector.extract_strided_slice %581 {offsets = [0, 320], sizes = [2, 8], strides = [1, 1]} : vector<2x384xf32> to vector<2x8xf32>
    %586 = vector.extract_strided_slice %581 {offsets = [0, 328], sizes = [2, 8], strides = [1, 1]} : vector<2x384xf32> to vector<2x8xf32>
    %587 = vector.extract_strided_slice %580 {offsets = [0, 336], sizes = [2, 1], strides = [1, 1]} : vector<2x384xf32> to vector<2x1xf32>
    %588 = arith.negf %587 : vector<2x1xf32>
    %589 = math.exp %588 : vector<2x1xf32>
    %cst_151 = arith.constant 1.000000e+00 : f32
    %590 = vector.broadcast %cst_151 : f32 to vector<2x1xf32>
    %591 = arith.addf %590, %589 : vector<2x1xf32>
    %592 = arith.divf %590, %591 : vector<2x1xf32>
    %593 = vector.shape_cast %584 : vector<2x64xf32> to vector<2x1x64xf32>
    %594 = vector.broadcast %593 : vector<2x1x64xf32> to vector<2x8x64xf32>
    %595 = arith.mulf %594, %483 : vector<2x8x64xf32>
    %cst_152 = arith.constant dense<0.000000e+00> : vector<2x8xf32>
    %596 = vector.multi_reduction <add>, %595, %cst_152 [2] : vector<2x8x64xf32> to vector<2x8xf32>
    %597 = vector.shape_cast %596 : vector<2x8xf32> to vector<2x8x1xf32>
    %598 = vector.shape_cast %592 : vector<2x1xf32> to vector<2x1x1xf32>
    %599 = vector.shape_cast %585 : vector<2x8xf32> to vector<2x8x1xf32>
    %600 = arith.subf %599, %597 : vector<2x8x1xf32>
    %601 = vector.broadcast %598 : vector<2x1x1xf32> to vector<2x8x1xf32>
    %602 = arith.mulf %601, %600 : vector<2x8x1xf32>
    %603 = vector.broadcast %593 : vector<2x1x64xf32> to vector<2x8x64xf32>
    %604 = vector.broadcast %602 : vector<2x8x1xf32> to vector<2x8x64xf32>
    %605 = arith.mulf %603, %604 : vector<2x8x64xf32>
    %606 = arith.addf %483, %605 : vector<2x8x64xf32>
    %607 = arith.mulf %606, %606 : vector<2x8x64xf32>
    %cst_153 = arith.constant dense<0.000000e+00> : vector<2x8xf32>
    %608 = vector.multi_reduction <add>, %607, %cst_153 [2] : vector<2x8x64xf32> to vector<2x8xf32>
    %609 = vector.shape_cast %608 : vector<2x8xf32> to vector<2x8x1xf32>
    %cst_154 = arith.constant dense<0.000000e+00> : vector<2x1xf32>
    %610 = vector.multi_reduction <add>, %609, %cst_154 [1] : vector<2x8x1xf32> to vector<2x1xf32>
    %611 = vector.shape_cast %610 : vector<2x1xf32> to vector<2x1x1xf32>
    %612 = math.sqrt %611 : vector<2x1x1xf32>
    %cst_155 = arith.constant 1.000000e+00 : f32
    %613 = vector.broadcast %cst_155 : f32 to vector<2x1x1xf32>
    %614 = arith.subf %612, %613 : vector<2x1x1xf32>
    %cst_156 = arith.constant 0.000000e+00 : f32
    %615 = vector.broadcast %cst_156 : f32 to vector<2x1x1xf32>
    %616 = arith.maximumf %614, %615 : vector<2x1x1xf32>
    %cst_157 = arith.constant 1.000000e+00 : f32
    %617 = vector.broadcast %cst_157 : f32 to vector<2x1x1xf32>
    %618 = arith.addf %616, %617 : vector<2x1x1xf32>
    %619 = tpu.reciprocal %618 {approx = true} : vector<2x1x1xf32> -> vector<2x1x1xf32>
    %620 = vector.broadcast %619 : vector<2x1x1xf32> to vector<2x8x64xf32>
    %621 = arith.mulf %606, %620 : vector<2x8x64xf32>
    %622 = vector.extract_strided_slice %581 {offsets = [0, 128], sizes = [2, 64], strides = [1, 1]} : vector<2x384xf32> to vector<2x64xf32>
    %cst_158 = arith.constant dense<0.000000e+00> : vector<2x64xf32>
    %623 = tpu.matmul %586, %3, %cst_158 {dimension_numbers = #tpu.dot_dimension_numbers<[1], [0], [0], [1], [0, 0, 1, 1], [], []>} : vector<2x8xf32>, vector<8x64xf32>, vector<2x64xf32> -> vector<2x64xf32>
    %624 = arith.mulf %623, %622 : vector<2x64xf32>
    %625 = vector.shape_cast %624 : vector<2x64xf32> to vector<2x1x64xf32>
    %626 = vector.broadcast %625 : vector<2x1x64xf32> to vector<2x8x64xf32>
    %627 = arith.mulf %626, %621 : vector<2x8x64xf32>
    %cst_159 = arith.constant dense<0.000000e+00> : vector<2x8xf32>
    %628 = vector.multi_reduction <add>, %627, %cst_159 [2] : vector<2x8x64xf32> to vector<2x8xf32>
    %cst_160 = arith.constant dense<0.000000e+00> : vector<2xf32>
    %629 = vector.multi_reduction <add>, %628, %cst_160 [1] : vector<2x8xf32> to vector<2xf32>
    %630 = vector.shape_cast %629 : vector<2xf32> to vector<2x1xf32>
    %cst_161 = arith.constant 8.000000e+00 : f32
    %631 = vector.broadcast %cst_161 : f32 to vector<2x1xf32>
    %632 = arith.divf %630, %631 : vector<2x1xf32>
    %633 = arith.mulf %628, %628 : vector<2x8xf32>
    %cst_162 = arith.constant dense<0.000000e+00> : vector<2xf32>
    %634 = vector.multi_reduction <add>, %633, %cst_162 [1] : vector<2x8xf32> to vector<2xf32>
    %635 = vector.shape_cast %634 : vector<2xf32> to vector<2x1xf32>
    %cst_163 = arith.constant 8.000000e+00 : f32
    %636 = vector.broadcast %cst_163 : f32 to vector<2x1xf32>
    %637 = arith.divf %635, %636 : vector<2x1xf32>
    %638 = arith.mulf %632, %632 : vector<2x1xf32>
    %639 = arith.subf %637, %638 : vector<2x1xf32>
    %640 = vector.broadcast %632 : vector<2x1xf32> to vector<2x8xf32>
    %641 = arith.subf %628, %640 : vector<2x8xf32>
    %cst_164 = arith.constant 9.99999974E-6 : f32
    %642 = vector.broadcast %cst_164 : f32 to vector<2x1xf32>
    %643 = arith.addf %639, %642 : vector<2x1xf32>
    %644 = math.rsqrt %643 : vector<2x1xf32>
    %645 = vector.broadcast %644 : vector<2x1xf32> to vector<2x8xf32>
    %646 = arith.mulf %641, %645 : vector<2x8xf32>
    %647 = vector.extract_strided_slice %581 {offsets = [0, 192], sizes = [2, 64], strides = [1, 1]} : vector<2x384xf32> to vector<2x64xf32>
    %cst_165 = arith.constant dense<0.000000e+00> : vector<2x64xf32>
    %648 = tpu.matmul %646, %3, %cst_165 {dimension_numbers = #tpu.dot_dimension_numbers<[1], [0], [0], [1], [0, 0, 1, 1], [], []>} : vector<2x8xf32>, vector<8x64xf32>, vector<2x64xf32> -> vector<2x64xf32>
    %649 = arith.mulf %648, %647 : vector<2x64xf32>
    %650 = vector.shape_cast %649 : vector<2x64xf32> to vector<2x1x64xf32>
    %651 = vector.broadcast %650 : vector<2x1x64xf32> to vector<2x8x64xf32>
    %652 = arith.mulf %651, %621 : vector<2x8x64xf32>
    %cst_166 = arith.constant dense<0.000000e+00> : vector<2x8xf32>
    %653 = vector.multi_reduction <add>, %652, %cst_166 [2] : vector<2x8x64xf32> to vector<2x8xf32>
    %cst_167 = arith.constant dense<0.000000e+00> : vector<2xf32>
    %654 = vector.multi_reduction <add>, %653, %cst_167 [1] : vector<2x8xf32> to vector<2xf32>
    %655 = vector.shape_cast %654 : vector<2xf32> to vector<2x1xf32>
    %cst_168 = arith.constant 8.000000e+00 : f32
    %656 = vector.broadcast %cst_168 : f32 to vector<2x1xf32>
    %657 = arith.divf %655, %656 : vector<2x1xf32>
    %658 = arith.mulf %653, %653 : vector<2x8xf32>
    %cst_169 = arith.constant dense<0.000000e+00> : vector<2xf32>
    %659 = vector.multi_reduction <add>, %658, %cst_169 [1] : vector<2x8xf32> to vector<2xf32>
    %660 = vector.shape_cast %659 : vector<2xf32> to vector<2x1xf32>
    %cst_170 = arith.constant 8.000000e+00 : f32
    %661 = vector.broadcast %cst_170 : f32 to vector<2x1xf32>
    %662 = arith.divf %660, %661 : vector<2x1xf32>
    %663 = arith.mulf %657, %657 : vector<2x1xf32>
    %664 = arith.subf %662, %663 : vector<2x1xf32>
    %665 = vector.broadcast %657 : vector<2x1xf32> to vector<2x8xf32>
    %666 = arith.subf %653, %665 : vector<2x8xf32>
    %cst_171 = arith.constant 9.99999974E-6 : f32
    %667 = vector.broadcast %cst_171 : f32 to vector<2x1xf32>
    %668 = arith.addf %664, %667 : vector<2x1xf32>
    %669 = math.rsqrt %668 : vector<2x1xf32>
    %670 = vector.broadcast %669 : vector<2x1xf32> to vector<2x8xf32>
    %671 = arith.mulf %666, %670 : vector<2x8xf32>
    %672 = vector.extract_strided_slice %581 {offsets = [0, 256], sizes = [2, 64], strides = [1, 1]} : vector<2x384xf32> to vector<2x64xf32>
    %cst_172 = arith.constant dense<0.000000e+00> : vector<2x64xf32>
    %673 = tpu.matmul %671, %3, %cst_172 {dimension_numbers = #tpu.dot_dimension_numbers<[1], [0], [0], [1], [0, 0, 1, 1], [], []>} : vector<2x8xf32>, vector<8x64xf32>, vector<2x64xf32> -> vector<2x64xf32>
    %674 = arith.mulf %673, %672 : vector<2x64xf32>
    %675 = vector.shape_cast %674 : vector<2x64xf32> to vector<2x1x64xf32>
    %676 = vector.broadcast %675 : vector<2x1x64xf32> to vector<2x8x64xf32>
    %677 = arith.mulf %676, %621 : vector<2x8x64xf32>
    %cst_173 = arith.constant dense<0.000000e+00> : vector<2x8xf32>
    %678 = vector.multi_reduction <add>, %677, %cst_173 [2] : vector<2x8x64xf32> to vector<2x8xf32>
    %cst_174 = arith.constant dense<0.000000e+00> : vector<2xf32>
    %679 = vector.multi_reduction <add>, %678, %cst_174 [1] : vector<2x8xf32> to vector<2xf32>
    %680 = vector.shape_cast %679 : vector<2xf32> to vector<2x1xf32>
    %cst_175 = arith.constant 8.000000e+00 : f32
    %681 = vector.broadcast %cst_175 : f32 to vector<2x1xf32>
    %682 = arith.divf %680, %681 : vector<2x1xf32>
    %683 = arith.mulf %678, %678 : vector<2x8xf32>
    %cst_176 = arith.constant dense<0.000000e+00> : vector<2xf32>
    %684 = vector.multi_reduction <add>, %683, %cst_176 [1] : vector<2x8xf32> to vector<2xf32>
    %685 = vector.shape_cast %684 : vector<2xf32> to vector<2x1xf32>
    %cst_177 = arith.constant 8.000000e+00 : f32
    %686 = vector.broadcast %cst_177 : f32 to vector<2x1xf32>
    %687 = arith.divf %685, %686 : vector<2x1xf32>
    %688 = arith.mulf %682, %682 : vector<2x1xf32>
    %689 = arith.subf %687, %688 : vector<2x1xf32>
    %690 = vector.broadcast %682 : vector<2x1xf32> to vector<2x8xf32>
    %691 = arith.subf %678, %690 : vector<2x8xf32>
    %cst_178 = arith.constant 9.99999974E-6 : f32
    %692 = vector.broadcast %cst_178 : f32 to vector<2x1xf32>
    %693 = arith.addf %689, %692 : vector<2x1xf32>
    %694 = math.rsqrt %693 : vector<2x1xf32>
    %695 = vector.broadcast %694 : vector<2x1xf32> to vector<2x8xf32>
    %696 = arith.mulf %691, %695 : vector<2x8xf32>
    %c5 = arith.constant 5 : index
    %c0_179 = arith.constant 0 : index
    %c0_180 = arith.constant 0 : index
    %697 = vector.load %arg0[%c5, %c0_179, %c0_180] : memref<8x2x128xf32, #tpu.memory_space<vmem>>, vector<1x2x128xf32>
    %698 = vector.shape_cast %697 : vector<1x2x128xf32> to vector<2x128xf32>
    %cst_181 = arith.constant dense<0.000000e+00> : vector<2x128xf32>
    %699 = tpu.matmul %577, %0, %cst_181 {dimension_numbers = #tpu.dot_dimension_numbers<[1], [0], [0], [1], [0, 0, 1, 1], [], []>} : vector<2x32xf32>, vector<32x128xf32>, vector<2x128xf32> -> vector<2x128xf32>
    %700 = arith.addf %698, %699 : vector<2x128xf32>
    %701 = arith.negf %700 : vector<2x128xf32>
    %702 = math.exp %701 : vector<2x128xf32>
    %cst_182 = arith.constant 1.000000e+00 : f32
    %703 = vector.broadcast %cst_182 : f32 to vector<2x128xf32>
    %704 = arith.addf %703, %702 : vector<2x128xf32>
    %705 = arith.divf %703, %704 : vector<2x128xf32>
    %706 = math.tanh %700 : vector<2x128xf32>
    %707 = vector.extract_strided_slice %705 {offsets = [0, 32], sizes = [2, 32], strides = [1, 1]} : vector<2x128xf32> to vector<2x32xf32>
    %708 = arith.mulf %707, %574 : vector<2x32xf32>
    %709 = vector.extract_strided_slice %705 {offsets = [0, 0], sizes = [2, 32], strides = [1, 1]} : vector<2x128xf32> to vector<2x32xf32>
    %710 = vector.extract_strided_slice %706 {offsets = [0, 64], sizes = [2, 32], strides = [1, 1]} : vector<2x128xf32> to vector<2x32xf32>
    %711 = arith.mulf %709, %710 : vector<2x32xf32>
    %712 = arith.addf %708, %711 : vector<2x32xf32>
    %713 = vector.extract_strided_slice %705 {offsets = [0, 96], sizes = [2, 32], strides = [1, 1]} : vector<2x128xf32> to vector<2x32xf32>
    %714 = math.tanh %712 : vector<2x32xf32>
    %715 = arith.mulf %713, %714 : vector<2x32xf32>
    %cst_183 = arith.constant dense<0.000000e+00> : vector<2x384xf32>
    %716 = tpu.matmul %715, %1, %cst_183 {dimension_numbers = #tpu.dot_dimension_numbers<[1], [0], [0], [1], [0, 0, 1, 1], [], []>} : vector<2x32xf32>, vector<32x384xf32>, vector<2x384xf32> -> vector<2x384xf32>
    %717 = vector.broadcast %2 : vector<1x384xf32> to vector<2x384xf32>
    %718 = arith.addf %716, %717 : vector<2x384xf32>
    %719 = math.tanh %718 : vector<2x384xf32>
    %720 = vector.extract_strided_slice %719 {offsets = [0, 0], sizes = [2, 64], strides = [1, 1]} : vector<2x384xf32> to vector<2x64xf32>
    %721 = vector.extract_strided_slice %719 {offsets = [0, 64], sizes = [2, 64], strides = [1, 1]} : vector<2x384xf32> to vector<2x64xf32>
    %722 = arith.mulf %720, %721 : vector<2x64xf32>
    %723 = vector.extract_strided_slice %719 {offsets = [0, 320], sizes = [2, 8], strides = [1, 1]} : vector<2x384xf32> to vector<2x8xf32>
    %724 = vector.extract_strided_slice %719 {offsets = [0, 328], sizes = [2, 8], strides = [1, 1]} : vector<2x384xf32> to vector<2x8xf32>
    %725 = vector.extract_strided_slice %718 {offsets = [0, 336], sizes = [2, 1], strides = [1, 1]} : vector<2x384xf32> to vector<2x1xf32>
    %726 = arith.negf %725 : vector<2x1xf32>
    %727 = math.exp %726 : vector<2x1xf32>
    %cst_184 = arith.constant 1.000000e+00 : f32
    %728 = vector.broadcast %cst_184 : f32 to vector<2x1xf32>
    %729 = arith.addf %728, %727 : vector<2x1xf32>
    %730 = arith.divf %728, %729 : vector<2x1xf32>
    %731 = vector.shape_cast %722 : vector<2x64xf32> to vector<2x1x64xf32>
    %732 = vector.broadcast %731 : vector<2x1x64xf32> to vector<2x8x64xf32>
    %733 = arith.mulf %732, %621 : vector<2x8x64xf32>
    %cst_185 = arith.constant dense<0.000000e+00> : vector<2x8xf32>
    %734 = vector.multi_reduction <add>, %733, %cst_185 [2] : vector<2x8x64xf32> to vector<2x8xf32>
    %735 = vector.shape_cast %734 : vector<2x8xf32> to vector<2x8x1xf32>
    %736 = vector.shape_cast %730 : vector<2x1xf32> to vector<2x1x1xf32>
    %737 = vector.shape_cast %723 : vector<2x8xf32> to vector<2x8x1xf32>
    %738 = arith.subf %737, %735 : vector<2x8x1xf32>
    %739 = vector.broadcast %736 : vector<2x1x1xf32> to vector<2x8x1xf32>
    %740 = arith.mulf %739, %738 : vector<2x8x1xf32>
    %741 = vector.broadcast %731 : vector<2x1x64xf32> to vector<2x8x64xf32>
    %742 = vector.broadcast %740 : vector<2x8x1xf32> to vector<2x8x64xf32>
    %743 = arith.mulf %741, %742 : vector<2x8x64xf32>
    %744 = arith.addf %621, %743 : vector<2x8x64xf32>
    %745 = arith.mulf %744, %744 : vector<2x8x64xf32>
    %cst_186 = arith.constant dense<0.000000e+00> : vector<2x8xf32>
    %746 = vector.multi_reduction <add>, %745, %cst_186 [2] : vector<2x8x64xf32> to vector<2x8xf32>
    %747 = vector.shape_cast %746 : vector<2x8xf32> to vector<2x8x1xf32>
    %cst_187 = arith.constant dense<0.000000e+00> : vector<2x1xf32>
    %748 = vector.multi_reduction <add>, %747, %cst_187 [1] : vector<2x8x1xf32> to vector<2x1xf32>
    %749 = vector.shape_cast %748 : vector<2x1xf32> to vector<2x1x1xf32>
    %750 = math.sqrt %749 : vector<2x1x1xf32>
    %cst_188 = arith.constant 1.000000e+00 : f32
    %751 = vector.broadcast %cst_188 : f32 to vector<2x1x1xf32>
    %752 = arith.subf %750, %751 : vector<2x1x1xf32>
    %cst_189 = arith.constant 0.000000e+00 : f32
    %753 = vector.broadcast %cst_189 : f32 to vector<2x1x1xf32>
    %754 = arith.maximumf %752, %753 : vector<2x1x1xf32>
    %cst_190 = arith.constant 1.000000e+00 : f32
    %755 = vector.broadcast %cst_190 : f32 to vector<2x1x1xf32>
    %756 = arith.addf %754, %755 : vector<2x1x1xf32>
    %757 = tpu.reciprocal %756 {approx = true} : vector<2x1x1xf32> -> vector<2x1x1xf32>
    %758 = vector.broadcast %757 : vector<2x1x1xf32> to vector<2x8x64xf32>
    %759 = arith.mulf %744, %758 : vector<2x8x64xf32>
    %760 = vector.extract_strided_slice %719 {offsets = [0, 128], sizes = [2, 64], strides = [1, 1]} : vector<2x384xf32> to vector<2x64xf32>
    %cst_191 = arith.constant dense<0.000000e+00> : vector<2x64xf32>
    %761 = tpu.matmul %724, %3, %cst_191 {dimension_numbers = #tpu.dot_dimension_numbers<[1], [0], [0], [1], [0, 0, 1, 1], [], []>} : vector<2x8xf32>, vector<8x64xf32>, vector<2x64xf32> -> vector<2x64xf32>
    %762 = arith.mulf %761, %760 : vector<2x64xf32>
    %763 = vector.shape_cast %762 : vector<2x64xf32> to vector<2x1x64xf32>
    %764 = vector.broadcast %763 : vector<2x1x64xf32> to vector<2x8x64xf32>
    %765 = arith.mulf %764, %759 : vector<2x8x64xf32>
    %cst_192 = arith.constant dense<0.000000e+00> : vector<2x8xf32>
    %766 = vector.multi_reduction <add>, %765, %cst_192 [2] : vector<2x8x64xf32> to vector<2x8xf32>
    %cst_193 = arith.constant dense<0.000000e+00> : vector<2xf32>
    %767 = vector.multi_reduction <add>, %766, %cst_193 [1] : vector<2x8xf32> to vector<2xf32>
    %768 = vector.shape_cast %767 : vector<2xf32> to vector<2x1xf32>
    %cst_194 = arith.constant 8.000000e+00 : f32
    %769 = vector.broadcast %cst_194 : f32 to vector<2x1xf32>
    %770 = arith.divf %768, %769 : vector<2x1xf32>
    %771 = arith.mulf %766, %766 : vector<2x8xf32>
    %cst_195 = arith.constant dense<0.000000e+00> : vector<2xf32>
    %772 = vector.multi_reduction <add>, %771, %cst_195 [1] : vector<2x8xf32> to vector<2xf32>
    %773 = vector.shape_cast %772 : vector<2xf32> to vector<2x1xf32>
    %cst_196 = arith.constant 8.000000e+00 : f32
    %774 = vector.broadcast %cst_196 : f32 to vector<2x1xf32>
    %775 = arith.divf %773, %774 : vector<2x1xf32>
    %776 = arith.mulf %770, %770 : vector<2x1xf32>
    %777 = arith.subf %775, %776 : vector<2x1xf32>
    %778 = vector.broadcast %770 : vector<2x1xf32> to vector<2x8xf32>
    %779 = arith.subf %766, %778 : vector<2x8xf32>
    %cst_197 = arith.constant 9.99999974E-6 : f32
    %780 = vector.broadcast %cst_197 : f32 to vector<2x1xf32>
    %781 = arith.addf %777, %780 : vector<2x1xf32>
    %782 = math.rsqrt %781 : vector<2x1xf32>
    %783 = vector.broadcast %782 : vector<2x1xf32> to vector<2x8xf32>
    %784 = arith.mulf %779, %783 : vector<2x8xf32>
    %785 = vector.extract_strided_slice %719 {offsets = [0, 192], sizes = [2, 64], strides = [1, 1]} : vector<2x384xf32> to vector<2x64xf32>
    %cst_198 = arith.constant dense<0.000000e+00> : vector<2x64xf32>
    %786 = tpu.matmul %784, %3, %cst_198 {dimension_numbers = #tpu.dot_dimension_numbers<[1], [0], [0], [1], [0, 0, 1, 1], [], []>} : vector<2x8xf32>, vector<8x64xf32>, vector<2x64xf32> -> vector<2x64xf32>
    %787 = arith.mulf %786, %785 : vector<2x64xf32>
    %788 = vector.shape_cast %787 : vector<2x64xf32> to vector<2x1x64xf32>
    %789 = vector.broadcast %788 : vector<2x1x64xf32> to vector<2x8x64xf32>
    %790 = arith.mulf %789, %759 : vector<2x8x64xf32>
    %cst_199 = arith.constant dense<0.000000e+00> : vector<2x8xf32>
    %791 = vector.multi_reduction <add>, %790, %cst_199 [2] : vector<2x8x64xf32> to vector<2x8xf32>
    %cst_200 = arith.constant dense<0.000000e+00> : vector<2xf32>
    %792 = vector.multi_reduction <add>, %791, %cst_200 [1] : vector<2x8xf32> to vector<2xf32>
    %793 = vector.shape_cast %792 : vector<2xf32> to vector<2x1xf32>
    %cst_201 = arith.constant 8.000000e+00 : f32
    %794 = vector.broadcast %cst_201 : f32 to vector<2x1xf32>
    %795 = arith.divf %793, %794 : vector<2x1xf32>
    %796 = arith.mulf %791, %791 : vector<2x8xf32>
    %cst_202 = arith.constant dense<0.000000e+00> : vector<2xf32>
    %797 = vector.multi_reduction <add>, %796, %cst_202 [1] : vector<2x8xf32> to vector<2xf32>
    %798 = vector.shape_cast %797 : vector<2xf32> to vector<2x1xf32>
    %cst_203 = arith.constant 8.000000e+00 : f32
    %799 = vector.broadcast %cst_203 : f32 to vector<2x1xf32>
    %800 = arith.divf %798, %799 : vector<2x1xf32>
    %801 = arith.mulf %795, %795 : vector<2x1xf32>
    %802 = arith.subf %800, %801 : vector<2x1xf32>
    %803 = vector.broadcast %795 : vector<2x1xf32> to vector<2x8xf32>
    %804 = arith.subf %791, %803 : vector<2x8xf32>
    %cst_204 = arith.constant 9.99999974E-6 : f32
    %805 = vector.broadcast %cst_204 : f32 to vector<2x1xf32>
    %806 = arith.addf %802, %805 : vector<2x1xf32>
    %807 = math.rsqrt %806 : vector<2x1xf32>
    %808 = vector.broadcast %807 : vector<2x1xf32> to vector<2x8xf32>
    %809 = arith.mulf %804, %808 : vector<2x8xf32>
    %810 = vector.extract_strided_slice %719 {offsets = [0, 256], sizes = [2, 64], strides = [1, 1]} : vector<2x384xf32> to vector<2x64xf32>
    %cst_205 = arith.constant dense<0.000000e+00> : vector<2x64xf32>
    %811 = tpu.matmul %809, %3, %cst_205 {dimension_numbers = #tpu.dot_dimension_numbers<[1], [0], [0], [1], [0, 0, 1, 1], [], []>} : vector<2x8xf32>, vector<8x64xf32>, vector<2x64xf32> -> vector<2x64xf32>
    %812 = arith.mulf %811, %810 : vector<2x64xf32>
    %813 = vector.shape_cast %812 : vector<2x64xf32> to vector<2x1x64xf32>
    %814 = vector.broadcast %813 : vector<2x1x64xf32> to vector<2x8x64xf32>
    %815 = arith.mulf %814, %759 : vector<2x8x64xf32>
    %cst_206 = arith.constant dense<0.000000e+00> : vector<2x8xf32>
    %816 = vector.multi_reduction <add>, %815, %cst_206 [2] : vector<2x8x64xf32> to vector<2x8xf32>
    %cst_207 = arith.constant dense<0.000000e+00> : vector<2xf32>
    %817 = vector.multi_reduction <add>, %816, %cst_207 [1] : vector<2x8xf32> to vector<2xf32>
    %818 = vector.shape_cast %817 : vector<2xf32> to vector<2x1xf32>
    %cst_208 = arith.constant 8.000000e+00 : f32
    %819 = vector.broadcast %cst_208 : f32 to vector<2x1xf32>
    %820 = arith.divf %818, %819 : vector<2x1xf32>
    %821 = arith.mulf %816, %816 : vector<2x8xf32>
    %cst_209 = arith.constant dense<0.000000e+00> : vector<2xf32>
    %822 = vector.multi_reduction <add>, %821, %cst_209 [1] : vector<2x8xf32> to vector<2xf32>
    %823 = vector.shape_cast %822 : vector<2xf32> to vector<2x1xf32>
    %cst_210 = arith.constant 8.000000e+00 : f32
    %824 = vector.broadcast %cst_210 : f32 to vector<2x1xf32>
    %825 = arith.divf %823, %824 : vector<2x1xf32>
    %826 = arith.mulf %820, %820 : vector<2x1xf32>
    %827 = arith.subf %825, %826 : vector<2x1xf32>
    %828 = vector.broadcast %820 : vector<2x1xf32> to vector<2x8xf32>
    %829 = arith.subf %816, %828 : vector<2x8xf32>
    %cst_211 = arith.constant 9.99999974E-6 : f32
    %830 = vector.broadcast %cst_211 : f32 to vector<2x1xf32>
    %831 = arith.addf %827, %830 : vector<2x1xf32>
    %832 = math.rsqrt %831 : vector<2x1xf32>
    %833 = vector.broadcast %832 : vector<2x1xf32> to vector<2x8xf32>
    %834 = arith.mulf %829, %833 : vector<2x8xf32>
    %c6 = arith.constant 6 : index
    %c0_212 = arith.constant 0 : index
    %c0_213 = arith.constant 0 : index
    %835 = vector.load %arg0[%c6, %c0_212, %c0_213] : memref<8x2x128xf32, #tpu.memory_space<vmem>>, vector<1x2x128xf32>
    %836 = vector.shape_cast %835 : vector<1x2x128xf32> to vector<2x128xf32>
    %cst_214 = arith.constant dense<0.000000e+00> : vector<2x128xf32>
    %837 = tpu.matmul %715, %0, %cst_214 {dimension_numbers = #tpu.dot_dimension_numbers<[1], [0], [0], [1], [0, 0, 1, 1], [], []>} : vector<2x32xf32>, vector<32x128xf32>, vector<2x128xf32> -> vector<2x128xf32>
    %838 = arith.addf %836, %837 : vector<2x128xf32>
    %839 = arith.negf %838 : vector<2x128xf32>
    %840 = math.exp %839 : vector<2x128xf32>
    %cst_215 = arith.constant 1.000000e+00 : f32
    %841 = vector.broadcast %cst_215 : f32 to vector<2x128xf32>
    %842 = arith.addf %841, %840 : vector<2x128xf32>
    %843 = arith.divf %841, %842 : vector<2x128xf32>
    %844 = math.tanh %838 : vector<2x128xf32>
    %845 = vector.extract_strided_slice %843 {offsets = [0, 32], sizes = [2, 32], strides = [1, 1]} : vector<2x128xf32> to vector<2x32xf32>
    %846 = arith.mulf %845, %712 : vector<2x32xf32>
    %847 = vector.extract_strided_slice %843 {offsets = [0, 0], sizes = [2, 32], strides = [1, 1]} : vector<2x128xf32> to vector<2x32xf32>
    %848 = vector.extract_strided_slice %844 {offsets = [0, 64], sizes = [2, 32], strides = [1, 1]} : vector<2x128xf32> to vector<2x32xf32>
    %849 = arith.mulf %847, %848 : vector<2x32xf32>
    %850 = arith.addf %846, %849 : vector<2x32xf32>
    %851 = vector.extract_strided_slice %843 {offsets = [0, 96], sizes = [2, 32], strides = [1, 1]} : vector<2x128xf32> to vector<2x32xf32>
    %852 = math.tanh %850 : vector<2x32xf32>
    %853 = arith.mulf %851, %852 : vector<2x32xf32>
    %cst_216 = arith.constant dense<0.000000e+00> : vector<2x384xf32>
    %854 = tpu.matmul %853, %1, %cst_216 {dimension_numbers = #tpu.dot_dimension_numbers<[1], [0], [0], [1], [0, 0, 1, 1], [], []>} : vector<2x32xf32>, vector<32x384xf32>, vector<2x384xf32> -> vector<2x384xf32>
    %855 = vector.broadcast %2 : vector<1x384xf32> to vector<2x384xf32>
    %856 = arith.addf %854, %855 : vector<2x384xf32>
    %857 = math.tanh %856 : vector<2x384xf32>
    %858 = vector.extract_strided_slice %857 {offsets = [0, 0], sizes = [2, 64], strides = [1, 1]} : vector<2x384xf32> to vector<2x64xf32>
    %859 = vector.extract_strided_slice %857 {offsets = [0, 64], sizes = [2, 64], strides = [1, 1]} : vector<2x384xf32> to vector<2x64xf32>
    %860 = arith.mulf %858, %859 : vector<2x64xf32>
    %861 = vector.extract_strided_slice %857 {offsets = [0, 320], sizes = [2, 8], strides = [1, 1]} : vector<2x384xf32> to vector<2x8xf32>
    %862 = vector.extract_strided_slice %857 {offsets = [0, 328], sizes = [2, 8], strides = [1, 1]} : vector<2x384xf32> to vector<2x8xf32>
    %863 = vector.extract_strided_slice %856 {offsets = [0, 336], sizes = [2, 1], strides = [1, 1]} : vector<2x384xf32> to vector<2x1xf32>
    %864 = arith.negf %863 : vector<2x1xf32>
    %865 = math.exp %864 : vector<2x1xf32>
    %cst_217 = arith.constant 1.000000e+00 : f32
    %866 = vector.broadcast %cst_217 : f32 to vector<2x1xf32>
    %867 = arith.addf %866, %865 : vector<2x1xf32>
    %868 = arith.divf %866, %867 : vector<2x1xf32>
    %869 = vector.shape_cast %860 : vector<2x64xf32> to vector<2x1x64xf32>
    %870 = vector.broadcast %869 : vector<2x1x64xf32> to vector<2x8x64xf32>
    %871 = arith.mulf %870, %759 : vector<2x8x64xf32>
    %cst_218 = arith.constant dense<0.000000e+00> : vector<2x8xf32>
    %872 = vector.multi_reduction <add>, %871, %cst_218 [2] : vector<2x8x64xf32> to vector<2x8xf32>
    %873 = vector.shape_cast %872 : vector<2x8xf32> to vector<2x8x1xf32>
    %874 = vector.shape_cast %868 : vector<2x1xf32> to vector<2x1x1xf32>
    %875 = vector.shape_cast %861 : vector<2x8xf32> to vector<2x8x1xf32>
    %876 = arith.subf %875, %873 : vector<2x8x1xf32>
    %877 = vector.broadcast %874 : vector<2x1x1xf32> to vector<2x8x1xf32>
    %878 = arith.mulf %877, %876 : vector<2x8x1xf32>
    %879 = vector.broadcast %869 : vector<2x1x64xf32> to vector<2x8x64xf32>
    %880 = vector.broadcast %878 : vector<2x8x1xf32> to vector<2x8x64xf32>
    %881 = arith.mulf %879, %880 : vector<2x8x64xf32>
    %882 = arith.addf %759, %881 : vector<2x8x64xf32>
    %883 = arith.mulf %882, %882 : vector<2x8x64xf32>
    %cst_219 = arith.constant dense<0.000000e+00> : vector<2x8xf32>
    %884 = vector.multi_reduction <add>, %883, %cst_219 [2] : vector<2x8x64xf32> to vector<2x8xf32>
    %885 = vector.shape_cast %884 : vector<2x8xf32> to vector<2x8x1xf32>
    %cst_220 = arith.constant dense<0.000000e+00> : vector<2x1xf32>
    %886 = vector.multi_reduction <add>, %885, %cst_220 [1] : vector<2x8x1xf32> to vector<2x1xf32>
    %887 = vector.shape_cast %886 : vector<2x1xf32> to vector<2x1x1xf32>
    %888 = math.sqrt %887 : vector<2x1x1xf32>
    %cst_221 = arith.constant 1.000000e+00 : f32
    %889 = vector.broadcast %cst_221 : f32 to vector<2x1x1xf32>
    %890 = arith.subf %888, %889 : vector<2x1x1xf32>
    %cst_222 = arith.constant 0.000000e+00 : f32
    %891 = vector.broadcast %cst_222 : f32 to vector<2x1x1xf32>
    %892 = arith.maximumf %890, %891 : vector<2x1x1xf32>
    %cst_223 = arith.constant 1.000000e+00 : f32
    %893 = vector.broadcast %cst_223 : f32 to vector<2x1x1xf32>
    %894 = arith.addf %892, %893 : vector<2x1x1xf32>
    %895 = tpu.reciprocal %894 {approx = true} : vector<2x1x1xf32> -> vector<2x1x1xf32>
    %896 = vector.broadcast %895 : vector<2x1x1xf32> to vector<2x8x64xf32>
    %897 = arith.mulf %882, %896 : vector<2x8x64xf32>
    %898 = vector.extract_strided_slice %857 {offsets = [0, 128], sizes = [2, 64], strides = [1, 1]} : vector<2x384xf32> to vector<2x64xf32>
    %cst_224 = arith.constant dense<0.000000e+00> : vector<2x64xf32>
    %899 = tpu.matmul %862, %3, %cst_224 {dimension_numbers = #tpu.dot_dimension_numbers<[1], [0], [0], [1], [0, 0, 1, 1], [], []>} : vector<2x8xf32>, vector<8x64xf32>, vector<2x64xf32> -> vector<2x64xf32>
    %900 = arith.mulf %899, %898 : vector<2x64xf32>
    %901 = vector.shape_cast %900 : vector<2x64xf32> to vector<2x1x64xf32>
    %902 = vector.broadcast %901 : vector<2x1x64xf32> to vector<2x8x64xf32>
    %903 = arith.mulf %902, %897 : vector<2x8x64xf32>
    %cst_225 = arith.constant dense<0.000000e+00> : vector<2x8xf32>
    %904 = vector.multi_reduction <add>, %903, %cst_225 [2] : vector<2x8x64xf32> to vector<2x8xf32>
    %cst_226 = arith.constant dense<0.000000e+00> : vector<2xf32>
    %905 = vector.multi_reduction <add>, %904, %cst_226 [1] : vector<2x8xf32> to vector<2xf32>
    %906 = vector.shape_cast %905 : vector<2xf32> to vector<2x1xf32>
    %cst_227 = arith.constant 8.000000e+00 : f32
    %907 = vector.broadcast %cst_227 : f32 to vector<2x1xf32>
    %908 = arith.divf %906, %907 : vector<2x1xf32>
    %909 = arith.mulf %904, %904 : vector<2x8xf32>
    %cst_228 = arith.constant dense<0.000000e+00> : vector<2xf32>
    %910 = vector.multi_reduction <add>, %909, %cst_228 [1] : vector<2x8xf32> to vector<2xf32>
    %911 = vector.shape_cast %910 : vector<2xf32> to vector<2x1xf32>
    %cst_229 = arith.constant 8.000000e+00 : f32
    %912 = vector.broadcast %cst_229 : f32 to vector<2x1xf32>
    %913 = arith.divf %911, %912 : vector<2x1xf32>
    %914 = arith.mulf %908, %908 : vector<2x1xf32>
    %915 = arith.subf %913, %914 : vector<2x1xf32>
    %916 = vector.broadcast %908 : vector<2x1xf32> to vector<2x8xf32>
    %917 = arith.subf %904, %916 : vector<2x8xf32>
    %cst_230 = arith.constant 9.99999974E-6 : f32
    %918 = vector.broadcast %cst_230 : f32 to vector<2x1xf32>
    %919 = arith.addf %915, %918 : vector<2x1xf32>
    %920 = math.rsqrt %919 : vector<2x1xf32>
    %921 = vector.broadcast %920 : vector<2x1xf32> to vector<2x8xf32>
    %922 = arith.mulf %917, %921 : vector<2x8xf32>
    %923 = vector.extract_strided_slice %857 {offsets = [0, 192], sizes = [2, 64], strides = [1, 1]} : vector<2x384xf32> to vector<2x64xf32>
    %cst_231 = arith.constant dense<0.000000e+00> : vector<2x64xf32>
    %924 = tpu.matmul %922, %3, %cst_231 {dimension_numbers = #tpu.dot_dimension_numbers<[1], [0], [0], [1], [0, 0, 1, 1], [], []>} : vector<2x8xf32>, vector<8x64xf32>, vector<2x64xf32> -> vector<2x64xf32>
    %925 = arith.mulf %924, %923 : vector<2x64xf32>
    %926 = vector.shape_cast %925 : vector<2x64xf32> to vector<2x1x64xf32>
    %927 = vector.broadcast %926 : vector<2x1x64xf32> to vector<2x8x64xf32>
    %928 = arith.mulf %927, %897 : vector<2x8x64xf32>
    %cst_232 = arith.constant dense<0.000000e+00> : vector<2x8xf32>
    %929 = vector.multi_reduction <add>, %928, %cst_232 [2] : vector<2x8x64xf32> to vector<2x8xf32>
    %cst_233 = arith.constant dense<0.000000e+00> : vector<2xf32>
    %930 = vector.multi_reduction <add>, %929, %cst_233 [1] : vector<2x8xf32> to vector<2xf32>
    %931 = vector.shape_cast %930 : vector<2xf32> to vector<2x1xf32>
    %cst_234 = arith.constant 8.000000e+00 : f32
    %932 = vector.broadcast %cst_234 : f32 to vector<2x1xf32>
    %933 = arith.divf %931, %932 : vector<2x1xf32>
    %934 = arith.mulf %929, %929 : vector<2x8xf32>
    %cst_235 = arith.constant dense<0.000000e+00> : vector<2xf32>
    %935 = vector.multi_reduction <add>, %934, %cst_235 [1] : vector<2x8xf32> to vector<2xf32>
    %936 = vector.shape_cast %935 : vector<2xf32> to vector<2x1xf32>
    %cst_236 = arith.constant 8.000000e+00 : f32
    %937 = vector.broadcast %cst_236 : f32 to vector<2x1xf32>
    %938 = arith.divf %936, %937 : vector<2x1xf32>
    %939 = arith.mulf %933, %933 : vector<2x1xf32>
    %940 = arith.subf %938, %939 : vector<2x1xf32>
    %941 = vector.broadcast %933 : vector<2x1xf32> to vector<2x8xf32>
    %942 = arith.subf %929, %941 : vector<2x8xf32>
    %cst_237 = arith.constant 9.99999974E-6 : f32
    %943 = vector.broadcast %cst_237 : f32 to vector<2x1xf32>
    %944 = arith.addf %940, %943 : vector<2x1xf32>
    %945 = math.rsqrt %944 : vector<2x1xf32>
    %946 = vector.broadcast %945 : vector<2x1xf32> to vector<2x8xf32>
    %947 = arith.mulf %942, %946 : vector<2x8xf32>
    %948 = vector.extract_strided_slice %857 {offsets = [0, 256], sizes = [2, 64], strides = [1, 1]} : vector<2x384xf32> to vector<2x64xf32>
    %cst_238 = arith.constant dense<0.000000e+00> : vector<2x64xf32>
    %949 = tpu.matmul %947, %3, %cst_238 {dimension_numbers = #tpu.dot_dimension_numbers<[1], [0], [0], [1], [0, 0, 1, 1], [], []>} : vector<2x8xf32>, vector<8x64xf32>, vector<2x64xf32> -> vector<2x64xf32>
    %950 = arith.mulf %949, %948 : vector<2x64xf32>
    %951 = vector.shape_cast %950 : vector<2x64xf32> to vector<2x1x64xf32>
    %952 = vector.broadcast %951 : vector<2x1x64xf32> to vector<2x8x64xf32>
    %953 = arith.mulf %952, %897 : vector<2x8x64xf32>
    %cst_239 = arith.constant dense<0.000000e+00> : vector<2x8xf32>
    %954 = vector.multi_reduction <add>, %953, %cst_239 [2] : vector<2x8x64xf32> to vector<2x8xf32>
    %cst_240 = arith.constant dense<0.000000e+00> : vector<2xf32>
    %955 = vector.multi_reduction <add>, %954, %cst_240 [1] : vector<2x8xf32> to vector<2xf32>
    %956 = vector.shape_cast %955 : vector<2xf32> to vector<2x1xf32>
    %cst_241 = arith.constant 8.000000e+00 : f32
    %957 = vector.broadcast %cst_241 : f32 to vector<2x1xf32>
    %958 = arith.divf %956, %957 : vector<2x1xf32>
    %959 = arith.mulf %954, %954 : vector<2x8xf32>
    %cst_242 = arith.constant dense<0.000000e+00> : vector<2xf32>
    %960 = vector.multi_reduction <add>, %959, %cst_242 [1] : vector<2x8xf32> to vector<2xf32>
    %961 = vector.shape_cast %960 : vector<2xf32> to vector<2x1xf32>
    %cst_243 = arith.constant 8.000000e+00 : f32
    %962 = vector.broadcast %cst_243 : f32 to vector<2x1xf32>
    %963 = arith.divf %961, %962 : vector<2x1xf32>
    %964 = arith.mulf %958, %958 : vector<2x1xf32>
    %965 = arith.subf %963, %964 : vector<2x1xf32>
    %966 = vector.broadcast %958 : vector<2x1xf32> to vector<2x8xf32>
    %967 = arith.subf %954, %966 : vector<2x8xf32>
    %cst_244 = arith.constant 9.99999974E-6 : f32
    %968 = vector.broadcast %cst_244 : f32 to vector<2x1xf32>
    %969 = arith.addf %965, %968 : vector<2x1xf32>
    %970 = math.rsqrt %969 : vector<2x1xf32>
    %971 = vector.broadcast %970 : vector<2x1xf32> to vector<2x8xf32>
    %972 = arith.mulf %967, %971 : vector<2x8xf32>
    %c7 = arith.constant 7 : index
    %c0_245 = arith.constant 0 : index
    %c0_246 = arith.constant 0 : index
    %973 = vector.load %arg0[%c7, %c0_245, %c0_246] : memref<8x2x128xf32, #tpu.memory_space<vmem>>, vector<1x2x128xf32>
    %974 = vector.shape_cast %973 : vector<1x2x128xf32> to vector<2x128xf32>
    %cst_247 = arith.constant dense<0.000000e+00> : vector<2x128xf32>
    %975 = tpu.matmul %853, %0, %cst_247 {dimension_numbers = #tpu.dot_dimension_numbers<[1], [0], [0], [1], [0, 0, 1, 1], [], []>} : vector<2x32xf32>, vector<32x128xf32>, vector<2x128xf32> -> vector<2x128xf32>
    %976 = arith.addf %974, %975 : vector<2x128xf32>
    %977 = arith.negf %976 : vector<2x128xf32>
    %978 = math.exp %977 : vector<2x128xf32>
    %cst_248 = arith.constant 1.000000e+00 : f32
    %979 = vector.broadcast %cst_248 : f32 to vector<2x128xf32>
    %980 = arith.addf %979, %978 : vector<2x128xf32>
    %981 = arith.divf %979, %980 : vector<2x128xf32>
    %982 = math.tanh %976 : vector<2x128xf32>
    %983 = vector.extract_strided_slice %981 {offsets = [0, 32], sizes = [2, 32], strides = [1, 1]} : vector<2x128xf32> to vector<2x32xf32>
    %984 = arith.mulf %983, %850 : vector<2x32xf32>
    %985 = vector.extract_strided_slice %981 {offsets = [0, 0], sizes = [2, 32], strides = [1, 1]} : vector<2x128xf32> to vector<2x32xf32>
    %986 = vector.extract_strided_slice %982 {offsets = [0, 64], sizes = [2, 32], strides = [1, 1]} : vector<2x128xf32> to vector<2x32xf32>
    %987 = arith.mulf %985, %986 : vector<2x32xf32>
    %988 = arith.addf %984, %987 : vector<2x32xf32>
    %989 = vector.extract_strided_slice %981 {offsets = [0, 96], sizes = [2, 32], strides = [1, 1]} : vector<2x128xf32> to vector<2x32xf32>
    %990 = math.tanh %988 : vector<2x32xf32>
    %991 = arith.mulf %989, %990 : vector<2x32xf32>
    %cst_249 = arith.constant dense<0.000000e+00> : vector<2x384xf32>
    %992 = tpu.matmul %991, %1, %cst_249 {dimension_numbers = #tpu.dot_dimension_numbers<[1], [0], [0], [1], [0, 0, 1, 1], [], []>} : vector<2x32xf32>, vector<32x384xf32>, vector<2x384xf32> -> vector<2x384xf32>
    %993 = vector.broadcast %2 : vector<1x384xf32> to vector<2x384xf32>
    %994 = arith.addf %992, %993 : vector<2x384xf32>
    %995 = math.tanh %994 : vector<2x384xf32>
    %996 = vector.extract_strided_slice %995 {offsets = [0, 0], sizes = [2, 64], strides = [1, 1]} : vector<2x384xf32> to vector<2x64xf32>
    %997 = vector.extract_strided_slice %995 {offsets = [0, 64], sizes = [2, 64], strides = [1, 1]} : vector<2x384xf32> to vector<2x64xf32>
    %998 = arith.mulf %996, %997 : vector<2x64xf32>
    %999 = vector.extract_strided_slice %995 {offsets = [0, 320], sizes = [2, 8], strides = [1, 1]} : vector<2x384xf32> to vector<2x8xf32>
    %1000 = vector.extract_strided_slice %995 {offsets = [0, 328], sizes = [2, 8], strides = [1, 1]} : vector<2x384xf32> to vector<2x8xf32>
    %1001 = vector.extract_strided_slice %994 {offsets = [0, 336], sizes = [2, 1], strides = [1, 1]} : vector<2x384xf32> to vector<2x1xf32>
    %1002 = arith.negf %1001 : vector<2x1xf32>
    %1003 = math.exp %1002 : vector<2x1xf32>
    %cst_250 = arith.constant 1.000000e+00 : f32
    %1004 = vector.broadcast %cst_250 : f32 to vector<2x1xf32>
    %1005 = arith.addf %1004, %1003 : vector<2x1xf32>
    %1006 = arith.divf %1004, %1005 : vector<2x1xf32>
    %1007 = vector.shape_cast %998 : vector<2x64xf32> to vector<2x1x64xf32>
    %1008 = vector.broadcast %1007 : vector<2x1x64xf32> to vector<2x8x64xf32>
    %1009 = arith.mulf %1008, %897 : vector<2x8x64xf32>
    %cst_251 = arith.constant dense<0.000000e+00> : vector<2x8xf32>
    %1010 = vector.multi_reduction <add>, %1009, %cst_251 [2] : vector<2x8x64xf32> to vector<2x8xf32>
    %1011 = vector.shape_cast %1010 : vector<2x8xf32> to vector<2x8x1xf32>
    %1012 = vector.shape_cast %1006 : vector<2x1xf32> to vector<2x1x1xf32>
    %1013 = vector.shape_cast %999 : vector<2x8xf32> to vector<2x8x1xf32>
    %1014 = arith.subf %1013, %1011 : vector<2x8x1xf32>
    %1015 = vector.broadcast %1012 : vector<2x1x1xf32> to vector<2x8x1xf32>
    %1016 = arith.mulf %1015, %1014 : vector<2x8x1xf32>
    %1017 = vector.broadcast %1007 : vector<2x1x64xf32> to vector<2x8x64xf32>
    %1018 = vector.broadcast %1016 : vector<2x8x1xf32> to vector<2x8x64xf32>
    %1019 = arith.mulf %1017, %1018 : vector<2x8x64xf32>
    %1020 = arith.addf %897, %1019 : vector<2x8x64xf32>
    %1021 = arith.mulf %1020, %1020 : vector<2x8x64xf32>
    %cst_252 = arith.constant dense<0.000000e+00> : vector<2x8xf32>
    %1022 = vector.multi_reduction <add>, %1021, %cst_252 [2] : vector<2x8x64xf32> to vector<2x8xf32>
    %1023 = vector.shape_cast %1022 : vector<2x8xf32> to vector<2x8x1xf32>
    %cst_253 = arith.constant dense<0.000000e+00> : vector<2x1xf32>
    %1024 = vector.multi_reduction <add>, %1023, %cst_253 [1] : vector<2x8x1xf32> to vector<2x1xf32>
    %1025 = vector.shape_cast %1024 : vector<2x1xf32> to vector<2x1x1xf32>
    %1026 = math.sqrt %1025 : vector<2x1x1xf32>
    %cst_254 = arith.constant 1.000000e+00 : f32
    %1027 = vector.broadcast %cst_254 : f32 to vector<2x1x1xf32>
    %1028 = arith.subf %1026, %1027 : vector<2x1x1xf32>
    %cst_255 = arith.constant 0.000000e+00 : f32
    %1029 = vector.broadcast %cst_255 : f32 to vector<2x1x1xf32>
    %1030 = arith.maximumf %1028, %1029 : vector<2x1x1xf32>
    %cst_256 = arith.constant 1.000000e+00 : f32
    %1031 = vector.broadcast %cst_256 : f32 to vector<2x1x1xf32>
    %1032 = arith.addf %1030, %1031 : vector<2x1x1xf32>
    %1033 = tpu.reciprocal %1032 {approx = true} : vector<2x1x1xf32> -> vector<2x1x1xf32>
    %1034 = vector.broadcast %1033 : vector<2x1x1xf32> to vector<2x8x64xf32>
    %1035 = arith.mulf %1020, %1034 : vector<2x8x64xf32>
    %1036 = vector.extract_strided_slice %995 {offsets = [0, 128], sizes = [2, 64], strides = [1, 1]} : vector<2x384xf32> to vector<2x64xf32>
    %cst_257 = arith.constant dense<0.000000e+00> : vector<2x64xf32>
    %1037 = tpu.matmul %1000, %3, %cst_257 {dimension_numbers = #tpu.dot_dimension_numbers<[1], [0], [0], [1], [0, 0, 1, 1], [], []>} : vector<2x8xf32>, vector<8x64xf32>, vector<2x64xf32> -> vector<2x64xf32>
    %1038 = arith.mulf %1037, %1036 : vector<2x64xf32>
    %1039 = vector.shape_cast %1038 : vector<2x64xf32> to vector<2x1x64xf32>
    %1040 = vector.broadcast %1039 : vector<2x1x64xf32> to vector<2x8x64xf32>
    %1041 = arith.mulf %1040, %1035 : vector<2x8x64xf32>
    %cst_258 = arith.constant dense<0.000000e+00> : vector<2x8xf32>
    %1042 = vector.multi_reduction <add>, %1041, %cst_258 [2] : vector<2x8x64xf32> to vector<2x8xf32>
    %cst_259 = arith.constant dense<0.000000e+00> : vector<2xf32>
    %1043 = vector.multi_reduction <add>, %1042, %cst_259 [1] : vector<2x8xf32> to vector<2xf32>
    %1044 = vector.shape_cast %1043 : vector<2xf32> to vector<2x1xf32>
    %cst_260 = arith.constant 8.000000e+00 : f32
    %1045 = vector.broadcast %cst_260 : f32 to vector<2x1xf32>
    %1046 = arith.divf %1044, %1045 : vector<2x1xf32>
    %1047 = arith.mulf %1042, %1042 : vector<2x8xf32>
    %cst_261 = arith.constant dense<0.000000e+00> : vector<2xf32>
    %1048 = vector.multi_reduction <add>, %1047, %cst_261 [1] : vector<2x8xf32> to vector<2xf32>
    %1049 = vector.shape_cast %1048 : vector<2xf32> to vector<2x1xf32>
    %cst_262 = arith.constant 8.000000e+00 : f32
    %1050 = vector.broadcast %cst_262 : f32 to vector<2x1xf32>
    %1051 = arith.divf %1049, %1050 : vector<2x1xf32>
    %1052 = arith.mulf %1046, %1046 : vector<2x1xf32>
    %1053 = arith.subf %1051, %1052 : vector<2x1xf32>
    %1054 = vector.broadcast %1046 : vector<2x1xf32> to vector<2x8xf32>
    %1055 = arith.subf %1042, %1054 : vector<2x8xf32>
    %cst_263 = arith.constant 9.99999974E-6 : f32
    %1056 = vector.broadcast %cst_263 : f32 to vector<2x1xf32>
    %1057 = arith.addf %1053, %1056 : vector<2x1xf32>
    %1058 = math.rsqrt %1057 : vector<2x1xf32>
    %1059 = vector.broadcast %1058 : vector<2x1xf32> to vector<2x8xf32>
    %1060 = arith.mulf %1055, %1059 : vector<2x8xf32>
    %1061 = vector.extract_strided_slice %995 {offsets = [0, 192], sizes = [2, 64], strides = [1, 1]} : vector<2x384xf32> to vector<2x64xf32>
    %cst_264 = arith.constant dense<0.000000e+00> : vector<2x64xf32>
    %1062 = tpu.matmul %1060, %3, %cst_264 {dimension_numbers = #tpu.dot_dimension_numbers<[1], [0], [0], [1], [0, 0, 1, 1], [], []>} : vector<2x8xf32>, vector<8x64xf32>, vector<2x64xf32> -> vector<2x64xf32>
    %1063 = arith.mulf %1062, %1061 : vector<2x64xf32>
    %1064 = vector.shape_cast %1063 : vector<2x64xf32> to vector<2x1x64xf32>
    %1065 = vector.broadcast %1064 : vector<2x1x64xf32> to vector<2x8x64xf32>
    %1066 = arith.mulf %1065, %1035 : vector<2x8x64xf32>
    %cst_265 = arith.constant dense<0.000000e+00> : vector<2x8xf32>
    %1067 = vector.multi_reduction <add>, %1066, %cst_265 [2] : vector<2x8x64xf32> to vector<2x8xf32>
    %cst_266 = arith.constant dense<0.000000e+00> : vector<2xf32>
    %1068 = vector.multi_reduction <add>, %1067, %cst_266 [1] : vector<2x8xf32> to vector<2xf32>
    %1069 = vector.shape_cast %1068 : vector<2xf32> to vector<2x1xf32>
    %cst_267 = arith.constant 8.000000e+00 : f32
    %1070 = vector.broadcast %cst_267 : f32 to vector<2x1xf32>
    %1071 = arith.divf %1069, %1070 : vector<2x1xf32>
    %1072 = arith.mulf %1067, %1067 : vector<2x8xf32>
    %cst_268 = arith.constant dense<0.000000e+00> : vector<2xf32>
    %1073 = vector.multi_reduction <add>, %1072, %cst_268 [1] : vector<2x8xf32> to vector<2xf32>
    %1074 = vector.shape_cast %1073 : vector<2xf32> to vector<2x1xf32>
    %cst_269 = arith.constant 8.000000e+00 : f32
    %1075 = vector.broadcast %cst_269 : f32 to vector<2x1xf32>
    %1076 = arith.divf %1074, %1075 : vector<2x1xf32>
    %1077 = arith.mulf %1071, %1071 : vector<2x1xf32>
    %1078 = arith.subf %1076, %1077 : vector<2x1xf32>
    %1079 = vector.broadcast %1071 : vector<2x1xf32> to vector<2x8xf32>
    %1080 = arith.subf %1067, %1079 : vector<2x8xf32>
    %cst_270 = arith.constant 9.99999974E-6 : f32
    %1081 = vector.broadcast %cst_270 : f32 to vector<2x1xf32>
    %1082 = arith.addf %1078, %1081 : vector<2x1xf32>
    %1083 = math.rsqrt %1082 : vector<2x1xf32>
    %1084 = vector.broadcast %1083 : vector<2x1xf32> to vector<2x8xf32>
    %1085 = arith.mulf %1080, %1084 : vector<2x8xf32>
    %1086 = vector.extract_strided_slice %995 {offsets = [0, 256], sizes = [2, 64], strides = [1, 1]} : vector<2x384xf32> to vector<2x64xf32>
    %cst_271 = arith.constant dense<0.000000e+00> : vector<2x64xf32>
    %1087 = tpu.matmul %1085, %3, %cst_271 {dimension_numbers = #tpu.dot_dimension_numbers<[1], [0], [0], [1], [0, 0, 1, 1], [], []>} : vector<2x8xf32>, vector<8x64xf32>, vector<2x64xf32> -> vector<2x64xf32>
    %1088 = arith.mulf %1087, %1086 : vector<2x64xf32>
    %1089 = vector.shape_cast %1088 : vector<2x64xf32> to vector<2x1x64xf32>
    %1090 = vector.broadcast %1089 : vector<2x1x64xf32> to vector<2x8x64xf32>
    %1091 = arith.mulf %1090, %1035 : vector<2x8x64xf32>
    %cst_272 = arith.constant dense<0.000000e+00> : vector<2x8xf32>
    %1092 = vector.multi_reduction <add>, %1091, %cst_272 [2] : vector<2x8x64xf32> to vector<2x8xf32>
    %cst_273 = arith.constant dense<0.000000e+00> : vector<2xf32>
    %1093 = vector.multi_reduction <add>, %1092, %cst_273 [1] : vector<2x8xf32> to vector<2xf32>
    %1094 = vector.shape_cast %1093 : vector<2xf32> to vector<2x1xf32>
    %cst_274 = arith.constant 8.000000e+00 : f32
    %1095 = vector.broadcast %cst_274 : f32 to vector<2x1xf32>
    %1096 = arith.divf %1094, %1095 : vector<2x1xf32>
    %1097 = arith.mulf %1092, %1092 : vector<2x8xf32>
    %cst_275 = arith.constant dense<0.000000e+00> : vector<2xf32>
    %1098 = vector.multi_reduction <add>, %1097, %cst_275 [1] : vector<2x8xf32> to vector<2xf32>
    %1099 = vector.shape_cast %1098 : vector<2xf32> to vector<2x1xf32>
    %cst_276 = arith.constant 8.000000e+00 : f32
    %1100 = vector.broadcast %cst_276 : f32 to vector<2x1xf32>
    %1101 = arith.divf %1099, %1100 : vector<2x1xf32>
    %1102 = arith.mulf %1096, %1096 : vector<2x1xf32>
    %1103 = arith.subf %1101, %1102 : vector<2x1xf32>
    %1104 = vector.broadcast %1096 : vector<2x1xf32> to vector<2x8xf32>
    %1105 = arith.subf %1092, %1104 : vector<2x8xf32>
    %cst_277 = arith.constant 9.99999974E-6 : f32
    %1106 = vector.broadcast %cst_277 : f32 to vector<2x1xf32>
    %1107 = arith.addf %1103, %1106 : vector<2x1xf32>
    %1108 = math.rsqrt %1107 : vector<2x1xf32>
    %1109 = vector.broadcast %1108 : vector<2x1xf32> to vector<2x8xf32>
    %1110 = arith.mulf %1105, %1109 : vector<2x8xf32>
    %c0_278 = arith.constant 0 : index
    %c0_279 = arith.constant 0 : index
    %1111 = vector.load %arg11[%c0_278, %c0_279] : memref<2x32xf32, #tpu.memory_space<vmem>>, vector<2x32xf32>
    tpu.vector_store %arg11[%c0_278, %c0_279], %991 {strides = array<i32>} : memref<2x32xf32, #tpu.memory_space<vmem>>, vector<2x32xf32>,
    %c0_280 = arith.constant 0 : index
    %c0_281 = arith.constant 0 : index
    %1112 = vector.load %arg12[%c0_280, %c0_281] : memref<2x32xf32, #tpu.memory_space<vmem>>, vector<2x32xf32>
    tpu.vector_store %arg12[%c0_280, %c0_281], %988 {strides = array<i32>} : memref<2x32xf32, #tpu.memory_space<vmem>>, vector<2x32xf32>,
    %c0_282 = arith.constant 0 : index
    %c0_283 = arith.constant 0 : index
    %c0_284 = arith.constant 0 : index
    %1113 = vector.load %arg13[%c0_282, %c0_283, %c0_284] : memref<2x8x64xf32, #tpu.memory_space<vmem>>, vector<2x8x64xf32>
    tpu.vector_store %arg13[%c0_282, %c0_283, %c0_284], %1035 {strides = array<i32>} : memref<2x8x64xf32, #tpu.memory_space<vmem>>, vector<2x8x64xf32>,
    %1114 = tpu.concatenate %144, %282, %420, %558, %696, %834, %972, %1110 in 1 : vector<2x8xf32>, vector<2x8xf32>, vector<2x8xf32>, vector<2x8xf32>, vector<2x8xf32>, vector<2x8xf32>, vector<2x8xf32>, vector<2x8xf32> -> vector<2x64xf32>
    %1115 = tpu.concatenate %25, %163, %301, %439, %577, %715, %853, %991 in 1 : vector<2x32xf32>, vector<2x32xf32>, vector<2x32xf32>, vector<2x32xf32>, vector<2x32xf32>, vector<2x32xf32>, vector<2x32xf32>, vector<2x32xf32> -> vector<2x256xf32>
    %c0_285 = arith.constant 0 : index
    %c0_286 = arith.constant 0 : index
    %1116 = vector.load %arg8[%c0_285, %c0_286] : memref<64x256xf32, #tpu.memory_space<vmem>>, vector<64x256xf32>
    %cst_287 = arith.constant dense<0.000000e+00> : vector<2x256xf32>
    %1117 = tpu.matmul %1114, %1116, %cst_287 {dimension_numbers = #tpu.dot_dimension_numbers<[1], [0], [0], [1], [0, 0, 1, 1], [], []>} : vector<2x64xf32>, vector<64x256xf32>, vector<2x256xf32> -> vector<2x256xf32>
    %1118 = arith.addf %1115, %1117 : vector<2x256xf32>
    %c0_288 = arith.constant 0 : index
    %c0_289 = arith.constant 0 : index
    %1119 = vector.load %arg9[%c0_288, %c0_289] : memref<1x256xf32, #tpu.memory_space<vmem>>, vector<1x256xf32>
    %1120 = vector.broadcast %1119 : vector<1x256xf32> to vector<2x256xf32>
    %1121 = arith.addf %1118, %1120 : vector<2x256xf32>
    %c0_290 = arith.constant 0 : index
    %c0_291 = arith.constant 0 : index
    %1122 = vector.load %arg10[%c0_290, %c0_291] : memref<2x256xf32, #tpu.memory_space<vmem>>, vector<2x256xf32>
    tpu.vector_store %arg10[%c0_290, %c0_291], %1121 {strides = array<i32>} : memref<2x256xf32, #tpu.memory_space<vmem>>, vector<2x256xf32>,
    return
  }
}

</mosaic_0001>

<bundles_post_ra>
// kernel: fwmrnn_forward.1
= control target key start
LH: loop header
LB: loop body
LE: loop exit
PB: predicated region body
PF: predicated region fallthrough
CT: control target
= control target key end

     0   :  { %19 = vsyncpa [#allocation3], 0  ;;  %v11231_v3 = vmov 0.0|0.0   ;;  %vm9380_vm0 = vmmov 0   ;;  %v11235_v6 = vmov 0.0   ;;  %s11215_s0 = inlined_call_operand.vmem [shape: f32[8,2,128], index: 0, kind: input, shape index: {}]   ;;  %s11216_s1 = inlined_call_operand.vmem [shape: f32[2,32], index: 1, kind: input, shape index: {}]   ;;  %s11217_s2 = inlined_call_operand.vmem [shape: f32[2,32], index: 2, kind: input, shape index: {}]   ;;  %s11218_s3 = inlined_call_operand.vmem [shape: f32[2,8,64], index: 3, kind: input, shape index: {}]   ;;  %s11219_s4 = inlined_call_operand.vmem [shape: f32[32,128], index: 4, kind: input, shape index: {}]   ;;  %s11220_s5 = inlined_call_operand.vmem [shape: f32[32,384], index: 5, kind: input, shape index: {}]   ;;  %s11221_s6 = inlined_call_operand.vmem [shape: f32[1,384], index: 6, kind: input, shape index: {}]   ;;  %s11222_s7 = inlined_call_operand.vmem [shape: f32[8,64], index: 7, kind: input, shape index: {}]   ;;  %s11223_s8 = inlined_call_operand.vmem [shape: f32[64,256], index: 8, kind: input, shape index: {}]   ;;  %s11224_s9 = inlined_call_operand.vmem [shape: f32[1,256], index: 9, kind: input, shape index: {}]   ;;  %s11225_s10 = inlined_call_operand.vmem [shape: f32[2,256], index: 10, kind: output, shape index: {0}]   ;;  %s11226_s11 = inlined_call_operand.hbm [shape: f32[2,32], index: 11, kind: output, shape index: {1}]   ;;  %s11227_s12 = inlined_call_operand.hbm [shape: f32[2,32], index: 12, kind: output, shape index: {2}]   ;;  %s11228_s13 = inlined_call_operand.hbm [shape: f32[2,8,64], index: 13, kind: output, shape index: {3}]  }
   0x1   :  { %v41_v0 = vld [vmem:[%s11219_s4] sm:$0xff]  ;;  %v42_v1 = vld [vmem:[%s11219_s4 + $0x8] sm:$0xff]  ;;  %v43_v2 = vld [vmem:[%s11219_s4 + $0x10] sm:$0xff]  ;;  %8837 = vmatprep.subr.bf16.mxu1 %v11231_v3  ;;  %8549 = vmatprep.mubr.msk.f32.mxu1 %vm9380_vm0, %v11235_v6 }
   0x2   :  { %v9474_v4 = vpack.c.bf16 %v42_v1, %v41_v0  ;;  %v44_v5 = vld [vmem:[%s11219_s4 + $0x18] sm:$0xff]  ;;  %8851 = vmatprep.subr.bf16.mxu0 %v11231_v3  ;;  %8560 = vmatprep.mubr.msk.f32.mxu0 %vm9380_vm0, %v11235_v6 }
   0x3   :  { %20 = vsyncpa [#allocation5], 0  ;;  %v9485_v7 = vpack.c.bf16 %v44_v5, %v43_v2  ;;  %v59_v8 = vld [vmem:[%s11216_s1] sm:$0x3]  ;;  %vm64_vm1 = vcmask 261120   ;;  %s9382_s19 = smov 64   ;;  %v168_v47 = vlaneseq }
   0x4   :  { %8839 = vmatpush3.bf16.msra.mxu1 %v9474_v4  ;;  %v63_v9 = vld [vmem:[%s11215_s0] sm:$0x3]  ;;  %s9383_s1 = smov 32   ;;  %v46_v25 = vld [vmem:[%s11220_s5 + $0x8] sm:$0xff]  ;;  %v48_v29 = vld [vmem:[%s11220_s5 + $0x18] sm:$0xff]  ;;  %vm499_vm2 = vcmask 64512  }
   0x5   :  { %8840 = vmatprep.subr.bf16.mxu1 %v11231_v3  ;;  %v60_v14 = vld [vmem:[%s11217_s2] sm:$0x3]  ;;  %v47_v30 = vld [vmem:[%s11220_s5 + $0x10] sm:$0xff]  ;;  %v50_v31 = vld [vmem:[%s11220_s5 + $0x28] sm:$0xff]  ;;  %v9576_v48 = vshrl.u32 %v168_v47, 7  ;;  %vm378_vm3 = vcmask 523264  }
   0x6   :  { %v49_v26 = vld [vmem:[%s11220_s5 + $0x20] sm:$0xff]  ;;  %v9528_v33 = vpack.c.bf16 %v50_v31, %v47_v30  ;;  %v52_v34 = vld [vmem:[%s11220_s5 + $0x38] sm:$0xff]  ;;  %v55_v35 = vld [vmem:[%s11220_s5 + $0x50] sm:$0xff]  ;;  %v9385_v63 = vmov 1966171168   ;;  %vm626_vm8 = vcmask 1041409  }
   0x7   :  { %v45_v27 = vld [vmem:[%s11220_s5] sm:$0xff]  ;;  %v9515_v28 = vpack.c.bf16 %v49_v26, %v46_v25  ;;  %v51_v36 = vld [vmem:[%s11220_s5 + $0x30] sm:$0xff]  ;;  %v9540_v37 = vpack.c.bf16 %v55_v35, %v52_v34  ;;  %v54_v38 = vld [vmem:[%s11220_s5 + $0x48] sm:$0xff]  ;;  %11253 = vst [vmem:[#allocation10_spill] sm:$0xff] %v9576_v48  ;;  %v9579_v49 = vsub.s32 0, %v9576_v48  ;;  %v178_v50 = vsub.s32 2, %v9576_v48 }
   0x8   :  { %8842 = vmatpush3.bf16.msra.mxu1 %v9485_v7  ;;  %v9526_v32 = vpack.c.bf16 %v48_v29, %v45_v27  ;;  %v53_v39 = vld [vmem:[%s11220_s5 + $0x40] sm:$0xff]  ;;  %v56_v40 = vld [vmem:[%s11220_s5 + $0x58] sm:$0xff]  ;;  %8853 = vmatpush3.bf16.msra.mxu0 %v9528_v33  ;;  %v9553_v41 = vpack.c.bf16 %v54_v38, %v51_v36  ;;  %v345_v0 = vunpack.c.l.s4 %v9385_v63  ;;  %v11229_v26 = vmov 80  }
   0x9   :  { %8844 = vmatprep.subr.bf16.mxu1 %v9515_v28  ;;  %v9555_v42 = vpack.c.bf16 %v56_v40, %v53_v39  ;;  %8854 = vmatprep.subr.bf16.mxu0 %v11231_v3  ;;  %v9585_v51 = vld [vmem:[%s11221_s6] sm:$0x7]  ;;  %s9384_s6 = smov 56   ;;  %vm629_vm9 = vcmask 58368  }
   0xa   :  { %v9589_v52 = vrot.slane %v9585_v51, %v9579_v49  ;;  %v9592_v53 = vrot.slane %v9585_v51, %v178_v50  ;;  %v9601_v60 = vld [vmem:[%s11222_s7] sm:$0xff]  ;;  %v346_v1 = vunpack.c.0.s8 %v345_v0  ;;  %9029 = vset.pattern.permute.xlu0 %v11229_v26  ;;  %9028 = vset.pattern.permute.xlu1 %v11229_v26 }
   0xb   :  { %8550 = vmatmul.mubr.msk.f32.vlgmr.msra.gmra.mrb[0].mxu1 %vm64_vm1, %v59_v8 }
   0xc   :  { %252 = vmatprep.mubr.f32.mxu1 %v11235_v6  ;;  %8846 = vmatpush1.bf16.msra.mxu1 %v9526_v32  ;;  %v9613_v5 = vsub.s32 %v346_v1, %v9576_v48 }
   0xd   :  { %8848 = vmatprep.subr.bf16.mxu1 %v9540_v37  ;;  %8856 = vmatpush3.bf16.msra.mxu0 %v9555_v42 }
   0xe   :  { %8573 = vmatprep.subr.mxu0 %v11235_v6 }
  0x10   :  { %8850 = vmatpush1.bf16.msra.mxu1 %v9553_v41 }
  0x11   :  { %8563 = vmatprep.subr.mxu1 %v11235_v6 }
  0xde   :  { %v134_v10 = vpop.f32.mrb[0].mxu1 }
  0xdf   :  { %v138_v11 = vadd.f32 %v134_v10, %v63_v9  ;;  %v8551_v12 = vpop.f32.mrb[1].mxu1 }
  0xe1   :  { %9050 = vtanh.f32 %v138_v11  ;;  %v8325_v15 = vmul.f32 -1.442695, %v138_v11 }
  0xe3   :  { %9052 = vpow2.f32 %v8325_v15 }
  0xeb   :  { %v9051_v13 = vpop.eup %9050 }
  0xec   :  { %152 = vrot.lane.b32.xlu0 %v9051_v13, %s9382_s19  ;;  %v61_v13 = vld [vmem:[%s11218_s3] sm:$0xff] }
  0xed   :  { %v9053_v16 = vpop.eup %9052 }
  0xee   :  { %v142_v17 = vadd.f32 1.0, %v9053_v16  ;;  %v62_v16 = vld [vmem:[%s11218_s3 + $0x8] sm:$0xff] }
  0xf0   :  { %147 = vrot.lane.b32.xlu0 %v60_v14, %s9383_s1  ;;  %9054 = vrcp.f32 %v142_v17 }
  0xfa   :  { %v9055_v18 = vpop.eup %9054 }
 0x15e   :  { %v153_v19 = vpop.permute.xlu0 %152 }
 0x15f   :  { %v155_v20 = vmul.f32 %v9055_v18, %v153_v19 }
 0x161   :  { %157 = vrot.lane.b32.xlu1 %v155_v20, %s9383_s1 }
 0x162   :  { %v148_v21 = vpop.permute.xlu0 %147 }
 0x163   :  { %v150_v22 = vmul.f32 %v9055_v18, %v148_v21 }
 0x1d3   :  { %v158_v23 = vpop.permute.xlu1 %157 }
 0x1d4   :  { %v9503_v24 = vadd.f32 %v158_v23, %v150_v22  ;;  %v9634_v22 = vsub.s32 1, %v9576_v48 }
 0x1d6   :  { %9056 = vtanh.f32 %v9503_v24 }
 0x1e0   :  { %v9057_v43 = vpop.eup %9056 }
 0x1e1   :  { %163 = vrot.lane.b32.xlu1 %v9057_v43, %s9382_s19 }
 0x253   :  { %v164_v44 = vpop.permute.xlu1 %163 }
 0x254   :  { %v166_v45 = vmul.f32 %v9055_v18, %v164_v44 }
 0x256   :  { %184 = vrot.lane.b32.xlu0 %v166_v45, %s9383_s1 }
 0x2c8   :  { %v9565_v46 = vpop.permute.xlu0 %184 }
 0x2c9   :  { %11252 = vst [vmem:[#allocation9_spill] sm:$0xff] %v9565_v46  ;;  %8326 = vmatmul.mubr.msk.f32.vlgmr.msra.gmra.mrb[2].mxu1 %vm64_vm1, %v9565_v46  ;;  %8561 = vmatmul.mubr.msk.f32.vlgmr.msra.gmra.mrb[0].mxu0 %vm64_vm1, %v9565_v46 }
 0x2ca   :  { %8565 = vmatprep.mubr.msk.f32.mxu1 %vm9380_vm0, %v11235_v6  ;;  %8575 = vmatprep.mubr.msk.f32.mxu0 %vm9380_vm0, %v11235_v6 }
 0x2cb   :  { %8564 = vmatpush3.msra.mxu1 %v9601_v60  ;;  %8574 = vmatpush3.msra.mxu0 %v9601_v60 }
 0x2cc   :  { %8568 = vmatprep.subr.mxu1 %v11235_v6  ;;  %8864 = vmatprep.subr.bf16.mxu0 %v9515_v28 }
 0x39c   :  { %v254_v54 = vpop.f32.mrb[2].mxu1  ;;  %v325_v55 = vpop.f32.mrb[0].mxu0 }
 0x39d   :  { %v255_v56 = vadd.f32 %v254_v54, %v9589_v52  ;;  %v326_v57 = vadd.f32 %v325_v55, %v9592_v53  ;;  %v9596_v58 = vpop.f32.mrb[3].mxu1  ;;  %v8562_v59 = vpop.f32.mrb[1].mxu0 }
 0x39f   :  { %9058 = vtanh.f32 %v255_v56  ;;  %v8328_v27 = vmul.f32 -1.442695, %v326_v57 }
 0x3a0   :  { %9060 = vtanh.f32 %v326_v57 }
 0x3a1   :  { %9062 = vpow2.f32 %v8328_v27 }
 0x3a9   :  { %v9059_v61 = vpop.eup %9058 }
 0x3aa   :  { %v9607_v62 = vpop.eup %9060  ;;  %333 = vrot.lane.b32.xlu1 %v9059_v61, %s9382_s19 }
 0x3ab   :  { %497 = vrot.lane.b32.xlu0 %v9607_v62, %s9384_s6  ;;  %v419_v23 = vrot.slane %v9607_v62, %v9634_v22  ;;  %v411_v25 = vrot.slane %v9607_v62, %v9579_v49  ;;  %v9063_v29 = vpop.eup %9062 }
 0x3ac   :  { %v340_v30 = vadd.f32 1.0, %v9063_v29 }
 0x3ae   :  { %9064 = vrcp.f32 %v340_v30 }
 0x3b8   :  { %v9065_v31 = vpop.eup %9064 }
 0x3b9   :  { %v392_v34 = vrot.slane %v9065_v31, %v9613_v5 }
 0x3bb   :  { %v393_v35 = vcombine.high %v392_v34, %v392_v34  ;;  %v400_v40 = vrot.slane %v392_v34, %v9613_v5 }
 0x3bd   :  { %v407_v38 = vrot.slane %v393_v35, %v9613_v5  ;;  %v429_v55 = vrot.slane %v400_v40, %v9579_v49 }
 0x3bf   :  { %v433_v44 = vrot.slane %v407_v38, %v9579_v49 }
 0x41c   :  { %v334_v2 = vpop.permute.xlu1 %333 }
 0x41d   :  { %v498_v8 = vpop.permute.xlu0 %497  ;;  %v336_v9 = vmul.f32 %v9059_v61, %v334_v2 }
 0x41e   :  { %8566 = vmatmul.mubr.msk.f32.vlgmr.msra.gmra.mrb[4].mxu1 %vm499_vm2, %v498_v8 }
 0x41f   :  { %v350_v10 = vrot.slane %v336_v9, %v9613_v5  ;;  %8569 = vmatpush3.msra.mxu1 %v9601_v60  ;;  %8570 = vmatprep.mubr.msk.f32.mxu1 %vm9380_vm0, %v11235_v6 }
 0x420   :  { %8857 = vmatprep.subr.bf16.mxu1 %v11231_v3 }
 0x421   :  { %v351_v11 = vcombine.high %v350_v10, %v350_v10  ;;  %v358_v12 = vrot.slane %v350_v10, %v9613_v5 }
 0x423   :  { %v369_v14 = vrot.slane %v358_v12, %v9579_v49  ;;  %v365_v15 = vrot.slane %v351_v11, %v9613_v5 }
 0x425   :  { %v376_v17 = vmul.f32 %v369_v14, %v61_v13  ;;  %v373_v18 = vrot.slane %v365_v15, %v9579_v49 }
 0x427   :  { %v379_v19 = vsel %vm378_vm3, %v376_v17, 0.0  ;;  %v377_v20 = vmul.f32 %v373_v18, %v62_v16 }
 0x428   :  { %380 = vadd.xlane.f32.xlu1 %v379_v19 }
 0x429   :  { %v382_v21 = vsel %vm378_vm3, %v377_v20, 0.0 }
 0x42a   :  { %383 = vadd.xlane.f32.xlu0 %v382_v21 }
 0x439   :  { %422 = vbcast.lane.b32.xlu1 %v419_v23, 320 }
 0x440   :  { %414 = vbcast.lane.b32.xlu0 %v411_v25, 320 }
 0x4b5   :  { %v381_v36 = vpop.xlane.xlu1 %380 }
 0x4b7   :  { %v384_v39 = vpop.xlane.xlu0 %383 }
 0x4b9   :  { %v423_v43 = vpop.permute.xlu1 %422 }
 0x4ba   :  { %v425_v45 = vsub.f32 %v423_v43, %v384_v39 }
 0x4bb   :  { %v415_v50 = vpop.permute.xlu0 %414 }
 0x4bc   :  { %v437_v54 = vmul.f32 %v433_v44, %v425_v45  ;;  %v424_v56 = vsub.f32 %v415_v50, %v381_v36 }
 0x4be   :  { %v436_v57 = vmul.f32 %v429_v55, %v424_v56  ;;  %445 = vperm.xlu0 %9029, %v437_v54  }
 0x4c0   :  { %440 = vperm.xlu1 %9028, %v436_v57  }
 0x4f1   :  { %v568_v59 = vpop.f32.mrb[4].mxu1 }
 0x4f2   :  { %v8567_v61 = vpop.f32.mrb[5].mxu1 }
 0x53d   :  { %v446_v63 = vpop.permute.xlu0 %445 }
 0x53e   :  { %v449_v0 = vmul.f32 %v446_v63, %v373_v18 }
 0x53f   :  { %v441_v1 = vpop.permute.xlu1 %440 }
 0x540   :  { %v451_v2 = vadd.f32 %v449_v0, %v62_v16  ;;  %v448_v8 = vmul.f32 %v441_v1, %v369_v14 }
 0x542   :  { %v450_v9 = vadd.f32 %v448_v8, %v61_v13  ;;  %v453_v10 = vmul.f32 %v451_v2, %v451_v2  ;;  %v9651_v13 = vrot.slane %v9585_v51, %v9634_v22 }
 0x544   :  { %v457_v11 = vsel %vm378_vm3, %v453_v10, 0.0  ;;  %v452_v12 = vmul.f32 %v450_v9, %v450_v9  ;;  %v257_v34 = vadd.f32 %v9596_v58, %v9651_v13 }
 0x545   :  { %458 = vadd.xlane.f32.xlu0 %v457_v11 }
 0x546   :  { %v454_v15 = vsel %vm378_vm3, %v452_v12, 0.0 }
 0x547   :  { %455 = vadd.xlane.f32.xlu1 %v454_v15 }
 0x5d2   :  { %v459_v17 = vpop.xlane.xlu0 %458 }
 0x5d3   :  { %v466_v19 = vrot.slane %v459_v17, 4 }
 0x5d4   :  { %v456_v20 = vpop.xlane.xlu1 %455 }
 0x5d5   :  { %v467_v21 = vadd.f32 %v466_v19, %v459_v17  ;;  %v460_v23 = vrot.slane %v456_v20, 4 }
 0x5d7   :  { %v468_v25 = vrot.slane %v467_v21, 2  ;;  %v461_v27 = vadd.f32 %v460_v23, %v456_v20 }
 0x5d9   :  { %v469_v18 = vadd.f32 %v468_v25, %v467_v21  ;;  %v462_v29 = vrot.slane %v461_v27, 2 }
 0x5db   :  { %v470_v16 = vrot.slane %v469_v18, 1  ;;  %v463_v14 = vadd.f32 %v462_v29, %v461_v27 }
 0x5dd   :  { %v471_v30 = vadd.f32 %v470_v16, %v469_v18  ;;  %v464_v31 = vrot.slane %v463_v14, 1 }
 0x5df   :  { %9066 = vrsqrt.f32 %v471_v30  ;;  %v465_v35 = vadd.f32 %v464_v31, %v463_v14  ;;  %vm481_vm4 = vcmp.eq.f32.partialorder %v471_v30, inf  ;;  %v484_v39 = vand.u32 2147483648, %v471_v30 }
 0x5e0   :  { %vm483_vm5 = vcmp.eq.f32.partialorder %v471_v30, 0.0 }
 0x5e1   :  { %9068 = vrsqrt.f32 %v465_v35  ;;  %vm474_vm6 = vcmp.eq.f32.partialorder %v465_v35, inf  ;;  %v477_v50 = vand.u32 2147483648, %v465_v35  ;;  %vm476_vm7 = vcmp.eq.f32.partialorder %v465_v35, 0.0 }
 0x5e2   :  { %9070 = vtanh.f32 %v257_v34 }
 0x5e9   :  { %v9067_v36 = vpop.eup %9066 }
 0x5ea   :  { %v480_v38 = vmul.f32 %v9067_v36, %v471_v30 }
 0x5eb   :  { %v9069_v40 = vpop.eup %9068 }
 0x5ec   :  { %v482_v43 = vsel %vm481_vm4, %v471_v30, %v480_v38  ;;  %v473_v44 = vmul.f32 %v9069_v40, %v465_v35  ;;  %v9655_v51 = vpop.eup %9070 }
 0x5ed   :  { %v485_v45 = vsel %vm483_vm5, %v484_v39, %v482_v43  ;;  %v572_v55 = vmul.f32 %v9655_v51, %v568_v59  ;;  %v11233_v43 = vmov 0  }
 0x5ee   :  { %v8330_v54 = vadd.f32 -1.0, %v485_v45  ;;  %v475_v58 = vsel %vm474_vm6, %v465_v35, %v473_v44  ;;  %9031 = vset.pattern.permute.xlu0 %v11233_v43  ;;  %9030 = vset.pattern.permute.xlu1 %v11233_v43 }
 0x5ef   :  { %v478_v57 = vsel %vm476_vm7, %v477_v50, %v475_v58  ;;  %v580_v0 = vrot.slane %v572_v55, %v9613_v5 }
 0x5f0   :  { %v489_v56 = vmax.f32 %v8330_v54, 0.0  ;;  %v8329_v61 = vadd.f32 -1.0, %v478_v57 }
 0x5f1   :  { %v581_v10 = vcombine.high %v580_v0, %v580_v0  ;;  %v588_v15 = vrot.slane %v580_v0, %v9613_v5 }
 0x5f2   :  { %v491_v63 = vadd.f32 1.0, %v489_v56  ;;  %v488_v1 = vmax.f32 %v8329_v61, 0.0 }
 0x5f3   :  { %v595_v11 = vrot.slane %v581_v10, %v9613_v5  ;;  %v599_v23 = vrot.slane %v588_v15, %v9579_v49 }
 0x5f4   :  { %9072 = vrcp.f32 %v491_v63  ;;  %v490_v8 = vadd.f32 1.0, %v488_v1 }
 0x5f5   :  { %v603_v59 = vrot.slane %v595_v11, %v9579_v49 }
 0x5f6   :  { %9074 = vrcp.f32 %v490_v8 }
 0x5fe   :  { %v9073_v12 = vpop.eup %9072 }
 0x5ff   :  { %v9661_v17 = vmul.f32 %v9073_v12, %v451_v2  ;;  %v9672_v2 = vand.u32 127, %v168_v47 }
 0x600   :  { %v9075_v19 = vpop.eup %9074 }
 0x601   :  { %v607_v20 = vmul.f32 %v603_v59, %v9661_v17  ;;  %v9665_v21 = vmul.f32 %v9075_v19, %v450_v9  ;;  %11254 = vst [vmem:[#allocation11_spill] sm:$0xff] %v9672_v2  ;;  %v9676_v29 = vsub.s32 %v9672_v2, %v9576_v48 }
 0x603   :  { %v611_v25 = vsel %vm378_vm3, %v607_v20, 0.0  ;;  %v606_v27 = vmul.f32 %v599_v23, %v9665_v21 }
 0x604   :  { %612 = vadd.xlane.f32.xlu0 %v611_v25 }
 0x605   :  { %v608_v18 = vsel %vm378_vm3, %v606_v27, 0.0 }
 0x606   :  { %609 = vadd.xlane.f32.xlu1 %v608_v18 }
 0x691   :  { %v613_v16 = vpop.xlane.xlu0 %612 }
 0x692   :  { %v636_v9 = vmul.f32 %v613_v16, %v613_v16  ;;  %v625_v30 = vrot.slane %v613_v16, %v9676_v29 }
 0x693   :  { %v610_v14 = vpop.xlane.xlu1 %609 }
 0x694   :  { %v621_v31 = vrot.slane %v610_v14, %v9676_v29  ;;  %v635_v34 = vmul.f32 %v610_v14, %v610_v14  ;;  %v646_v47 = vrot.slane %v636_v9, %v9676_v29 }
 0x696   :  { %v627_v35 = vsel %vm626_vm8, %v625_v30, %v621_v31  ;;  %v642_v36 = vrot.slane %v635_v34, %v9676_v29 }
 0x697   :  { %v630_v38 = vsel %vm629_vm9, %v627_v35, 0.0 }
 0x698   :  { %631 = vadd.xlane.f32.xlu1 %v630_v38  ;;  %v647_v39 = vsel %vm626_vm8, %v646_v47, %v642_v36 }
 0x699   :  { %v649_v40 = vsel %vm629_vm9, %v647_v39, 0.0 }
 0x69a   :  { %650 = vadd.xlane.f32.xlu0 %v649_v40 }
 0x725   :  { %v632_v44 = vpop.xlane.xlu1 %631 }
 0x726   :  { %v634_v45 = vmul.f32 0.125, %v632_v44 }
 0x727   :  { %v651_v50 = vpop.xlane.xlu0 %650 }
 0x728   :  { %v653_v54 = vmul.f32 %v634_v45, %v634_v45  ;;  %v652_v55 = vmul.f32 0.125, %v651_v50  ;;  %v659_v57 = vrot.slane %v634_v45, %v9579_v49  ;;  %v663_v61 = vrot.slane %v634_v45, %v9634_v22 }
 0x72a   :  { %v654_v58 = vsub.f32 %v652_v55, %v653_v54  ;;  %v667_v0 = vsub.f32 %v613_v16, %v663_v61  ;;  %v666_v8 = vsub.f32 %v610_v14, %v659_v57  ;;  %v8334_v14 = vld [vmem:[%s11215_s0 + $0x2] sm:$0x3] }
 0x72c   :  { %v668_v56 = vadd.f32 1e-05, %v654_v58 }
 0x72e   :  { %9076 = vrsqrt.f32 %v668_v56 }
 0x738   :  { %v9077_v63 = vpop.eup %9076 }
 0x739   :  { %v678_v1 = vrot.slane %v9077_v63, %v9634_v22  ;;  %v674_v10 = vrot.slane %v9077_v63, %v9579_v49 }
 0x73b   :  { %v682_v11 = vmul.f32 %v678_v1, %v667_v0  ;;  %v681_v12 = vmul.f32 %v674_v10, %v666_v8 }
 0x73d   :  { %689 = vperm.xlu0 %9031, %v682_v11   ;;  %686 = vperm.xlu1 %9030, %v681_v12  }
 0x741   :  { %773 = vrot.lane.b32.xlu1 %v9655_v51, %s9382_s19 }
 0x7bc   :  { %v690_v15 = vpop.permute.xlu0 %689  ;;  %v687_v59 = vpop.permute.xlu1 %686 }
 0x7bd   :  { %v698_v19 = vrot.slane %v690_v15, %v9676_v29  ;;  %v694_v20 = vrot.slane %v687_v59, %v9676_v29 }
 0x7bf   :  { %v699_v23 = vsel %vm626_vm8, %v698_v19, %v694_v20 }
 0x7c0   :  { %8571 = vmatmul.mubr.msk.f32.vlgmr.msra.gmra.mrb[6].mxu1 %vm499_vm2, %v699_v23  ;;  %v774_v51 = vpop.permute.xlu1 %773 }
 0x7c1   :  { %8859 = vmatpush3.bf16.msra.mxu1 %v9474_v4  ;;  %8586 = vmatprep.mubr.msk.f32.mxu1 %vm9380_vm0, %v11235_v6 }
 0x7c2   :  { %8860 = vmatprep.subr.bf16.mxu1 %v11231_v3 }
 0x7c5   :  { %8862 = vmatpush3.bf16.msra.mxu1 %v9485_v7 }
 0x7c6   :  { %8871 = vmatprep.subr.bf16.mxu1 %v11231_v3 }
 0x7c8   :  { %8587 = vmatmul.mubr.msk.f32.vlgmr.msra.gmra.mrb[8].mxu1 %vm64_vm1, %v9565_v46 }
 0x7c9   :  { %8873 = vmatpush3.bf16.msra.mxu1 %v9528_v33  ;;  %8597 = vmatprep.mubr.msk.f32.mxu1 %vm9380_vm0, %v11235_v6 }
 0x7ca   :  { %8874 = vmatprep.subr.bf16.mxu1 %v11231_v3 }
 0x7cd   :  { %8876 = vmatpush3.bf16.msra.mxu1 %v9555_v42 }
 0x7ce   :  { %8610 = vmatprep.subr.mxu1 %v11235_v6 }
 0x893   :  { %v768_v25 = vpop.f32.mrb[6].mxu1 }
 0x894   :  { %v776_v27 = vmul.f32 %v774_v51, %v768_v25  ;;  %v8572_v18 = vpop.f32.mrb[7].mxu1 }
 0x896   :  { %v784_v16 = vrot.slane %v776_v27, %v9613_v5 }
 0x898   :  { %v785_v9 = vcombine.high %v784_v16, %v784_v16  ;;  %v792_v40 = vrot.slane %v784_v16, %v9613_v5 }
 0x89a   :  { %v799_v30 = vrot.slane %v785_v9, %v9613_v5  ;;  %v803_v44 = vrot.slane %v792_v40, %v9579_v49 }
 0x89b   :  { %v1145_v31 = vpop.f32.mrb[8].mxu1 }
 0x89c   :  { %v1149_v34 = vadd.f32 %v8334_v14, %v1145_v31  ;;  %v8588_v35 = vpop.f32.mrb[9].mxu1  ;;  %v807_v36 = vrot.slane %v799_v30, %v9579_v49  ;;  %v810_v45 = vmul.f32 %v803_v44, %v9665_v21 }
 0x89e   :  { %9078 = vtanh.f32 %v1149_v34  ;;  %v811_v47 = vmul.f32 %v807_v36, %v9661_v17  ;;  %v812_v50 = vsel %vm378_vm3, %v810_v45, 0.0  ;;  %v8336_v54 = vmul.f32 -1.442695, %v1149_v34 }
 0x8a0   :  { %v815_v38 = vsel %vm378_vm3, %v811_v47, 0.0  ;;  %9080 = vpow2.f32 %v8336_v54 }
 0x8a1   :  { %816 = vadd.xlane.f32.xlu0 %v815_v38 }
 0x8a8   :  { %v9079_v39 = vpop.eup %9078 }
 0x8a9   :  { %1159 = vrot.lane.b32.xlu1 %v9079_v39, %s9382_s19 }
 0x8aa   :  { %v9081_v55 = vpop.eup %9080 }
 0x8ab   :  { %v1153_v58 = vadd.f32 1.0, %v9081_v55 }
 0x8ad   :  { %9082 = vrcp.f32 %v1153_v58 }
 0x8b7   :  { %v9083_v56 = vpop.eup %9082 }
 0x8b8   :  { %v1157_v51 = vmul.f32 %v9083_v56, %v9503_v24 }
 0x8cd   :  { %813 = vadd.xlane.f32.xlu1 %v812_v50 }
 0x91b   :  { %v1160_v57 = vpop.permute.xlu1 %1159 }
 0x91c   :  { %v1162_v61 = vmul.f32 %v9083_v56, %v1160_v57 }
 0x91e   :  { %1164 = vrot.lane.b32.xlu1 %v1162_v61, %s9383_s1 }
 0x92e   :  { %v817_v63 = vpop.xlane.xlu0 %816 }
 0x92f   :  { %v835_v0 = vmul.f32 %v817_v63, %v817_v63  ;;  %v827_v8 = vrot.slane %v817_v63, %v9676_v29 }
 0x931   :  { %v845_v59 = vrot.slane %v835_v0, %v9676_v29 }
 0x95a   :  { %v814_v1 = vpop.xlane.xlu1 %813 }
 0x95b   :  { %v823_v10 = vrot.slane %v814_v1, %v9676_v29  ;;  %v834_v11 = vmul.f32 %v814_v1, %v814_v1 }
 0x95d   :  { %v828_v12 = vsel %vm626_vm8, %v827_v8, %v823_v10  ;;  %v841_v15 = vrot.slane %v834_v11, %v9676_v29 }
 0x95e   :  { %v830_v19 = vsel %vm629_vm9, %v828_v12, 0.0 }
 0x95f   :  { %831 = vadd.xlane.f32.xlu0 %v830_v19  ;;  %v846_v20 = vsel %vm626_vm8, %v845_v59, %v841_v15 }
 0x960   :  { %v848_v23 = vsel %vm629_vm9, %v846_v20, 0.0 }
 0x961   :  { %849 = vadd.xlane.f32.xlu1 %v848_v23 }
 0x990   :  { %v1165_v25 = vpop.permute.xlu1 %1164 }
 0x991   :  { %v9735_v27 = vadd.f32 %v1165_v25, %v1157_v51 }
 0x993   :  { %9084 = vtanh.f32 %v9735_v27 }
 0x99d   :  { %v9085_v18 = vpop.eup %9084 }
 0x99e   :  { %1170 = vrot.lane.b32.xlu0 %v9085_v18, %s9382_s19 }
 0x9ec   :  { %v832_v16 = vpop.xlane.xlu0 %831 }
 0x9ed   :  { %v833_v9 = vmul.f32 0.125, %v832_v16 }
 0x9ee   :  { %v850_v14 = vpop.xlane.xlu1 %849 }
 0x9ef   :  { %v852_v30 = vmul.f32 %v833_v9, %v833_v9  ;;  %v851_v31 = vmul.f32 0.125, %v850_v14  ;;  %v858_v36 = vrot.slane %v833_v9, %v9579_v49  ;;  %v862_v24 = vrot.slane %v833_v9, %v9634_v22 }
 0x9f1   :  { %v853_v34 = vsub.f32 %v851_v31, %v852_v30  ;;  %v865_v38 = vsub.f32 %v814_v1, %v858_v36  ;;  %v866_v45 = vsub.f32 %v817_v63, %v862_v24 }
 0x9f3   :  { %v867_v35 = vadd.f32 1e-05, %v853_v34 }
 0x9f5   :  { %9086 = vrsqrt.f32 %v867_v35 }
 0x9ff   :  { %v9087_v47 = vpop.eup %9086 }
 0xa00   :  { %v873_v39 = vrot.slane %v9087_v47, %v9579_v49  ;;  %v877_v44 = vrot.slane %v9087_v47, %v9634_v22 }
 0xa02   :  { %v880_v40 = vmul.f32 %v873_v39, %v865_v38  ;;  %v881_v50 = vmul.f32 %v877_v44, %v866_v45 }
 0xa04   :  { %885 = vperm.xlu0 %9031, %v880_v40  }
 0xa08   :  { %888 = vperm.xlu0 %9031, %v881_v50  }
 0xa0c   :  { %9032 = vset.pattern.permute.xlu0 %v11229_v26 }
 0xa10   :  { %v1171_v54 = vpop.permute.xlu0 %1170 }
 0xa11   :  { %v9744_v55 = vmul.f32 %v9083_v56, %v1171_v54 }
 0xa13   :  { %11255 = vst [vmem:[#allocation12_spill] sm:$0xff] %v9744_v55  ;;  %1175 = vrot.lane.b32.xlu0 %v9744_v55, %s9383_s1 }
 0xa83   :  { %v886_v58 = vpop.permute.xlu0 %885 }
 0xa84   :  { %v893_v61 = vrot.slane %v886_v58, %v9676_v29 }
 0xa87   :  { %v889_v57 = vpop.permute.xlu0 %888 }
 0xa88   :  { %v897_v0 = vrot.slane %v889_v57, %v9676_v29 }
 0xa8a   :  { %v898_v1 = vsel %vm626_vm8, %v897_v0, %v893_v61 }
 0xa8b   :  { %8576 = vmatmul.mubr.msk.f32.vlgmr.msra.gmra.mrb[2].mxu0 %vm499_vm2, %v898_v1  ;;  %v9752_v63 = vpop.permute.xlu0 %1175 }
 0xa8c   :  { %8866 = vmatpush1.bf16.msra.mxu0 %v9526_v32  ;;  %8598 = vmatmul.mubr.msk.f32.vlgmr.msra.gmra.mrb[10].mxu1 %vm64_vm1, %v9752_v63 }
 0xa8d   :  { %8868 = vmatprep.subr.bf16.mxu0 %v9540_v37  ;;  %1243 = vmatprep.mubr.f32.mxu0 %v11235_v6 }
 0xa8e   :  { %8611 = vmatpush3.msra.mxu1 %v9601_v60  ;;  %8612 = vmatprep.mubr.msk.f32.mxu1 %vm9380_vm0, %v11235_v6 }
 0xa8f   :  { %8884 = vmatprep.subr.bf16.mxu1 %v9515_v28 }
 0xa90   :  { %8870 = vmatpush1.bf16.msra.mxu0 %v9553_v41 }
 0xa91   :  { %8600 = vmatprep.subr.mxu0 %v11235_v6 }
 0xa93   :  { %8337 = vmatmul.mubr.msk.f32.vlgmr.msra.gmra.mrb[4].mxu0 %vm64_vm1, %v9752_v63 }
 0xa94   :  { %8601 = vmatpush3.msra.mxu0 %v9601_v60  ;;  %8602 = vmatprep.mubr.msk.f32.mxu0 %vm9380_vm0, %v11235_v6 }
 0xa95   :  { %8605 = vmatprep.subr.mxu0 %v11235_v6 }
 0xb5e   :  { %v9771_v56 = vpop.f32.mrb[2].mxu0 }
 0xb5f   :  { %v8577_v8 = vpop.f32.mrb[3].mxu0  ;;  %v1316_v10 = vpop.f32.mrb[10].mxu1 }
 0xb60   :  { %v1317_v11 = vadd.f32 %v1316_v10, %v9592_v53  ;;  %v8599_v12 = vpop.f32.mrb[11].mxu1 }
 0xb62   :  { %9088 = vtanh.f32 %v1317_v11  ;;  %v8339_v39 = vmul.f32 -1.442695, %v1317_v11 }
 0xb66   :  { %v1245_v15 = vpop.f32.mrb[4].mxu0 }
 0xb67   :  { %v1246_v59 = vadd.f32 %v1245_v15, %v9589_v52  ;;  %v9775_v19 = vpop.f32.mrb[5].mxu0 }
 0xb69   :  { %9090 = vtanh.f32 %v1246_v59 }
 0xb6a   :  { %9092 = vpow2.f32 %v8339_v39 }
 0xb6c   :  { %v9777_v20 = vpop.eup %9088 }
 0xb6d   :  { %1487 = vrot.lane.b32.xlu0 %v9777_v20, %s9384_s6  ;;  %v1409_v24 = vrot.slane %v9777_v20, %v9634_v22  ;;  %v1401_v38 = vrot.slane %v9777_v20, %v9579_v49 }
 0xb73   :  { %v9091_v23 = vpop.eup %9090 }
 0xb74   :  { %1324 = vrot.lane.b32.xlu1 %v9091_v23, %s9382_s19  ;;  %v9093_v40 = vpop.eup %9092 }
 0xb75   :  { %v1331_v44 = vadd.f32 1.0, %v9093_v40 }
 0xb77   :  { %9094 = vrcp.f32 %v1331_v44 }
 0xb81   :  { %v9095_v45 = vpop.eup %9094 }
 0xb82   :  { %v1382_v50 = vrot.slane %v9095_v45, %v9613_v5 }
 0xb84   :  { %v1390_v58 = vrot.slane %v1382_v50, %v9613_v5  ;;  %v1383_v57 = vcombine.high %v1382_v50, %v1382_v50 }
 0xb86   :  { %v1419_v1 = vrot.slane %v1390_v58, %v9579_v49  ;;  %v1397_v10 = vrot.slane %v1383_v57, %v9613_v5 }
 0xb88   :  { %v1423_v59 = vrot.slane %v1397_v10, %v9579_v49 }
 0xbdf   :  { %v1488_v51 = vpop.permute.xlu0 %1487 }
 0xbe0   :  { %8603 = vmatmul.mubr.msk.f32.vlgmr.msra.gmra.mrb[6].mxu0 %vm499_vm2, %v1488_v51 }
 0xbe1   :  { %8606 = vmatpush3.msra.mxu0 %v9601_v60  ;;  %8607 = vmatprep.mubr.msk.f32.mxu0 %vm9380_vm0, %v11235_v6 }
 0xbe2   :  { %8877 = vmatprep.subr.bf16.mxu0 %v11231_v3 }
 0xbe6   :  { %v1325_v25 = vpop.permute.xlu1 %1324 }
 0xbe7   :  { %v1327_v18 = vmul.f32 %v9091_v23, %v1325_v25 }
 0xbe9   :  { %v1341_v16 = vrot.slane %v1327_v18, %v9613_v5 }
 0xbeb   :  { %v1342_v9 = vcombine.high %v1341_v16, %v1341_v16  ;;  %v1349_v14 = vrot.slane %v1341_v16, %v9613_v5 }
 0xbed   :  { %v1360_v30 = vrot.slane %v1349_v14, %v9579_v49  ;;  %v1356_v31 = vrot.slane %v1342_v9, %v9613_v5 }
 0xbef   :  { %v1367_v34 = vmul.f32 %v1360_v30, %v9665_v21  ;;  %v1364_v60 = vrot.slane %v1356_v31, %v9579_v49 }
 0xbf1   :  { %v1369_v35 = vsel %vm378_vm3, %v1367_v34, 0.0  ;;  %v1368_v36 = vmul.f32 %v1364_v60, %v9661_v17 }
 0xbf2   :  { %1370 = vadd.xlane.f32.xlu0 %v1369_v35 }
 0xbf3   :  { %v1372_v47 = vsel %vm378_vm3, %v1368_v36, 0.0 }
 0xbf4   :  { %1373 = vadd.xlane.f32.xlu1 %v1372_v47 }
 0xc05   :  { %1412 = vbcast.lane.b32.xlu1 %v1409_v24, 320 }
 0xc08   :  { %1404 = vbcast.lane.b32.xlu0 %v1401_v38, 320 }
 0xc7f   :  { %v1371_v54 = vpop.xlane.xlu0 %1370 }
 0xc81   :  { %v1374_v61 = vpop.xlane.xlu1 %1373 }
 0xc83   :  { %v1405_v0 = vpop.permute.xlu0 %1404 }
 0xc84   :  { %v1414_v8 = vsub.f32 %v1405_v0, %v1371_v54 }
 0xc85   :  { %v1413_v12 = vpop.permute.xlu1 %1412 }
 0xc86   :  { %v1426_v11 = vmul.f32 %v1419_v1, %v1414_v8  ;;  %v1415_v15 = vsub.f32 %v1413_v12, %v1374_v61  ;;  %v1248_v8 = vadd.f32 %v9775_v19, %v9651_v13 }
 0xc88   :  { %1430 = vperm.xlu0 %9032, %v1426_v11   ;;  %v1427_v23 = vmul.f32 %v1423_v59, %v1415_v15 }
 0xc8c   :  { %1435 = vperm.xlu0 %9032, %v1427_v23  }
 0xc90   :  { %9033 = vset.pattern.permute.xlu0 %v11233_v43 }
 0xcb3   :  { %v1557_v51 = vpop.f32.mrb[6].mxu0 }
 0xcb4   :  { %v8604_v25 = vpop.f32.mrb[7].mxu0 }
 0xd07   :  { %v1431_v18 = vpop.permute.xlu0 %1430 }
 0xd08   :  { %v1438_v16 = vmul.f32 %v1431_v18, %v1360_v30 }
 0xd0a   :  { %v1440_v9 = vadd.f32 %v1438_v16, %v9665_v21 }
 0xd0b   :  { %v1436_v14 = vpop.permute.xlu0 %1435 }
 0xd0c   :  { %v1439_v31 = vmul.f32 %v1436_v14, %v1364_v60  ;;  %v1442_v34 = vmul.f32 %v1440_v9, %v1440_v9 }
 0xd0e   :  { %v1441_v35 = vadd.f32 %v1439_v31, %v9661_v17  ;;  %v1444_v36 = vsel %vm378_vm3, %v1442_v34, 0.0 }
 0xd0f   :  { %1445 = vadd.xlane.f32.xlu1 %v1444_v36 }
 0xd10   :  { %v1443_v47 = vmul.f32 %v1441_v35, %v1441_v35 }
 0xd12   :  { %v1447_v24 = vsel %vm378_vm3, %v1443_v47, 0.0 }
 0xd13   :  { %1448 = vadd.xlane.f32.xlu0 %v1447_v24 }
 0xd9c   :  { %v1446_v38 = vpop.xlane.xlu1 %1445 }
 0xd9d   :  { %v1450_v39 = vrot.slane %v1446_v38, 4 }
 0xd9f   :  { %v1451_v40 = vadd.f32 %v1450_v39, %v1446_v38 }
 0xda0   :  { %v1449_v44 = vpop.xlane.xlu0 %1448 }
 0xda1   :  { %v1452_v45 = vrot.slane %v1451_v40, 2  ;;  %v1456_v30 = vrot.slane %v1449_v44, 4 }
 0xda3   :  { %v1453_v50 = vadd.f32 %v1452_v45, %v1451_v40  ;;  %v1457_v54 = vadd.f32 %v1456_v30, %v1449_v44 }
 0xda5   :  { %v1454_v58 = vrot.slane %v1453_v50, 1  ;;  %v1458_v60 = vrot.slane %v1457_v54, 2 }
 0xda7   :  { %v1455_v57 = vadd.f32 %v1454_v58, %v1453_v50  ;;  %v1459_v61 = vadd.f32 %v1458_v60, %v1457_v54 }
 0xda9   :  { %9096 = vrsqrt.f32 %v1455_v57  ;;  %v1460_v0 = vrot.slane %v1459_v61, 1  ;;  %vm1464_vm10 = vcmp.eq.f32.partialorder %v1455_v57, inf  ;;  %v1467_v11 = vand.u32 2147483648, %v1455_v57 }
 0xdaa   :  { %vm1466_vm11 = vcmp.eq.f32.partialorder %v1455_v57, 0.0 }
 0xdab   :  { %v1461_v1 = vadd.f32 %v1460_v0, %v1459_v61 }
 0xdad   :  { %9098 = vrsqrt.f32 %v1461_v1  ;;  %vm1471_vm12 = vcmp.eq.f32.partialorder %v1461_v1, inf  ;;  %v1474_v16 = vand.u32 2147483648, %v1461_v1  ;;  %vm1473_vm13 = vcmp.eq.f32.partialorder %v1461_v1, 0.0 }
 0xdae   :  { %9100 = vtanh.f32 %v1248_v8 }
 0xdb3   :  { %v9097_v10 = vpop.eup %9096 }
 0xdb4   :  { %v1463_v12 = vmul.f32 %v9097_v10, %v1455_v57 }
 0xdb6   :  { %v1465_v15 = vsel %vm1464_vm10, %v1455_v57, %v1463_v12 }
 0xdb7   :  { %v1468_v59 = vsel %vm1466_vm11, %v1467_v11, %v1465_v15  ;;  %v9099_v23 = vpop.eup %9098 }
 0xdb8   :  { %v8340_v25 = vadd.f32 -1.0, %v1468_v59  ;;  %v1470_v18 = vmul.f32 %v9099_v23, %v1461_v1  ;;  %v9101_v34 = vpop.eup %9100 }
 0xdb9   :  { %v1561_v47 = vmul.f32 %v9101_v34, %v1557_v51 }
 0xdba   :  { %v1478_v14 = vmax.f32 %v8340_v25, 0.0  ;;  %v1472_v31 = vsel %vm1471_vm12, %v1461_v1, %v1470_v18 }
 0xdbb   :  { %v1475_v19 = vsel %vm1473_vm13, %v1474_v16, %v1472_v31  ;;  %v1569_v39 = vrot.slane %v1561_v47, %v9613_v5 }
 0xdbc   :  { %v1480_v36 = vadd.f32 1.0, %v1478_v14  ;;  %v8341_v24 = vadd.f32 -1.0, %v1475_v19 }
 0xdbd   :  { %v1577_v44 = vrot.slane %v1569_v39, %v9613_v5  ;;  %v1570_v45 = vcombine.high %v1569_v39, %v1569_v39 }
 0xdbe   :  { %9102 = vrcp.f32 %v1480_v36  ;;  %v1479_v38 = vmax.f32 %v8341_v24, 0.0 }
 0xdbf   :  { %v1588_v54 = vrot.slane %v1577_v44, %v9579_v49  ;;  %v1584_v58 = vrot.slane %v1570_v45, %v9613_v5 }
 0xdc0   :  { %v1481_v40 = vadd.f32 1.0, %v1479_v38 }
 0xdc1   :  { %v1592_v0 = vrot.slane %v1584_v58, %v9579_v49 }
 0xdc2   :  { %9104 = vrcp.f32 %v1481_v40 }
 0xdc8   :  { %v9103_v30 = vpop.eup %9102 }
 0xdc9   :  { %v9814_v50 = vmul.f32 %v9103_v30, %v1440_v9 }
 0xdcb   :  { %v1595_v60 = vmul.f32 %v1588_v54, %v9814_v50 }
 0xdcc   :  { %v9105_v51 = vpop.eup %9104 }
 0xdcd   :  { %v1597_v57 = vsel %vm378_vm3, %v1595_v60, 0.0  ;;  %v9820_v61 = vmul.f32 %v9105_v51, %v1441_v35 }
 0xdce   :  { %1598 = vadd.xlane.f32.xlu0 %v1597_v57 }
 0xdcf   :  { %v1596_v1 = vmul.f32 %v1592_v0, %v9820_v61 }
 0xdd1   :  { %v1600_v8 = vsel %vm378_vm3, %v1596_v1, 0.0 }
 0xdd2   :  { %1601 = vadd.xlane.f32.xlu0 %v1600_v8 }
 0xe5b   :  { %v1599_v9 = vpop.xlane.xlu0 %1598 }
 0xe5c   :  { %v1619_v10 = vmul.f32 %v1599_v9, %v1599_v9  ;;  %v1608_v11 = vrot.slane %v1599_v9, %v9676_v29 }
 0xe5e   :  { %v1626_v35 = vrot.slane %v1619_v10, %v9676_v29 }
 0xe5f   :  { %v1602_v12 = vpop.xlane.xlu0 %1601 }
 0xe60   :  { %v1612_v15 = vrot.slane %v1602_v12, %v9676_v29  ;;  %v1620_v59 = vmul.f32 %v1602_v12, %v1602_v12 }
 0xe62   :  { %v1613_v23 = vsel %vm626_vm8, %v1612_v15, %v1608_v11  ;;  %v1630_v25 = vrot.slane %v1620_v59, %v9676_v29 }
 0xe63   :  { %v1615_v18 = vsel %vm629_vm9, %v1613_v23, 0.0 }
 0xe64   :  { %1616 = vadd.xlane.f32.xlu1 %v1615_v18  ;;  %v1631_v16 = vsel %vm626_vm8, %v1630_v25, %v1626_v35 }
 0xe65   :  { %v1633_v14 = vsel %vm629_vm9, %v1631_v16, 0.0 }
 0xe66   :  { %1634 = vadd.xlane.f32.xlu0 %v1633_v14 }
 0xef1   :  { %v1617_v31 = vpop.xlane.xlu1 %1616 }
 0xef2   :  { %v1618_v36 = vmul.f32 0.125, %v1617_v31 }
 0xef3   :  { %v1635_v19 = vpop.xlane.xlu0 %1634 }
 0xef4   :  { %v1637_v47 = vmul.f32 %v1618_v36, %v1618_v36  ;;  %v1636_v24 = vmul.f32 0.125, %v1635_v19  ;;  %v1643_v40 = vrot.slane %v1618_v36, %v9579_v49  ;;  %v1647_v44 = vrot.slane %v1618_v36, %v9634_v22 }
 0xef6   :  { %v1638_v38 = vsub.f32 %v1636_v24, %v1637_v47  ;;  %v1651_v30 = vsub.f32 %v1602_v12, %v1647_v44  ;;  %v1650_v58 = vsub.f32 %v1599_v9, %v1643_v40 }
 0xef8   :  { %v1652_v39 = vadd.f32 1e-05, %v1638_v38 }
 0xefa   :  { %9106 = vrsqrt.f32 %v1652_v39 }
 0xf04   :  { %v9107_v45 = vpop.eup %9106 }
 0xf05   :  { %v1662_v54 = vrot.slane %v9107_v45, %v9634_v22  ;;  %v1658_v60 = vrot.slane %v9107_v45, %v9579_v49 }
 0xf07   :  { %v1666_v51 = vmul.f32 %v1662_v54, %v1651_v30  ;;  %v1665_v57 = vmul.f32 %v1658_v60, %v1650_v58 }
 0xf09   :  { %1673 = vperm.xlu0 %9033, %v1666_v51   ;;  %1670 = vperm.xlu1 %9030, %v1665_v57  }
 0xf0d   :  { %1757 = vrot.lane.b32.xlu1 %v9101_v34, %s9382_s19 }
 0xf88   :  { %v1674_v0 = vpop.permute.xlu0 %1673  ;;  %v1671_v1 = vpop.permute.xlu1 %1670 }
 0xf89   :  { %v1682_v8 = vrot.slane %v1674_v0, %v9676_v29  ;;  %v1678_v10 = vrot.slane %v1671_v1, %v9676_v29 }
 0xf8b   :  { %v1683_v11 = vsel %vm626_vm8, %v1682_v8, %v1678_v10 }
 0xf8c   :  { %8608 = vmatmul.mubr.msk.f32.vlgmr.msra.gmra.mrb[8].mxu0 %vm499_vm2, %v1683_v11  ;;  %v1758_v34 = vpop.permute.xlu1 %1757 }
 0xf8d   :  { %8879 = vmatpush3.bf16.msra.mxu0 %v9474_v4  ;;  %8623 = vmatprep.mubr.msk.f32.mxu0 %vm9380_vm0, %v11235_v6 }
 0xf8e   :  { %8880 = vmatprep.subr.bf16.mxu0 %v11231_v3 }
 0xf91   :  { %8882 = vmatpush3.bf16.msra.mxu0 %v9485_v7 }
 0xf92   :  { %8891 = vmatprep.subr.bf16.mxu0 %v11231_v3 }
 0xf94   :  { %8624 = vmatmul.mubr.msk.f32.vlgmr.msra.gmra.mrb[10].mxu0 %vm64_vm1, %v9752_v63  ;;  %v8345_v63 = vld [vmem:[%s11215_s0 + $0x4] sm:$0x3] }
 0xf95   :  { %8893 = vmatpush3.bf16.msra.mxu0 %v9528_v33  ;;  %8634 = vmatprep.mubr.msk.f32.mxu0 %vm9380_vm0, %v11235_v6 }
 0xf96   :  { %8894 = vmatprep.subr.bf16.mxu0 %v11231_v3 }
 0xf99   :  { %8896 = vmatpush3.bf16.msra.mxu0 %v9555_v42 }
 0xf9a   :  { %8647 = vmatprep.subr.mxu0 %v11235_v6 }
0x105f   :  { %v1752_v9 = vpop.f32.mrb[8].mxu0 }
0x1060   :  { %v1760_v12 = vmul.f32 %v1758_v34, %v1752_v9  ;;  %v8609_v15 = vpop.f32.mrb[9].mxu0 }
0x1062   :  { %v1768_v59 = vrot.slane %v1760_v12, %v9613_v5 }
0x1064   :  { %v1769_v23 = vcombine.high %v1768_v59, %v1768_v59  ;;  %v1776_v47 = vrot.slane %v1768_v59, %v9613_v5 }
0x1066   :  { %v1783_v35 = vrot.slane %v1769_v23, %v9613_v5  ;;  %v1787_v24 = vrot.slane %v1776_v47, %v9579_v49 }
0x1067   :  { %v2129_v25 = vpop.f32.mrb[10].mxu0 }
0x1068   :  { %v2133_v18 = vadd.f32 %v8345_v63, %v2129_v25  ;;  %v8625_v16 = vpop.f32.mrb[11].mxu0  ;;  %v1791_v14 = vrot.slane %v1783_v35, %v9579_v49  ;;  %v1794_v38 = vmul.f32 %v1787_v24, %v9814_v50 }
0x106a   :  { %9108 = vtanh.f32 %v2133_v18  ;;  %v1795_v31 = vmul.f32 %v1791_v14, %v9820_v61  ;;  %v1796_v39 = vsel %vm378_vm3, %v1794_v38, 0.0  ;;  %v8347_v40 = vmul.f32 -1.442695, %v2133_v18 }
0x106c   :  { %v1799_v36 = vsel %vm378_vm3, %v1795_v31, 0.0  ;;  %9110 = vpow2.f32 %v8347_v40 }
0x106d   :  { %1800 = vadd.xlane.f32.xlu0 %v1799_v36 }
0x1074   :  { %v9109_v19 = vpop.eup %9108 }
0x1075   :  { %2143 = vrot.lane.b32.xlu1 %v9109_v19, %s9382_s19 }
0x1076   :  { %v9111_v44 = vpop.eup %9110 }
0x1077   :  { %v2137_v45 = vadd.f32 1.0, %v9111_v44 }
0x1079   :  { %9112 = vrcp.f32 %v2137_v45 }
0x1083   :  { %v9113_v30 = vpop.eup %9112 }
0x1084   :  { %v2141_v59 = vmul.f32 %v9113_v30, %v9735_v27 }
0x1099   :  { %1797 = vadd.xlane.f32.xlu1 %v1796_v39 }
0x10e7   :  { %v2144_v54 = vpop.permute.xlu1 %2143 }
0x10e8   :  { %v2146_v58 = vmul.f32 %v9113_v30, %v2144_v54 }
0x10ea   :  { %2148 = vrot.lane.b32.xlu1 %v2146_v58, %s9383_s1 }
0x10fa   :  { %v1801_v60 = vpop.xlane.xlu0 %1800 }
0x10fb   :  { %v1819_v51 = vmul.f32 %v1801_v60, %v1801_v60  ;;  %v1811_v0 = vrot.slane %v1801_v60, %v9676_v29 }
0x10fd   :  { %v1829_v34 = vrot.slane %v1819_v51, %v9676_v29 }
0x1126   :  { %v1798_v57 = vpop.xlane.xlu1 %1797 }
0x1127   :  { %v1807_v1 = vrot.slane %v1798_v57, %v9676_v29  ;;  %v1818_v8 = vmul.f32 %v1798_v57, %v1798_v57 }
0x1129   :  { %v1812_v10 = vsel %vm626_vm8, %v1811_v0, %v1807_v1  ;;  %v1825_v11 = vrot.slane %v1818_v8, %v9676_v29 }
0x112a   :  { %v1814_v9 = vsel %vm629_vm9, %v1812_v10, 0.0 }
0x112b   :  { %1815 = vadd.xlane.f32.xlu1 %v1814_v9  ;;  %v1830_v12 = vsel %vm626_vm8, %v1829_v34, %v1825_v11 }
0x112c   :  { %v1832_v15 = vsel %vm629_vm9, %v1830_v12, 0.0 }
0x112d   :  { %1833 = vadd.xlane.f32.xlu0 %v1832_v15 }
0x115c   :  { %v2149_v23 = vpop.permute.xlu1 %2148 }
0x115d   :  { %v9879_v63 = vadd.f32 %v2149_v23, %v2141_v59 }
0x115f   :  { %9114 = vtanh.f32 %v9879_v63 }
0x1169   :  { %v9115_v35 = vpop.eup %9114 }
0x116a   :  { %2154 = vrot.lane.b32.xlu0 %v9115_v35, %s9382_s19 }
0x11b8   :  { %v1816_v25 = vpop.xlane.xlu1 %1815 }
0x11b9   :  { %v1817_v18 = vmul.f32 0.125, %v1816_v25 }
0x11ba   :  { %v1834_v16 = vpop.xlane.xlu0 %1833 }
0x11bb   :  { %v1835_v14 = vmul.f32 0.125, %v1834_v16  ;;  %v1836_v31 = vmul.f32 %v1817_v18, %v1817_v18  ;;  %v1842_v47 = vrot.slane %v1817_v18, %v9579_v49  ;;  %v1846_v27 = vrot.slane %v1817_v18, %v9634_v22 }
0x11bd   :  { %v1837_v36 = vsub.f32 %v1835_v14, %v1836_v31  ;;  %v1849_v38 = vsub.f32 %v1798_v57, %v1842_v47  ;;  %v1850_v45 = vsub.f32 %v1801_v60, %v1846_v27 }
0x11bf   :  { %v1851_v19 = vadd.f32 1e-05, %v1837_v36 }
0x11c1   :  { %9116 = vrsqrt.f32 %v1851_v19 }
0x11cb   :  { %v9117_v24 = vpop.eup %9116 }
0x11cc   :  { %v1857_v39 = vrot.slane %v9117_v24, %v9579_v49  ;;  %v1861_v44 = vrot.slane %v9117_v24, %v9634_v22 }
0x11ce   :  { %v1864_v40 = vmul.f32 %v1857_v39, %v1849_v38  ;;  %v1865_v54 = vmul.f32 %v1861_v44, %v1850_v45 }
0x11d0   :  { %1869 = vperm.xlu0 %9033, %v1864_v40  }
0x11d4   :  { %1872 = vperm.xlu0 %9033, %v1865_v54  }
0x11d8   :  { %9034 = vset.pattern.permute.xlu0 %v11229_v26 }
0x11dc   :  { %v2155_v58 = vpop.permute.xlu0 %2154 }
0x11dd   :  { %v9888_v51 = vmul.f32 %v9113_v30, %v2155_v58  ;;  %v9906_v30 = vld [vmem:[%s11222_s7] sm:$0xff] }
0x11df   :  { %11256 = vst [vmem:[#allocation13_spill] sm:$0xff] %v9888_v51  ;;  %2159 = vrot.lane.b32.xlu0 %v9888_v51, %s9383_s1 }
0x124f   :  { %v1870_v0 = vpop.permute.xlu0 %1869 }
0x1250   :  { %v1877_v57 = vrot.slane %v1870_v0, %v9676_v29 }
0x1253   :  { %v1873_v1 = vpop.permute.xlu0 %1872 }
0x1254   :  { %v1881_v8 = vrot.slane %v1873_v1, %v9676_v29 }
0x1256   :  { %v1882_v10 = vsel %vm626_vm8, %v1881_v8, %v1877_v57 }
0x1257   :  { %8613 = vmatmul.mubr.msk.f32.vlgmr.msra.gmra.mrb[12].mxu1 %vm499_vm2, %v1882_v10  ;;  %v9896_v60 = vpop.permute.xlu0 %2159 }
0x1258   :  { %8886 = vmatpush1.bf16.msra.mxu1 %v9526_v32  ;;  %8635 = vmatmul.mubr.msk.f32.vlgmr.msra.gmra.mrb[12].mxu0 %vm64_vm1, %v9896_v60 }
0x1259   :  { %8888 = vmatprep.subr.bf16.mxu1 %v9540_v37  ;;  %2227 = vmatprep.mubr.f32.mxu1 %v11235_v6 }
0x125a   :  { %8648 = vmatpush3.msra.mxu0 %v9906_v30  ;;  %8649 = vmatprep.mubr.msk.f32.mxu0 %vm9380_vm0, %v11235_v6 }
0x125b   :  { %8904 = vmatprep.subr.bf16.mxu0 %v9515_v28 }
0x125c   :  { %8890 = vmatpush1.bf16.msra.mxu1 %v9553_v41 }
0x125d   :  { %8637 = vmatprep.subr.mxu1 %v11235_v6 }
0x125f   :  { %8348 = vmatmul.mubr.msk.f32.vlgmr.msra.gmra.mrb[14].mxu1 %vm64_vm1, %v9896_v60 }
0x1260   :  { %8638 = vmatpush3.msra.mxu1 %v9906_v30  ;;  %8639 = vmatprep.mubr.msk.f32.mxu1 %vm9380_vm0, %v11235_v6 }
0x1261   :  { %8642 = vmatprep.subr.mxu1 %v11235_v6 }
0x132a   :  { %v9920_v11 = vpop.f32.mrb[12].mxu1 }
0x132b   :  { %v8614_v34 = vpop.f32.mrb[13].mxu1  ;;  %v2300_v9 = vpop.f32.mrb[12].mxu0 }
0x132c   :  { %v2301_v12 = vadd.f32 %v2300_v9, %v9592_v53  ;;  %v8636_v15 = vpop.f32.mrb[13].mxu0 }
0x132e   :  { %9118 = vtanh.f32 %v2301_v12  ;;  %v8350_v0 = vmul.f32 -1.442695, %v2301_v12 }
0x1332   :  { %v2229_v59 = vpop.f32.mrb[14].mxu1 }
0x1333   :  { %v2230_v23 = vadd.f32 %v2229_v59, %v9589_v52  ;;  %v9924_v35 = vpop.f32.mrb[15].mxu1 }
0x1335   :  { %9120 = vtanh.f32 %v2230_v23 }
0x1336   :  { %9122 = vpow2.f32 %v8350_v0 }
0x1338   :  { %v9926_v25 = vpop.eup %9118 }
0x1339   :  { %2471 = vrot.lane.b32.xlu0 %v9926_v25, %s9384_s6  ;;  %v2393_v54 = vrot.slane %v9926_v25, %v9634_v22  ;;  %v2385_v58 = vrot.slane %v9926_v25, %v9579_v49 }
0x133f   :  { %v9121_v18 = vpop.eup %9120 }
0x1340   :  { %2308 = vrot.lane.b32.xlu1 %v9121_v18, %s9382_s19  ;;  %v9123_v1 = vpop.eup %9122 }
0x1341   :  { %v2315_v57 = vadd.f32 1.0, %v9123_v1 }
0x1343   :  { %9124 = vrcp.f32 %v2315_v57 }
0x134d   :  { %v9125_v8 = vpop.eup %9124 }
0x134e   :  { %v2366_v10 = vrot.slane %v9125_v8, %v9613_v5 }
0x1350   :  { %v2374_v9 = vrot.slane %v2366_v10, %v9613_v5  ;;  %v2367_v15 = vcombine.high %v2366_v10, %v2366_v10 }
0x13ab   :  { %v2472_v16 = vpop.permute.xlu0 %2471 }
0x13ac   :  { %8640 = vmatmul.mubr.msk.f32.vlgmr.msra.gmra.mrb[16].mxu1 %vm499_vm2, %v2472_v16 }
0x13ad   :  { %8643 = vmatpush3.msra.mxu1 %v9906_v30  ;;  %8644 = vmatprep.mubr.msk.f32.mxu1 %vm9380_vm0, %v11235_v6 }
0x13ae   :  { %8897 = vmatprep.subr.bf16.mxu1 %v11231_v3 }
0x13b2   :  { %v2309_v14 = vpop.permute.xlu1 %2308 }
0x13b3   :  { %v2311_v31 = vmul.f32 %v9121_v18, %v2309_v14  ;;  %v2403_v18 = vrot.slane %v2374_v9, %v9579_v49  ;;  %v2381_v14 = vrot.slane %v2367_v15, %v9613_v5 }
0x13b5   :  { %v2325_v36 = vrot.slane %v2311_v31, %v9613_v5 }
0x13b7   :  { %v2326_v19 = vcombine.high %v2325_v36, %v2325_v36  ;;  %v2333_v47 = vrot.slane %v2325_v36, %v9613_v5 }
0x13b9   :  { %v2344_v24 = vrot.slane %v2333_v47, %v9579_v49  ;;  %v2340_v27 = vrot.slane %v2326_v19, %v9613_v5  ;;  %v2407_v19 = vrot.slane %v2381_v14, %v9579_v49 }
0x13bb   :  { %v2351_v38 = vmul.f32 %v2344_v24, %v9814_v50  ;;  %v2348_v39 = vrot.slane %v2340_v27, %v9579_v49 }
0x13bd   :  { %v2353_v40 = vsel %vm378_vm3, %v2351_v38, 0.0  ;;  %v2352_v44 = vmul.f32 %v2348_v39, %v9820_v61 }
0x13be   :  { %2354 = vadd.xlane.f32.xlu0 %v2353_v40 }
0x13bf   :  { %v2356_v45 = vsel %vm378_vm3, %v2352_v44, 0.0 }
0x13c0   :  { %2357 = vadd.xlane.f32.xlu1 %v2356_v45 }
0x13d1   :  { %2396 = vbcast.lane.b32.xlu1 %v2393_v54, 320 }
0x13d4   :  { %2388 = vbcast.lane.b32.xlu0 %v2385_v58, 320 }
0x144b   :  { %v2355_v34 = vpop.xlane.xlu0 %2354 }
0x144d   :  { %v2358_v59 = vpop.xlane.xlu1 %2357 }
0x144f   :  { %v2389_v23 = vpop.permute.xlu0 %2388 }
0x1450   :  { %v2398_v16 = vsub.f32 %v2389_v23, %v2355_v34 }
0x1451   :  { %v2397_v31 = vpop.permute.xlu1 %2396 }
0x1452   :  { %v2410_v12 = vmul.f32 %v2403_v18, %v2398_v16  ;;  %v2399_v36 = vsub.f32 %v2397_v31, %v2358_v59 }
0x1454   :  { %2414 = vperm.xlu0 %9034, %v2410_v12   ;;  %v2411_v47 = vmul.f32 %v2407_v19, %v2399_v36 }
0x1458   :  { %2419 = vperm.xlu0 %9034, %v2411_v47   ;;  %v2232_v47 = vadd.f32 %v9924_v35, %v9651_v13 }
0x145c   :  { %9035 = vset.pattern.permute.xlu0 %v11233_v43 }
0x147f   :  { %v2541_v27 = vpop.f32.mrb[16].mxu1 }
0x1480   :  { %v8641_v38 = vpop.f32.mrb[17].mxu1 }
0x14d3   :  { %v2415_v40 = vpop.permute.xlu0 %2414 }
0x14d4   :  { %v2422_v44 = vmul.f32 %v2415_v40, %v2344_v24 }
0x14d6   :  { %v2424_v45 = vadd.f32 %v2422_v44, %v9814_v50 }
0x14d7   :  { %v2420_v54 = vpop.permute.xlu0 %2419 }
0x14d8   :  { %v2423_v58 = vmul.f32 %v2420_v54, %v2348_v39  ;;  %v2426_v0 = vmul.f32 %v2424_v45, %v2424_v45 }
0x14da   :  { %v2425_v1 = vadd.f32 %v2423_v58, %v9820_v61  ;;  %v2428_v57 = vsel %vm378_vm3, %v2426_v0, 0.0 }
0x14db   :  { %2429 = vadd.xlane.f32.xlu1 %v2428_v57 }
0x14dc   :  { %v2427_v8 = vmul.f32 %v2425_v1, %v2425_v1 }
0x14de   :  { %v2431_v10 = vsel %vm378_vm3, %v2427_v8, 0.0 }
0x14df   :  { %2432 = vadd.xlane.f32.xlu0 %v2431_v10 }
0x1568   :  { %v2430_v34 = vpop.xlane.xlu1 %2429 }
0x1569   :  { %v2434_v9 = vrot.slane %v2430_v34, 4 }
0x156b   :  { %v2435_v15 = vadd.f32 %v2434_v9, %v2430_v34 }
0x156c   :  { %v2433_v59 = vpop.xlane.xlu0 %2432 }
0x156d   :  { %v2436_v23 = vrot.slane %v2435_v15, 2  ;;  %v2440_v24 = vrot.slane %v2433_v59, 4 }
0x156f   :  { %v2437_v18 = vadd.f32 %v2436_v23, %v2435_v15  ;;  %v2441_v16 = vadd.f32 %v2440_v24, %v2433_v59 }
0x1571   :  { %v2438_v14 = vrot.slane %v2437_v18, 1  ;;  %v2442_v39 = vrot.slane %v2441_v16, 2 }
0x1573   :  { %v2439_v31 = vadd.f32 %v2438_v14, %v2437_v18  ;;  %v2443_v12 = vadd.f32 %v2442_v39, %v2441_v16 }
0x1575   :  { %9126 = vrsqrt.f32 %v2439_v31  ;;  %v2444_v36 = vrot.slane %v2443_v12, 1  ;;  %vm2448_vm14 = vcmp.eq.f32.partialorder %v2439_v31, inf  ;;  %v2451_v44 = vand.u32 2147483648, %v2439_v31 }
0x1576   :  { %vm2450_vm15 = vcmp.eq.f32.partialorder %v2439_v31, 0.0 }
0x1577   :  { %v2445_v19 = vadd.f32 %v2444_v36, %v2443_v12 }
0x1579   :  { %9128 = vrsqrt.f32 %v2445_v19  ;;  %vm2455_vm4 = vcmp.eq.f32.partialorder %v2445_v19, inf  ;;  %v2458_v10 = vand.u32 2147483648, %v2445_v19  ;;  %vm2457_vm5 = vcmp.eq.f32.partialorder %v2445_v19, 0.0 }
0x157a   :  { %9130 = vtanh.f32 %v2232_v47 }
0x157f   :  { %v9127_v38 = vpop.eup %9126 }
0x1580   :  { %v2447_v40 = vmul.f32 %v9127_v38, %v2439_v31 }
0x1582   :  { %v2449_v54 = vsel %vm2448_vm14, %v2439_v31, %v2447_v40 }
0x1583   :  { %v2452_v58 = vsel %vm2450_vm15, %v2451_v44, %v2449_v54  ;;  %v9129_v0 = vpop.eup %9128 }
0x1584   :  { %v8351_v57 = vadd.f32 -1.0, %v2452_v58  ;;  %v2454_v8 = vmul.f32 %v9129_v0, %v2445_v19  ;;  %v9131_v15 = vpop.eup %9130 }
0x1585   :  { %v2545_v23 = vmul.f32 %v9131_v15, %v2541_v27 }
0x1586   :  { %v2462_v34 = vmax.f32 %v8351_v57, 0.0  ;;  %v2456_v9 = vsel %vm2455_vm4, %v2445_v19, %v2454_v8 }
0x1587   :  { %v2459_v35 = vsel %vm2457_vm5, %v2458_v10, %v2456_v9  ;;  %v2553_v16 = vrot.slane %v2545_v23, %v9613_v5 }
0x1588   :  { %v2464_v59 = vadd.f32 1.0, %v2462_v34  ;;  %v8352_v24 = vadd.f32 -1.0, %v2459_v35 }
0x1589   :  { %v2561_v39 = vrot.slane %v2553_v16, %v9613_v5  ;;  %v2554_v31 = vcombine.high %v2553_v16, %v2553_v16 }
0x158a   :  { %9132 = vrcp.f32 %v2464_v59  ;;  %v2463_v18 = vmax.f32 %v8352_v24, 0.0 }
0x158b   :  { %v2572_v47 = vrot.slane %v2561_v39, %v9579_v49  ;;  %v2568_v19 = vrot.slane %v2554_v31, %v9613_v5 }
0x158c   :  { %v2465_v14 = vadd.f32 1.0, %v2463_v18 }
0x158d   :  { %v2576_v54 = vrot.slane %v2568_v19, %v9579_v49 }
0x158e   :  { %9134 = vrcp.f32 %v2465_v14 }
0x1594   :  { %v9133_v12 = vpop.eup %9132 }
0x1595   :  { %v9963_v36 = vmul.f32 %v9133_v12, %v2424_v45 }
0x1597   :  { %v2579_v38 = vmul.f32 %v2572_v47, %v9963_v36 }
0x1598   :  { %v9135_v27 = vpop.eup %9134 }
0x1599   :  { %v2581_v40 = vsel %vm378_vm3, %v2579_v38, 0.0  ;;  %v9969_v44 = vmul.f32 %v9135_v27, %v2425_v1 }
0x159a   :  { %2582 = vadd.xlane.f32.xlu0 %v2581_v40 }
0x159b   :  { %11257 = vst [vmem:[#allocation14_spill] sm:$0xff] %v9969_v44  ;;  %v2580_v58 = vmul.f32 %v2576_v54, %v9969_v44 }
0x159d   :  { %v2584_v0 = vsel %vm378_vm3, %v2580_v58, 0.0 }
0x159e   :  { %2585 = vadd.xlane.f32.xlu1 %v2584_v0 }
0x1627   :  { %v2583_v45 = vpop.xlane.xlu0 %2582 }
0x1628   :  { %v2603_v57 = vmul.f32 %v2583_v45, %v2583_v45  ;;  %v2592_v10 = vrot.slane %v2583_v45, %v9676_v29 }
0x162a   :  { %v2610_v1 = vrot.slane %v2603_v57, %v9676_v29 }
0x162b   :  { %v2586_v8 = vpop.xlane.xlu1 %2585 }
0x162c   :  { %v2596_v34 = vrot.slane %v2586_v8, %v9676_v29  ;;  %v2604_v9 = vmul.f32 %v2586_v8, %v2586_v8 }
0x162e   :  { %v2597_v59 = vsel %vm626_vm8, %v2596_v34, %v2592_v10  ;;  %v2614_v35 = vrot.slane %v2604_v9, %v9676_v29 }
0x162f   :  { %v2599_v23 = vsel %vm629_vm9, %v2597_v59, 0.0 }
0x1630   :  { %2600 = vadd.xlane.f32.xlu0 %v2599_v23  ;;  %v2615_v24 = vsel %vm626_vm8, %v2614_v35, %v2610_v1 }
0x1631   :  { %v2617_v18 = vsel %vm629_vm9, %v2615_v24, 0.0 }
0x1632   :  { %2618 = vadd.xlane.f32.xlu1 %v2617_v18 }
0x16bd   :  { %v2601_v16 = vpop.xlane.xlu0 %2600 }
0x16be   :  { %v2602_v14 = vmul.f32 0.125, %v2601_v16 }
0x16bf   :  { %v2619_v39 = vpop.xlane.xlu1 %2618 }
0x16c0   :  { %v2621_v31 = vmul.f32 %v2602_v14, %v2602_v14  ;;  %v2620_v12 = vmul.f32 0.125, %v2619_v39  ;;  %v2627_v38 = vrot.slane %v2602_v14, %v9579_v49  ;;  %v2631_v27 = vrot.slane %v2602_v14, %v9634_v22 }
0x16c2   :  { %v2622_v47 = vsub.f32 %v2620_v12, %v2621_v31  ;;  %v2635_v54 = vsub.f32 %v2586_v8, %v2631_v27  ;;  %v2634_v0 = vsub.f32 %v2583_v45, %v2627_v38 }
0x16c4   :  { %v2636_v19 = vadd.f32 1e-05, %v2622_v47 }
0x16c6   :  { %9136 = vrsqrt.f32 %v2636_v19 }
0x16d0   :  { %v9137_v40 = vpop.eup %9136 }
0x16d1   :  { %v2646_v58 = vrot.slane %v9137_v40, %v9634_v22  ;;  %v2642_v57 = vrot.slane %v9137_v40, %v9579_v49 }
0x16d3   :  { %v2650_v10 = vmul.f32 %v2646_v58, %v2635_v54  ;;  %v2649_v34 = vmul.f32 %v2642_v57, %v2634_v0 }
0x16d5   :  { %2657 = vperm.xlu1 %9030, %v2650_v10   ;;  %2654 = vperm.xlu0 %9035, %v2649_v34  }
0x16d9   :  { %2741 = vrot.lane.b32.xlu1 %v9131_v15, %s9382_s19 }
0x1754   :  { %v2658_v9 = vpop.permute.xlu1 %2657  ;;  %v2655_v59 = vpop.permute.xlu0 %2654 }
0x1755   :  { %v2666_v1 = vrot.slane %v2658_v9, %v9676_v29  ;;  %v2662_v35 = vrot.slane %v2655_v59, %v9676_v29 }
0x1757   :  { %v2667_v23 = vsel %vm626_vm8, %v2666_v1, %v2662_v35 }
0x1758   :  { %8645 = vmatmul.mubr.msk.f32.vlgmr.msra.gmra.mrb[18].mxu1 %vm499_vm2, %v2667_v23  ;;  %v2742_v15 = vpop.permute.xlu1 %2741 }
0x1759   :  { %8899 = vmatpush3.bf16.msra.mxu1 %v9474_v4  ;;  %8660 = vmatprep.mubr.msk.f32.mxu1 %vm9380_vm0, %v11235_v6 }
0x175a   :  { %8900 = vmatprep.subr.bf16.mxu1 %v11231_v3 }
0x175d   :  { %8902 = vmatpush3.bf16.msra.mxu1 %v9485_v7 }
0x175e   :  { %8911 = vmatprep.subr.bf16.mxu1 %v11231_v3 }
0x1760   :  { %8661 = vmatmul.mubr.msk.f32.vlgmr.msra.gmra.mrb[20].mxu1 %vm64_vm1, %v9896_v60  ;;  %v8356_v60 = vld [vmem:[%s11215_s0 + $0x6] sm:$0x3] }
0x1761   :  { %8913 = vmatpush3.bf16.msra.mxu1 %v9528_v33  ;;  %8671 = vmatprep.mubr.msk.f32.mxu1 %vm9380_vm0, %v11235_v6 }
0x1762   :  { %8914 = vmatprep.subr.bf16.mxu1 %v11231_v3 }
0x1765   :  { %8916 = vmatpush3.bf16.msra.mxu1 %v9555_v42 }
0x1766   :  { %8684 = vmatprep.subr.mxu1 %v11235_v6 }
0x182b   :  { %v2736_v45 = vpop.f32.mrb[18].mxu1 }
0x182c   :  { %v2744_v8 = vmul.f32 %v2742_v15, %v2736_v45  ;;  %v8646_v24 = vpop.f32.mrb[19].mxu1 }
0x182e   :  { %v2752_v18 = vrot.slane %v2744_v8, %v9613_v5 }
0x1830   :  { %v2753_v16 = vcombine.high %v2752_v18, %v2752_v18  ;;  %v2760_v40 = vrot.slane %v2752_v18, %v9613_v5 }
0x1832   :  { %v2767_v14 = vrot.slane %v2753_v16, %v9613_v5  ;;  %v2771_v54 = vrot.slane %v2760_v40, %v9579_v49 }
0x1833   :  { %v3113_v39 = vpop.f32.mrb[20].mxu1 }
0x1834   :  { %v3117_v31 = vadd.f32 %v8356_v60, %v3113_v39  ;;  %v8662_v12 = vpop.f32.mrb[21].mxu1  ;;  %v2775_v47 = vrot.slane %v2767_v14, %v9579_v49  ;;  %v2778_v58 = vmul.f32 %v2771_v54, %v9963_v36 }
0x1836   :  { %9138 = vtanh.f32 %v3117_v31  ;;  %v2779_v19 = vmul.f32 %v2775_v47, %v9969_v44  ;;  %v2780_v0 = vsel %vm378_vm3, %v2778_v58, 0.0  ;;  %v8358_v57 = vmul.f32 -1.442695, %v3117_v31 }
0x1838   :  { %v2783_v38 = vsel %vm378_vm3, %v2779_v19, 0.0  ;;  %9140 = vpow2.f32 %v8358_v57 }
0x1839   :  { %2784 = vadd.xlane.f32.xlu0 %v2783_v38 }
0x1840   :  { %v9139_v27 = vpop.eup %9138 }
0x1841   :  { %3127 = vrot.lane.b32.xlu1 %v9139_v27, %s9382_s19 }
0x1842   :  { %v9141_v10 = vpop.eup %9140 }
0x1843   :  { %v3121_v34 = vadd.f32 1.0, %v9141_v10 }
0x1845   :  { %9142 = vrcp.f32 %v3121_v34 }
0x184f   :  { %v9143_v9 = vpop.eup %9142 }
0x1850   :  { %v3125_v12 = vmul.f32 %v9143_v9, %v9879_v63 }
0x1865   :  { %2781 = vadd.xlane.f32.xlu1 %v2780_v0 }
0x18b3   :  { %v3128_v59 = vpop.permute.xlu1 %3127 }
0x18b4   :  { %v3130_v1 = vmul.f32 %v9143_v9, %v3128_v59 }
0x18b6   :  { %3132 = vrot.lane.b32.xlu1 %v3130_v1, %s9383_s1 }
0x18c6   :  { %v2785_v35 = vpop.xlane.xlu0 %2784 }
0x18c7   :  { %v2803_v23 = vmul.f32 %v2785_v35, %v2785_v35  ;;  %v2795_v45 = vrot.slane %v2785_v35, %v9676_v29 }
0x18c9   :  { %v2813_v60 = vrot.slane %v2803_v23, %v9676_v29 }
0x18f2   :  { %v2782_v15 = vpop.xlane.xlu1 %2781 }
0x18f3   :  { %v2791_v8 = vrot.slane %v2782_v15, %v9676_v29  ;;  %v2802_v24 = vmul.f32 %v2782_v15, %v2782_v15 }
0x18f5   :  { %v2796_v18 = vsel %vm626_vm8, %v2795_v45, %v2791_v8  ;;  %v2809_v16 = vrot.slane %v2802_v24, %v9676_v29 }
0x18f6   :  { %v2798_v14 = vsel %vm629_vm9, %v2796_v18, 0.0 }
0x18f7   :  { %2799 = vadd.xlane.f32.xlu0 %v2798_v14  ;;  %v2814_v39 = vsel %vm626_vm8, %v2813_v60, %v2809_v16 }
0x18f8   :  { %v2816_v31 = vsel %vm629_vm9, %v2814_v39, 0.0 }
0x18fb   :  { %2817 = vadd.xlane.f32.xlu0 %v2816_v31 }
0x1928   :  { %v3133_v47 = vpop.permute.xlu1 %3132 }
0x1929   :  { %v10028_v19 = vadd.f32 %v3133_v47, %v3125_v12 }
0x192b   :  { %9144 = vtanh.f32 %v10028_v19 }
0x1935   :  { %v9145_v38 = vpop.eup %9144 }
0x1936   :  { %3138 = vrot.lane.b32.xlu1 %v9145_v38, %s9382_s19 }
0x1984   :  { %v2800_v27 = vpop.xlane.xlu0 %2799 }
0x1985   :  { %v2801_v40 = vmul.f32 0.125, %v2800_v27 }
0x1987   :  { %v2820_v58 = vmul.f32 %v2801_v40, %v2801_v40  ;;  %v2826_v34 = vrot.slane %v2801_v40, %v9579_v49  ;;  %v2830_v63 = vrot.slane %v2801_v40, %v9634_v22 }
0x1988   :  { %v2818_v54 = vpop.xlane.xlu0 %2817 }
0x1989   :  { %v2819_v0 = vmul.f32 0.125, %v2818_v54  ;;  %v2833_v1 = vsub.f32 %v2782_v15, %v2826_v34  ;;  %v2834_v45 = vsub.f32 %v2785_v35, %v2830_v63 }
0x198b   :  { %v2821_v57 = vsub.f32 %v2819_v0, %v2820_v58 }
0x198d   :  { %v2835_v10 = vadd.f32 1e-05, %v2821_v57 }
0x198f   :  { %9146 = vrsqrt.f32 %v2835_v10 }
0x1999   :  { %v9147_v59 = vpop.eup %9146 }
0x199a   :  { %v2841_v23 = vrot.slane %v9147_v59, %v9579_v49  ;;  %v2845_v8 = vrot.slane %v9147_v59, %v9634_v22 }
0x199c   :  { %v2848_v24 = vmul.f32 %v2841_v23, %v2833_v1  ;;  %v2849_v18 = vmul.f32 %v2845_v8, %v2834_v45 }
0x199e   :  { %2853 = vperm.xlu0 %9035, %v2848_v24   ;;  %2856 = vperm.xlu1 %9030, %v2849_v18  }
0x19a2   :  { %9037 = vset.pattern.permute.xlu0 %v11229_v26  ;;  %9036 = vset.pattern.permute.xlu1 %v11229_v26 }
0x19a8   :  { %v3139_v16 = vpop.permute.xlu1 %3138 }
0x19a9   :  { %v10038_v60 = vmul.f32 %v9143_v9, %v3139_v16 }
0x19ab   :  { %11258 = vst [vmem:[#allocation15_spill] sm:$0xff] %v10038_v60  ;;  %3143 = vrot.lane.b32.xlu1 %v10038_v60, %s9383_s1 }
0x1a1d   :  { %v2854_v15 = vpop.permute.xlu0 %2853  ;;  %v2857_v14 = vpop.permute.xlu1 %2856 }
0x1a1e   :  { %v2861_v35 = vrot.slane %v2854_v15, %v9676_v29  ;;  %v2865_v39 = vrot.slane %v2857_v14, %v9676_v29 }
0x1a20   :  { %v2866_v31 = vsel %vm626_vm8, %v2865_v39, %v2861_v35 }
0x1a21   :  { %8650 = vmatmul.mubr.msk.f32.vlgmr.msra.gmra.mrb[14].mxu0 %vm499_vm2, %v2866_v31  ;;  %v10046_v12 = vpop.permute.xlu1 %3143 }
0x1a22   :  { %8906 = vmatpush1.bf16.msra.mxu0 %v9526_v32  ;;  %8672 = vmatmul.mubr.msk.f32.vlgmr.msra.gmra.mrb[22].mxu1 %vm64_vm1, %v10046_v12 }
0x1a23   :  { %8908 = vmatprep.subr.bf16.mxu0 %v9540_v37  ;;  %3211 = vmatprep.mubr.f32.mxu0 %v11235_v6 }
0x1a24   :  { %8685 = vmatpush3.msra.mxu1 %v9906_v30  ;;  %8686 = vmatprep.mubr.msk.f32.mxu1 %vm9380_vm0, %v11235_v6 }
0x1a25   :  { %8924 = vmatprep.subr.bf16.mxu1 %v9515_v28 }
0x1a26   :  { %8910 = vmatpush1.bf16.msra.mxu0 %v9553_v41 }
0x1a27   :  { %8674 = vmatprep.subr.mxu0 %v11235_v6 }
0x1a29   :  { %8359 = vmatmul.mubr.msk.f32.vlgmr.msra.gmra.mrb[16].mxu0 %vm64_vm1, %v10046_v12 }
0x1a2a   :  { %8675 = vmatpush3.msra.mxu0 %v9906_v30  ;;  %8676 = vmatprep.mubr.msk.f32.mxu0 %vm9380_vm0, %v11235_v6 }
0x1a2b   :  { %8679 = vmatprep.subr.mxu0 %v11235_v6 }
0x1af4   :  { %v10065_v9 = vpop.f32.mrb[14].mxu0 }
0x1af5   :  { %v8651_v47 = vpop.f32.mrb[15].mxu0  ;;  %v3284_v38 = vpop.f32.mrb[22].mxu1 }
0x1af6   :  { %v8673_v27 = vpop.f32.mrb[23].mxu1  ;;  %v3285_v0 = vadd.f32 %v3284_v38, %v9592_v53 }
0x1af8   :  { %v8361_v31 = vmul.f32 -1.442695, %v3285_v0 }
0x1afc   :  { %v3213_v40 = vpop.f32.mrb[16].mxu0 }
0x1afd   :  { %v3214_v54 = vadd.f32 %v3213_v40, %v9589_v52  ;;  %v10068_v58 = vpop.f32.mrb[17].mxu0 }
0x1aff   :  { %9148 = vtanh.f32 %v3214_v54 }
0x1b00   :  { %9150 = vtanh.f32 %v3285_v0 }
0x1b01   :  { %9152 = vpow2.f32 %v8361_v31 }
0x1b09   :  { %v9149_v57 = vpop.eup %9148 }
0x1b0a   :  { %3292 = vrot.lane.b32.xlu1 %v9149_v57, %s9382_s19  ;;  %v10072_v10 = vpop.eup %9150 }
0x1b0b   :  { %v3377_v35 = vrot.slane %v10072_v10, %v9634_v22  ;;  %v3369_v39 = vrot.slane %v10072_v10, %v9579_v49  ;;  %v9153_v47 = vpop.eup %9152 }
0x1b0c   :  { %v3299_v38 = vadd.f32 1.0, %v9153_v47 }
0x1b0e   :  { %3455 = vrot.lane.b32.xlu1 %v10072_v10, %s9384_s6  ;;  %9154 = vrcp.f32 %v3299_v38 }
0x1b18   :  { %v9155_v27 = vpop.eup %9154 }
0x1b19   :  { %v3350_v40 = vrot.slane %v9155_v27, %v9613_v5 }
0x1b1b   :  { %v3351_v54 = vcombine.high %v3350_v40, %v3350_v40 }
0x1b7c   :  { %v3293_v34 = vpop.permute.xlu1 %3292 }
0x1b7d   :  { %v3295_v63 = vmul.f32 %v9149_v57, %v3293_v34  ;;  %v3365_v34 = vrot.slane %v3351_v54, %v9613_v5 }
0x1b7f   :  { %v3309_v59 = vrot.slane %v3295_v63, %v9613_v5 }
0x1b80   :  { %v3456_v1 = vpop.permute.xlu1 %3455 }
0x1b81   :  { %v3310_v23 = vcombine.high %v3309_v59, %v3309_v59  ;;  %v3317_v45 = vrot.slane %v3309_v59, %v9613_v5  ;;  %8677 = vmatmul.mubr.msk.f32.vlgmr.msra.gmra.mrb[18].mxu0 %vm499_vm2, %v3456_v1  ;;  %v3358_v59 = vrot.slane %v3350_v40, %v9613_v5 }
0x1b82   :  { %8680 = vmatpush3.msra.mxu0 %v9906_v30  ;;  %8681 = vmatprep.mubr.msk.f32.mxu0 %vm9380_vm0, %v11235_v6 }
0x1b83   :  { %v3328_v8 = vrot.slane %v3317_v45, %v9579_v49  ;;  %v3324_v24 = vrot.slane %v3310_v23, %v9613_v5  ;;  %8917 = vmatprep.subr.bf16.mxu0 %v11231_v3  ;;  %v3391_v23 = vrot.slane %v3365_v34, %v9579_v49 }
0x1b85   :  { %v3335_v18 = vmul.f32 %v3328_v8, %v9963_v36  ;;  %v3332_v16 = vrot.slane %v3324_v24, %v9579_v49 }
0x1b87   :  { %v3337_v15 = vsel %vm378_vm3, %v3335_v18, 0.0  ;;  %v3336_v14 = vmul.f32 %v3332_v16, %v9969_v44  ;;  %v3387_v18 = vrot.slane %v3358_v59, %v9579_v49 }
0x1b88   :  { %3338 = vadd.xlane.f32.xlu1 %v3337_v15 }
0x1b89   :  { %v3340_v30 = vsel %vm378_vm3, %v3336_v14, 0.0 }
0x1b8a   :  { %3341 = vadd.xlane.f32.xlu0 %v3340_v30 }
0x1b99   :  { %3380 = vbcast.lane.b32.xlu1 %v3377_v35, 320 }
0x1ba0   :  { %3372 = vbcast.lane.b32.xlu0 %v3369_v39, 320 }
0x1c15   :  { %v3339_v57 = vpop.xlane.xlu1 %3338 }
0x1c17   :  { %v3342_v63 = vpop.xlane.xlu0 %3341 }
0x1c19   :  { %v3381_v1 = vpop.permute.xlu1 %3380 }
0x1c1a   :  { %v3383_v45 = vsub.f32 %v3381_v1, %v3342_v63 }
0x1c1b   :  { %v3373_v24 = vpop.permute.xlu0 %3372 }
0x1c1c   :  { %v3395_v0 = vmul.f32 %v3391_v23, %v3383_v45  ;;  %v3382_v15 = vsub.f32 %v3373_v24, %v3339_v57 }
0x1c1e   :  { %v3394_v14 = vmul.f32 %v3387_v18, %v3382_v15  ;;  %3403 = vperm.xlu0 %9037, %v3395_v0  }
0x1c20   :  { %3398 = vperm.xlu1 %9036, %v3394_v14  }
0x1c22   :  { %9039 = vset.pattern.permute.xlu0 %v11233_v43 }
0x1c24   :  { %9038 = vset.pattern.permute.xlu1 %v11233_v43 }
0x1c54   :  { %v3525_v30 = vpop.f32.mrb[18].mxu0 }
0x1c55   :  { %v8678_v35 = vpop.f32.mrb[19].mxu0 }
0x1c9d   :  { %v3404_v39 = vpop.permute.xlu0 %3403 }
0x1c9e   :  { %v3407_v31 = vmul.f32 %v3404_v39, %v3332_v16 }
0x1c9f   :  { %v3399_v47 = vpop.permute.xlu1 %3398 }
0x1ca0   :  { %v3409_v38 = vadd.f32 %v3407_v31, %v9969_v44  ;;  %v3406_v27 = vmul.f32 %v3399_v47, %v3328_v8  ;;  %v3216_v31 = vadd.f32 %v10068_v58, %v9651_v13 }
0x1ca2   :  { %v3408_v40 = vadd.f32 %v3406_v27, %v9963_v36  ;;  %v3411_v54 = vmul.f32 %v3409_v38, %v3409_v38 }
0x1ca4   :  { %v3415_v57 = vsel %vm378_vm3, %v3411_v54, 0.0  ;;  %v3410_v34 = vmul.f32 %v3408_v40, %v3408_v40 }
0x1ca5   :  { %3416 = vadd.xlane.f32.xlu0 %v3415_v57 }
0x1ca6   :  { %v3412_v63 = vsel %vm378_vm3, %v3410_v34, 0.0 }
0x1ca7   :  { %3413 = vadd.xlane.f32.xlu1 %v3412_v63 }
0x1d32   :  { %v3417_v59 = vpop.xlane.xlu0 %3416 }
0x1d33   :  { %v3424_v1 = vrot.slane %v3417_v59, 4 }
0x1d34   :  { %v3414_v23 = vpop.xlane.xlu1 %3413 }
0x1d35   :  { %v3425_v45 = vadd.f32 %v3424_v1, %v3417_v59  ;;  %v3418_v24 = vrot.slane %v3414_v23, 4 }
0x1d37   :  { %v3426_v16 = vrot.slane %v3425_v45, 2  ;;  %v3419_v0 = vadd.f32 %v3418_v24, %v3414_v23 }
0x1d39   :  { %v3427_v18 = vadd.f32 %v3426_v16, %v3425_v45  ;;  %v3420_v15 = vrot.slane %v3419_v0, 2 }
0x1d3b   :  { %v3428_v8 = vrot.slane %v3427_v18, 1  ;;  %v3421_v14 = vadd.f32 %v3420_v15, %v3419_v0 }
0x1d3d   :  { %v3429_v35 = vadd.f32 %v3428_v8, %v3427_v18  ;;  %v3422_v39 = vrot.slane %v3421_v14, 1 }
0x1d3f   :  { %9156 = vrsqrt.f32 %v3429_v35  ;;  %v3423_v47 = vadd.f32 %v3422_v39, %v3421_v14  ;;  %vm3439_vm6 = vcmp.eq.f32.partialorder %v3429_v35, inf  ;;  %v3442_v57 = vand.u32 2147483648, %v3429_v35 }
0x1d40   :  { %vm3441_vm7 = vcmp.eq.f32.partialorder %v3429_v35, 0.0 }
0x1d41   :  { %9158 = vrsqrt.f32 %v3423_v47  ;;  %vm3432_vm10 = vcmp.eq.f32.partialorder %v3423_v47, inf  ;;  %v3435_v24 = vand.u32 2147483648, %v3423_v47  ;;  %vm3434_vm11 = vcmp.eq.f32.partialorder %v3423_v47, 0.0 }
0x1d42   :  { %9160 = vtanh.f32 %v3216_v31 }
0x1d49   :  { %v9157_v27 = vpop.eup %9156 }
0x1d4a   :  { %v3438_v54 = vmul.f32 %v9157_v27, %v3429_v35 }
0x1d4b   :  { %v9159_v34 = vpop.eup %9158 }
0x1d4c   :  { %v3440_v63 = vsel %vm3439_vm6, %v3429_v35, %v3438_v54  ;;  %v3431_v1 = vmul.f32 %v9159_v34, %v3423_v47  ;;  %v10107_v23 = vpop.eup %9160 }
0x1d4d   :  { %v3443_v59 = vsel %vm3441_vm7, %v3442_v57, %v3440_v63  ;;  %v3529_v16 = vmul.f32 %v10107_v23, %v3525_v30 }
0x1d4e   :  { %v8363_v45 = vadd.f32 -1.0, %v3443_v59  ;;  %v3433_v58 = vsel %vm3432_vm10, %v3423_v47, %v3431_v1 }
0x1d4f   :  { %v3436_v18 = vsel %vm3434_vm11, %v3435_v24, %v3433_v58  ;;  %v3537_v14 = vrot.slane %v3529_v16, %v9613_v5 }
0x1d50   :  { %v3447_v0 = vmax.f32 %v8363_v45, 0.0  ;;  %v8362_v15 = vadd.f32 -1.0, %v3436_v18 }
0x1d51   :  { %v3538_v31 = vcombine.high %v3537_v14, %v3537_v14  ;;  %v3545_v57 = vrot.slane %v3537_v14, %v9613_v5 }
0x1d52   :  { %v3449_v8 = vadd.f32 1.0, %v3447_v0  ;;  %v3446_v39 = vmax.f32 %v8362_v15, 0.0 }
0x1d53   :  { %v3552_v27 = vrot.slane %v3538_v31, %v9613_v5  ;;  %v3556_v1 = vrot.slane %v3545_v57, %v9579_v49 }
0x1d54   :  { %9162 = vrcp.f32 %v3449_v8  ;;  %v3448_v35 = vadd.f32 1.0, %v3446_v39 }
0x1d55   :  { %v3560_v30 = vrot.slane %v3552_v27, %v9579_v49 }
0x1d56   :  { %9164 = vrcp.f32 %v3448_v35 }
0x1d5e   :  { %v9163_v54 = vpop.eup %9162 }
0x1d5f   :  { %v10113_v34 = vmul.f32 %v9163_v54, %v3409_v38 }
0x1d60   :  { %v9165_v47 = vpop.eup %9164 }
0x1d61   :  { %11259 = vst [vmem:[#allocation16_spill] sm:$0xff] %v10113_v34  ;;  %v3564_v63 = vmul.f32 %v3560_v30, %v10113_v34  ;;  %v10117_v59 = vmul.f32 %v9165_v47, %v3408_v40 }
0x1d63   :  { %v3568_v45 = vsel %vm378_vm3, %v3564_v63, 0.0  ;;  %v3563_v24 = vmul.f32 %v3556_v1, %v10117_v59 }
0x1d64   :  { %3569 = vadd.xlane.f32.xlu0 %v3568_v45 }
0x1d65   :  { %v3565_v16 = vsel %vm378_vm3, %v3563_v24, 0.0 }
0x1d66   :  { %3566 = vadd.xlane.f32.xlu1 %v3565_v16 }
0x1df1   :  { %v3570_v58 = vpop.xlane.xlu0 %3569 }
0x1df2   :  { %v3588_v38 = vmul.f32 %v3570_v58, %v3570_v58  ;;  %v3580_v18 = vrot.slane %v3570_v58, %v9676_v29 }
0x1df3   :  { %v3567_v0 = vpop.xlane.xlu1 %3566 }
0x1df4   :  { %v3576_v15 = vrot.slane %v3567_v0, %v9676_v29  ;;  %v3587_v8 = vmul.f32 %v3567_v0, %v3567_v0  ;;  %v3598_v39 = vrot.slane %v3588_v38, %v9676_v29 }
0x1df6   :  { %v3581_v40 = vsel %vm626_vm8, %v3580_v18, %v3576_v15  ;;  %v3594_v14 = vrot.slane %v3587_v8, %v9676_v29 }
0x1df7   :  { %v3583_v35 = vsel %vm629_vm9, %v3581_v40, 0.0 }
0x1df8   :  { %3584 = vadd.xlane.f32.xlu1 %v3583_v35  ;;  %v3599_v31 = vsel %vm626_vm8, %v3598_v39, %v3594_v14 }
0x1df9   :  { %v3601_v27 = vsel %vm629_vm9, %v3599_v31, 0.0 }
0x1dfa   :  { %3602 = vadd.xlane.f32.xlu0 %v3601_v27 }
0x1e85   :  { %v3585_v54 = vpop.xlane.xlu1 %3584 }
0x1e86   :  { %v3586_v57 = vmul.f32 0.125, %v3585_v54 }
0x1e87   :  { %v3603_v30 = vpop.xlane.xlu0 %3602 }
0x1e88   :  { %v3605_v47 = vmul.f32 %v3586_v57, %v3586_v57  ;;  %v3604_v63 = vmul.f32 0.125, %v3603_v30  ;;  %v3611_v24 = vrot.slane %v3586_v57, %v9579_v49  ;;  %v3615_v16 = vrot.slane %v3586_v57, %v9634_v22 }
0x1e8a   :  { %v3606_v1 = vsub.f32 %v3604_v63, %v3605_v47  ;;  %v3619_v18 = vsub.f32 %v3570_v58, %v3615_v16  ;;  %v3618_v8 = vsub.f32 %v3567_v0, %v3611_v24 }
0x1e8c   :  { %v3620_v45 = vadd.f32 1e-05, %v3606_v1 }
0x1e8e   :  { %9166 = vrsqrt.f32 %v3620_v45 }
0x1e98   :  { %v9167_v38 = vpop.eup %9166 }
0x1e99   :  { %v3630_v15 = vrot.slane %v9167_v38, %v9634_v22  ;;  %v3626_v40 = vrot.slane %v9167_v38, %v9579_v49 }
0x1e9b   :  { %v3634_v14 = vmul.f32 %v3630_v15, %v3619_v18  ;;  %v3633_v39 = vmul.f32 %v3626_v40, %v3618_v8 }
0x1e9d   :  { %3641 = vperm.xlu0 %9039, %v3634_v14   ;;  %3638 = vperm.xlu1 %9038, %v3633_v39  }
0x1ea1   :  { %3725 = vrot.lane.b32.xlu1 %v10107_v23, %s9382_s19 }
0x1f1c   :  { %v3642_v35 = vpop.permute.xlu0 %3641  ;;  %v3639_v31 = vpop.permute.xlu1 %3638 }
0x1f1d   :  { %v3650_v27 = vrot.slane %v3642_v35, %v9676_v29  ;;  %v3646_v54 = vrot.slane %v3639_v31, %v9676_v29 }
0x1f1f   :  { %v3651_v58 = vsel %vm626_vm8, %v3650_v27, %v3646_v54 }
0x1f20   :  { %8682 = vmatmul.mubr.msk.f32.vlgmr.msra.gmra.mrb[20].mxu0 %vm499_vm2, %v3651_v58  ;;  %v3726_v23 = vpop.permute.xlu1 %3725 }
0x1f21   :  { %8919 = vmatpush3.bf16.msra.mxu0 %v9474_v4  ;;  %8697 = vmatprep.mubr.msk.f32.mxu0 %vm9380_vm0, %v11235_v6 }
0x1f22   :  { %8920 = vmatprep.subr.bf16.mxu0 %v11231_v3 }
0x1f25   :  { %8922 = vmatpush3.bf16.msra.mxu0 %v9485_v7 }
0x1f26   :  { %8931 = vmatprep.subr.bf16.mxu0 %v11231_v3 }
0x1f28   :  { %8698 = vmatmul.mubr.msk.f32.vlgmr.msra.gmra.mrb[22].mxu0 %vm64_vm1, %v10046_v12  ;;  %v8367_v12 = vld [vmem:[%s11215_s0 + $0x8] sm:$0x3] }
0x1f29   :  { %8933 = vmatpush3.bf16.msra.mxu0 %v9528_v33  ;;  %8708 = vmatprep.mubr.msk.f32.mxu0 %vm9380_vm0, %v11235_v6 }
0x1f2a   :  { %8934 = vmatprep.subr.bf16.mxu0 %v11231_v3 }
0x1f2d   :  { %8936 = vmatpush3.bf16.msra.mxu0 %v9555_v42 }
0x1f2e   :  { %8721 = vmatprep.subr.mxu0 %v11235_v6 }
0x1ff3   :  { %v3720_v0 = vpop.f32.mrb[20].mxu0 }
0x1ff4   :  { %v3728_v57 = vmul.f32 %v3726_v23, %v3720_v0  ;;  %v8683_v30 = vpop.f32.mrb[21].mxu0 }
0x1ff6   :  { %v3736_v47 = vrot.slane %v3728_v57, %v9613_v5 }
0x1ff8   :  { %v3737_v63 = vcombine.high %v3736_v47, %v3736_v47  ;;  %v3744_v40 = vrot.slane %v3736_v47, %v9613_v5 }
0x1ffa   :  { %v3751_v1 = vrot.slane %v3737_v63, %v9613_v5  ;;  %v3755_v14 = vrot.slane %v3744_v40, %v9579_v49 }
0x1ffb   :  { %v4097_v45 = vpop.f32.mrb[22].mxu0 }
0x1ffc   :  { %v4101_v24 = vadd.f32 %v8367_v12, %v4097_v45  ;;  %v8699_v16 = vpop.f32.mrb[23].mxu0  ;;  %v3759_v38 = vrot.slane %v3751_v1, %v9579_v49  ;;  %v3762_v39 = vmul.f32 %v3755_v14, %v10117_v59 }
0x1ffe   :  { %9168 = vtanh.f32 %v4101_v24  ;;  %v3763_v18 = vmul.f32 %v3759_v38, %v10113_v34  ;;  %v3764_v35 = vsel %vm378_vm3, %v3762_v39, 0.0  ;;  %v8369_v31 = vmul.f32 -1.442695, %v4101_v24 }
0x2000   :  { %v3767_v15 = vsel %vm378_vm3, %v3763_v18, 0.0  ;;  %9170 = vpow2.f32 %v8369_v31 }
0x2001   :  { %3768 = vadd.xlane.f32.xlu0 %v3767_v15 }
0x2008   :  { %v9169_v8 = vpop.eup %9168 }
0x2009   :  { %4111 = vrot.lane.b32.xlu1 %v9169_v8, %s9382_s19 }
0x200a   :  { %v9171_v27 = vpop.eup %9170 }
0x200b   :  { %v4105_v54 = vadd.f32 1.0, %v9171_v27 }
0x200d   :  { %9172 = vrcp.f32 %v4105_v54 }
0x2017   :  { %v9173_v58 = vpop.eup %9172 }
0x2018   :  { %v4109_v8 = vmul.f32 %v9173_v58, %v10028_v19 }
0x202d   :  { %3765 = vadd.xlane.f32.xlu1 %v3764_v35 }
0x207b   :  { %v4112_v23 = vpop.permute.xlu1 %4111 }
0x207c   :  { %v4114_v0 = vmul.f32 %v9173_v58, %v4112_v23 }
0x207e   :  { %4116 = vrot.lane.b32.xlu1 %v4114_v0, %s9383_s1 }
0x208e   :  { %v3769_v57 = vpop.xlane.xlu0 %3768 }
0x208f   :  { %v3787_v30 = vmul.f32 %v3769_v57, %v3769_v57  ;;  %v3779_v63 = vrot.slane %v3769_v57, %v9676_v29 }
0x2091   :  { %v3797_v16 = vrot.slane %v3787_v30, %v9676_v29 }
0x20ba   :  { %v3766_v47 = vpop.xlane.xlu1 %3765 }
0x20bb   :  { %v3775_v12 = vrot.slane %v3766_v47, %v9676_v29  ;;  %v3786_v1 = vmul.f32 %v3766_v47, %v3766_v47 }
0x20bd   :  { %v3780_v45 = vsel %vm626_vm8, %v3779_v63, %v3775_v12  ;;  %v3793_v24 = vrot.slane %v3786_v1, %v9676_v29 }
0x20be   :  { %v3782_v38 = vsel %vm629_vm9, %v3780_v45, 0.0 }
0x20bf   :  { %3783 = vadd.xlane.f32.xlu0 %v3782_v38  ;;  %v3798_v18 = vsel %vm626_vm8, %v3797_v16, %v3793_v24 }
0x20c0   :  { %v3800_v15 = vsel %vm629_vm9, %v3798_v18, 0.0 }
0x20c1   :  { %3801 = vadd.xlane.f32.xlu1 %v3800_v15 }
0x20f0   :  { %v4117_v40 = vpop.permute.xlu1 %4116 }
0x20f1   :  { %v10178_v14 = vadd.f32 %v4117_v40, %v4109_v8 }
0x20f3   :  { %9174 = vtanh.f32 %v10178_v14 }
0x20fd   :  { %v9175_v39 = vpop.eup %9174 }
0x20fe   :  { %4122 = vrot.lane.b32.xlu0 %v9175_v39, %s9382_s19 }
0x214c   :  { %v3784_v35 = vpop.xlane.xlu0 %3783 }
0x214d   :  { %v3785_v31 = vmul.f32 0.125, %v3784_v35 }
0x214e   :  { %v3802_v27 = vpop.xlane.xlu1 %3801 }
0x214f   :  { %v3804_v54 = vmul.f32 %v3785_v31, %v3785_v31  ;;  %v3803_v23 = vmul.f32 0.125, %v3802_v27  ;;  %v3810_v63 = vrot.slane %v3785_v31, %v9579_v49  ;;  %v3814_v19 = vrot.slane %v3785_v31, %v9634_v22 }
0x2151   :  { %v3805_v0 = vsub.f32 %v3803_v23, %v3804_v54  ;;  %v3817_v1 = vsub.f32 %v3766_v47, %v3810_v63  ;;  %v3818_v38 = vsub.f32 %v3769_v57, %v3814_v19 }
0x2153   :  { %v3819_v30 = vadd.f32 1e-05, %v3805_v0 }
0x2155   :  { %9176 = vrsqrt.f32 %v3819_v30 }
0x215f   :  { %v9177_v12 = vpop.eup %9176 }
0x2160   :  { %v3825_v45 = vrot.slane %v9177_v12, %v9579_v49  ;;  %v3829_v16 = vrot.slane %v9177_v12, %v9634_v22 }
0x2162   :  { %v3832_v24 = vmul.f32 %v3825_v45, %v3817_v1  ;;  %v3833_v18 = vmul.f32 %v3829_v16, %v3818_v38 }
0x2164   :  { %3837 = vperm.xlu0 %9039, %v3832_v24  }
0x2168   :  { %3840 = vperm.xlu0 %9039, %v3833_v18  }
0x216c   :  { %9040 = vset.pattern.permute.xlu0 %v11229_v26 }
0x2170   :  { %v4123_v15 = vpop.permute.xlu0 %4122 }
0x2171   :  { %v4125_v8 = vmul.f32 %v9173_v58, %v4123_v15  ;;  %v10202_v58 = vld [vmem:[%s11222_s7] sm:$0xff] }
0x2173   :  { %4127 = vrot.lane.b32.xlu0 %v4125_v8, %s9383_s1 }
0x21e3   :  { %v3838_v40 = vpop.permute.xlu0 %3837 }
0x21e4   :  { %v3845_v35 = vrot.slane %v3838_v40, %v9676_v29 }
0x21e7   :  { %v3841_v39 = vpop.permute.xlu0 %3840 }
0x21e8   :  { %v3849_v47 = vrot.slane %v3841_v39, %v9676_v29 }
0x21ea   :  { %v3850_v31 = vsel %vm626_vm8, %v3849_v47, %v3845_v35 }
0x21eb   :  { %8687 = vmatmul.mubr.msk.f32.vlgmr.msra.gmra.mrb[24].mxu1 %vm499_vm2, %v3850_v31  ;;  %v10192_v57 = vpop.permute.xlu0 %4127 }
0x21ec   :  { %11260 = vst [vmem:[#allocation17_spill] sm:$0xff] %v10192_v57  ;;  %8926 = vmatpush1.bf16.msra.mxu1 %v9526_v32  ;;  %8709 = vmatmul.mubr.msk.f32.vlgmr.msra.gmra.mrb[24].mxu0 %vm64_vm1, %v10192_v57 }
0x21ed   :  { %8928 = vmatprep.subr.bf16.mxu1 %v9540_v37  ;;  %4195 = vmatprep.mubr.f32.mxu1 %v11235_v6 }
0x21ee   :  { %8722 = vmatpush3.msra.mxu0 %v10202_v58  ;;  %8723 = vmatprep.mubr.msk.f32.mxu0 %vm9380_vm0, %v11235_v6 }
0x21ef   :  { %8944 = vmatprep.subr.bf16.mxu0 %v9515_v28 }
0x21f0   :  { %8930 = vmatpush1.bf16.msra.mxu1 %v9553_v41 }
0x21f1   :  { %8711 = vmatprep.subr.mxu1 %v11235_v6 }
0x21f3   :  { %8370 = vmatmul.mubr.msk.f32.vlgmr.msra.gmra.mrb[26].mxu1 %vm64_vm1, %v10192_v57 }
0x21f4   :  { %8712 = vmatpush3.msra.mxu1 %v10202_v58  ;;  %8713 = vmatprep.mubr.msk.f32.mxu1 %vm9380_vm0, %v11235_v6 }
0x21f5   :  { %8716 = vmatprep.subr.mxu1 %v11235_v6 }
0x22be   :  { %v10216_v27 = vpop.f32.mrb[24].mxu1 }
0x22bf   :  { %v8688_v54 = vpop.f32.mrb[25].mxu1  ;;  %v4268_v23 = vpop.f32.mrb[24].mxu0 }
0x22c0   :  { %v4269_v0 = vadd.f32 %v4268_v23, %v9592_v53  ;;  %v8710_v30 = vpop.f32.mrb[25].mxu0 }
0x22c2   :  { %9178 = vtanh.f32 %v4269_v0 }
0x22c6   :  { %v4197_v63 = vpop.f32.mrb[26].mxu1 }
0x22c7   :  { %v4198_v12 = vadd.f32 %v4197_v63, %v9589_v52  ;;  %v10220_v19 = vpop.f32.mrb[27].mxu1 }
0x22c9   :  { %9180 = vtanh.f32 %v4198_v12  ;;  %v8372_v12 = vmul.f32 -1.442695, %v4269_v0 }
0x22cb   :  { %9182 = vpow2.f32 %v8372_v12 }
0x22cc   :  { %v10222_v1 = vpop.eup %9178 }
0x22cd   :  { %4439 = vrot.lane.b32.xlu0 %v10222_v1, %s9384_s6  ;;  %v4361_v30 = vrot.slane %v10222_v1, %v9634_v22  ;;  %v4353_v63 = vrot.slane %v10222_v1, %v9579_v49 }
0x22d3   :  { %v9181_v45 = vpop.eup %9180 }
0x22d4   :  { %4276 = vrot.lane.b32.xlu1 %v9181_v45, %s9382_s19 }
0x233f   :  { %v4440_v24 = vpop.permute.xlu0 %4439 }
0x2340   :  { %8714 = vmatmul.mubr.msk.f32.vlgmr.msra.gmra.mrb[28].mxu1 %vm499_vm2, %v4440_v24 }
0x2341   :  { %8717 = vmatpush3.msra.mxu1 %v10202_v58  ;;  %8718 = vmatprep.mubr.msk.f32.mxu1 %vm9380_vm0, %v11235_v6 }
0x2342   :  { %8937 = vmatprep.subr.bf16.mxu1 %v11231_v3 }
0x2346   :  { %v4277_v16 = vpop.permute.xlu1 %4276 }
0x2347   :  { %v4279_v38 = vmul.f32 %v9181_v45, %v4277_v16  ;;  %v9183_v45 = vpop.eup %9182 }
0x2348   :  { %v4283_v24 = vadd.f32 1.0, %v9183_v45 }
0x2349   :  { %v4293_v18 = vrot.slane %v4279_v38, %v9613_v5 }
0x234a   :  { %9184 = vrcp.f32 %v4283_v24 }
0x234b   :  { %v4294_v15 = vcombine.high %v4293_v18, %v4293_v18  ;;  %v4301_v8 = vrot.slane %v4293_v18, %v9613_v5 }
0x234d   :  { %v4312_v40 = vrot.slane %v4301_v8, %v9579_v49  ;;  %v4308_v39 = vrot.slane %v4294_v15, %v9613_v5 }
0x234f   :  { %v4319_v35 = vmul.f32 %v4312_v40, %v10117_v59  ;;  %v4316_v47 = vrot.slane %v4308_v39, %v9579_v49 }
0x2351   :  { %v4321_v31 = vsel %vm378_vm3, %v4319_v35, 0.0  ;;  %v4320_v54 = vmul.f32 %v4316_v47, %v10113_v34 }
0x2352   :  { %4322 = vadd.xlane.f32.xlu0 %v4321_v31 }
0x2353   :  { %v4324_v23 = vsel %vm378_vm3, %v4320_v54, 0.0 }
0x2354   :  { %4325 = vadd.xlane.f32.xlu1 %v4324_v23  ;;  %v9185_v16 = vpop.eup %9184 }
0x2355   :  { %v4334_v38 = vrot.slane %v9185_v16, %v9613_v5 }
0x2357   :  { %v4342_v15 = vrot.slane %v4334_v38, %v9613_v5  ;;  %v4335_v8 = vcombine.high %v4334_v38, %v4334_v38 }
0x2359   :  { %v4371_v31 = vrot.slane %v4342_v15, %v9579_v49  ;;  %v4349_v23 = vrot.slane %v4335_v8, %v9613_v5 }
0x235b   :  { %v4375_v12 = vrot.slane %v4349_v23, %v9579_v49 }
0x2365   :  { %4364 = vbcast.lane.b32.xlu1 %v4361_v30, 320 }
0x2368   :  { %4356 = vbcast.lane.b32.xlu0 %v4353_v63, 320 }
0x23df   :  { %v4323_v18 = vpop.xlane.xlu0 %4322 }
0x23e1   :  { %v4326_v39 = vpop.xlane.xlu1 %4325 }
0x23e3   :  { %v4357_v35 = vpop.permute.xlu0 %4356 }
0x23e4   :  { %v4366_v54 = vsub.f32 %v4357_v35, %v4323_v18 }
0x23e5   :  { %v4365_v30 = vpop.permute.xlu1 %4364 }
0x23e6   :  { %v4378_v0 = vmul.f32 %v4371_v31, %v4366_v54  ;;  %v4367_v63 = vsub.f32 %v4365_v30, %v4326_v39 }
0x23e8   :  { %4382 = vperm.xlu0 %9040, %v4378_v0   ;;  %v4379_v45 = vmul.f32 %v4375_v12, %v4367_v63 }
0x23ec   :  { %4387 = vperm.xlu0 %9040, %v4379_v45  }
0x23f0   :  { %9041 = vset.pattern.permute.xlu0 %v11233_v43 }
0x2413   :  { %v4509_v24 = vpop.f32.mrb[28].mxu1 }
0x2414   :  { %v8715_v16 = vpop.f32.mrb[29].mxu1 }
0x2467   :  { %v4383_v38 = vpop.permute.xlu0 %4382 }
0x2468   :  { %v4390_v26 = vmul.f32 %v4383_v38, %v4312_v40 }
0x246a   :  { %v4392_v3 = vadd.f32 %v4390_v26, %v10117_v59 }
0x246b   :  { %v4388_v15 = vpop.permute.xlu0 %4387 }
0x246c   :  { %v4391_v18 = vmul.f32 %v4388_v15, %v4316_v47  ;;  %v4394_v35 = vmul.f32 %v4392_v3, %v4392_v3 }
0x246e   :  { %v4393_v8 = vadd.f32 %v4391_v18, %v10113_v34  ;;  %v4396_v39 = vsel %vm378_vm3, %v4394_v35, 0.0 }
0x246f   :  { %4397 = vadd.xlane.f32.xlu1 %v4396_v39  ;;  %v4200_v39 = vadd.f32 %v10220_v19, %v9651_v13 }
0x2470   :  { %v4395_v31 = vmul.f32 %v4393_v8, %v4393_v8 }
0x2472   :  { %v4399_v54 = vsel %vm378_vm3, %v4395_v31, 0.0 }
0x2473   :  { %4400 = vadd.xlane.f32.xlu0 %v4399_v54 }
0x24fc   :  { %v4398_v23 = vpop.xlane.xlu1 %4397 }
0x24fd   :  { %v4402_v30 = vrot.slane %v4398_v23, 4 }
0x24ff   :  { %v4403_v0 = vadd.f32 %v4402_v30, %v4398_v23 }
0x2500   :  { %v4401_v63 = vpop.xlane.xlu0 %4400 }
0x2501   :  { %v4404_v12 = vrot.slane %v4403_v0, 2  ;;  %v4408_v40 = vrot.slane %v4401_v63, 4 }
0x2503   :  { %v4405_v45 = vadd.f32 %v4404_v12, %v4403_v0  ;;  %v4409_v26 = vadd.f32 %v4408_v40, %v4401_v63 }
0x2505   :  { %v4406_v16 = vrot.slane %v4405_v45, 1  ;;  %v4410_v47 = vrot.slane %v4409_v26, 2 }
0x2507   :  { %v4407_v38 = vadd.f32 %v4406_v16, %v4405_v45  ;;  %v4411_v15 = vadd.f32 %v4410_v47, %v4409_v26 }
0x2509   :  { %9186 = vrsqrt.f32 %v4407_v38  ;;  %v4412_v18 = vrot.slane %v4411_v15, 1  ;;  %vm4416_vm12 = vcmp.eq.f32.partialorder %v4407_v38, inf  ;;  %v4419_v23 = vand.u32 2147483648, %v4407_v38 }
0x250a   :  { %vm4418_vm13 = vcmp.eq.f32.partialorder %v4407_v38, 0.0 }
0x250b   :  { %v4413_v35 = vadd.f32 %v4412_v18, %v4411_v15 }
0x250d   :  { %9188 = vrsqrt.f32 %v4413_v35  ;;  %vm4423_vm14 = vcmp.eq.f32.partialorder %v4413_v35, inf  ;;  %v4426_v45 = vand.u32 2147483648, %v4413_v35  ;;  %vm4425_vm15 = vcmp.eq.f32.partialorder %v4413_v35, 0.0 }
0x250e   :  { %9190 = vtanh.f32 %v4200_v39 }
0x2513   :  { %v9187_v31 = vpop.eup %9186 }
0x2514   :  { %v4415_v54 = vmul.f32 %v9187_v31, %v4407_v38 }
0x2516   :  { %v4417_v30 = vsel %vm4416_vm12, %v4407_v38, %v4415_v54 }
0x2517   :  { %v4420_v0 = vsel %vm4418_vm13, %v4419_v23, %v4417_v30  ;;  %v9189_v63 = vpop.eup %9188 }
0x2518   :  { %v8373_v12 = vadd.f32 -1.0, %v4420_v0  ;;  %v4422_v40 = vmul.f32 %v9189_v63, %v4413_v35  ;;  %v9191_v47 = vpop.eup %9190 }
0x2519   :  { %v4513_v18 = vmul.f32 %v9191_v47, %v4509_v24 }
0x251a   :  { %v4430_v26 = vmax.f32 %v8373_v12, 0.0  ;;  %v4424_v16 = vsel %vm4423_vm14, %v4413_v35, %v4422_v40  ;;  %vm7966_vm14 = vcmask 254976  }
0x251b   :  { %v4427_v15 = vsel %vm4425_vm15, %v4426_v45, %v4424_v16  ;;  %v4521_v43 = vrot.slane %v4513_v18, %v9613_v5 }
0x251c   :  { %v4432_v19 = vadd.f32 1.0, %v4430_v26  ;;  %v8374_v39 = vadd.f32 -1.0, %v4427_v15 }
0x251d   :  { %v4529_v38 = vrot.slane %v4521_v43, %v9613_v5  ;;  %v4522_v23 = vcombine.high %v4521_v43, %v4521_v43 }
0x251e   :  { %9192 = vrcp.f32 %v4432_v19  ;;  %v4431_v31 = vmax.f32 %v8374_v39, 0.0 }
0x251f   :  { %v4540_v63 = vrot.slane %v4529_v38, %v9579_v49  ;;  %v4536_v35 = vrot.slane %v4522_v23, %v9613_v5 }
0x2520   :  { %v4433_v54 = vadd.f32 1.0, %v4431_v31 }
0x2521   :  { %v4544_v26 = vrot.slane %v4536_v35, %v9579_v49 }
0x2522   :  { %9194 = vrcp.f32 %v4433_v54 }
0x2528   :  { %v9193_v30 = vpop.eup %9192 }
0x2529   :  { %v10259_v0 = vmul.f32 %v9193_v30, %v4392_v3 }
0x252b   :  { %v4547_v12 = vmul.f32 %v4540_v63, %v10259_v0 }
0x252c   :  { %v9195_v24 = vpop.eup %9194 }
0x252d   :  { %v4549_v40 = vsel %vm378_vm3, %v4547_v12, 0.0  ;;  %v10265_v45 = vmul.f32 %v9195_v24, %v4393_v8 }
0x252e   :  { %4550 = vadd.xlane.f32.xlu0 %v4549_v40 }
0x252f   :  { %11261 = vst [vmem:[#allocation18_spill] sm:$0xff] %v10265_v45  ;;  %v4548_v16 = vmul.f32 %v4544_v26, %v10265_v45 }
0x2531   :  { %v4552_v43 = vsel %vm378_vm3, %v4548_v16, 0.0 }
0x2532   :  { %4553 = vadd.xlane.f32.xlu0 %v4552_v43 }
0x25bb   :  { %v4551_v3 = vpop.xlane.xlu0 %4550 }
0x25bc   :  { %v4571_v15 = vmul.f32 %v4551_v3, %v4551_v3  ;;  %v4560_v18 = vrot.slane %v4551_v3, %v9676_v29 }
0x25be   :  { %v4578_v8 = vrot.slane %v4571_v15, %v9676_v29 }
0x25bf   :  { %v4554_v19 = vpop.xlane.xlu0 %4553 }
0x25c0   :  { %v4564_v39 = vrot.slane %v4554_v19, %v9676_v29  ;;  %v4572_v31 = vmul.f32 %v4554_v19, %v4554_v19 }
0x25c2   :  { %v4565_v54 = vsel %vm626_vm8, %v4564_v39, %v4560_v18  ;;  %v4582_v38 = vrot.slane %v4572_v31, %v9676_v29 }
0x25c3   :  { %v4567_v23 = vsel %vm629_vm9, %v4565_v54, 0.0 }
0x25c4   :  { %4568 = vadd.xlane.f32.xlu1 %v4567_v23  ;;  %v4583_v30 = vsel %vm626_vm8, %v4582_v38, %v4578_v8 }
0x25c5   :  { %v4585_v63 = vsel %vm629_vm9, %v4583_v30, 0.0 }
0x25c6   :  { %4586 = vadd.xlane.f32.xlu0 %v4585_v63 }
0x2651   :  { %v4569_v35 = vpop.xlane.xlu1 %4568 }
0x2652   :  { %v4570_v12 = vmul.f32 0.125, %v4569_v35 }
0x2653   :  { %v4587_v24 = vpop.xlane.xlu0 %4586 }
0x2654   :  { %v4589_v40 = vmul.f32 %v4570_v12, %v4570_v12  ;;  %v4588_v26 = vmul.f32 0.125, %v4587_v24  ;;  %v4595_v15 = vrot.slane %v4570_v12, %v9579_v49  ;;  %v4599_v18 = vrot.slane %v4570_v12, %v9634_v22 }
0x2656   :  { %v4590_v16 = vsub.f32 %v4588_v26, %v4589_v40  ;;  %v4602_v31 = vsub.f32 %v4551_v3, %v4595_v15  ;;  %v4603_v54 = vsub.f32 %v4554_v19, %v4599_v18  ;;  %v11262_v3 = vmov 0.0|0.0   ;;  %v8378_v18 = vld [vmem:[%s11215_s0 + $0xa] sm:$0x3] }
0x2658   :  { %v4604_v43 = vadd.f32 1e-05, %v4590_v16 }
0x265a   :  { %9196 = vrsqrt.f32 %v4604_v43 }
0x2664   :  { %v9197_v39 = vpop.eup %9196 }
0x2665   :  { %v4614_v8 = vrot.slane %v9197_v39, %v9634_v22  ;;  %v4610_v38 = vrot.slane %v9197_v39, %v9579_v49 }
0x2667   :  { %v4618_v23 = vmul.f32 %v4614_v8, %v4603_v54  ;;  %v4617_v30 = vmul.f32 %v4610_v38, %v4602_v31 }
0x2669   :  { %4625 = vperm.xlu0 %9041, %v4618_v23   ;;  %4622 = vperm.xlu1 %9038, %v4617_v30  }
0x266d   :  { %4709 = vrot.lane.b32.xlu1 %v9191_v47, %s9382_s19 }
0x26e8   :  { %v4626_v63 = vpop.permute.xlu0 %4625  ;;  %v4623_v35 = vpop.permute.xlu1 %4622 }
0x26e9   :  { %v4634_v24 = vrot.slane %v4626_v63, %v9676_v29  ;;  %v4630_v40 = vrot.slane %v4623_v35, %v9676_v29 }
0x26eb   :  { %v4635_v12 = vsel %vm626_vm8, %v4634_v24, %v4630_v40 }
0x26ec   :  { %8719 = vmatmul.mubr.msk.f32.vlgmr.msra.gmra.mrb[30].mxu1 %vm499_vm2, %v4635_v12  ;;  %v4710_v47 = vpop.permute.xlu1 %4709 }
0x26ed   :  { %8939 = vmatpush3.bf16.msra.mxu1 %v9474_v4  ;;  %8734 = vmatprep.mubr.msk.f32.mxu1 %vm9380_vm0, %v11235_v6 }
0x26ee   :  { %8940 = vmatprep.subr.bf16.mxu1 %v11262_v3 }
0x26f1   :  { %8942 = vmatpush3.bf16.msra.mxu1 %v9485_v7 }
0x26f2   :  { %8951 = vmatprep.subr.bf16.mxu1 %v11262_v3 }
0x26f4   :  { %8735 = vmatmul.mubr.msk.f32.vlgmr.msra.gmra.mrb[32].mxu1 %vm64_vm1, %v10192_v57 }
0x26f5   :  { %8953 = vmatpush3.bf16.msra.mxu1 %v9528_v33  ;;  %8745 = vmatprep.mubr.msk.f32.mxu1 %vm9380_vm0, %v11235_v6 }
0x26f6   :  { %8954 = vmatprep.subr.bf16.mxu1 %v11262_v3 }
0x26f9   :  { %8956 = vmatpush3.bf16.msra.mxu1 %v9555_v42 }
0x26fa   :  { %8758 = vmatprep.subr.mxu1 %v11235_v6 }
0x27bf   :  { %v4704_v19 = vpop.f32.mrb[30].mxu1 }
0x27c0   :  { %v4712_v26 = vmul.f32 %v4710_v47, %v4704_v19  ;;  %v8720_v16 = vpop.f32.mrb[31].mxu1 }
0x27c2   :  { %v4720_v43 = vrot.slane %v4712_v26, %v9613_v5 }
0x27c4   :  { %v4721_v15 = vcombine.high %v4720_v43, %v4720_v43  ;;  %v4728_v35 = vrot.slane %v4720_v43, %v9613_v5 }
0x27c6   :  { %v4735_v39 = vrot.slane %v4721_v15, %v9613_v5  ;;  %v4739_v24 = vrot.slane %v4728_v35, %v9579_v49 }
0x27c7   :  { %v5081_v31 = vpop.f32.mrb[32].mxu1 }
0x27c8   :  { %v5085_v54 = vadd.f32 %v8378_v18, %v5081_v31  ;;  %v8736_v8 = vpop.f32.mrb[33].mxu1  ;;  %v4743_v38 = vrot.slane %v4735_v39, %v9579_v49  ;;  %v4746_v40 = vmul.f32 %v4739_v24, %v10259_v0 }
0x27ca   :  { %9198 = vtanh.f32 %v5085_v54  ;;  %v4747_v23 = vmul.f32 %v4743_v38, %v10265_v45  ;;  %v4748_v12 = vsel %vm378_vm3, %v4746_v40, 0.0  ;;  %v8380_v47 = vmul.f32 -1.442695, %v5085_v54 }
0x27cc   :  { %v4751_v30 = vsel %vm378_vm3, %v4747_v23, 0.0  ;;  %9200 = vpow2.f32 %v8380_v47 }
0x27cd   :  { %4752 = vadd.xlane.f32.xlu0 %v4751_v30 }
0x27d4   :  { %v9199_v63 = vpop.eup %9198 }
0x27d5   :  { %5095 = vrot.lane.b32.xlu1 %v9199_v63, %s9382_s19 }
0x27d6   :  { %v9201_v19 = vpop.eup %9200 }
0x27d7   :  { %v5089_v26 = vadd.f32 1.0, %v9201_v19 }
0x27d9   :  { %9202 = vrcp.f32 %v5089_v26 }
0x27e3   :  { %v9203_v16 = vpop.eup %9202 }
0x27f9   :  { %4749 = vadd.xlane.f32.xlu1 %v4748_v12  ;;  %v5093_v12 = vmul.f32 %v9203_v16, %v10178_v14 }
0x2847   :  { %v5096_v15 = vpop.permute.xlu1 %5095 }
0x2848   :  { %v5098_v18 = vmul.f32 %v9203_v16, %v5096_v15 }
0x284a   :  { %5100 = vrot.lane.b32.xlu1 %v5098_v18, %s9383_s1 }
0x285a   :  { %v4753_v39 = vpop.xlane.xlu0 %4752 }
0x285b   :  { %v4771_v31 = vmul.f32 %v4753_v39, %v4753_v39  ;;  %v4763_v8 = vrot.slane %v4753_v39, %v9676_v29 }
0x285d   :  { %v4781_v63 = vrot.slane %v4771_v31, %v9676_v29 }
0x2886   :  { %v4750_v43 = vpop.xlane.xlu1 %4749 }
0x2887   :  { %v4759_v38 = vrot.slane %v4750_v43, %v9676_v29  ;;  %v4770_v23 = vmul.f32 %v4750_v43, %v4750_v43 }
0x2889   :  { %v4764_v30 = vsel %vm626_vm8, %v4763_v8, %v4759_v38  ;;  %v4777_v54 = vrot.slane %v4770_v23, %v9676_v29 }
0x288a   :  { %v4766_v35 = vsel %vm629_vm9, %v4764_v30, 0.0 }
0x288b   :  { %4767 = vadd.xlane.f32.xlu1 %v4766_v35  ;;  %v4782_v24 = vsel %vm626_vm8, %v4781_v63, %v4777_v54 }
0x288c   :  { %v4784_v40 = vsel %vm629_vm9, %v4782_v24, 0.0 }
0x288d   :  { %4785 = vadd.xlane.f32.xlu0 %v4784_v40 }
0x28bc   :  { %v5101_v47 = vpop.permute.xlu1 %5100 }
0x28bd   :  { %v10324_v19 = vadd.f32 %v5101_v47, %v5093_v12 }
0x28bf   :  { %9204 = vtanh.f32 %v10324_v19 }
0x28c9   :  { %v9205_v26 = vpop.eup %9204 }
0x28ca   :  { %5106 = vrot.lane.b32.xlu0 %v9205_v26, %s9382_s19 }
0x2918   :  { %v4768_v15 = vpop.xlane.xlu1 %4767 }
0x2919   :  { %v4769_v18 = vmul.f32 0.125, %v4768_v15  ;;  %v11263_v15 = vmov 80  }
0x291a   :  { %v4786_v31 = vpop.xlane.xlu0 %4785 }
0x291b   :  { %v4787_v8 = vmul.f32 0.125, %v4786_v31  ;;  %v4788_v38 = vmul.f32 %v4769_v18, %v4769_v18  ;;  %v4794_v54 = vrot.slane %v4769_v18, %v9579_v49  ;;  %v4798_v14 = vrot.slane %v4769_v18, %v9634_v22 }
0x291d   :  { %v4789_v23 = vsub.f32 %v4787_v8, %v4788_v38  ;;  %v4801_v35 = vsub.f32 %v4750_v43, %v4794_v54  ;;  %v4802_v47 = vsub.f32 %v4753_v39, %v4798_v14 }
0x291f   :  { %v4803_v30 = vadd.f32 1e-05, %v4789_v23 }
0x2921   :  { %9206 = vrsqrt.f32 %v4803_v30 }
0x292b   :  { %v9207_v63 = vpop.eup %9206 }
0x292c   :  { %v4809_v24 = vrot.slane %v9207_v63, %v9579_v49  ;;  %v4813_v12 = vrot.slane %v9207_v63, %v9634_v22 }
0x292e   :  { %v4816_v40 = vmul.f32 %v4809_v24, %v4801_v35  ;;  %v4817_v26 = vmul.f32 %v4813_v12, %v4802_v47 }
0x2930   :  { %4821 = vperm.xlu0 %9041, %v4816_v40  }
0x2934   :  { %4824 = vperm.xlu0 %9041, %v4817_v26  }
0x2938   :  { %9042 = vset.pattern.permute.xlu0 %v11263_v15 }
0x293c   :  { %v5107_v31 = vpop.permute.xlu0 %5106 }
0x293d   :  { %v10333_v8 = vmul.f32 %v9203_v16, %v5107_v31 }
0x293f   :  { %11264 = vst [vmem:[#allocation19_spill] sm:$0xff] %v10333_v8  ;;  %5111 = vrot.lane.b32.xlu0 %v10333_v8, %s9383_s1 }
0x29af   :  { %v4822_v38 = vpop.permute.xlu0 %4821 }
0x29b0   :  { %v4829_v43 = vrot.slane %v4822_v38, %v9676_v29 }
0x29b3   :  { %v4825_v18 = vpop.permute.xlu0 %4824 }
0x29b4   :  { %v4833_v23 = vrot.slane %v4825_v18, %v9676_v29 }
0x29b6   :  { %v4834_v30 = vsel %vm626_vm8, %v4833_v23, %v4829_v43 }
0x29b7   :  { %8724 = vmatmul.mubr.msk.f32.vlgmr.msra.gmra.mrb[26].mxu0 %vm499_vm2, %v4834_v30  ;;  %v10341_v39 = vpop.permute.xlu0 %5111 }
0x29b8   :  { %8946 = vmatpush1.bf16.msra.mxu0 %v9526_v32  ;;  %8746 = vmatmul.mubr.msk.f32.vlgmr.msra.gmra.mrb[34].mxu1 %vm64_vm1, %v10341_v39 }
0x29b9   :  { %8948 = vmatprep.subr.bf16.mxu0 %v9540_v37  ;;  %5179 = vmatprep.mubr.f32.mxu0 %v11235_v6 }
0x29ba   :  { %8759 = vmatpush3.msra.mxu1 %v10202_v58  ;;  %8760 = vmatprep.mubr.msk.f32.mxu1 %vm9380_vm0, %v11235_v6 }
0x29bb   :  { %8964 = vmatprep.subr.bf16.mxu1 %v9515_v28 }
0x29bc   :  { %8950 = vmatpush1.bf16.msra.mxu0 %v9553_v41 }
0x29bd   :  { %8748 = vmatprep.subr.mxu0 %v11235_v6 }
0x29bf   :  { %8381 = vmatmul.mubr.msk.f32.vlgmr.msra.gmra.mrb[28].mxu0 %vm64_vm1, %v10341_v39 }
0x29c0   :  { %8749 = vmatpush3.msra.mxu0 %v10202_v58  ;;  %8750 = vmatprep.mubr.msk.f32.mxu0 %vm9380_vm0, %v11235_v6 }
0x29c1   :  { %8753 = vmatprep.subr.mxu0 %v11235_v6 }
0x2a8a   :  { %v10360_v16 = vpop.f32.mrb[26].mxu0 }
0x2a8b   :  { %v8725_v54 = vpop.f32.mrb[27].mxu0  ;;  %v5252_v63 = vpop.f32.mrb[34].mxu1 }
0x2a8c   :  { %v5253_v14 = vadd.f32 %v5252_v63, %v9592_v53  ;;  %v8747_v35 = vpop.f32.mrb[35].mxu1 }
0x2a8e   :  { %9208 = vtanh.f32 %v5253_v14 }
0x2a92   :  { %v5181_v24 = vpop.f32.mrb[28].mxu0 }
0x2a93   :  { %v5182_v40 = vadd.f32 %v5181_v24, %v9589_v52  ;;  %v10364_v12 = vpop.f32.mrb[29].mxu0 }
0x2a95   :  { %9210 = vtanh.f32 %v5182_v40 }
0x2a98   :  { %v10366_v47 = vpop.eup %9208 }
0x2a99   :  { %5423 = vrot.lane.b32.xlu0 %v10366_v47, %s9384_s6 }
0x2a9f   :  { %v9211_v26 = vpop.eup %9210 }
0x2aa0   :  { %5260 = vrot.lane.b32.xlu1 %v9211_v26, %s9382_s19 }
0x2b0b   :  { %v5424_v31 = vpop.permute.xlu0 %5423 }
0x2b0c   :  { %8751 = vmatmul.mubr.msk.f32.vlgmr.msra.gmra.mrb[30].mxu0 %vm499_vm2, %v5424_v31  ;;  %v5345_v31 = vrot.slane %v10366_v47, %v9634_v22 }
0x2b0d   :  { %8754 = vmatpush3.msra.mxu0 %v10202_v58  ;;  %8755 = vmatprep.mubr.msk.f32.mxu0 %vm9380_vm0, %v11235_v6 }
0x2b0e   :  { %8957 = vmatprep.subr.bf16.mxu0 %v11262_v3 }
0x2b12   :  { %v5261_v38 = vpop.permute.xlu1 %5260 }
0x2b13   :  { %v5263_v18 = vmul.f32 %v9211_v26, %v5261_v38  ;;  %v5337_v38 = vrot.slane %v10366_v47, %v9579_v49 }
0x2b15   :  { %v5277_v43 = vrot.slane %v5263_v18, %v9613_v5  ;;  %v8383_v18 = vmul.f32 -1.442695, %v5253_v14 }
0x2b17   :  { %v5278_v23 = vcombine.high %v5277_v43, %v5277_v43  ;;  %v5285_v30 = vrot.slane %v5277_v43, %v9613_v5  ;;  %9212 = vpow2.f32 %v8383_v18 }
0x2b19   :  { %v5296_v54 = vrot.slane %v5285_v30, %v9579_v49  ;;  %v5292_v63 = vrot.slane %v5278_v23, %v9613_v5 }
0x2b1b   :  { %v5303_v35 = vmul.f32 %v5296_v54, %v10259_v0  ;;  %v5300_v58 = vrot.slane %v5292_v63, %v9579_v49 }
0x2b1d   :  { %v5305_v24 = vsel %vm378_vm3, %v5303_v35, 0.0  ;;  %v5304_v40 = vmul.f32 %v5300_v58, %v10265_v45 }
0x2b1e   :  { %5306 = vadd.xlane.f32.xlu0 %v5305_v24 }
0x2b1f   :  { %v5308_v26 = vsel %vm378_vm3, %v5304_v40, 0.0 }
0x2b20   :  { %5309 = vadd.xlane.f32.xlu1 %v5308_v26 }
0x2b21   :  { %v9213_v43 = vpop.eup %9212 }
0x2b22   :  { %v5267_v23 = vadd.f32 1.0, %v9213_v43 }
0x2b24   :  { %9214 = vrcp.f32 %v5267_v23 }
0x2b2e   :  { %v9215_v30 = vpop.eup %9214 }
0x2b2f   :  { %v5318_v63 = vrot.slane %v9215_v30, %v9613_v5  ;;  %v11265_v30 = vmov 0  }
0x2b31   :  { %5348 = vbcast.lane.b32.xlu1 %v5345_v31, 320  ;;  %v5326_v24 = vrot.slane %v5318_v63, %v9613_v5  ;;  %v5319_v40 = vcombine.high %v5318_v63, %v5318_v63 }
0x2b33   :  { %v5355_v31 = vrot.slane %v5326_v24, %v9579_v49  ;;  %v5333_v57 = vrot.slane %v5319_v40, %v9613_v5 }
0x2b34   :  { %5340 = vbcast.lane.b32.xlu0 %v5337_v38, 320 }
0x2b35   :  { %v5359_v43 = vrot.slane %v5333_v57, %v9579_v49 }
0x2bab   :  { %v5307_v35 = vpop.xlane.xlu0 %5306 }
0x2bad   :  { %v5310_v26 = vpop.xlane.xlu1 %5309 }
0x2baf   :  { %v5341_v6 = vpop.permute.xlu0 %5340 }
0x2bb0   :  { %v5350_v60 = vsub.f32 %v5341_v6, %v5307_v35 }
0x2bb1   :  { %v5349_v38 = vpop.permute.xlu1 %5348 }
0x2bb2   :  { %v5362_v14 = vmul.f32 %v5355_v31, %v5350_v60  ;;  %v5351_v18 = vsub.f32 %v5349_v38, %v5310_v26 }
0x2bb4   :  { %5366 = vperm.xlu0 %9042, %v5362_v14   ;;  %v5363_v23 = vmul.f32 %v5359_v43, %v5351_v18 }
0x2bb8   :  { %5371 = vperm.xlu0 %9042, %v5363_v23  }
0x2bbc   :  { %9043 = vset.pattern.permute.xlu0 %v11265_v30 }
0x2bdf   :  { %v5493_v46 = vpop.f32.mrb[30].mxu0 }
0x2be0   :  { %v8752_v48 = vpop.f32.mrb[31].mxu0 }
0x2c33   :  { %v5367_v63 = vpop.permute.xlu0 %5366 }
0x2c34   :  { %v5374_v2 = vmul.f32 %v5367_v63, %v5296_v54 }
0x2c36   :  { %v5376_v8 = vadd.f32 %v5374_v2, %v10259_v0 }
0x2c37   :  { %v5372_v24 = vpop.permute.xlu0 %5371 }
0x2c38   :  { %v5375_v6 = vmul.f32 %v5372_v24, %v5300_v58  ;;  %v5378_v35 = vmul.f32 %v5376_v8, %v5376_v8 }
0x2c3a   :  { %v5377_v40 = vadd.f32 %v5375_v6, %v10265_v45  ;;  %v5380_v60 = vsel %vm378_vm3, %v5378_v35, 0.0 }
0x2c3b   :  { %5381 = vadd.xlane.f32.xlu1 %v5380_v60  ;;  %v5184_v60 = vadd.f32 %v10364_v12, %v9651_v13 }
0x2c3c   :  { %v5379_v57 = vmul.f32 %v5377_v40, %v5377_v40 }
0x2c3e   :  { %v5383_v26 = vsel %vm378_vm3, %v5379_v57, 0.0 }
0x2c3f   :  { %5384 = vadd.xlane.f32.xlu0 %v5383_v26 }
0x2cc8   :  { %v5382_v31 = vpop.xlane.xlu1 %5381 }
0x2cc9   :  { %v5386_v38 = vrot.slane %v5382_v31, 4 }
0x2ccb   :  { %v5387_v14 = vadd.f32 %v5386_v38, %v5382_v31 }
0x2ccc   :  { %v5385_v48 = vpop.xlane.xlu0 %5384 }
0x2ccd   :  { %v5388_v18 = vrot.slane %v5387_v14, 2  ;;  %v5392_v54 = vrot.slane %v5385_v48, 4 }
0x2ccf   :  { %v5389_v43 = vadd.f32 %v5388_v18, %v5387_v14  ;;  %v5393_v2 = vadd.f32 %v5392_v54, %v5385_v48 }
0x2cd1   :  { %v5390_v23 = vrot.slane %v5389_v43, 1  ;;  %v5394_v58 = vrot.slane %v5393_v2, 2 }
0x2cd3   :  { %v5391_v63 = vadd.f32 %v5390_v23, %v5389_v43  ;;  %v5395_v24 = vadd.f32 %v5394_v58, %v5393_v2 }
0x2cd5   :  { %9216 = vrsqrt.f32 %v5391_v63  ;;  %v5396_v6 = vrot.slane %v5395_v24, 1  ;;  %vm5400_vm4 = vcmp.eq.f32.partialorder %v5391_v63, inf  ;;  %v5403_v31 = vand.u32 2147483648, %v5391_v63 }
0x2cd6   :  { %vm5402_vm5 = vcmp.eq.f32.partialorder %v5391_v63, 0.0 }
0x2cd7   :  { %v5397_v35 = vadd.f32 %v5396_v6, %v5395_v24 }
0x2cd9   :  { %9218 = vrsqrt.f32 %v5397_v35  ;;  %vm5407_vm6 = vcmp.eq.f32.partialorder %v5397_v35, inf  ;;  %v5410_v43 = vand.u32 2147483648, %v5397_v35  ;;  %vm5409_vm7 = vcmp.eq.f32.partialorder %v5397_v35, 0.0 }
0x2cda   :  { %9220 = vtanh.f32 %v5184_v60 }
0x2cdf   :  { %v9217_v57 = vpop.eup %9216 }
0x2ce0   :  { %v5399_v26 = vmul.f32 %v9217_v57, %v5391_v63 }
0x2ce2   :  { %v5401_v38 = vsel %vm5400_vm4, %v5391_v63, %v5399_v26 }
0x2ce3   :  { %v5404_v14 = vsel %vm5402_vm5, %v5403_v31, %v5401_v38  ;;  %v9219_v48 = vpop.eup %9218 }
0x2ce4   :  { %v8384_v18 = vadd.f32 -1.0, %v5404_v14  ;;  %v5406_v54 = vmul.f32 %v9219_v48, %v5397_v35  ;;  %v9221_v58 = vpop.eup %9220 }
0x2ce5   :  { %v5497_v6 = vmul.f32 %v9221_v58, %v5493_v46 }
0x2ce6   :  { %v5414_v2 = vmax.f32 %v8384_v18, 0.0  ;;  %v5408_v23 = vsel %vm5407_vm6, %v5397_v35, %v5406_v54  ;;  %vm8129_vm6 = vcmask 195584  }
0x2ce7   :  { %v5411_v24 = vsel %vm5409_vm7, %v5410_v43, %v5408_v23  ;;  %v5505_v55 = vrot.slane %v5497_v6, %v9613_v5  ;;  %vm8132_vm7 = vcmask 326656  }
0x2ce8   :  { %v5416_v12 = vadd.f32 1.0, %v5414_v2  ;;  %v8385_v60 = vadd.f32 -1.0, %v5411_v24 }
0x2ce9   :  { %v5513_v63 = vrot.slane %v5505_v55, %v9613_v5  ;;  %v5506_v31 = vcombine.high %v5505_v55, %v5505_v55 }
0x2cea   :  { %9222 = vrcp.f32 %v5416_v12  ;;  %v5415_v57 = vmax.f32 %v8385_v60, 0.0 }
0x2ceb   :  { %v5524_v48 = vrot.slane %v5513_v63, %v9579_v49  ;;  %v5520_v35 = vrot.slane %v5506_v31, %v9613_v5 }
0x2cec   :  { %v5417_v26 = vadd.f32 1.0, %v5415_v57 }
0x2ced   :  { %v5528_v2 = vrot.slane %v5520_v35, %v9579_v49 }
0x2cee   :  { %9224 = vrcp.f32 %v5417_v26 }
0x2cf4   :  { %v9223_v38 = vpop.eup %9222 }
0x2cf5   :  { %v10403_v14 = vmul.f32 %v9223_v38, %v5376_v8 }
0x2cf7   :  { %v5531_v18 = vmul.f32 %v5524_v48, %v10403_v14 }
0x2cf8   :  { %v9225_v46 = vpop.eup %9224 }
0x2cf9   :  { %v5533_v54 = vsel %vm378_vm3, %v5531_v18, 0.0  ;;  %v10409_v43 = vmul.f32 %v9225_v46, %v5377_v40 }
0x2cfa   :  { %5534 = vadd.xlane.f32.xlu0 %v5533_v54 }
0x2cfb   :  { %11266 = vst [vmem:[#allocation20_spill] sm:$0xff] %v10409_v43  ;;  %v5532_v23 = vmul.f32 %v5528_v2, %v10409_v43 }
0x2cfd   :  { %v5536_v55 = vsel %vm378_vm3, %v5532_v23, 0.0 }
0x2cfe   :  { %5537 = vadd.xlane.f32.xlu1 %v5536_v55 }
0x2d87   :  { %v5535_v8 = vpop.xlane.xlu0 %5534 }
0x2d88   :  { %v5555_v24 = vmul.f32 %v5535_v8, %v5535_v8  ;;  %v5544_v6 = vrot.slane %v5535_v8, %v9676_v29 }
0x2d8a   :  { %v5562_v40 = vrot.slane %v5555_v24, %v9676_v29 }
0x2d8b   :  { %v5538_v12 = vpop.xlane.xlu1 %5537 }
0x2d8c   :  { %v5548_v60 = vrot.slane %v5538_v12, %v9676_v29  ;;  %v5556_v57 = vmul.f32 %v5538_v12, %v5538_v12 }
0x2d8e   :  { %v5549_v26 = vsel %vm626_vm8, %v5548_v60, %v5544_v6  ;;  %v5566_v63 = vrot.slane %v5556_v57, %v9676_v29 }
0x2d8f   :  { %v5551_v31 = vsel %vm629_vm9, %v5549_v26, 0.0 }
0x2d90   :  { %5552 = vadd.xlane.f32.xlu0 %v5551_v31  ;;  %v5567_v38 = vsel %vm626_vm8, %v5566_v63, %v5562_v40 }
0x2d91   :  { %v5569_v48 = vsel %vm629_vm9, %v5567_v38, 0.0 }
0x2d92   :  { %5570 = vadd.xlane.f32.xlu1 %v5569_v48 }
0x2e1d   :  { %v5553_v35 = vpop.xlane.xlu0 %5552 }
0x2e1e   :  { %v5554_v18 = vmul.f32 0.125, %v5553_v35 }
0x2e1f   :  { %v5571_v46 = vpop.xlane.xlu1 %5570 }
0x2e20   :  { %v5573_v54 = vmul.f32 %v5554_v18, %v5554_v18  ;;  %v5572_v2 = vmul.f32 0.125, %v5571_v46  ;;  %v5579_v24 = vrot.slane %v5554_v18, %v9579_v49  ;;  %v5583_v6 = vrot.slane %v5554_v18, %v9634_v22 }
0x2e22   :  { %v5574_v23 = vsub.f32 %v5572_v2, %v5573_v54  ;;  %v5586_v57 = vsub.f32 %v5535_v8, %v5579_v24  ;;  %v5587_v26 = vsub.f32 %v5538_v12, %v5583_v6  ;;  %v11267_v8 = vmov 0.0  }
0x2e24   :  { %v5588_v55 = vadd.f32 1e-05, %v5574_v23 }
0x2e26   :  { %9226 = vrsqrt.f32 %v5588_v55 }
0x2e30   :  { %v9227_v60 = vpop.eup %9226 }
0x2e31   :  { %v5598_v40 = vrot.slane %v9227_v60, %v9634_v22  ;;  %v5594_v63 = vrot.slane %v9227_v60, %v9579_v49 }
0x2e33   :  { %v5602_v31 = vmul.f32 %v5598_v40, %v5587_v26  ;;  %v5601_v38 = vmul.f32 %v5594_v63, %v5586_v57 }
0x2e35   :  { %5609 = vperm.xlu1 %9038, %v5602_v31   ;;  %5606 = vperm.xlu0 %9043, %v5601_v38  }
0x2e39   :  { %5693 = vrot.lane.b32.xlu1 %v9221_v58, %s9382_s19 }
0x2eb4   :  { %v5610_v48 = vpop.permute.xlu1 %5609  ;;  %v5607_v35 = vpop.permute.xlu0 %5606 }
0x2eb5   :  { %v5618_v46 = vrot.slane %v5610_v48, %v9676_v29  ;;  %v5614_v54 = vrot.slane %v5607_v35, %v9676_v29 }
0x2eb7   :  { %v5619_v18 = vsel %vm626_vm8, %v5618_v46, %v5614_v54 }
0x2eb8   :  { %8756 = vmatmul.mubr.msk.f32.vlgmr.msra.gmra.mrb[32].mxu0 %vm499_vm2, %v5619_v18  ;;  %v5694_v58 = vpop.permute.xlu1 %5693 }
0x2eb9   :  { %8959 = vmatpush3.bf16.msra.mxu0 %v9474_v4  ;;  %8771 = vmatprep.mubr.msk.f32.mxu0 %vm9380_vm0, %v11267_v8 }
0x2eba   :  { %8960 = vmatprep.subr.bf16.mxu0 %v11262_v3 }
0x2ebd   :  { %8962 = vmatpush3.bf16.msra.mxu0 %v9485_v7 }
0x2ebe   :  { %8971 = vmatprep.subr.bf16.mxu0 %v11262_v3 }
0x2ec0   :  { %8772 = vmatmul.mubr.msk.f32.vlgmr.msra.gmra.mrb[34].mxu0 %vm64_vm1, %v10341_v39  ;;  %v8389_v39 = vld [vmem:[%s11215_s0 + $0xc] sm:$0x3] }
0x2ec1   :  { %8973 = vmatpush3.bf16.msra.mxu0 %v9528_v33  ;;  %8782 = vmatprep.mubr.msk.f32.mxu0 %vm9380_vm0, %v11267_v8 }
0x2ec2   :  { %8974 = vmatprep.subr.bf16.mxu0 %v11262_v3 }
0x2ec5   :  { %8976 = vmatpush3.bf16.msra.mxu0 %v9555_v42 }
0x2ec6   :  { %8795 = vmatprep.subr.mxu0 %v11267_v8 }
0x2f8b   :  { %v5688_v12 = vpop.f32.mrb[32].mxu0 }
0x2f8c   :  { %v5696_v2 = vmul.f32 %v5694_v58, %v5688_v12  ;;  %v8757_v23 = vpop.f32.mrb[33].mxu0 }
0x2f8e   :  { %v5704_v55 = vrot.slane %v5696_v2, %v9613_v5 }
0x2f90   :  { %v5705_v24 = vcombine.high %v5704_v55, %v5704_v55  ;;  %v5712_v48 = vrot.slane %v5704_v55, %v9613_v5 }
0x2f92   :  { %v5719_v6 = vrot.slane %v5705_v24, %v9613_v5  ;;  %v5723_v35 = vrot.slane %v5712_v48, %v9579_v49 }
0x2f93   :  { %v6065_v60 = vpop.f32.mrb[34].mxu0 }
0x2f94   :  { %v6069_v57 = vadd.f32 %v8389_v39, %v6065_v60  ;;  %v8773_v26 = vpop.f32.mrb[35].mxu0  ;;  %v5727_v40 = vrot.slane %v5719_v6, %v9579_v49  ;;  %v5730_v46 = vmul.f32 %v5723_v35, %v10403_v14 }
0x2f96   :  { %9228 = vtanh.f32 %v6069_v57  ;;  %v5731_v63 = vmul.f32 %v5727_v40, %v10409_v43  ;;  %v5732_v54 = vsel %vm378_vm3, %v5730_v46, 0.0  ;;  %v8391_v18 = vmul.f32 -1.442695, %v6069_v57 }
0x2f98   :  { %v5735_v31 = vsel %vm378_vm3, %v5731_v63, 0.0  ;;  %9230 = vpow2.f32 %v8391_v18 }
0x2f99   :  { %5736 = vadd.xlane.f32.xlu0 %v5735_v31 }
0x2fa0   :  { %v9229_v38 = vpop.eup %9228 }
0x2fa1   :  { %6079 = vrot.lane.b32.xlu1 %v9229_v38, %s9382_s19 }
0x2fa2   :  { %v9231_v58 = vpop.eup %9230 }
0x2fa3   :  { %v6073_v12 = vadd.f32 1.0, %v9231_v58 }
0x2fa5   :  { %9232 = vrcp.f32 %v6073_v12 }
0x2faf   :  { %v9233_v2 = vpop.eup %9232 }
0x2fb0   :  { %v6077_v46 = vmul.f32 %v9233_v2, %v10324_v19 }
0x2fc5   :  { %5733 = vadd.xlane.f32.xlu1 %v5732_v54 }
0x3013   :  { %v6080_v23 = vpop.permute.xlu1 %6079 }
0x3014   :  { %v6082_v24 = vmul.f32 %v9233_v2, %v6080_v23 }
0x3016   :  { %6084 = vrot.lane.b32.xlu1 %v6082_v24, %s9383_s1 }
0x3026   :  { %v5737_v39 = vpop.xlane.xlu0 %5736 }
0x3027   :  { %v5755_v6 = vmul.f32 %v5737_v39, %v5737_v39  ;;  %v5747_v60 = vrot.slane %v5737_v39, %v9676_v29 }
0x3029   :  { %v5765_v31 = vrot.slane %v5755_v6, %v9676_v29 }
0x3052   :  { %v5734_v55 = vpop.xlane.xlu1 %5733 }
0x3053   :  { %v5743_v26 = vrot.slane %v5734_v55, %v9676_v29  ;;  %v5754_v40 = vmul.f32 %v5734_v55, %v5734_v55 }
0x3055   :  { %v5748_v63 = vsel %vm626_vm8, %v5747_v60, %v5743_v26  ;;  %v5761_v57 = vrot.slane %v5754_v40, %v9676_v29 }
0x3056   :  { %v5750_v38 = vsel %vm629_vm9, %v5748_v63, 0.0 }
0x3057   :  { %5751 = vadd.xlane.f32.xlu0 %v5750_v38  ;;  %v5766_v48 = vsel %vm626_vm8, %v5765_v31, %v5761_v57 }
0x3058   :  { %v5768_v35 = vsel %vm629_vm9, %v5766_v48, 0.0 }
0x305b   :  { %5769 = vadd.xlane.f32.xlu0 %v5768_v35 }
0x3088   :  { %v6085_v54 = vpop.permute.xlu1 %6084 }
0x3089   :  { %v10468_v18 = vadd.f32 %v6085_v54, %v6077_v46 }
0x308b   :  { %9234 = vtanh.f32 %v10468_v18 }
0x3095   :  { %v9235_v58 = vpop.eup %9234 }
0x3096   :  { %6090 = vrot.lane.b32.xlu1 %v9235_v58, %s9382_s19 }
0x30e4   :  { %v5752_v12 = vpop.xlane.xlu0 %5751 }
0x30e5   :  { %v5753_v23 = vmul.f32 0.125, %v5752_v12 }
0x30e7   :  { %v5772_v6 = vmul.f32 %v5753_v23, %v5753_v23  ;;  %v5778_v63 = vrot.slane %v5753_v23, %v9579_v49  ;;  %v5782_v19 = vrot.slane %v5753_v23, %v9634_v22 }
0x30e8   :  { %v5770_v24 = vpop.xlane.xlu0 %5769 }
0x30e9   :  { %v5771_v60 = vmul.f32 0.125, %v5770_v24  ;;  %v5785_v31 = vsub.f32 %v5734_v55, %v5778_v63  ;;  %v5786_v38 = vsub.f32 %v5737_v39, %v5782_v19 }
0x30eb   :  { %v5773_v26 = vsub.f32 %v5771_v60, %v5772_v6 }
0x30ed   :  { %v5787_v40 = vadd.f32 1e-05, %v5773_v26 }
0x30ef   :  { %9236 = vrsqrt.f32 %v5787_v40 }
0x30f9   :  { %v9237_v57 = vpop.eup %9236 }
0x30fa   :  { %v5793_v48 = vrot.slane %v9237_v57, %v9579_v49  ;;  %v5797_v35 = vrot.slane %v9237_v57, %v9634_v22 }
0x30fc   :  { %v5800_v46 = vmul.f32 %v5793_v48, %v5785_v31  ;;  %v5801_v54 = vmul.f32 %v5797_v35, %v5786_v38 }
0x30fe   :  { %5805 = vperm.xlu0 %9043, %v5800_v46   ;;  %5808 = vperm.xlu1 %9038, %v5801_v54  }
0x3102   :  { %9045 = vset.pattern.permute.xlu0 %v11263_v15  ;;  %9044 = vset.pattern.permute.xlu1 %v11263_v15 }
0x3108   :  { %v6091_v58 = vpop.permute.xlu1 %6090 }
0x3109   :  { %v10478_v12 = vmul.f32 %v9233_v2, %v6091_v58  ;;  %v10496_v2 = vld [vmem:[%s11222_s7] sm:$0xff] }
0x310b   :  { %11268 = vst [vmem:[#allocation21_spill] sm:$0xff] %v10478_v12  ;;  %6095 = vrot.lane.b32.xlu1 %v10478_v12, %s9383_s1 }
0x317d   :  { %v5806_v55 = vpop.permute.xlu0 %5805  ;;  %v5809_v39 = vpop.permute.xlu1 %5808 }
0x317e   :  { %v5813_v23 = vrot.slane %v5806_v55, %v9676_v29  ;;  %v5817_v24 = vrot.slane %v5809_v39, %v9676_v29 }
0x3180   :  { %v5818_v6 = vsel %vm626_vm8, %v5817_v24, %v5813_v23 }
0x3181   :  { %8761 = vmatmul.mubr.msk.f32.vlgmr.msra.gmra.mrb[36].mxu1 %vm499_vm2, %v5818_v6  ;;  %v10486_v60 = vpop.permute.xlu1 %6095 }
0x3182   :  { %8966 = vmatpush1.bf16.msra.mxu1 %v9526_v32  ;;  %8783 = vmatmul.mubr.msk.f32.vlgmr.msra.gmra.mrb[36].mxu0 %vm64_vm1, %v10486_v60 }
0x3183   :  { %8968 = vmatprep.subr.bf16.mxu1 %v9540_v37  ;;  %6163 = vmatprep.mubr.f32.mxu1 %v11267_v8 }
0x3184   :  { %8796 = vmatpush3.msra.mxu0 %v10496_v2  ;;  %8797 = vmatprep.mubr.msk.f32.mxu0 %vm9380_vm0, %v11267_v8 }
0x3185   :  { %8984 = vmatprep.subr.bf16.mxu0 %v9515_v28 }
0x3186   :  { %8970 = vmatpush1.bf16.msra.mxu1 %v9553_v41 }
0x3187   :  { %8785 = vmatprep.subr.mxu1 %v11267_v8 }
0x3189   :  { %8392 = vmatmul.mubr.msk.f32.vlgmr.msra.gmra.mrb[38].mxu1 %vm64_vm1, %v10486_v60 }
0x318a   :  { %8786 = vmatpush3.msra.mxu1 %v10496_v2  ;;  %8787 = vmatprep.mubr.msk.f32.mxu1 %vm9380_vm0, %v11267_v8 }
0x318b   :  { %8790 = vmatprep.subr.mxu1 %v11267_v8 }
0x3254   :  { %v10510_v26 = vpop.f32.mrb[36].mxu1 }
0x3255   :  { %v8762_v40 = vpop.f32.mrb[37].mxu1  ;;  %v6236_v63 = vpop.f32.mrb[36].mxu0 }
0x3256   :  { %v8784_v19 = vpop.f32.mrb[37].mxu0  ;;  %v6237_v38 = vadd.f32 %v6236_v63, %v9592_v53 }
0x325c   :  { %v6165_v28 = vpop.f32.mrb[38].mxu1 }
0x325d   :  { %v6166_v57 = vadd.f32 %v6165_v28, %v9589_v52  ;;  %v10513_v31 = vpop.f32.mrb[39].mxu1 }
0x325f   :  { %9238 = vtanh.f32 %v6166_v57 }
0x3260   :  { %9240 = vtanh.f32 %v6237_v38 }
0x3269   :  { %v9239_v48 = vpop.eup %9238 }
0x326a   :  { %6244 = vrot.lane.b32.xlu1 %v9239_v48, %s9382_s19  ;;  %v10517_v35 = vpop.eup %9240 }
0x326e   :  { %6407 = vrot.lane.b32.xlu1 %v10517_v35, %s9384_s6 }
0x32dc   :  { %v6245_v46 = vpop.permute.xlu1 %6244 }
0x32dd   :  { %v6247_v54 = vmul.f32 %v9239_v48, %v6245_v46  ;;  %v6329_v48 = vrot.slane %v10517_v35, %v9634_v22  ;;  %v6321_v46 = vrot.slane %v10517_v35, %v9579_v49 }
0x32df   :  { %v6261_v58 = vrot.slane %v6247_v54, %v9613_v5  ;;  %v8394_v54 = vmul.f32 -1.442695, %v6237_v38 }
0x32e0   :  { %v6408_v55 = vpop.permute.xlu1 %6407 }
0x32e1   :  { %v6262_v39 = vcombine.high %v6261_v58, %v6261_v58  ;;  %v6269_v23 = vrot.slane %v6261_v58, %v9613_v5  ;;  %8788 = vmatmul.mubr.msk.f32.vlgmr.msra.gmra.mrb[40].mxu1 %vm499_vm2, %v6408_v55  ;;  %9242 = vpow2.f32 %v8394_v54 }
0x32e2   :  { %8791 = vmatpush3.msra.mxu1 %v10496_v2  ;;  %8792 = vmatprep.mubr.msk.f32.mxu1 %vm9380_vm0, %v11267_v8 }
0x32e3   :  { %v6280_v24 = vrot.slane %v6269_v23, %v9579_v49  ;;  %v6276_v6 = vrot.slane %v6262_v39, %v9613_v5  ;;  %8977 = vmatprep.subr.bf16.mxu1 %v11262_v3 }
0x32e5   :  { %v6287_v40 = vmul.f32 %v6280_v24, %v10403_v14  ;;  %v6284_v63 = vrot.slane %v6276_v6, %v9579_v49 }
0x32e7   :  { %v6289_v19 = vsel %vm378_vm3, %v6287_v40, 0.0  ;;  %v6288_v28 = vmul.f32 %v6284_v63, %v10409_v43 }
0x32e8   :  { %6290 = vadd.xlane.f32.xlu1 %v6289_v19 }
0x32e9   :  { %v6292_v57 = vsel %vm378_vm3, %v6288_v28, 0.0 }
0x32ea   :  { %6293 = vadd.xlane.f32.xlu0 %v6292_v57 }
0x32eb   :  { %v9243_v58 = vpop.eup %9242 }
0x32ec   :  { %v6251_v55 = vadd.f32 1.0, %v9243_v58 }
0x32ee   :  { %9244 = vrcp.f32 %v6251_v55 }
0x32f8   :  { %v9245_v39 = vpop.eup %9244 }
0x32f9   :  { %6332 = vbcast.lane.b32.xlu1 %v6329_v48, 320  ;;  %v6302_v23 = vrot.slane %v9245_v39, %v9613_v5 }
0x32fb   :  { %v6303_v6 = vcombine.high %v6302_v23, %v6302_v23  ;;  %v6310_v57 = vrot.slane %v6302_v23, %v9613_v5 }
0x32fd   :  { %v6317_v19 = vrot.slane %v6303_v6, %v9613_v5  ;;  %v6339_v54 = vrot.slane %v6310_v57, %v9579_v49 }
0x32ff   :  { %v6343_v12 = vrot.slane %v6317_v19, %v9579_v49 }
0x3300   :  { %6324 = vbcast.lane.b32.xlu0 %v6321_v46, 320 }
0x3375   :  { %v6291_v40 = vpop.xlane.xlu1 %6290 }
0x3377   :  { %v6294_v28 = vpop.xlane.xlu0 %6293 }
0x3379   :  { %v6333_v48 = vpop.permute.xlu1 %6332 }
0x337a   :  { %v6335_v51 = vsub.f32 %v6333_v48, %v6294_v28 }
0x337b   :  { %v6325_v46 = vpop.permute.xlu0 %6324 }
0x337c   :  { %v6347_v38 = vmul.f32 %v6343_v12, %v6335_v51  ;;  %v6334_v58 = vsub.f32 %v6325_v46, %v6291_v40 }
0x337e   :  { %v6346_v55 = vmul.f32 %v6339_v54, %v6334_v58  ;;  %6355 = vperm.xlu0 %9045, %v6347_v38  }
0x3380   :  { %6350 = vperm.xlu1 %9044, %v6346_v55  }
0x3382   :  { %9047 = vset.pattern.permute.xlu0 %v11265_v30 }
0x3384   :  { %9046 = vset.pattern.permute.xlu1 %v11265_v30 }
0x33b4   :  { %v6477_v39 = vpop.f32.mrb[40].mxu1 }
0x33b5   :  { %v8789_v6 = vpop.f32.mrb[41].mxu1 }
0x33fd   :  { %v6356_v45 = vpop.permute.xlu0 %6355 }
0x33fe   :  { %v6359_v23 = vmul.f32 %v6356_v45, %v6284_v63 }
0x33ff   :  { %v6351_v34 = vpop.permute.xlu1 %6350 }
0x3400   :  { %v6361_v19 = vadd.f32 %v6359_v23, %v10409_v43  ;;  %v6358_v28 = vmul.f32 %v6351_v34, %v6280_v24 }
0x3402   :  { %v6360_v51 = vadd.f32 %v6358_v28, %v10403_v14  ;;  %v6363_v12 = vmul.f32 %v6361_v19, %v6361_v19 }
0x3404   :  { %v6367_v40 = vsel %vm378_vm3, %v6363_v12, 0.0  ;;  %v6362_v57 = vmul.f32 %v6360_v51, %v6360_v51  ;;  %v6168_v12 = vadd.f32 %v10513_v31, %v9651_v13 }
0x3405   :  { %6368 = vadd.xlane.f32.xlu0 %v6367_v40 }
0x3406   :  { %v6364_v48 = vsel %vm378_vm3, %v6362_v57, 0.0 }
0x3407   :  { %6365 = vadd.xlane.f32.xlu1 %v6364_v48 }
0x3492   :  { %v6369_v46 = vpop.xlane.xlu0 %6368 }
0x3493   :  { %v6376_v38 = vrot.slane %v6369_v46, 4 }
0x3494   :  { %v6366_v54 = vpop.xlane.xlu1 %6365 }
0x3495   :  { %v6377_v58 = vadd.f32 %v6376_v38, %v6369_v46  ;;  %v6370_v55 = vrot.slane %v6366_v54, 4 }
0x3497   :  { %v6378_v45 = vrot.slane %v6377_v58, 2  ;;  %v6371_v63 = vadd.f32 %v6370_v55, %v6366_v54 }
0x3499   :  { %v6379_v6 = vadd.f32 %v6378_v45, %v6377_v58  ;;  %v6372_v23 = vrot.slane %v6371_v63, 2 }
0x349b   :  { %v6380_v34 = vrot.slane %v6379_v6, 1  ;;  %v6373_v24 = vadd.f32 %v6372_v23, %v6371_v63 }
0x349d   :  { %v6381_v28 = vadd.f32 %v6380_v34, %v6379_v6  ;;  %v6374_v43 = vrot.slane %v6373_v24, 1 }
0x349f   :  { %9246 = vrsqrt.f32 %v6381_v28  ;;  %v6375_v40 = vadd.f32 %v6374_v43, %v6373_v24  ;;  %vm6391_vm10 = vcmp.eq.f32.partialorder %v6381_v28, inf  ;;  %v6394_v46 = vand.u32 2147483648, %v6381_v28 }
0x34a0   :  { %vm6393_vm11 = vcmp.eq.f32.partialorder %v6381_v28, 0.0 }
0x34a1   :  { %9248 = vrsqrt.f32 %v6375_v40  ;;  %vm6384_vm12 = vcmp.eq.f32.partialorder %v6375_v40, inf  ;;  %v6387_v63 = vand.u32 2147483648, %v6375_v40  ;;  %vm6386_vm13 = vcmp.eq.f32.partialorder %v6375_v40, 0.0 }
0x34a2   :  { %9250 = vtanh.f32 %v6168_v12 }
0x34a9   :  { %v9247_v57 = vpop.eup %9246 }
0x34aa   :  { %v6390_v48 = vmul.f32 %v9247_v57, %v6381_v28 }
0x34ab   :  { %v9249_v38 = vpop.eup %9248 }
0x34ac   :  { %v6392_v44 = vsel %vm6391_vm10, %v6381_v28, %v6390_v48  ;;  %v6383_v58 = vmul.f32 %v9249_v38, %v6375_v40  ;;  %v10552_v55 = vpop.eup %9250  ;;  %vm8134_vm10 = vcmask 392192  }
0x34ad   :  { %v6395_v54 = vsel %vm6393_vm11, %v6394_v46, %v6392_v44  ;;  %v6481_v6 = vmul.f32 %v10552_v55, %v6477_v39  ;;  %vm8136_vm11 = vcmask 457728  }
0x34ae   :  { %v8396_v45 = vadd.f32 -1.0, %v6395_v54  ;;  %v6385_v31 = vsel %vm6384_vm12, %v6375_v40, %v6383_v58 }
0x34af   :  { %v6388_v23 = vsel %vm6386_vm13, %v6387_v63, %v6385_v31  ;;  %v6489_v12 = vrot.slane %v6481_v6, %v9613_v5 }
0x34b0   :  { %v6399_v43 = vmax.f32 %v8396_v45, 0.0  ;;  %v8395_v34 = vadd.f32 -1.0, %v6388_v23 }
0x34b1   :  { %v6490_v44 = vcombine.high %v6489_v12, %v6489_v12  ;;  %v6497_v38 = vrot.slane %v6489_v12, %v9613_v5 }
0x34b2   :  { %v6401_v24 = vadd.f32 1.0, %v6399_v43  ;;  %v6398_v57 = vmax.f32 %v8395_v34, 0.0 }
0x34b3   :  { %v6504_v48 = vrot.slane %v6490_v44, %v9613_v5  ;;  %v6508_v63 = vrot.slane %v6497_v38, %v9579_v49 }
0x34b4   :  { %9252 = vrcp.f32 %v6401_v24  ;;  %v6400_v28 = vadd.f32 1.0, %v6398_v57 }
0x34b5   :  { %v6512_v39 = vrot.slane %v6504_v48, %v9579_v49 }
0x34b6   :  { %9254 = vrcp.f32 %v6400_v28 }
0x34be   :  { %v9253_v46 = vpop.eup %9252 }
0x34bf   :  { %v10558_v54 = vmul.f32 %v9253_v46, %v6361_v19 }
0x34c0   :  { %v9255_v40 = vpop.eup %9254 }
0x34c1   :  { %v6516_v58 = vmul.f32 %v6512_v39, %v10558_v54  ;;  %v10562_v45 = vmul.f32 %v9255_v40, %v6360_v51 }
0x34c3   :  { %v6520_v6 = vsel %vm378_vm3, %v6516_v58, 0.0  ;;  %v6515_v31 = vmul.f32 %v6508_v63, %v10562_v45 }
0x34c4   :  { %6521 = vadd.xlane.f32.xlu0 %v6520_v6 }
0x34c5   :  { %v6517_v43 = vsel %vm378_vm3, %v6515_v31, 0.0 }
0x34c6   :  { %6518 = vadd.xlane.f32.xlu1 %v6517_v43 }
0x3551   :  { %v6522_v23 = vpop.xlane.xlu0 %6521 }
0x3552   :  { %v6540_v19 = vmul.f32 %v6522_v23, %v6522_v23  ;;  %v6532_v24 = vrot.slane %v6522_v23, %v9676_v29 }
0x3553   :  { %v6519_v34 = vpop.xlane.xlu1 %6518 }
0x3554   :  { %v6528_v12 = vrot.slane %v6519_v34, %v9676_v29  ;;  %v6539_v57 = vmul.f32 %v6519_v34, %v6519_v34  ;;  %v6550_v51 = vrot.slane %v6540_v19, %v9676_v29 }
0x3556   :  { %v6546_v28 = vrot.slane %v6539_v57, %v9676_v29  ;;  %v6533_v44 = vsel %vm626_vm8, %v6532_v24, %v6528_v12 }
0x3557   :  { %v6535_v48 = vsel %vm629_vm9, %v6533_v44, 0.0 }
0x3558   :  { %6536 = vadd.xlane.f32.xlu1 %v6535_v48  ;;  %v6551_v46 = vsel %vm626_vm8, %v6550_v51, %v6546_v28 }
0x3559   :  { %v6553_v38 = vsel %vm629_vm9, %v6551_v46, 0.0 }
0x355a   :  { %6554 = vadd.xlane.f32.xlu0 %v6553_v38 }
0x35e5   :  { %v6537_v39 = vpop.xlane.xlu1 %6536 }
0x35e6   :  { %v6538_v40 = vmul.f32 0.125, %v6537_v39 }
0x35e7   :  { %v6555_v58 = vpop.xlane.xlu0 %6554 }
0x35e8   :  { %v6557_v63 = vmul.f32 %v6538_v40, %v6538_v40  ;;  %v6556_v6 = vmul.f32 0.125, %v6555_v58  ;;  %v6563_v19 = vrot.slane %v6538_v40, %v9579_v49  ;;  %v6567_v24 = vrot.slane %v6538_v40, %v9634_v22 }
0x35ea   :  { %v6558_v31 = vsub.f32 %v6556_v6, %v6557_v63  ;;  %v6570_v57 = vsub.f32 %v6519_v34, %v6563_v19  ;;  %v6571_v44 = vsub.f32 %v6522_v23, %v6567_v24 }
0x35ec   :  { %v6572_v43 = vadd.f32 1e-05, %v6558_v31 }
0x35ee   :  { %9256 = vrsqrt.f32 %v6572_v43 }
0x35f8   :  { %v9257_v12 = vpop.eup %9256 }
0x35f9   :  { %v6582_v51 = vrot.slane %v9257_v12, %v9634_v22  ;;  %v6578_v28 = vrot.slane %v9257_v12, %v9579_v49 }
0x35fb   :  { %v6586_v48 = vmul.f32 %v6582_v51, %v6571_v44  ;;  %v6585_v46 = vmul.f32 %v6578_v28, %v6570_v57 }
0x35fd   :  { %6593 = vperm.xlu0 %9047, %v6586_v48   ;;  %6590 = vperm.xlu1 %9046, %v6585_v46  }
0x3601   :  { %6677 = vrot.lane.b32.xlu1 %v10552_v55, %s9382_s19 }
0x367c   :  { %v6594_v38 = vpop.permute.xlu0 %6593  ;;  %v6591_v39 = vpop.permute.xlu1 %6590 }
0x367d   :  { %v6602_v58 = vrot.slane %v6594_v38, %v9676_v29  ;;  %v6598_v40 = vrot.slane %v6591_v39, %v9676_v29 }
0x367f   :  { %v6603_v34 = vsel %vm626_vm8, %v6602_v58, %v6598_v40 }
0x3680   :  { %8793 = vmatmul.mubr.msk.f32.vlgmr.msra.gmra.mrb[42].mxu1 %vm499_vm2, %v6603_v34 }
0x3681   :  { %8979 = vmatpush3.bf16.msra.mxu1 %v9474_v4  ;;  %8808 = vmatprep.mubr.msk.f32.mxu1 %vm9380_vm0, %v11267_v8  ;;  %v6678_v4 = vpop.permute.xlu1 %6677 }
0x3682   :  { %8980 = vmatprep.subr.bf16.mxu1 %v11262_v3 }
0x3685   :  { %8982 = vmatpush3.bf16.msra.mxu1 %v9485_v7 }
0x3686   :  { %8991 = vmatprep.subr.bf16.mxu1 %v11262_v3 }
0x3688   :  { %8809 = vmatmul.mubr.msk.f32.vlgmr.msra.gmra.mrb[44].mxu1 %vm64_vm1, %v10486_v60 }
0x3689   :  { %8993 = vmatpush3.bf16.msra.mxu1 %v9528_v33  ;;  %8819 = vmatprep.mubr.msk.f32.mxu1 %vm9380_vm0, %v11267_v8  ;;  %v8400_v33 = vld [vmem:[%s11215_s0 + $0xe] sm:$0x3]  ;;  %s9388_s0 = smov 96  }
0x368a   :  { %8994 = vmatprep.subr.bf16.mxu1 %v11262_v3 }
0x368d   :  { %8996 = vmatpush3.bf16.msra.mxu1 %v9555_v42 }
0x368e   :  { %8832 = vmatprep.subr.mxu1 %v11267_v8 }
0x3753   :  { %v6672_v55 = vpop.f32.mrb[42].mxu1 }
0x3754   :  { %v6680_v23 = vmul.f32 %v6678_v4, %v6672_v55  ;;  %v8794_v7 = vpop.f32.mrb[43].mxu1 }
0x3756   :  { %v6688_v63 = vrot.slane %v6680_v23, %v9613_v5 }
0x3758   :  { %v6689_v6 = vcombine.high %v6688_v63, %v6688_v63  ;;  %v6696_v57 = vrot.slane %v6688_v63, %v9613_v5 }
0x375a   :  { %v6703_v60 = vrot.slane %v6689_v6, %v9613_v5  ;;  %v6707_v44 = vrot.slane %v6696_v57, %v9579_v49 }
0x375b   :  { %v7049_v31 = vpop.f32.mrb[44].mxu1 }
0x375c   :  { %v7053_v43 = vadd.f32 %v8400_v33, %v7049_v31  ;;  %v8810_v3 = vpop.f32.mrb[45].mxu1  ;;  %v6711_v42 = vrot.slane %v6703_v60, %v9579_v49  ;;  %v6714_v51 = vmul.f32 %v6707_v44, %v10562_v45 }
0x375e   :  { %9258 = vtanh.f32 %v7053_v43  ;;  %v6715_v19 = vmul.f32 %v6711_v42, %v10558_v54  ;;  %v6716_v28 = vsel %vm378_vm3, %v6714_v51, 0.0  ;;  %v8402_v48 = vmul.f32 -1.442695, %v7053_v43 }
0x3760   :  { %v6719_v24 = vsel %vm378_vm3, %v6715_v19, 0.0  ;;  %9260 = vpow2.f32 %v8402_v48 }
0x3761   :  { %6720 = vadd.xlane.f32.xlu0 %v6719_v24 }
0x3768   :  { %v9259_v12 = vpop.eup %9258 }
0x3769   :  { %7063 = vrot.lane.b32.xlu1 %v9259_v12, %s9382_s19 }
0x376a   :  { %v9261_v46 = vpop.eup %9260 }
0x376b   :  { %v7057_v38 = vadd.f32 1.0, %v9261_v46 }
0x376d   :  { %9262 = vrcp.f32 %v7057_v38 }
0x3777   :  { %v9263_v39 = vpop.eup %9262 }
0x3778   :  { %v7061_v42 = vmul.f32 %v9263_v39, %v10468_v18 }
0x378d   :  { %6717 = vadd.xlane.f32.xlu1 %v6716_v28 }
0x37db   :  { %v7064_v58 = vpop.permute.xlu1 %7063 }
0x37dc   :  { %v7066_v40 = vmul.f32 %v9263_v39, %v7064_v58 }
0x37de   :  { %7068 = vrot.lane.b32.xlu1 %v7066_v40, %s9383_s1 }
0x37ee   :  { %v6721_v34 = vpop.xlane.xlu0 %6720 }
0x37ef   :  { %v6739_v4 = vmul.f32 %v6721_v34, %v6721_v34  ;;  %v6731_v23 = vrot.slane %v6721_v34, %v9676_v29 }
0x37f1   :  { %v6749_v6 = vrot.slane %v6739_v4, %v9676_v29 }
0x381a   :  { %v6718_v55 = vpop.xlane.xlu1 %6717 }
0x381b   :  { %v6727_v7 = vrot.slane %v6718_v55, %v9676_v29  ;;  %v6738_v63 = vmul.f32 %v6718_v55, %v6718_v55 }
0x381d   :  { %v6745_v33 = vrot.slane %v6738_v63, %v9676_v29  ;;  %v6732_v60 = vsel %vm626_vm8, %v6731_v23, %v6727_v7 }
0x381e   :  { %v6734_v31 = vsel %vm629_vm9, %v6732_v60, 0.0 }
0x381f   :  { %6735 = vadd.xlane.f32.xlu0 %v6734_v31  ;;  %v6750_v43 = vsel %vm626_vm8, %v6749_v6, %v6745_v33 }
0x3820   :  { %v6752_v3 = vsel %vm629_vm9, %v6750_v43, 0.0 }
0x3821   :  { %6753 = vadd.xlane.f32.xlu1 %v6752_v3 }
0x3850   :  { %v7069_v19 = vpop.permute.xlu1 %7068 }
0x3851   :  { %v10623_v24 = vadd.f32 %v7069_v19, %v7061_v42 }
0x3853   :  { %9264 = vtanh.f32 %v10623_v24 }
0x385d   :  { %v9265_v12 = vpop.eup %9264 }
0x385e   :  { %7074 = vrot.lane.b32.xlu0 %v9265_v12, %s9382_s19 }
0x38ac   :  { %v6736_v57 = vpop.xlane.xlu0 %6735 }
0x38ad   :  { %v6737_v44 = vmul.f32 0.125, %v6736_v57 }
0x38ae   :  { %v6754_v51 = vpop.xlane.xlu1 %6753 }
0x38af   :  { %v6756_v28 = vmul.f32 %v6737_v44, %v6737_v44  ;;  %v6755_v48 = vmul.f32 0.125, %v6754_v51  ;;  %v6762_v58 = vrot.slane %v6737_v44, %v9579_v49  ;;  %v6766_v18 = vrot.slane %v6737_v44, %v9634_v22 }
0x38b1   :  { %v6757_v46 = vsub.f32 %v6755_v48, %v6756_v28  ;;  %v6769_v4 = vsub.f32 %v6718_v55, %v6762_v58  ;;  %v6770_v6 = vsub.f32 %v6721_v34, %v6766_v18 }
0x38b3   :  { %v6771_v38 = vadd.f32 1e-05, %v6757_v46 }
0x38b5   :  { %9266 = vrsqrt.f32 %v6771_v38 }
0x38bf   :  { %v9267_v40 = vpop.eup %9266 }
0x38c0   :  { %v6777_v23 = vrot.slane %v9267_v40, %v9579_v49  ;;  %v6781_v63 = vrot.slane %v9267_v40, %v9634_v22 }
0x38c2   :  { %v6784_v7 = vmul.f32 %v6777_v23, %v6769_v4  ;;  %v6785_v33 = vmul.f32 %v6781_v63, %v6770_v6 }
0x38c4   :  { %6789 = vperm.xlu0 %9047, %v6784_v7  }
0x38c8   :  { %6792 = vperm.xlu0 %9047, %v6785_v33  }
0x38cc   :  { %9048 = vset.pattern.permute.xlu0 %v11263_v15 }
0x38d0   :  { %v7075_v60 = vpop.permute.xlu0 %7074 }
0x38d1   :  { %v10632_v31 = vmul.f32 %v9263_v39, %v7075_v60 }
0x38d3   :  { %7079 = vrot.lane.b32.xlu0 %v10632_v31, %s9383_s1 }
0x3943   :  { %v6790_v43 = vpop.permute.xlu0 %6789 }
0x3944   :  { %v6797_v55 = vrot.slane %v6790_v43, %v9676_v29 }
0x3947   :  { %v6793_v3 = vpop.permute.xlu0 %6792 }
0x3948   :  { %v6801_v42 = vrot.slane %v6793_v3, %v9676_v29 }
0x394a   :  { %v6802_v34 = vsel %vm626_vm8, %v6801_v42, %v6797_v55 }
0x394b   :  { %8798 = vmatmul.mubr.msk.f32.vlgmr.msra.gmra.mrb[38].mxu0 %vm499_vm2, %v6802_v34  ;;  %v7080_v19 = vpop.permute.xlu0 %7079 }
0x394c   :  { %8986 = vmatpush1.bf16.msra.mxu0 %v9526_v32  ;;  %8820 = vmatmul.mubr.msk.f32.vlgmr.msra.gmra.mrb[46].mxu1 %vm64_vm1, %v7080_v19  ;;  %7967 = vst.msk [vmem:[#allocation2] sm:$0x3] %vm7966_vm14, %v7080_v19 }
0x394d   :  { %8988 = vmatprep.subr.bf16.mxu0 %v9540_v37  ;;  %7147 = vmatprep.mubr.f32.mxu0 %v11267_v8 }
0x394e   :  { %8833 = vmatpush3.msra.mxu1 %v10496_v2  ;;  %8834 = vmatprep.mubr.msk.f32.mxu1 %vm9380_vm0, %v11267_v8 }
0x3950   :  { %8990 = vmatpush1.bf16.msra.mxu0 %v9553_v41 }
0x3951   :  { %8822 = vmatprep.subr.mxu0 %v11267_v8 }
0x3953   :  { %8403 = vmatmul.mubr.msk.f32.vlgmr.msra.gmra.mrb[40].mxu0 %vm64_vm1, %v7080_v19 }
0x3954   :  { %8823 = vmatpush3.msra.mxu0 %v10496_v2  ;;  %8824 = vmatprep.mubr.msk.f32.mxu0 %vm9380_vm0, %v11267_v8 }
0x3955   :  { %8827 = vmatprep.subr.mxu0 %v11267_v8 }
0x3a1e   :  { %v10655_v32 = vpop.f32.mrb[38].mxu0 }
0x3a1f   :  { %v8799_v37 = vpop.f32.mrb[39].mxu0  ;;  %v7220_v15 = vpop.f32.mrb[46].mxu1 }
0x3a20   :  { %v7221_v39 = vadd.f32 %v7220_v15, %v9592_v53  ;;  %v8821_v12 = vpop.f32.mrb[47].mxu1 }
0x3a22   :  { %9268 = vtanh.f32 %v7221_v39  ;;  %v8405_v60 = vmul.f32 -1.442695, %v7221_v39 }
0x3a26   :  { %v7149_v41 = vpop.f32.mrb[40].mxu0 }
0x3a27   :  { %v7150_v57 = vadd.f32 %v7149_v41, %v9589_v52  ;;  %v10659_v44 = vpop.f32.mrb[41].mxu0 }
0x3a29   :  { %9270 = vtanh.f32 %v7150_v57 }
0x3a2a   :  { %9272 = vpow2.f32 %v8405_v60 }
0x3a2c   :  { %v10661_v51 = vpop.eup %9268 }
0x3a2d   :  { %7391 = vrot.lane.b32.xlu0 %v10661_v51, %s9384_s6  ;;  %v7313_v6 = vrot.slane %v10661_v51, %v9634_v22  ;;  %v7305_v33 = vrot.slane %v10661_v51, %v9579_v49 }
0x3a33   :  { %v9271_v28 = vpop.eup %9270 }
0x3a34   :  { %7228 = vrot.lane.b32.xlu1 %v9271_v28, %s9382_s19  ;;  %v9273_v43 = vpop.eup %9272 }
0x3a35   :  { %v7235_v3 = vadd.f32 1.0, %v9273_v43 }
0x3a37   :  { %9274 = vrcp.f32 %v7235_v3 }
0x3a41   :  { %v9275_v55 = vpop.eup %9274 }
0x3a42   :  { %v7286_v42 = vrot.slane %v9275_v55, %v9613_v5 }
0x3a44   :  { %v7294_v19 = vrot.slane %v7286_v42, %v9613_v5  ;;  %v7287_v37 = vcombine.high %v7286_v42, %v7286_v42 }
0x3a46   :  { %v7323_v41 = vrot.slane %v7294_v19, %v9579_v49 }
0x3a9f   :  { %v7392_v48 = vpop.permute.xlu0 %7391 }
0x3aa0   :  { %8825 = vmatmul.mubr.msk.f32.vlgmr.msra.gmra.mrb[42].mxu0 %vm499_vm2, %v7392_v48 }
0x3aa1   :  { %8828 = vmatpush3.msra.mxu0 %v10496_v2  ;;  %8829 = vmatprep.mubr.msk.f32.mxu0 %vm9380_vm0, %v11267_v8 }
0x3aa6   :  { %v7229_v52 = vpop.permute.xlu1 %7228 }
0x3aa7   :  { %v7231_v53 = vmul.f32 %v9271_v28, %v7229_v52  ;;  %v7301_v28 = vrot.slane %v7287_v37, %v9613_v5 }
0x3aa9   :  { %v7245_v46 = vrot.slane %v7231_v53, %v9613_v5  ;;  %v7327_v53 = vrot.slane %v7301_v28, %v9579_v49 }
0x3aab   :  { %v7246_v38 = vcombine.high %v7245_v46, %v7245_v46  ;;  %v7253_v58 = vrot.slane %v7245_v46, %v9613_v5 }
0x3aad   :  { %v7260_v40 = vrot.slane %v7246_v38, %v9613_v5  ;;  %v7264_v18 = vrot.slane %v7253_v58, %v9579_v49 }
0x3aaf   :  { %v7271_v4 = vmul.f32 %v7264_v18, %v10562_v45  ;;  %v7268_v23 = vrot.slane %v7260_v40, %v9579_v49 }
0x3ab1   :  { %v7273_v2 = vsel %vm378_vm3, %v7271_v4, 0.0  ;;  %v7272_v7 = vmul.f32 %v7268_v23, %v10558_v54 }
0x3ab2   :  { %7274 = vadd.xlane.f32.xlu0 %v7273_v2 }
0x3ab3   :  { %v7276_v63 = vsel %vm378_vm3, %v7272_v7, 0.0 }
0x3ab4   :  { %7277 = vadd.xlane.f32.xlu1 %v7276_v63 }
0x3ac5   :  { %7316 = vbcast.lane.b32.xlu1 %v7313_v6, 320 }
0x3ac8   :  { %7308 = vbcast.lane.b32.xlu0 %v7305_v33, 320 }
0x3b3f   :  { %v7275_v34 = vpop.xlane.xlu0 %7274 }
0x3b41   :  { %v7278_v15 = vpop.xlane.xlu1 %7277 }
0x3b43   :  { %v7309_v12 = vpop.permute.xlu0 %7308 }
0x3b44   :  { %v7318_v57 = vsub.f32 %v7309_v12, %v7275_v34 }
0x3b45   :  { %v7317_v48 = vpop.permute.xlu1 %7316 }
0x3b46   :  { %v7330_v39 = vmul.f32 %v7323_v41, %v7318_v57  ;;  %v7319_v52 = vsub.f32 %v7317_v48, %v7278_v15 }
0x3b48   :  { %7334 = vperm.xlu0 %9048, %v7330_v39   ;;  %v7331_v46 = vmul.f32 %v7327_v53, %v7319_v52  ;;  %v7152_v39 = vadd.f32 %v10659_v44, %v9651_v13 }
0x3b4c   :  { %7339 = vperm.xlu0 %9048, %v7331_v46  }
0x3b50   :  { %9049 = vset.pattern.permute.xlu0 %v11265_v30 }
0x3b73   :  { %v7461_v38 = vpop.f32.mrb[42].mxu0 }
0x3b74   :  { %v8826_v58 = vpop.f32.mrb[43].mxu0 }
0x3bc7   :  { %v7335_v40 = vpop.permute.xlu0 %7334 }
0x3bc8   :  { %v7342_v4 = vmul.f32 %v7335_v40, %v7264_v18 }
0x3bca   :  { %v7344_v2 = vadd.f32 %v7342_v4, %v10562_v45 }
0x3bcb   :  { %v7340_v7 = vpop.permute.xlu0 %7339 }
0x3bcc   :  { %v7343_v63 = vmul.f32 %v7340_v7, %v7268_v23  ;;  %v7346_v6 = vmul.f32 %v7344_v2, %v7344_v2 }
0x3bce   :  { %v7345_v33 = vadd.f32 %v7343_v63, %v10558_v54  ;;  %v7348_v60 = vsel %vm378_vm3, %v7346_v6, 0.0 }
0x3bcf   :  { %7349 = vadd.xlane.f32.xlu1 %v7348_v60 }
0x3bd0   :  { %v7347_v43 = vmul.f32 %v7345_v33, %v7345_v33 }
0x3bd2   :  { %v7351_v3 = vsel %vm378_vm3, %v7347_v43, 0.0 }
0x3bd3   :  { %7352 = vadd.xlane.f32.xlu0 %v7351_v3 }
0x3c5c   :  { %v7350_v55 = vpop.xlane.xlu1 %7349 }
0x3c5d   :  { %v7354_v30 = vrot.slane %v7350_v55, 4 }
0x3c5f   :  { %v7355_v42 = vadd.f32 %v7354_v30, %v7350_v55 }
0x3c60   :  { %v7353_v34 = vpop.xlane.xlu0 %7352 }
0x3c61   :  { %v7356_v19 = vrot.slane %v7355_v42, 2  ;;  %v7360_v18 = vrot.slane %v7353_v34, 4 }
0x3c63   :  { %v7357_v37 = vadd.f32 %v7356_v19, %v7355_v42  ;;  %v7361_v15 = vadd.f32 %v7360_v18, %v7353_v34 }
0x3c65   :  { %v7358_v12 = vrot.slane %v7357_v37, 1  ;;  %v7362_v23 = vrot.slane %v7361_v15, 2 }
0x3c67   :  { %v7359_v41 = vadd.f32 %v7358_v12, %v7357_v37  ;;  %v7363_v57 = vadd.f32 %v7362_v23, %v7361_v15 }
0x3c69   :  { %9276 = vrsqrt.f32 %v7359_v41  ;;  %v7364_v28 = vrot.slane %v7363_v57, 1  ;;  %vm7368_vm0 = vcmp.eq.f32.partialorder %v7359_v41, inf  ;;  %v7371_v46 = vand.u32 2147483648, %v7359_v41 }
0x3c6a   :  { %vm7370_vm15 = vcmp.eq.f32.partialorder %v7359_v41, 0.0 }
0x3c6b   :  { %v7365_v48 = vadd.f32 %v7364_v28, %v7363_v57 }
0x3c6d   :  { %9278 = vrsqrt.f32 %v7365_v48  ;;  %vm7375_vm4 = vcmp.eq.f32.partialorder %v7365_v48, inf  ;;  %v7378_v6 = vand.u32 2147483648, %v7365_v48  ;;  %vm7377_vm5 = vcmp.eq.f32.partialorder %v7365_v48, 0.0 }
0x3c6e   :  { %9280 = vtanh.f32 %v7152_v39 }
0x3c73   :  { %v9277_v52 = vpop.eup %9276 }
0x3c74   :  { %v7367_v53 = vmul.f32 %v9277_v52, %v7359_v41 }
0x3c76   :  { %v7369_v58 = vsel %vm7368_vm0, %v7359_v41, %v7367_v53 }
0x3c77   :  { %v7372_v40 = vsel %vm7370_vm15, %v7371_v46, %v7369_v58  ;;  %v9279_v4 = vpop.eup %9278 }
0x3c78   :  { %v8406_v7 = vadd.f32 -1.0, %v7372_v40  ;;  %v7374_v63 = vmul.f32 %v9279_v4, %v7365_v48  ;;  %v9281_v3 = vpop.eup %9280 }
0x3c79   :  { %v7465_v44 = vmul.f32 %v9281_v3, %v7461_v38 }
0x3c7a   :  { %v7382_v60 = vmax.f32 %v8406_v7, 0.0  ;;  %v7376_v43 = vsel %vm7375_vm4, %v7365_v48, %v7374_v63 }
0x3c7b   :  { %v7379_v13 = vsel %vm7377_vm5, %v7378_v6, %v7376_v43  ;;  %v7473_v34 = vrot.slane %v7465_v44, %v9613_v5 }
0x3c7c   :  { %v7384_v55 = vadd.f32 1.0, %v7382_v60  ;;  %v8407_v30 = vadd.f32 -1.0, %v7379_v13 }
0x3c7d   :  { %v7481_v18 = vrot.slane %v7473_v34, %v9613_v5  ;;  %v7474_v37 = vcombine.high %v7473_v34, %v7473_v34 }
0x3c7e   :  { %9282 = vrcp.f32 %v7384_v55  ;;  %v7383_v42 = vmax.f32 %v8407_v30, 0.0 }
0x3c7f   :  { %v7492_v23 = vrot.slane %v7481_v18, %v9579_v49  ;;  %v7488_v41 = vrot.slane %v7474_v37, %v9613_v5 }
0x3c80   :  { %v7385_v19 = vadd.f32 1.0, %v7383_v42 }
0x3c81   :  { %v7496_v39 = vrot.slane %v7488_v41, %v9579_v49 }
0x3c82   :  { %9284 = vrcp.f32 %v7385_v19 }
0x3c88   :  { %v9283_v15 = vpop.eup %9282 }
0x3c89   :  { %v10697_v12 = vmul.f32 %v9283_v15, %v7344_v2 }
0x3c8b   :  { %v7499_v57 = vmul.f32 %v7492_v23, %v10697_v12  ;;  %7973 = vst.msk [vmem:[#allocation6] sm:$0xff] %vm378_vm3, %v10697_v12 }
0x3c8c   :  { %v9285_v38 = vpop.eup %9284 }
0x3c8d   :  { %v7501_v28 = vsel %vm378_vm3, %v7499_v57, 0.0  ;;  %v10705_v48 = vmul.f32 %v9285_v38, %v7345_v33 }
0x3c8e   :  { %7502 = vadd.xlane.f32.xlu0 %v7501_v28 }
0x3c8f   :  { %v7500_v2 = vmul.f32 %v7496_v39, %v10705_v48  ;;  %7974 = vst.msk [vmem:[#allocation6 + $0x8] sm:$0xff] %vm378_vm3, %v10705_v48 }
0x3c91   :  { %v7504_v52 = vsel %vm378_vm3, %v7500_v2, 0.0 }
0x3c92   :  { %7505 = vadd.xlane.f32.xlu0 %v7504_v52 }
0x3d1b   :  { %v7503_v53 = vpop.xlane.xlu0 %7502 }
0x3d1c   :  { %v7523_v46 = vmul.f32 %v7503_v53, %v7503_v53  ;;  %v7512_v40 = vrot.slane %v7503_v53, %v9676_v29 }
0x3d1e   :  { %v7530_v33 = vrot.slane %v7523_v46, %v9676_v29 }
0x3d1f   :  { %v7506_v58 = vpop.xlane.xlu0 %7505 }
0x3d20   :  { %v7516_v4 = vrot.slane %v7506_v58, %v9676_v29  ;;  %v7524_v7 = vmul.f32 %v7506_v58, %v7506_v58 }
0x3d22   :  { %v7534_v63 = vrot.slane %v7524_v7, %v9676_v29  ;;  %v7517_v6 = vsel %vm626_vm8, %v7516_v4, %v7512_v40 }
0x3d23   :  { %v7519_v60 = vsel %vm629_vm9, %v7517_v6, 0.0 }
0x3d24   :  { %7520 = vadd.xlane.f32.xlu1 %v7519_v60  ;;  %v7535_v43 = vsel %vm626_vm8, %v7534_v63, %v7530_v33 }
0x3d25   :  { %v7537_v55 = vsel %vm629_vm9, %v7535_v43, 0.0 }
0x3d26   :  { %7538 = vadd.xlane.f32.xlu0 %v7537_v55 }
0x3db1   :  { %v7521_v13 = vpop.xlane.xlu1 %7520 }
0x3db2   :  { %v7522_v44 = vmul.f32 0.125, %v7521_v13 }
0x3db3   :  { %v7539_v30 = vpop.xlane.xlu0 %7538 }
0x3db4   :  { %v7541_v42 = vmul.f32 %v7522_v44, %v7522_v44  ;;  %v7540_v34 = vmul.f32 0.125, %v7539_v30  ;;  %v7547_v37 = vrot.slane %v7522_v44, %v9579_v49  ;;  %v7551_v15 = vrot.slane %v7522_v44, %v9634_v22 }
0x3db6   :  { %v7542_v19 = vsub.f32 %v7540_v34, %v7541_v42  ;;  %v7554_v41 = vsub.f32 %v7503_v53, %v7547_v37  ;;  %v7555_v57 = vsub.f32 %v7506_v58, %v7551_v15 }
0x3db8   :  { %v7556_v18 = vadd.f32 1e-05, %v7542_v19 }
0x3dba   :  { %9286 = vrsqrt.f32 %v7556_v18 }
0x3dc4   :  { %v9287_v23 = vpop.eup %9286 }
0x3dc5   :  { %v7566_v38 = vrot.slane %v9287_v23, %v9634_v22  ;;  %v7562_v28 = vrot.slane %v9287_v23, %v9579_v49 }
0x3dc7   :  { %v7570_v39 = vmul.f32 %v7566_v38, %v7555_v57  ;;  %v7569_v2 = vmul.f32 %v7562_v28, %v7554_v41 }
0x3dc9   :  { %7577 = vperm.xlu0 %9049, %v7570_v39   ;;  %7574 = vperm.xlu1 %9046, %v7569_v2  }
0x3dcd   :  { %7661 = vrot.lane.b32.xlu1 %v9281_v3, %s9382_s19 }
0x3e48   :  { %v7578_v52 = vpop.permute.xlu0 %7577  ;;  %v7575_v46 = vpop.permute.xlu1 %7574 }
0x3e49   :  { %v7586_v40 = vrot.slane %v7578_v52, %v9676_v29  ;;  %v7582_v4 = vrot.slane %v7575_v46, %v9676_v29 }
0x3e4b   :  { %v7587_v7 = vsel %vm626_vm8, %v7586_v40, %v7582_v4 }
0x3e4c   :  { %8830 = vmatmul.mubr.msk.f32.vlgmr.msra.gmra.mrb[44].mxu0 %vm499_vm2, %v7587_v7  ;;  %v7662_v53 = vpop.permute.xlu1 %7661 }
0x3e4d   :  { %8242 = vmatprep.mubr.f32.mxu0 %v11267_v8 }
0x3f1f   :  { %v7656_v58 = vpop.f32.mrb[44].mxu0 }
0x3f20   :  { %v7664_v33 = vmul.f32 %v7662_v53, %v7656_v58  ;;  %v8831_v63 = vpop.f32.mrb[45].mxu0 }
0x3f22   :  { %v7672_v6 = vrot.slane %v7664_v33, %v9613_v5 }
0x3f24   :  { %v7673_v60 = vcombine.high %v7672_v6, %v7672_v6  ;;  %v7680_v3 = vrot.slane %v7672_v6, %v9613_v5 }
0x3f26   :  { %v7687_v43 = vrot.slane %v7673_v60, %v9613_v5  ;;  %v7691_v55 = vrot.slane %v7680_v3, %v9579_v49 }
0x3f28   :  { %v7698_v13 = vmul.f32 %v7691_v55, %v10697_v12  ;;  %v7695_v44 = vrot.slane %v7687_v43, %v9579_v49 }
0x3f2a   :  { %v7700_v30 = vsel %vm378_vm3, %v7698_v13, 0.0  ;;  %v7699_v8 = vmul.f32 %v7695_v44, %v10705_v48 }
0x3f2b   :  { %7701 = vadd.xlane.f32.xlu1 %v7700_v30  ;;  %v971_v30 = vmul.f32 %v9607_v62, %v9771_v56 }
0x3f2c   :  { %v7703_v42 = vsel %vm378_vm3, %v7699_v8, 0.0 }
0x3f2d   :  { %7704 = vadd.xlane.f32.xlu0 %v7703_v42  ;;  %v979_v8 = vrot.slane %v971_v30, %v9613_v5 }
0x3f2f   :  { %v980_v42 = vcombine.high %v979_v8, %v979_v8 }
0x3fb8   :  { %v7702_v34 = vpop.xlane.xlu1 %7701 }
0x3fb9   :  { %v7722_v19 = vmul.f32 %v7702_v34, %v7702_v34  ;;  %v7711_v37 = vrot.slane %v7702_v34, %v9676_v29 }
0x3fba   :  { %v7705_v18 = vpop.xlane.xlu0 %7704 }
0x3fbb   :  { %v7715_v15 = vrot.slane %v7705_v18, %v9676_v29  ;;  %v7723_v23 = vmul.f32 %v7705_v18, %v7705_v18  ;;  %v7729_v41 = vrot.slane %v7722_v19, %v9676_v29  ;;  %v3923_v19 = vmul.f32 %v10072_v10, %v10216_v27 }
0x3fbc   :  { %v987_v10 = vrot.slane %v979_v8, %v9613_v5 }
0x3fbd   :  { %v7733_v57 = vrot.slane %v7723_v23, %v9676_v29  ;;  %v7716_v38 = vsel %vm626_vm8, %v7715_v15, %v7711_v37  ;;  %v4907_v37 = vmul.f32 %v10222_v1, %v10360_v16  ;;  %v1955_v15 = vmul.f32 %v9777_v20, %v9920_v11 }
0x3fbe   :  { %v7718_v28 = vsel %vm629_vm9, %v7716_v38, 0.0  ;;  %v6875_v16 = vmul.f32 %v10517_v35, %v10655_v32 }
0x3fbf   :  { %7719 = vadd.xlane.f32.xlu1 %v7718_v28  ;;  %v7734_v39 = vsel %vm626_vm8, %v7733_v57, %v7729_v41  ;;  %v4915_v56 = vrot.slane %v4907_v37, %v9613_v5  ;;  %v5891_v41 = vmul.f32 %v10366_v47, %v10510_v26  ;;  %v1963_v27 = vrot.slane %v1955_v15, %v9613_v5 }
0x3fc0   :  { %v7736_v2 = vsel %vm629_vm9, %v7734_v39, 0.0  ;;  %v2939_v57 = vmul.f32 %v9926_v25, %v10065_v9  ;;  %v998_v26 = vrot.slane %v987_v10, %v9579_v49  ;;  %v6883_v9 = vrot.slane %v6875_v16, %v9613_v5 }
0x3fc1   :  { %v4923_v20 = vrot.slane %v4915_v56, %v9613_v5  ;;  %v5899_v11 = vrot.slane %v5891_v41, %v9613_v5  ;;  %v1964_v28 = vcombine.high %v1963_v27, %v1963_v27  ;;  %v1971_v47 = vrot.slane %v1963_v27, %v9613_v5 }
0x3fc2   :  { %v2947_v39 = vrot.slane %v2939_v57, %v9613_v5  ;;  %v1005_v32 = vmul.f32 %v998_v26, %v9665_v21  ;;  %v6884_v10 = vcombine.high %v6883_v9, %v6883_v9 }
0x3fc3   :  { %7737 = vadd.xlane.f32.xlu1 %v7736_v2  ;;  %v1978_v35 = vrot.slane %v1964_v28, %v9613_v5 }
0x3fc5   :  { %v1986_v21 = vrot.slane %v1978_v35, %v9579_v49 }
0x404c   :  { %v7720_v52 = vpop.xlane.xlu1 %7719 }
0x404d   :  { %v7721_v46 = vmul.f32 0.125, %v7720_v52  ;;  %v4934_v52 = vrot.slane %v4923_v20, %v9579_v49 }
0x404f   :  { %v7740_v4 = vmul.f32 %v7721_v46, %v7721_v46  ;;  %v7746_v33 = vrot.slane %v7721_v46, %v9579_v49  ;;  %v7750_v63 = vrot.slane %v7721_v46, %v9634_v22  ;;  %v1982_v46 = vrot.slane %v1971_v47, %v9579_v49  ;;  %v11272_v47 = vld [vmem:[#allocation20_spill] sm:$0xff] }
0x4050   :  { %v7738_v40 = vpop.xlane.xlu1 %7737 }
0x4051   :  { %v7739_v7 = vmul.f32 0.125, %v7738_v40  ;;  %v7753_v60 = vsub.f32 %v7702_v34, %v7746_v33  ;;  %v7754_v3 = vsub.f32 %v7705_v18, %v7750_v63  ;;  %v994_v34 = vrot.slane %v980_v42, %v9613_v5 }
0x4052   :  { %v3931_v18 = vrot.slane %v3923_v19, %v9613_v5  ;;  %v2948_v40 = vcombine.high %v2947_v39, %v2947_v39  ;;  %v1007_v33 = vsel %vm378_vm3, %v1005_v32, 0.0  ;;  %v1989_v63 = vmul.f32 %v1982_v46, %v9814_v50 }
0x4053   :  { %v7741_v53 = vsub.f32 %v7739_v7, %v7740_v4  ;;  %v1002_v23 = vrot.slane %v994_v34, %v9579_v49  ;;  %v6891_v4 = vrot.slane %v6883_v9, %v9613_v5 }
0x4054   :  { %v3939_v62 = vrot.slane %v3931_v18, %v9613_v5 }
0x4055   :  { %v7755_v58 = vadd.f32 1e-05, %v7741_v53  ;;  %v1006_v1 = vmul.f32 %v1002_v23, %v9661_v17  ;;  %v5907_v17 = vrot.slane %v5899_v11, %v9613_v5  ;;  %v4941_v53 = vmul.f32 %v4934_v52, %v10259_v0 }
0x4056   :  { %v3950_v38 = vrot.slane %v3939_v62, %v9579_v49  ;;  %v6902_v0 = vrot.slane %v6891_v4, %v9579_v49  ;;  %v5900_v23 = vcombine.high %v5899_v11, %v5899_v11  ;;  %v11271_v11 = vld [vmem:[#allocation18_spill] sm:$0xff] }
0x4057   :  { %9288 = vrsqrt.f32 %v7755_v58  ;;  %v1010_v25 = vsel %vm378_vm3, %v1006_v1, 0.0  ;;  %v5918_v58 = vrot.slane %v5907_v17, %v9579_v49  ;;  %v6898_v1 = vrot.slane %v6884_v10, %v9613_v5 }
0x4058   :  { %v3957_v2 = vmul.f32 %v3950_v38, %v10117_v59  ;;  %v2955_v59 = vrot.slane %v2947_v39, %v9613_v5  ;;  %v6909_v30 = vmul.f32 %v6902_v0, %v10562_v45  ;;  %v5914_v41 = vrot.slane %v5900_v23, %v9613_v5 }
0x4059   :  { %v6906_v39 = vrot.slane %v6898_v1, %v9579_v49 }
0x405a   :  { %v3959_v7 = vsel %vm378_vm3, %v3957_v2, 0.0  ;;  %v5922_v38 = vrot.slane %v5914_v41, %v9579_v49 }
0x405b   :  { %v6910_v17 = vmul.f32 %v6906_v39, %v10558_v54 }
0x405c   :  { %v5926_v26 = vmul.f32 %v5922_v38, %v11272_v47 }
0x405d   :  { %v6914_v9 = vsel %vm378_vm3, %v6910_v17, 0.0 }
0x4061   :  { %v9289_v6 = vpop.eup %9288 }
0x4062   :  { %v7765_v43 = vrot.slane %v9289_v6, %v9634_v22  ;;  %v7761_v55 = vrot.slane %v9289_v6, %v9579_v49  ;;  %v2962_v6 = vrot.slane %v2948_v40, %v9613_v5 }
0x4064   :  { %v7769_v13 = vmul.f32 %v7765_v43, %v7754_v3  ;;  %v7768_v44 = vmul.f32 %v7761_v55, %v7753_v60  ;;  %v4943_v60 = vsel %vm378_vm3, %v4941_v53, 0.0  ;;  %v5925_v3 = vmul.f32 %v5918_v58, %v10403_v14 }
0x4065   :  { %v3932_v43 = vcombine.high %v3931_v18, %v3931_v18  ;;  %v1991_v55 = vsel %vm378_vm3, %v1989_v63, 0.0  ;;  %v2970_v8 = vrot.slane %v2962_v6, %v9579_v49  ;;  %v4916_v14 = vcombine.high %v4915_v56, %v4915_v56  ;;  %v11269_v18 = vld [vmem:[#allocation14_spill] sm:$0xff] }
0x4066   :  { %7776 = vperm.xlu0 %9049, %v7769_v13   ;;  %7773 = vperm.xlu1 %9046, %v7768_v44   ;;  %v1990_v13 = vmul.f32 %v1986_v21, %v9820_v61  ;;  %v2966_v44 = vrot.slane %v2955_v59, %v9579_v49  ;;  %v5927_v50 = vsel %vm378_vm3, %v5925_v3, 0.0  ;;  %v6911_v61 = vsel %vm378_vm3, %v6909_v30, 0.0 }
0x4067   :  { %v3946_v42 = vrot.slane %v3932_v43, %v9613_v5  ;;  %v2974_v37 = vmul.f32 %v2970_v8, %v11269_v18  ;;  %v4930_v15 = vrot.slane %v4916_v14, %v9613_v5 }
0x4068   :  { %v1994_v19 = vsel %vm378_vm3, %v1990_v13, 0.0  ;;  %v2973_v34 = vmul.f32 %v2966_v44, %v9963_v36  ;;  %v11270_v36 = vld [vmem:[#allocation16_spill] sm:$0xff] }
0x4069   :  { %v3954_v62 = vrot.slane %v3946_v42, %v9579_v49  ;;  %v2978_v56 = vsel %vm378_vm3, %v2974_v37, 0.0  ;;  %v4938_v57 = vrot.slane %v4930_v15, %v9579_v49 }
0x406a   :  { %v2975_v45 = vsel %vm378_vm3, %v2973_v34, 0.0 }
0x406b   :  { %v3958_v27 = vmul.f32 %v3954_v62, %v11270_v36  ;;  %v4942_v16 = vmul.f32 %v4938_v57, %v11271_v11 }
0x406d   :  { %v3962_v20 = vsel %vm378_vm3, %v3958_v27, 0.0  ;;  %v4946_v28 = vsel %vm378_vm3, %v4942_v16, 0.0 }
0x4085   :  { %1011 = vadd.xlane.f32.xlu0 %v1010_v25  ;;  %v5930_v25 = vsel %vm378_vm3, %v5926_v26, 0.0 }
0x4089   :  { %3960 = vadd.xlane.f32.xlu0 %v3959_v7 }
0x408a   :  { %1008 = vadd.xlane.f32.xlu1 %v1007_v33 }
0x408d   :  { %4944 = vadd.xlane.f32.xlu0 %v4943_v60 }
0x408e   :  { %1992 = vadd.xlane.f32.xlu1 %v1991_v55 }
0x4091   :  { %5928 = vadd.xlane.f32.xlu0 %v5927_v50 }
0x4092   :  { %1995 = vadd.xlane.f32.xlu1 %v1994_v19 }
0x4095   :  { %6912 = vadd.xlane.f32.xlu0 %v6911_v61 }
0x4096   :  { %2976 = vadd.xlane.f32.xlu1 %v2975_v45 }
0x409a   :  { %2979 = vadd.xlane.f32.xlu1 %v2978_v56 }
0x409e   :  { %3963 = vadd.xlane.f32.xlu1 %v3962_v20 }
0x40a2   :  { %4947 = vadd.xlane.f32.xlu1 %v4946_v28 }
0x40a6   :  { %5931 = vadd.xlane.f32.xlu1 %v5930_v25 }
0x40aa   :  { %6915 = vadd.xlane.f32.xlu1 %v6914_v9 }
0x40e5   :  { %v7777_v2 = vpop.permute.xlu0 %7776  ;;  %v7774_v52 = vpop.permute.xlu1 %7773 }
0x40e6   :  { %v7785_v35 = vrot.slane %v7777_v2, %v9676_v29  ;;  %v7781_v32 = vrot.slane %v7774_v52, %v9676_v29 }
0x40e8   :  { %v7786_v46 = vsel %vm626_vm8, %v7785_v35, %v7781_v32 }
0x40e9   :  { %8835 = vmatmul.mubr.msk.f32.vlgmr.msra.gmra.mrb[48].mxu1 %vm499_vm2, %v7786_v46 }
0x4112   :  { %v10844_v21 = vpop.xlane.xlu0 %1011 }
0x4113   :  { %v1022_v44 = vrot.slane %v10844_v21, %v9676_v29  ;;  %v1030_v30 = vmul.f32 %v10844_v21, %v10844_v21 }
0x4115   :  { %v1040_v56 = vrot.slane %v1030_v30, %v9676_v29 }
0x4116   :  { %v10863_v8 = vpop.xlane.xlu0 %3960 }
0x4117   :  { %v10832_v40 = vpop.xlane.xlu1 %1008  ;;  %v3970_v28 = vrot.slane %v10863_v8, %v9676_v29  ;;  %v3981_v9 = vmul.f32 %v10863_v8, %v10863_v8 }
0x4118   :  { %v1018_v43 = vrot.slane %v10832_v40, %v9676_v29  ;;  %v1029_v50 = vmul.f32 %v10832_v40, %v10832_v40 }
0x411a   :  { %v1023_v61 = vsel %vm626_vm8, %v1022_v44, %v1018_v43  ;;  %v1036_v37 = vrot.slane %v1029_v50, %v9676_v29  ;;  %v10889_v27 = vpop.xlane.xlu0 %4944 }
0x411b   :  { %v10834_v4 = vpop.xlane.xlu1 %1992  ;;  %v1025_v62 = vsel %vm629_vm9, %v1023_v61, 0.0 }
0x411c   :  { %v2002_v14 = vrot.slane %v10834_v4, %v9676_v29  ;;  %v2013_v15 = vmul.f32 %v10834_v4, %v10834_v4  ;;  %v1041_v16 = vsel %vm626_vm8, %v1040_v56, %v1036_v37 }
0x411d   :  { %v1043_v17 = vsel %vm629_vm9, %v1041_v16, 0.0 }
0x411e   :  { %v2020_v1 = vrot.slane %v2013_v15, %v9676_v29  ;;  %v10914_v32 = vpop.xlane.xlu0 %5928 }
0x411f   :  { %v10836_v7 = vpop.xlane.xlu1 %1995  ;;  %v5938_v44 = vrot.slane %v10914_v32, %v9676_v29 }
0x4120   :  { %v2014_v19 = vmul.f32 %v10836_v7, %v10836_v7 }
0x4122   :  { %v2024_v41 = vrot.slane %v2014_v19, %v9676_v29  ;;  %v5949_v19 = vmul.f32 %v10914_v32, %v10914_v32 }
0x4123   :  { %v10838_v54 = vpop.xlane.xlu1 %2976 }
0x4124   :  { %v2997_v20 = vmul.f32 %v10838_v54, %v10838_v54  ;;  %v2025_v39 = vsel %vm626_vm8, %v2024_v41, %v2020_v1  ;;  %v5956_v56 = vrot.slane %v5949_v19, %v9676_v29 }
0x4125   :  { %v2027_v46 = vsel %vm629_vm9, %v2025_v39, 0.0 }
0x4126   :  { %v3004_v2 = vrot.slane %v2997_v20, %v9676_v29 }
0x4127   :  { %v10841_v33 = vpop.xlane.xlu1 %2979 }
0x4128   :  { %v2990_v34 = vrot.slane %v10841_v33, %v9676_v29  ;;  %v2998_v10 = vmul.f32 %v10841_v33, %v10841_v33 }
0x412a   :  { %v3008_v47 = vrot.slane %v2998_v10, %v9676_v29 }
0x412b   :  { %v10851_v55 = vpop.xlane.xlu1 %3963 }
0x412c   :  { %v3974_v11 = vrot.slane %v10851_v55, %v9676_v29  ;;  %v3982_v26 = vmul.f32 %v10851_v55, %v10851_v55 }
0x412e   :  { %v3975_v35 = vsel %vm626_vm8, %v3974_v11, %v3970_v28 }
0x412f   :  { %v10881_v45 = vpop.xlane.xlu1 %4947 }
0x4130   :  { %v4958_v52 = vrot.slane %v10881_v45, %v9676_v29 }
0x4133   :  { %v10905_v25 = vpop.xlane.xlu1 %5931 }
0x41bc   :  { %v7855_v53 = vpop.f32.mrb[48].mxu1 }
0x41bd   :  { %v7859_v58 = vmul.f32 %v10661_v51, %v7855_v53  ;;  %v8836_v59 = vpop.f32.mrb[49].mxu1  ;;  %v4954_v53 = vrot.slane %v10889_v27, %v9676_v29 }
0x41be   :  { %v4966_v59 = vmul.f32 %v10881_v45, %v10881_v45 }
0x41bf   :  { %v7867_v63 = vrot.slane %v7859_v58, %v9613_v5  ;;  %v3992_v58 = vrot.slane %v3982_v26, %v9676_v29  ;;  %v4959_v43 = vsel %vm626_vm8, %v4958_v52, %v4954_v53 }
0x41c0   :  { %v4976_v50 = vrot.slane %v4966_v59, %v9676_v29 }
0x41c1   :  { %v7868_v6 = vcombine.high %v7867_v63, %v7867_v63  ;;  %v7875_v60 = vrot.slane %v7867_v63, %v9613_v5  ;;  %v3009_v63 = vsel %vm626_vm8, %v3008_v47, %v3004_v2 }
0x41c3   :  { %v7882_v3 = vrot.slane %v7868_v6, %v9613_v5  ;;  %v7886_v0 = vrot.slane %v7875_v60, %v9579_v49  ;;  %v2006_v5 = vrot.slane %v10836_v7, %v9676_v29  ;;  %v3977_v6 = vsel %vm629_vm9, %v3975_v35, 0.0 }
0x41c4   :  { %v3988_v60 = vrot.slane %v3981_v9, %v9676_v29 }
0x41c5   :  { %v7893_v51 = vmul.f32 %v7886_v0, %v10697_v12  ;;  %v7890_v13 = vrot.slane %v7882_v3, %v9579_v49  ;;  %v2007_v23 = vsel %vm626_vm8, %v2006_v5, %v2002_v14  ;;  %v4965_v3 = vmul.f32 %v10889_v27, %v10889_v27 }
0x41c6   :  { %v2009_v57 = vsel %vm629_vm9, %v2007_v23, 0.0  ;;  %v5942_v0 = vrot.slane %v10905_v25, %v9676_v29  ;;  %v5950_v5 = vmul.f32 %v10905_v25, %v10905_v25  ;;  %v3993_v30 = vsel %vm626_vm8, %v3992_v58, %v3988_v60 }
0x41c7   :  { %v7895_v42 = vsel %vm378_vm3, %v7893_v51, 0.0  ;;  %v7894_v12 = vmul.f32 %v7890_v13, %v10705_v48  ;;  %v2986_v48 = vrot.slane %v10838_v54, %v9676_v29  ;;  %v10930_v51 = vpop.xlane.xlu1 %6915  ;;  %v3011_v13 = vsel %vm629_vm9, %v3009_v63, 0.0 }
0x41c8   :  { %7896 = vadd.xlane.f32.xlu0 %v7895_v42  ;;  %v10939_v42 = vpop.xlane.xlu0 %6912  ;;  %v4972_v14 = vrot.slane %v4965_v3, %v9676_v29  ;;  %v5943_v61 = vsel %vm626_vm8, %v5942_v0, %v5938_v44  ;;  %v5960_v15 = vrot.slane %v5950_v5, %v9676_v29 }
0x41c9   :  { %v7898_v18 = vsel %vm378_vm3, %v7894_v12, 0.0  ;;  %v2991_v36 = vsel %vm626_vm8, %v2990_v34, %v2986_v48  ;;  %v4961_v12 = vsel %vm629_vm9, %v4959_v43, 0.0  ;;  %v6926_v34 = vrot.slane %v10930_v51, %v9676_v29 }
0x41ca   :  { %7899 = vadd.xlane.f32.xlu1 %v7898_v18  ;;  %v2993_v38 = vsel %vm629_vm9, %v2991_v36, 0.0  ;;  %v3995_v18 = vsel %vm629_vm9, %v3993_v30, 0.0  ;;  %v6922_v37 = vrot.slane %v10939_v42, %v9676_v29  ;;  %v6934_v48 = vmul.f32 %v10930_v51, %v10930_v51 }
0x41cb   :  { %v4977_v23 = vsel %vm626_vm8, %v4976_v50, %v4972_v14  ;;  %v6933_v41 = vmul.f32 %v10939_v42, %v10939_v42  ;;  %v5961_v1 = vsel %vm626_vm8, %v5960_v15, %v5956_v56 }
0x41cc   :  { %1026 = vadd.xlane.f32.xlu0 %v1025_v62  ;;  %v5945_v62 = vsel %vm629_vm9, %v5943_v61, 0.0  ;;  %v6927_v10 = vsel %vm626_vm8, %v6926_v34, %v6922_v37  ;;  %v4979_v36 = vsel %vm629_vm9, %v4977_v23, 0.0  ;;  %v5963_v16 = vsel %vm629_vm9, %v5961_v1, 0.0 }
0x41cd   :  { %v6929_v20 = vsel %vm629_vm9, %v6927_v10, 0.0  ;;  %v6940_v11 = vrot.slane %v6933_v41, %v9676_v29 }
0x41ce   :  { %2010 = vadd.xlane.f32.xlu1 %v2009_v57  ;;  %v6944_v57 = vrot.slane %v6934_v48, %v9676_v29 }
0x41d0   :  { %2994 = vadd.xlane.f32.xlu0 %v2993_v38  ;;  %v6945_v38 = vsel %vm626_vm8, %v6944_v57, %v6940_v11 }
0x41d1   :  { %v6947_v28 = vsel %vm629_vm9, %v6945_v38, 0.0 }
0x41d2   :  { %1044 = vadd.xlane.f32.xlu1 %v1043_v17 }
0x41d4   :  { %2028 = vadd.xlane.f32.xlu0 %v2027_v46 }
0x41d6   :  { %3978 = vadd.xlane.f32.xlu1 %v3977_v6 }
0x41d8   :  { %3012 = vadd.xlane.f32.xlu0 %v3011_v13 }
0x41da   :  { %4962 = vadd.xlane.f32.xlu1 %v4961_v12 }
0x41dc   :  { %3996 = vadd.xlane.f32.xlu0 %v3995_v18 }
0x41de   :  { %5946 = vadd.xlane.f32.xlu1 %v5945_v62 }
0x41e0   :  { %4980 = vadd.xlane.f32.xlu0 %v4979_v36 }
0x41e2   :  { %6930 = vadd.xlane.f32.xlu1 %v6929_v20 }
0x41e4   :  { %5964 = vadd.xlane.f32.xlu0 %v5963_v16 }
0x41e8   :  { %6948 = vadd.xlane.f32.xlu0 %v6947_v28 }
0x41fe   :  { %7969 = vrot.lane.b32.xlu0 %v10623_v24, %s9388_s0 }
0x4255   :  { %v10970_v47 = vpop.xlane.xlu0 %7896 }
0x4256   :  { %v7917_v26 = vmul.f32 %v10970_v47, %v10970_v47  ;;  %v7906_v17 = vrot.slane %v10970_v47, %v9676_v29 }
0x4257   :  { %v10974_v39 = vpop.xlane.xlu1 %7899 }
0x4258   :  { %v7910_v9 = vrot.slane %v10974_v39, %v9676_v29  ;;  %v7918_v2 = vmul.f32 %v10974_v39, %v10974_v39  ;;  %v7924_v46 = vrot.slane %v7917_v26, %v9676_v29 }
0x4259   :  { %v1027_v52 = vpop.xlane.xlu0 %1026 }
0x425a   :  { %v7928_v35 = vrot.slane %v7918_v2, %v9676_v29  ;;  %v7911_v24 = vsel %vm626_vm8, %v7910_v9, %v7906_v17  ;;  %v10986_v59 = vmul.f32 0.125, %v1027_v52 }
0x425b   :  { %v2011_v53 = vpop.xlane.xlu1 %2010  ;;  %v7913_v58 = vsel %vm629_vm9, %v7911_v24, 0.0 }
0x425c   :  { %7914 = vadd.xlane.f32.xlu1 %v7913_v58  ;;  %v7929_v6 = vsel %vm626_vm8, %v7928_v35, %v7924_v46  ;;  %v10989_v60 = vmul.f32 0.125, %v2011_v53  ;;  %v1047_v43 = vmul.f32 %v10986_v59, %v10986_v59  ;;  %v1053_v11 = vrot.slane %v10986_v59, %v9579_v49 }
0x425d   :  { %v2995_v63 = vpop.xlane.xlu0 %2994  ;;  %v7931_v0 = vsel %vm629_vm9, %v7929_v6, 0.0  ;;  %v1057_v24 = vrot.slane %v10986_v59, %v9634_v22  ;;  %vm8127_vm9 = vcmask 130048  }
0x425e   :  { %v2031_v30 = vmul.f32 %v10989_v60, %v10989_v60  ;;  %v10996_v12 = vmul.f32 0.125, %v2995_v63  ;;  %v2037_v9 = vrot.slane %v10989_v60, %v9579_v49  ;;  %v1060_v46 = vsub.f32 %v10832_v40, %v1053_v11 }
0x425f   :  { %v1045_v3 = vpop.xlane.xlu1 %1044 }
0x4260   :  { %v1046_v13 = vmul.f32 0.125, %v1045_v3  ;;  %7932 = vadd.xlane.f32.xlu1 %v7931_v0  ;;  %v3015_v15 = vmul.f32 %v10996_v12, %v10996_v12  ;;  %v3021_v59 = vrot.slane %v10996_v12, %v9579_v49 }
0x4261   :  { %v2029_v44 = vpop.xlane.xlu0 %2028 }
0x4262   :  { %v1048_v50 = vsub.f32 %v1046_v13, %v1047_v43  ;;  %v2030_v5 = vmul.f32 0.125, %v2029_v44  ;;  %v2044_v13 = vsub.f32 %v10834_v4, %v2037_v9 }
0x4263   :  { %v3979_v14 = vpop.xlane.xlu1 %3978 }
0x4264   :  { %v1062_v19 = vadd.f32 1e-05, %v1048_v50  ;;  %v2032_v34 = vsub.f32 %v2030_v5, %v2031_v30  ;;  %v10998_v37 = vmul.f32 0.125, %v3979_v14  ;;  %v1061_v30 = vsub.f32 %v10844_v21, %v1057_v24 }
0x4265   :  { %v3013_v61 = vpop.xlane.xlu0 %3012  ;;  %v2041_v14 = vrot.slane %v10989_v60, %v9634_v22  ;;  %v3028_v21 = vsub.f32 %v10838_v54, %v3021_v59 }
0x4266   :  { %9290 = vrsqrt.f32 %v1062_v19  ;;  %v2046_v18 = vadd.f32 1e-05, %v2032_v34  ;;  %v3014_v48 = vmul.f32 0.125, %v3013_v61  ;;  %v3999_v36 = vmul.f32 %v10998_v37, %v10998_v37 }
0x4267   :  { %v4963_v23 = vpop.xlane.xlu1 %4962  ;;  %v4005_v19 = vrot.slane %v10998_v37, %v9579_v49 }
0x4268   :  { %9292 = vrsqrt.f32 %v2046_v18  ;;  %v3016_v62 = vsub.f32 %v3014_v48, %v3015_v15  ;;  %v11002_v41 = vmul.f32 0.125, %v4963_v23 }
0x4269   :  { %v3997_v56 = vpop.xlane.xlu0 %3996 }
0x426a   :  { %v3998_v10 = vmul.f32 0.125, %v3997_v56  ;;  %v3030_v57 = vadd.f32 1e-05, %v3016_v62  ;;  %v4983_v17 = vmul.f32 %v11002_v41, %v11002_v41  ;;  %v4989_v54 = vrot.slane %v11002_v41, %v9579_v49 }
0x426b   :  { %v5947_v1 = vpop.xlane.xlu1 %5946 }
0x426c   :  { %v4000_v20 = vsub.f32 %v3998_v10, %v3999_v36  ;;  %9294 = vrsqrt.f32 %v3030_v57  ;;  %v11008_v28 = vmul.f32 0.125, %v5947_v1  ;;  %v2045_v10 = vsub.f32 %v10836_v7, %v2041_v14 }
0x426d   :  { %v4981_v16 = vpop.xlane.xlu0 %4980  ;;  %v3025_v36 = vrot.slane %v10996_v12, %v9634_v22 }
0x426e   :  { %v4014_v38 = vadd.f32 1e-05, %v4000_v20  ;;  %v4982_v26 = vmul.f32 0.125, %v4981_v16  ;;  %v5967_v43 = vmul.f32 %v11008_v28, %v11008_v28  ;;  %v4012_v20 = vsub.f32 %v10863_v8, %v4005_v19 }
0x426f   :  { %v6931_v2 = vpop.xlane.xlu1 %6930  ;;  %v3029_v12 = vsub.f32 %v10841_v33, %v3025_v36  ;;  %v4993_v33 = vrot.slane %v11002_v41, %v9634_v22  ;;  %v8167_v36 = vld [vmem:[%s11223_s8 + $0x40] sm:$0xff] }
0x4270   :  { %v9291_v52 = vpop.eup %9290  ;;  %9296 = vrsqrt.f32 %v4014_v38  ;;  %v4984_v35 = vsub.f32 %v4982_v26, %v4983_v17  ;;  %v11018_v3 = vmul.f32 0.125, %v6931_v2  ;;  %v4009_v17 = vrot.slane %v10998_v37, %v9634_v22 }
0x4271   :  { %v5965_v53 = vpop.xlane.xlu0 %5964  ;;  %v1068_v58 = vrot.slane %v9291_v52, %v9579_v49  ;;  %v1072_v50 = vrot.slane %v9291_v52, %v9634_v22  ;;  %v5973_v2 = vrot.slane %v11008_v28, %v9579_v49  ;;  %v4996_v52 = vsub.f32 %v10889_v27, %v4989_v54 }
0x4272   :  { %v9293_v63 = vpop.eup %9292  ;;  %v4998_v6 = vadd.f32 1e-05, %v4984_v35  ;;  %v5966_v0 = vmul.f32 0.125, %v5965_v53  ;;  %v6951_v18 = vmul.f32 %v11018_v3, %v11018_v3  ;;  %v4013_v53 = vsub.f32 %v10851_v55, %v4009_v17 }
0x4273   :  { %v1075_v44 = vmul.f32 %v1068_v58, %v1060_v46  ;;  %v2052_v5 = vrot.slane %v9293_v63, %v9579_v49  ;;  %v1076_v23 = vmul.f32 %v1072_v50, %v1061_v30  ;;  %v2056_v62 = vrot.slane %v9293_v63, %v9634_v22 }
0x4274   :  { %9298 = vrsqrt.f32 %v4998_v6  ;;  %v5968_v40 = vsub.f32 %v5966_v0, %v5967_v43  ;;  %v5980_v63 = vsub.f32 %v10914_v32, %v5973_v2  ;;  %v6957_v6 = vrot.slane %v11018_v3, %v9579_v49 }
0x4275   :  { %v6949_v34 = vpop.xlane.xlu0 %6948  ;;  %7978 = vperm.xlu1 %9046, %v1075_v44   ;;  %v2059_v15 = vmul.f32 %v2052_v5, %v2044_v13  ;;  %v2060_v38 = vmul.f32 %v2056_v62, %v2045_v10  ;;  %v4997_v13 = vsub.f32 %v10881_v45, %v4993_v33  ;;  %v5977_v55 = vrot.slane %v11008_v28, %v9634_v22  ;;  %v8165_v62 = vld [vmem:[%s11223_s8 + $0x30] sm:$0xff]  ;;  %v8174_v33 = vld [vmem:[%s11223_s8 + $0x78] sm:$0xff] }
0x4276   :  { %v5982_v4 = vadd.f32 1e-05, %v5968_v40  ;;  %v6950_v61 = vmul.f32 0.125, %v6949_v34  ;;  %v9295_v48 = vpop.eup %9294  ;;  %v6964_v50 = vsub.f32 %v10939_v42, %v6957_v6  ;;  %v6961_v30 = vrot.slane %v11018_v3, %v9634_v22  ;;  %v8160_v34 = vld [vmem:[%s11223_s8 + $0x8] sm:$0xff]  ;;  %v8159_v3 = vld [vmem:[%s11223_s8] sm:$0xff] }
0x4277   :  { %7996 = vperm.xlu0 %9049, %v2059_v15   ;;  %v3036_v60 = vrot.slane %v9295_v48, %v9579_v49  ;;  %v3040_v7 = vrot.slane %v9295_v48, %v9634_v22  ;;  %v5981_v5 = vsub.f32 %v10905_v25, %v5977_v55  ;;  %v8162_v25 = vld [vmem:[%s11223_s8 + $0x18] sm:$0xff]  ;;  %v11274_v6 = vld [vmem:[#allocation12_spill] sm:$0xff] }
0x4278   :  { %9300 = vrsqrt.f32 %v5982_v4  ;;  %v6952_v56 = vsub.f32 %v6950_v61, %v6951_v18  ;;  %v6965_v19 = vsub.f32 %v10930_v51, %v6961_v30  ;;  %v8997_v4 = vpack.c.bf16 %v8162_v25, %v8160_v34  ;;  %v8161_v51 = vld [vmem:[%s11223_s8 + $0x10] sm:$0xff]  ;;  %v8164_v61 = vld [vmem:[%s11223_s8 + $0x28] sm:$0xff]  ;;  %v8166_v18 = vld [vmem:[%s11223_s8 + $0x38] sm:$0xff] }
0x4279   :  { %v7970_v57 = vpop.permute.xlu0 %7969  ;;  %7981 = vperm.xlu1 %9046, %v1076_v23   ;;  %v3043_v16 = vmul.f32 %v3036_v60, %v3028_v21  ;;  %v3044_v35 = vmul.f32 %v3040_v7, %v3029_v12  ;;  %v8999_v15 = vpack.c.bf16 %v8161_v51, %v8159_v3  ;;  %v9001_v48 = vpack.c.bf16 %v8166_v18, %v8164_v61  ;;  %v8163_v23 = vld [vmem:[%s11223_s8 + $0x20] sm:$0xff]  ;;  %v8168_v21 = vld [vmem:[%s11223_s8 + $0x48] sm:$0xff] }
0x427a   :  { %v9297_v1 = vpop.eup %9296  ;;  %v6966_v11 = vadd.f32 1e-05, %v6952_v56  ;;  %7972 = vst.msk [vmem:[#allocation4] sm:$0x3] %vm7966_vm14, %v7970_v57  ;;  %8998 = vmatprep.subr.bf16.mxu0 %v8997_v4  ;;  %v8170_v56 = vld [vmem:[%s11223_s8 + $0x58] sm:$0xff]  ;;  %v9003_v60 = vpack.c.bf16 %v8165_v62, %v8163_v23  ;;  %v8169_v57 = vld [vmem:[%s11223_s8 + $0x50] sm:$0xff] }
0x427b   :  { %v4020_v26 = vrot.slane %v9297_v1, %v9579_v49  ;;  %8015 = vperm.xlu0 %9049, %v3043_v16   ;;  %v4024_v46 = vrot.slane %v9297_v1, %v9634_v22  ;;  %9000 = vmatpush1.bf16.msra.mxu0 %v8999_v15  ;;  %v9005_v10 = vpack.c.bf16 %v8170_v56, %v8168_v21  ;;  %v11277_v30 = vld [vmem:[#allocation11_spill] sm:$0xff]  ;;  %v11278_v25 = vld [vmem:[#allocation10_spill] sm:$0xff] }
0x427c   :  { %9302 = vrsqrt.f32 %v6966_v11  ;;  %9002 = vmatprep.subr.bf16.mxu0 %v9001_v48  ;;  %v9007_v1 = vpack.c.bf16 %v8169_v57, %v8167_v36  ;;  %v8077_v34 = vadd.s32 4294967256, %v11277_v30  ;;  %v8096_v61 = vadd.s32 4294967248, %v11277_v30 }
0x427d   :  { %7999 = vperm.xlu1 %9046, %v2060_v38   ;;  %v4027_v8 = vmul.f32 %v4020_v26, %v4012_v20  ;;  %v4028_v27 = vmul.f32 %v4024_v46, %v4013_v53  ;;  %v8172_v53 = vld [vmem:[%s11223_s8 + $0x68] sm:$0xff]  ;;  %v8115_v36 = vadd.s32 4294967240, %v11277_v30 }
0x427e   :  { %v9299_v9 = vpop.eup %9298  ;;  %v8080_v62 = vsub.s32 %v8077_v34, %v11278_v25 }
0x427f   :  { %v5004_v24 = vrot.slane %v9299_v9, %v9579_v49  ;;  %8034 = vperm.xlu0 %9049, %v4027_v8   ;;  %v5008_v43 = vrot.slane %v9299_v9, %v9634_v22  ;;  %9004 = vmatpush1.bf16.msra.mxu0 %v9003_v60 }
0x4280   :  { %9006 = vmatprep.subr.bf16.mxu0 %v9005_v10 }
0x4281   :  { %8018 = vperm.xlu1 %9046, %v3044_v35   ;;  %v5011_v37 = vmul.f32 %v5004_v24, %v4996_v52  ;;  %v5012_v32 = vmul.f32 %v5008_v43, %v4997_v13 }
0x4282   :  { %v9301_v58 = vpop.eup %9300 }
0x4283   :  { %v5988_v0 = vrot.slane %v9301_v58, %v9579_v49  ;;  %8053 = vperm.xlu0 %9049, %v5011_v37   ;;  %v5992_v40 = vrot.slane %v9301_v58, %v9634_v22  ;;  %9008 = vmatpush1.bf16.msra.mxu0 %v9007_v1  ;;  %v9009_v37 = vpack.c.bf16 %v8174_v33, %v8172_v53 }
0x4285   :  { %8037 = vperm.xlu1 %9046, %v4028_v27   ;;  %v5995_v41 = vmul.f32 %v5988_v0, %v5980_v63  ;;  %v5996_v14 = vmul.f32 %v5992_v40, %v5981_v5  ;;  %9010 = vmatprep.subr.bf16.mxu0 %v9009_v37  ;;  %v11273_v63 = vld [vmem:[#allocation13_spill] sm:$0xff]  ;;  %v11276_v0 = vld [vmem:[#allocation19_spill] sm:$0xff] }
0x4286   :  { %v9303_v44 = vpop.eup %9302  ;;  %v11275_v27 = vld [vmem:[#allocation21_spill] sm:$0xff] }
0x4287   :  { %v6972_v59 = vrot.slane %v9303_v44, %v9579_v49  ;;  %8072 = vperm.xlu0 %9049, %v5995_v41   ;;  %v6976_v28 = vrot.slane %v9303_v44, %v9634_v22 }
0x4289   :  { %8056 = vperm.xlu1 %9046, %v5012_v32   ;;  %v6979_v45 = vmul.f32 %v6972_v59, %v6964_v50  ;;  %v6980_v42 = vmul.f32 %v6976_v28, %v6965_v19  ;;  %v8039_v28 = vadd.s32 4294967272, %v11277_v30 }
0x428b   :  { %8091 = vperm.xlu0 %9049, %v6979_v45   ;;  %v8001_v45 = vadd.s32 4294967288, %v11277_v30  ;;  %v8042_v15 = vsub.s32 %v8039_v28, %v11278_v25 }
0x428d   :  { %8075 = vperm.xlu1 %9046, %v5996_v14   ;;  %v8020_v14 = vadd.s32 4294967280, %v11277_v30  ;;  %v8004_v3 = vsub.s32 %v8001_v45, %v11278_v25 }
0x428f   :  { %v8023_v51 = vsub.s32 %v8020_v14, %v11278_v25 }
0x4291   :  { %8094 = vperm.xlu1 %9046, %v6980_v42   ;;  %v8058_v42 = vadd.s32 4294967264, %v11277_v30 }
0x4293   :  { %v8061_v23 = vsub.s32 %v8058_v42, %v11278_v25 }
0x42e9   :  { %v7915_v20 = vpop.xlane.xlu1 %7914 }
0x42ea   :  { %v7916_v11 = vmul.f32 0.125, %v7915_v20  ;;  %v8099_v20 = vsub.s32 %v8096_v61, %v11278_v25 }
0x42ec   :  { %v7935_v54 = vmul.f32 %v7916_v11, %v7916_v11  ;;  %v7941_v12 = vrot.slane %v7916_v11, %v9579_v49  ;;  %v7945_v17 = vrot.slane %v7916_v11, %v9634_v22 }
0x42ed   :  { %v7933_v16 = vpop.xlane.xlu1 %7932 }
0x42ee   :  { %v7934_v38 = vmul.f32 0.125, %v7933_v16  ;;  %v7948_v9 = vsub.f32 %v10970_v47, %v7941_v12  ;;  %v7949_v2 = vsub.f32 %v10974_v39, %v7945_v17  ;;  %v8171_v47 = vld [vmem:[%s11223_s8 + $0x60] sm:$0xff]  ;;  %v8173_v39 = vld [vmem:[%s11223_s8 + $0x70] sm:$0xff]  ;;  %s9389_s8 = smov [#allocation4]  }
0x42ef   :  { %v9011_v58 = vpack.c.bf16 %v8173_v39, %v8171_v47 }
0x42f0   :  { %v7936_v26 = vsub.f32 %v7934_v38, %v7935_v54 }
0x42f1   :  { %9012 = vmatpush1.bf16.msra.mxu0 %v9011_v58 }
0x42f2   :  { %v7950_v7 = vadd.f32 1e-05, %v7936_v26 }
0x42f4   :  { %9304 = vrsqrt.f32 %v7950_v7  ;;  %v7979_v43 = vpop.permute.xlu1 %7978 }
0x42f5   :  { %v7986_v11 = vrot.slane %v7979_v43, %v9676_v29 }
0x42f6   :  { %v7997_v41 = vpop.permute.xlu0 %7996 }
0x42f7   :  { %v8005_v21 = vrot.slane %v7997_v41, %v8004_v3 }
0x42f8   :  { %v7982_v13 = vpop.permute.xlu1 %7981 }
0x42f9   :  { %v7990_v56 = vrot.slane %v7982_v13, %v9676_v29 }
0x42fa   :  { %v8016_v50 = vpop.permute.xlu0 %8015 }
0x42fb   :  { %v8024_v57 = vrot.slane %v8016_v50, %v8023_v51 }
0x42fc   :  { %v8000_v55 = vpop.permute.xlu1 %7999 }
0x42fd   :  { %v8009_v18 = vrot.slane %v8000_v55, %v8004_v3 }
0x42fe   :  { %v9305_v8 = vpop.eup %9304  ;;  %v8035_v59 = vpop.permute.xlu0 %8034 }
0x42ff   :  { %v7960_v52 = vrot.slane %v9305_v8, %v9634_v22  ;;  %v7956_v35 = vrot.slane %v9305_v8, %v9579_v49  ;;  %v8010_v16 = vsel %vm626_vm8, %v8009_v18, %v8005_v21  ;;  %v8043_v54 = vrot.slane %v8035_v59, %v8042_v15 }
0x4300   :  { %v8019_v44 = vpop.permute.xlu1 %8018  ;;  %v7991_v8 = vsel %vm626_vm8, %v7990_v56, %v7986_v11 }
0x4301   :  { %v7964_v24 = vmul.f32 %v7960_v52, %v7949_v2  ;;  %v7963_v46 = vmul.f32 %v7956_v35, %v7948_v9  ;;  %v8028_v48 = vrot.slane %v8019_v44, %v8023_v51  ;;  %v8118_v52 = vsub.s32 %v8115_v36, %v11278_v25 }
0x4302   :  { %v8054_v5 = vpop.permute.xlu0 %8053  ;;  %v8126_v35 = vsel %vm499_vm2, %v7991_v8, %v8010_v16 }
0x4303   :  { %8113 = vperm.xlu1 %9046, %v7964_v24   ;;  %8110 = vperm.xlu0 %9049, %v7963_v46   ;;  %v8029_v7 = vsel %vm626_vm8, %v8028_v48, %v8024_v57  ;;  %v8062_v12 = vrot.slane %v8054_v5, %v8061_v23 }
0x4304   :  { %v8038_v32 = vpop.permute.xlu1 %8037  ;;  %v8128_v46 = vsel %vm8127_vm9, %v8126_v35, %v8029_v7 }
0x4305   :  { %v8047_v60 = vrot.slane %v8038_v32, %v8042_v15 }
0x4306   :  { %v8073_v4 = vpop.permute.xlu0 %8072 }
0x4307   :  { %8142 = vrot.lane.b32.xlu1 %v11273_v63, %s9388_s0  ;;  %8139 = vrot.lane.b32.xlu0 %v11274_v6, %s9382_s19  ;;  %v8048_v9 = vsel %vm626_vm8, %v8047_v60, %v8043_v54  ;;  %v8081_v2 = vrot.slane %v8073_v4, %v8080_v62 }
0x4308   :  { %v8057_v40 = vpop.permute.xlu1 %8056  ;;  %v8130_v33 = vsel %vm8129_vm6, %v8128_v46, %v8048_v9 }
0x4309   :  { %v8066_v1 = vrot.slane %v8057_v40, %v8061_v23 }
0x430a   :  { %v8092_v38 = vpop.permute.xlu0 %8091 }
0x430b   :  { %8149 = vrot.lane.b32.xlu1 %v11275_v27, %s9388_s0  ;;  %8146 = vrot.lane.b32.xlu0 %v11276_v0, %s9382_s19  ;;  %v8067_v29 = vsel %vm626_vm8, %v8066_v1, %v8062_v12  ;;  %v8100_v24 = vrot.slane %v8092_v38, %v8099_v20  ;;  %s8295_s19 = sshll.u32 %s9389_s8, 4  ;;  %s9390_s0 = smov [#allocation2]   ;;  %s8296_s19 = int_to_ptr.vmem [resolvable:$true] %s8295_s19 }
0x430c   :  { %v8076_v19 = vpop.permute.xlu1 %8075  ;;  %v8131_v58 = vsel %vm64_vm1, %v8130_v33, %v8067_v29  ;;  %s8285_s2 = sshll.u32 %s9390_s0, 4  ;;  %s9309_s22 = scalar_lea.vmem %s8296_s19, 32  ;;  %s8286_s2 = int_to_ptr.vmem [resolvable:$true] %s8285_s2 }
0x430d   :  { %v8085_v26 = vrot.slane %v8076_v19, %v8080_v62  ;;  %p9310_p0 = scmp.ne.s32.totalorder %s8296_s19, %s9309_s22  ;;  %p9314_p1 = scmp.lt.s32.totalorder %s8296_s19, %s8296_s19 }
0x430e   :  { %p9315_p2 = scmp.lt.s32.totalorder %s9309_s22, %s9309_s22 }
0x430f   :  { %v8086_v53 = vsel %vm626_vm8, %v8085_v26, %v8081_v2 }
0x4310   :  { %v8095_v10 = vpop.permute.xlu1 %8094  ;;  %v8133_v27 = vsel %vm8132_vm7, %v8131_v58, %v8086_v53  ;;  %p9316_p3 = por %p9315_p2, %p9314_p1 }
0x4311   :  { %v8104_v17 = vrot.slane %v8095_v10, %v8099_v20 }
0x4312   :  { %p9317_p4 = pnand %p9316_p3, %p9310_p0 }
0x4313   :  { %v8105_v37 = vsel %vm626_vm8, %v8104_v17, %v8100_v24 }
0x4314   :  { %v8135_v0 = vsel %vm8134_vm10, %v8133_v27, %v8105_v37 }
0x4382   :  { %v8111_v47 = vpop.permute.xlu0 %8110  ;;  %v8114_v39 = vpop.permute.xlu1 %8113 }
0x4383   :  { %v8119_v63 = vrot.slane %v8111_v47, %v8118_v52  ;;  %v8123_v6 = vrot.slane %v8114_v39, %v8118_v52 }
0x4385   :  { %v8124_v43 = vsel %vm626_vm8, %v8123_v6, %v8119_v63 }
0x4386   :  { %v8137_v13 = vsel %vm8136_vm11, %v8135_v0, %v8124_v43 }
0x4387   :  { %8411 = vmatmul.mubr.msk.f32.vlgmr.msra.gmra.mrb[46].mxu0 %vm378_vm3, %v8137_v13 }
0x4388   :  { %9320 = shalt.err (!%p9317_p4)
}
0x4389   :  { %s9321_s25 = scalar_lea.hbm %s11227_s12, 32 }
0x438a   :  { %p9322_p5 = scmp.ne.s32.totalorder %s11227_s12, %s9321_s25  ;;  %p9325_p6 = scmp.lt.u32.totalorder %s9321_s25, %s11227_s12 }
0x438c   :  { %p9327_p7 = pnand %p9325_p6, %p9322_p5 }
0x438e   :  { %9330 = shalt.err (!%p9327_p7)
}
0x438f   :  { %8298 = dma.vmem_to_hbm [thread:$0]  %s8296_s19, 32, %s11227_s12, [#allocation5]  }
0x4390   :  { %s9331_s14 = scalar_lea.vmem %s8286_s2, 32  ;;  %p9336_p9 = scmp.lt.s32.totalorder %s8286_s2, %s8286_s2 }
0x4391   :  { %p9332_p8 = scmp.ne.s32.totalorder %s8286_s2, %s9331_s14  ;;  %p9337_p10 = scmp.lt.s32.totalorder %s9331_s14, %s9331_s14 }
0x4393   :  { %p9338_p11 = por %p9337_p10, %p9336_p9 }
0x4395   :  { %p9339_p12 = pnand %p9338_p11, %p9332_p8 }
0x4397   :  { %9342 = shalt.err (!%p9339_p12)
}
0x4398   :  { %s9343_s1 = scalar_lea.hbm %s11226_s11, 32 }
0x4399   :  { %p9344_p13 = scmp.ne.s32.totalorder %s11226_s11, %s9343_s1  ;;  %p9347_p0 = scmp.lt.u32.totalorder %s9343_s1, %s11226_s11 }
0x439b   :  { %p9349_p1 = pnand %p9347_p0, %p9344_p13 }
0x439d   :  { %9352 = shalt.err (!%p9349_p1)
}
0x439e   :  { %8288 = dma.vmem_to_hbm [thread:$0]  %s8286_s2, 32, %s11226_s11, [#allocation3]  }
0x439f   :  { %s9391_s18 = smov [#allocation6]  }
0x43a0   :  { %s8304_s20 = sshll.u32 %s9391_s18, 4  ;;  %s8305_s20 = int_to_ptr.vmem [resolvable:$true] %s8304_s20 }
0x43a1   :  { %s9353_s21 = scalar_lea.vmem %s8305_s20, 256  ;;  %p9358_p3 = scmp.lt.s32.totalorder %s8305_s20, %s8305_s20 }
0x43a2   :  { %p9354_p2 = scmp.ne.s32.totalorder %s8305_s20, %s9353_s21  ;;  %p9359_p4 = scmp.lt.s32.totalorder %s9353_s21, %s9353_s21 }
0x43a4   :  { %p9360_p5 = por %p9359_p4, %p9358_p3 }
0x43a6   :  { %p9361_p6 = pnand %p9360_p5, %p9354_p2 }
0x43a8   :  { %9364 = shalt.err (!%p9361_p6)
}
0x43a9   :  { %s9365_s0 = scalar_lea.hbm %s11228_s13, 256 }
0x43aa   :  { %p9366_p7 = scmp.ne.s32.totalorder %s11228_s13, %s9365_s0  ;;  %p9369_p8 = scmp.lt.u32.totalorder %s9365_s0, %s11228_s13 }
0x43ac   :  { %p9371_p9 = pnand %p9369_p8, %p9366_p7 }
0x43ae   :  { %9374 = shalt.err (!%p9371_p9)
}
0x43af   :  { %s9392_s2 = smov 128   ;;  %s9393_s25 = smov 8   ;;  %v8140_v55 = vpop.permute.xlu0 %8139  ;;  %v8143_v41 = vpop.permute.xlu1 %8142  ;;  %v11279_v50 = vld [vmem:[#allocation9_spill] sm:$0xff]  ;;  %v8251_v30 = vld [vmem:[%s11224_s9] sm:$0x3]  ;;  %vm8154_vm2 = vcmask 785408  }
0x43b0   :  { %8310 = dma.vmem_to_hbm [thread:$0]  %s8305_s20, 256, %s11228_s13, [#allocation5], %s9392_s2, %s9392_s2, %s9393_s25   ;;  %v8152_v32 = vsel %vm64_vm1, %v11279_v50, %v8140_v55  ;;  %v11280_v59 = vld [vmem:[#allocation17_spill] sm:$0xff]  ;;  %v8256_v28 = vrot.slane %v8251_v30, %v9579_v49  ;;  %v11281_v19 = vld [vmem:[#allocation15_spill] sm:$0xff]  ;;  %v8260_v25 = vrot.slane %v8251_v30, %v9634_v22 }
0x43b1   :  { %v8153_v45 = vsel %vm378_vm3, %v8152_v32, %v8143_v41 }
0x43b2   :  { %v8155_v42 = vsel %vm8154_vm2, %v8153_v45, %v11281_v19 }
0x43b3   :  { %v8147_v44 = vpop.permute.xlu0 %8146  ;;  %v8150_v5 = vpop.permute.xlu1 %8149 }
0x43b4   :  { %v8156_v40 = vsel %vm64_vm1, %v11280_v59, %v8147_v44 }
0x43b5   :  { %v8157_v14 = vsel %vm378_vm3, %v8156_v40, %v8150_v5 }
0x43b6   :  { %v8158_v4 = vsel %vm8154_vm2, %v8157_v14, %v10632_v31 }
0x445a   :  { %v8244_v34 = vpop.f32.mrb[46].mxu0 }
0x445b   :  { %v8249_v3 = vadd.f32 %v8244_v34, %v8155_v42  ;;  %v8246_v51 = vpop.f32.mrb[47].mxu0 }
0x445c   :  { %v8250_v61 = vadd.f32 %v8246_v51, %v8158_v4 }
0x445d   :  { %v8263_v18 = vadd.f32 %v8256_v28, %v8249_v3 }
0x445e   :  { %v8264_v15 = vadd.f32 %v8260_v25, %v8250_v61 }
0x4460   :  { %v8267_v48 = vcombine.low %v8263_v18, %v8264_v15 }
0x4462   :  { %8412 = vst.sshfl [vmem:[%s11225_s10] sm:$0x33 pattern:$0x76325410] %v8267_v48 }
0x4463   :  { %9375 = dma.done.wait [#allocation3], 32  }
0x4464   :  { %9376 = vsyncadd [#allocation3], 4294967264 }
0x4465   :  { %9377 = dma.done.wait [#allocation5], 288  }
0x4466   :  { %9378 = vsyncadd [#allocation5], 4294967008 }
0x4467   :  { %8322 = vsyncpa [#allocation3], 1 }
0x4468   :  { %8323 = vsyncpa [#allocation5], 1 }

</bundles_post_ra>
